<compile_context>
chip_gen: v7x
topology: tpu7x:2x2x1
jax: 0.10.0
libtpu: 0.0.40
codegen_flags: <defaults>
</compile_context>

<pallas_src>
import jax
import jax.numpy as jnp
from jax.experimental import pallas as pl
from jax.experimental.pallas import tpu as pltpu

BLOCK_DIMS = (128, 256)
EPS = 1e-8


# ---------------------------------------------------------------------------
# Kernel
# ---------------------------------------------------------------------------
def _sim_kernel(img_ref, cap_ref, scale_ref, out_ref):
    # img_ref:   (tm, d_img)   image-row tile (f32)
    # cap_ref:   (tn, d_cap)   RAW caption tile, already in the MXU dtype
    # scale_ref: (n_blk, tn)   per-(cap-block, cap-row) reciprocal norms (f32)
    # out_ref:   (tm, tn)      similarity tile
    img = img_ref[...].astype(jnp.float32)
    cap = cap_ref[...]
    tm, d_img = img.shape
    tn, d_cap = cap.shape

    sims = jnp.zeros((tm, tn), jnp.float32)
    col = 0
    for block_dim in BLOCK_DIMS:
        n_img_blk = d_img // block_dim
        n_cap_blk = d_cap // block_dim

        # Per-block l2 norm of the image tile in f32 (VPU + EUP rsqrt), cast
        # once to the MXU operand dtype.
        img_blocks = []
        for v in range(n_img_blk):
            blk = img[:, v * block_dim:(v + 1) * block_dim]
            inv = jax.lax.rsqrt(
                jnp.sum(blk * blk, axis=-1, keepdims=True) + EPS * EPS)
            img_blocks.append((blk * inv).astype(cap.dtype))

        for t in range(n_cap_blk):
            ct = cap[:, t * block_dim:(t + 1) * block_dim]   # raw caption block
            m = None
            for v in range(n_img_blk):
                # Contract on the last dim of BOTH operands: the MXU consumes
                # the natural lane-major layout, no transpose materialized.
                mv = jax.lax.dot_general(
                    img_blocks[v], ct,
                    dimension_numbers=(((1,), (1,)), ((), ())),
                    preferred_element_type=jnp.float32)
                m = mv if m is None else jnp.maximum(m, mv)
            # Caption normalization applied post-max as one lane-broadcast mul.
            sims = sims + m * scale_ref[col + t:col + t + 1, :]
        col += n_cap_blk

    out_ref[...] = sims.astype(out_ref.dtype)


# ---------------------------------------------------------------------------
# Wrapper
# ---------------------------------------------------------------------------
def _choose_tile(n, preferred, quantum):
    """Largest multiple of `quantum` dividing n and <= preferred (else full n)."""
    if n <= preferred:
        return n
    t = (preferred // quantum) * quantum
    while t >= quantum:
        if n % t == 0:
            return t
        t -= quantum
    return n


def encoder_similarity(img_emb, cap_emb, *, tile_m=256, tile_n=256,
                       mxu_dtype=jnp.bfloat16, vmem_limit_bytes=None):
    n_img, d_img = img_emb.shape
    n_cap, d_cap = cap_emb.shape
    for bd in BLOCK_DIMS:
        assert d_img % bd == 0 and d_cap % bd == 0, \
            "feature dims must be divisible by every block dim"

    # Lane-dense, pipeline-friendly tiles: tm multiple of 8 sublanes, tn a
    # multiple of 128 lanes (falls back to the full extent for tiny inputs).
    tm = _choose_tile(n_img, tile_m, 8)
    tn = _choose_tile(n_cap, tile_n, 128)
    # TODO(synk): if n_cap is not a multiple of 128, the output falls back to a
    # full-extent (masked-store) tile; pad captions to 128 upstream for peak
    # store throughput.

    # One-time caption-side precompute (hoisted out of the grid entirely).
    #   cap_g   = cap / (||cap|| + eps)
    #   cap_blk = cap_g_blk / (||cap_g_blk|| + eps)
    #           = raw_blk / (||raw_blk|| + eps * (||cap|| + eps))
    # so the caption normalization is a single positive per-(row, block) scale
    # that commutes with the max over image blocks.
    cap32 = cap_emb.astype(jnp.float32)
    g = jnp.sqrt(jnp.sum(cap32 * cap32, axis=-1, keepdims=True)) + EPS
    scales = []
    for bd in BLOCK_DIMS:
        nb = d_cap // bd
        blk = cap32.reshape(n_cap, nb, bd)
        bn = jnp.sqrt(jnp.sum(blk * blk, axis=-1))               # (n_cap, nb)
        scales.append(1.0 / (bn + EPS * g))
    scale = jnp.concatenate(scales, axis=-1).T.astype(jnp.float32)  # (n_blk, n_cap)
    n_blk = scale.shape[0]

    cap_in = cap_emb.astype(mxu_dtype)   # raw captions; bf16 halves DMA bytes

    return pl.pallas_call(
        _sim_kernel,
        out_shape=jax.ShapeDtypeStruct((n_img, n_cap), jnp.float32),
        grid_spec=pltpu.PrefetchScalarGridSpec(
            num_scalar_prefetch=0,
            grid=(n_img // tm, n_cap // tn),
            in_specs=[
                pl.BlockSpec((tm, d_img), lambda i, j: (i, 0)),
                pl.BlockSpec((tn, d_cap), lambda i, j: (j, 0)),
                pl.BlockSpec((n_blk, tn), lambda i, j: (0, j)),
            ],
            out_specs=pl.BlockSpec((tm, tn), lambda i, j: (i, j)),
        ),
        compiler_params=pltpu.CompilerParams(
            dimension_semantics=("parallel", "parallel"),
            vmem_limit_bytes=vmem_limit_bytes),
    )(img_emb, cap_in, scale)


# ---------------------------------------------------------------------------
# Pure-JAX reference (mirrors the PyTorch forward, high-precision matmuls)
# ---------------------------------------------------------------------------
def _l2norm_ref(x, axis):
    norm = jnp.sqrt(jnp.sum(x * x, axis=axis, keepdims=True)) + EPS
    return x / norm


def _reference(img_emb, cap_emb):
    cap_emb = _l2norm_ref(cap_emb, -1)
    sims = []
    for block_dim in BLOCK_DIMS:
        v_blk = img_emb.shape[1] // block_dim
        t_blk = cap_emb.shape[1] // block_dim
        img_b = _l2norm_ref(img_emb.reshape(img_emb.shape[0], v_blk, block_dim), -1)
        cap_b = _l2norm_ref(cap_emb.reshape(cap_emb.shape[0], t_blk, block_dim), -1)
        logits = jnp.einsum('avc,btc->abvt', img_b, cap_b,
                            precision=jax.lax.Precision.HIGHEST)
        sims.append(logits.max(axis=-2).sum(axis=-1))
    return jnp.stack(sims, -1).sum(-1)


if __name__ == "__main__":
    key = jax.random.PRNGKey(0)
    k1, k2 = jax.random.split(key)

    # Small shapes consistent with the module (feature dim divisible by 128 and
    # 256); sized so the 2-D grid actually tiles: grid = (2, 3).
    n_img, n_cap, dim = 512, 384, 512
    img_emb = jax.random.normal(k1, (n_img, dim), dtype=jnp.float32)
    cap_emb = jax.random.normal(k2, (n_cap, dim), dtype=jnp.float32)

    # Deterministic parameter from __init__ (registered but NEVER used in forward).
    bin_score = jnp.float32(0.0)  # TODO(synk): bin_score is unused by the reference forward pass.

    ref = _reference(img_emb, cap_emb)

    # Accuracy path: f32 MXU operands.
    out_f32 = encoder_similarity(img_emb, cap_emb, mxu_dtype=jnp.float32)
    jax.block_until_ready(out_f32)
    assert out_f32.shape == (n_img, n_cap)
    assert jnp.allclose(out_f32, ref, atol=5e-3, rtol=5e-3), "f32 path mismatch"

    # Fast (default) path: bf16 MXU operands, f32 accumulation.
    out_bf16 = encoder_similarity(img_emb, cap_emb)
    jax.block_until_ready(out_bf16)
    assert out_bf16.shape == (n_img, n_cap)
    assert jnp.allclose(out_bf16, ref, atol=3e-2, rtol=3e-2), "bf16 path mismatch"

    print("KERNEL_OK")
</pallas_src>

<mosaic_0001>
module attributes {stable_mosaic.version = 11 : i64} {
  func.func @_sim_kernel(%arg0: i32, %arg1: i32, %arg2: memref<256x512xf32, #tpu.memory_space<vmem>>, %arg3: memref<128x512xf32, #tpu.memory_space<vmem>>, %arg4: memref<6x128xf32, #tpu.memory_space<vmem>>, %arg5: memref<256x128xf32, #tpu.memory_space<vmem>>) attributes {dimension_semantics = [#tpu.dimension_semantics<parallel>, #tpu.dimension_semantics<parallel>], iteration_bounds = array<i64: 2, 3>, scalar_prefetch = 0 : i64, scratch_operands = 0 : i64, tpu.core_type = #tpu.core_type<tc>, window_params = [{transform_indices = @transform_0, window_bounds = array<i64: 256, 512>}, {transform_indices = @transform_1, window_bounds = array<i64: 128, 512>}, {transform_indices = @transform_2, window_bounds = array<i64: 6, 128>}, {transform_indices = @transform_3, window_bounds = array<i64: 256, 128>}]} {
    %c0 = arith.constant 0 : index
    %c0_0 = arith.constant 0 : index
    %0 = vector.load %arg2[%c0, %c0_0] : memref<256x512xf32, #tpu.memory_space<vmem>>, vector<256x512xf32>
    %c0_1 = arith.constant 0 : index
    %c0_2 = arith.constant 0 : index
    %1 = vector.load %arg3[%c0_1, %c0_2] : memref<128x512xf32, #tpu.memory_space<vmem>>, vector<128x512xf32>
    %cst = arith.constant 0.000000e+00 : f32
    %2 = vector.broadcast %cst : f32 to vector<256x128xf32>
    %3 = vector.extract_strided_slice %0 {offsets = [0, 0], sizes = [256, 128], strides = [1, 1]} : vector<256x512xf32> to vector<256x128xf32>
    %4 = arith.mulf %3, %3 : vector<256x128xf32>
    %cst_3 = arith.constant dense<0.000000e+00> : vector<256xf32>
    %5 = vector.multi_reduction <add>, %4, %cst_3 [1] : vector<256x128xf32> to vector<256xf32>
    %6 = vector.shape_cast %5 : vector<256xf32> to vector<256x1xf32>
    %cst_4 = arith.constant 1.000000e-16 : f32
    %7 = vector.broadcast %cst_4 : f32 to vector<256x1xf32>
    %8 = arith.addf %6, %7 : vector<256x1xf32>
    %9 = math.rsqrt %8 : vector<256x1xf32>
    %10 = vector.broadcast %9 : vector<256x1xf32> to vector<256x128xf32>
    %11 = arith.mulf %3, %10 : vector<256x128xf32>
    %12 = vector.extract_strided_slice %0 {offsets = [0, 128], sizes = [256, 128], strides = [1, 1]} : vector<256x512xf32> to vector<256x128xf32>
    %13 = arith.mulf %12, %12 : vector<256x128xf32>
    %cst_5 = arith.constant dense<0.000000e+00> : vector<256xf32>
    %14 = vector.multi_reduction <add>, %13, %cst_5 [1] : vector<256x128xf32> to vector<256xf32>
    %15 = vector.shape_cast %14 : vector<256xf32> to vector<256x1xf32>
    %cst_6 = arith.constant 1.000000e-16 : f32
    %16 = vector.broadcast %cst_6 : f32 to vector<256x1xf32>
    %17 = arith.addf %15, %16 : vector<256x1xf32>
    %18 = math.rsqrt %17 : vector<256x1xf32>
    %19 = vector.broadcast %18 : vector<256x1xf32> to vector<256x128xf32>
    %20 = arith.mulf %12, %19 : vector<256x128xf32>
    %21 = vector.extract_strided_slice %0 {offsets = [0, 256], sizes = [256, 128], strides = [1, 1]} : vector<256x512xf32> to vector<256x128xf32>
    %22 = arith.mulf %21, %21 : vector<256x128xf32>
    %cst_7 = arith.constant dense<0.000000e+00> : vector<256xf32>
    %23 = vector.multi_reduction <add>, %22, %cst_7 [1] : vector<256x128xf32> to vector<256xf32>
    %24 = vector.shape_cast %23 : vector<256xf32> to vector<256x1xf32>
    %cst_8 = arith.constant 1.000000e-16 : f32
    %25 = vector.broadcast %cst_8 : f32 to vector<256x1xf32>
    %26 = arith.addf %24, %25 : vector<256x1xf32>
    %27 = math.rsqrt %26 : vector<256x1xf32>
    %28 = vector.broadcast %27 : vector<256x1xf32> to vector<256x128xf32>
    %29 = arith.mulf %21, %28 : vector<256x128xf32>
    %30 = vector.extract_strided_slice %0 {offsets = [0, 384], sizes = [256, 128], strides = [1, 1]} : vector<256x512xf32> to vector<256x128xf32>
    %31 = arith.mulf %30, %30 : vector<256x128xf32>
    %cst_9 = arith.constant dense<0.000000e+00> : vector<256xf32>
    %32 = vector.multi_reduction <add>, %31, %cst_9 [1] : vector<256x128xf32> to vector<256xf32>
    %33 = vector.shape_cast %32 : vector<256xf32> to vector<256x1xf32>
    %cst_10 = arith.constant 1.000000e-16 : f32
    %34 = vector.broadcast %cst_10 : f32 to vector<256x1xf32>
    %35 = arith.addf %33, %34 : vector<256x1xf32>
    %36 = math.rsqrt %35 : vector<256x1xf32>
    %37 = vector.broadcast %36 : vector<256x1xf32> to vector<256x128xf32>
    %38 = arith.mulf %30, %37 : vector<256x128xf32>
    %39 = vector.extract_strided_slice %1 {offsets = [0, 0], sizes = [128, 128], strides = [1, 1]} : vector<128x512xf32> to vector<128x128xf32>
    %cst_11 = arith.constant dense<0.000000e+00> : vector<256x128xf32>
    %40 = tpu.matmul %11, %39, %cst_11 {dimension_numbers = #tpu.dot_dimension_numbers<[1], [1], [0], [0], [0, 0, 1, 0], [], []>} : vector<256x128xf32>, vector<128x128xf32>, vector<256x128xf32> -> vector<256x128xf32>
    %cst_12 = arith.constant dense<0.000000e+00> : vector<256x128xf32>
    %41 = tpu.matmul %20, %39, %cst_12 {dimension_numbers = #tpu.dot_dimension_numbers<[1], [1], [0], [0], [0, 0, 1, 0], [], []>} : vector<256x128xf32>, vector<128x128xf32>, vector<256x128xf32> -> vector<256x128xf32>
    %42 = arith.maximumf %40, %41 : vector<256x128xf32>
    %cst_13 = arith.constant dense<0.000000e+00> : vector<256x128xf32>
    %43 = tpu.matmul %29, %39, %cst_13 {dimension_numbers = #tpu.dot_dimension_numbers<[1], [1], [0], [0], [0, 0, 1, 0], [], []>} : vector<256x128xf32>, vector<128x128xf32>, vector<256x128xf32> -> vector<256x128xf32>
    %44 = arith.maximumf %42, %43 : vector<256x128xf32>
    %cst_14 = arith.constant dense<0.000000e+00> : vector<256x128xf32>
    %45 = tpu.matmul %38, %39, %cst_14 {dimension_numbers = #tpu.dot_dimension_numbers<[1], [1], [0], [0], [0, 0, 1, 0], [], []>} : vector<256x128xf32>, vector<128x128xf32>, vector<256x128xf32> -> vector<256x128xf32>
    %46 = arith.maximumf %44, %45 : vector<256x128xf32>
    %c0_15 = arith.constant 0 : index
    %c0_16 = arith.constant 0 : index
    %47 = vector.load %arg4[%c0_15, %c0_16] : memref<6x128xf32, #tpu.memory_space<vmem>>, vector<1x128xf32>
    %48 = vector.broadcast %47 : vector<1x128xf32> to vector<256x128xf32>
    %49 = arith.mulf %46, %48 : vector<256x128xf32>
    %50 = arith.addf %2, %49 : vector<256x128xf32>
    %51 = vector.extract_strided_slice %1 {offsets = [0, 128], sizes = [128, 128], strides = [1, 1]} : vector<128x512xf32> to vector<128x128xf32>
    %cst_17 = arith.constant dense<0.000000e+00> : vector<256x128xf32>
    %52 = tpu.matmul %11, %51, %cst_17 {dimension_numbers = #tpu.dot_dimension_numbers<[1], [1], [0], [0], [0, 0, 1, 0], [], []>} : vector<256x128xf32>, vector<128x128xf32>, vector<256x128xf32> -> vector<256x128xf32>
    %cst_18 = arith.constant dense<0.000000e+00> : vector<256x128xf32>
    %53 = tpu.matmul %20, %51, %cst_18 {dimension_numbers = #tpu.dot_dimension_numbers<[1], [1], [0], [0], [0, 0, 1, 0], [], []>} : vector<256x128xf32>, vector<128x128xf32>, vector<256x128xf32> -> vector<256x128xf32>
    %54 = arith.maximumf %52, %53 : vector<256x128xf32>
    %cst_19 = arith.constant dense<0.000000e+00> : vector<256x128xf32>
    %55 = tpu.matmul %29, %51, %cst_19 {dimension_numbers = #tpu.dot_dimension_numbers<[1], [1], [0], [0], [0, 0, 1, 0], [], []>} : vector<256x128xf32>, vector<128x128xf32>, vector<256x128xf32> -> vector<256x128xf32>
    %56 = arith.maximumf %54, %55 : vector<256x128xf32>
    %cst_20 = arith.constant dense<0.000000e+00> : vector<256x128xf32>
    %57 = tpu.matmul %38, %51, %cst_20 {dimension_numbers = #tpu.dot_dimension_numbers<[1], [1], [0], [0], [0, 0, 1, 0], [], []>} : vector<256x128xf32>, vector<128x128xf32>, vector<256x128xf32> -> vector<256x128xf32>
    %58 = arith.maximumf %56, %57 : vector<256x128xf32>
    %c1 = arith.constant 1 : index
    %c0_21 = arith.constant 0 : index
    %59 = vector.load %arg4[%c1, %c0_21] : memref<6x128xf32, #tpu.memory_space<vmem>>, vector<1x128xf32>
    %60 = vector.broadcast %59 : vector<1x128xf32> to vector<256x128xf32>
    %61 = arith.mulf %58, %60 : vector<256x128xf32>
    %62 = arith.addf %50, %61 : vector<256x128xf32>
    %63 = vector.extract_strided_slice %1 {offsets = [0, 256], sizes = [128, 128], strides = [1, 1]} : vector<128x512xf32> to vector<128x128xf32>
    %cst_22 = arith.constant dense<0.000000e+00> : vector<256x128xf32>
    %64 = tpu.matmul %11, %63, %cst_22 {dimension_numbers = #tpu.dot_dimension_numbers<[1], [1], [0], [0], [0, 0, 1, 0], [], []>} : vector<256x128xf32>, vector<128x128xf32>, vector<256x128xf32> -> vector<256x128xf32>
    %cst_23 = arith.constant dense<0.000000e+00> : vector<256x128xf32>
    %65 = tpu.matmul %20, %63, %cst_23 {dimension_numbers = #tpu.dot_dimension_numbers<[1], [1], [0], [0], [0, 0, 1, 0], [], []>} : vector<256x128xf32>, vector<128x128xf32>, vector<256x128xf32> -> vector<256x128xf32>
    %66 = arith.maximumf %64, %65 : vector<256x128xf32>
    %cst_24 = arith.constant dense<0.000000e+00> : vector<256x128xf32>
    %67 = tpu.matmul %29, %63, %cst_24 {dimension_numbers = #tpu.dot_dimension_numbers<[1], [1], [0], [0], [0, 0, 1, 0], [], []>} : vector<256x128xf32>, vector<128x128xf32>, vector<256x128xf32> -> vector<256x128xf32>
    %68 = arith.maximumf %66, %67 : vector<256x128xf32>
    %cst_25 = arith.constant dense<0.000000e+00> : vector<256x128xf32>
    %69 = tpu.matmul %38, %63, %cst_25 {dimension_numbers = #tpu.dot_dimension_numbers<[1], [1], [0], [0], [0, 0, 1, 0], [], []>} : vector<256x128xf32>, vector<128x128xf32>, vector<256x128xf32> -> vector<256x128xf32>
    %70 = arith.maximumf %68, %69 : vector<256x128xf32>
    %c2 = arith.constant 2 : index
    %c0_26 = arith.constant 0 : index
    %71 = vector.load %arg4[%c2, %c0_26] : memref<6x128xf32, #tpu.memory_space<vmem>>, vector<1x128xf32>
    %72 = vector.broadcast %71 : vector<1x128xf32> to vector<256x128xf32>
    %73 = arith.mulf %70, %72 : vector<256x128xf32>
    %74 = arith.addf %62, %73 : vector<256x128xf32>
    %75 = vector.extract_strided_slice %1 {offsets = [0, 384], sizes = [128, 128], strides = [1, 1]} : vector<128x512xf32> to vector<128x128xf32>
    %cst_27 = arith.constant dense<0.000000e+00> : vector<256x128xf32>
    %76 = tpu.matmul %11, %75, %cst_27 {dimension_numbers = #tpu.dot_dimension_numbers<[1], [1], [0], [0], [0, 0, 1, 0], [], []>} : vector<256x128xf32>, vector<128x128xf32>, vector<256x128xf32> -> vector<256x128xf32>
    %cst_28 = arith.constant dense<0.000000e+00> : vector<256x128xf32>
    %77 = tpu.matmul %20, %75, %cst_28 {dimension_numbers = #tpu.dot_dimension_numbers<[1], [1], [0], [0], [0, 0, 1, 0], [], []>} : vector<256x128xf32>, vector<128x128xf32>, vector<256x128xf32> -> vector<256x128xf32>
    %78 = arith.maximumf %76, %77 : vector<256x128xf32>
    %cst_29 = arith.constant dense<0.000000e+00> : vector<256x128xf32>
    %79 = tpu.matmul %29, %75, %cst_29 {dimension_numbers = #tpu.dot_dimension_numbers<[1], [1], [0], [0], [0, 0, 1, 0], [], []>} : vector<256x128xf32>, vector<128x128xf32>, vector<256x128xf32> -> vector<256x128xf32>
    %80 = arith.maximumf %78, %79 : vector<256x128xf32>
    %cst_30 = arith.constant dense<0.000000e+00> : vector<256x128xf32>
    %81 = tpu.matmul %38, %75, %cst_30 {dimension_numbers = #tpu.dot_dimension_numbers<[1], [1], [0], [0], [0, 0, 1, 0], [], []>} : vector<256x128xf32>, vector<128x128xf32>, vector<256x128xf32> -> vector<256x128xf32>
    %82 = arith.maximumf %80, %81 : vector<256x128xf32>
    %c3 = arith.constant 3 : index
    %c0_31 = arith.constant 0 : index
    %83 = vector.load %arg4[%c3, %c0_31] : memref<6x128xf32, #tpu.memory_space<vmem>>, vector<1x128xf32>
    %84 = vector.broadcast %83 : vector<1x128xf32> to vector<256x128xf32>
    %85 = arith.mulf %82, %84 : vector<256x128xf32>
    %86 = arith.addf %74, %85 : vector<256x128xf32>
    %87 = vector.extract_strided_slice %0 {offsets = [0, 0], sizes = [256, 256], strides = [1, 1]} : vector<256x512xf32> to vector<256x256xf32>
    %88 = arith.mulf %87, %87 : vector<256x256xf32>
    %cst_32 = arith.constant dense<0.000000e+00> : vector<256xf32>
    %89 = vector.multi_reduction <add>, %88, %cst_32 [1] : vector<256x256xf32> to vector<256xf32>
    %90 = vector.shape_cast %89 : vector<256xf32> to vector<256x1xf32>
    %cst_33 = arith.constant 1.000000e-16 : f32
    %91 = vector.broadcast %cst_33 : f32 to vector<256x1xf32>
    %92 = arith.addf %90, %91 : vector<256x1xf32>
    %93 = math.rsqrt %92 : vector<256x1xf32>
    %94 = vector.broadcast %93 : vector<256x1xf32> to vector<256x256xf32>
    %95 = arith.mulf %87, %94 : vector<256x256xf32>
    %96 = vector.extract_strided_slice %0 {offsets = [0, 256], sizes = [256, 256], strides = [1, 1]} : vector<256x512xf32> to vector<256x256xf32>
    %97 = arith.mulf %96, %96 : vector<256x256xf32>
    %cst_34 = arith.constant dense<0.000000e+00> : vector<256xf32>
    %98 = vector.multi_reduction <add>, %97, %cst_34 [1] : vector<256x256xf32> to vector<256xf32>
    %99 = vector.shape_cast %98 : vector<256xf32> to vector<256x1xf32>
    %cst_35 = arith.constant 1.000000e-16 : f32
    %100 = vector.broadcast %cst_35 : f32 to vector<256x1xf32>
    %101 = arith.addf %99, %100 : vector<256x1xf32>
    %102 = math.rsqrt %101 : vector<256x1xf32>
    %103 = vector.broadcast %102 : vector<256x1xf32> to vector<256x256xf32>
    %104 = arith.mulf %96, %103 : vector<256x256xf32>
    %105 = vector.extract_strided_slice %1 {offsets = [0, 0], sizes = [128, 256], strides = [1, 1]} : vector<128x512xf32> to vector<128x256xf32>
    %cst_36 = arith.constant dense<0.000000e+00> : vector<256x128xf32>
    %106 = tpu.matmul %95, %105, %cst_36 {dimension_numbers = #tpu.dot_dimension_numbers<[1], [1], [0], [0], [0, 0, 1, 0], [], []>} : vector<256x256xf32>, vector<128x256xf32>, vector<256x128xf32> -> vector<256x128xf32>
    %cst_37 = arith.constant dense<0.000000e+00> : vector<256x128xf32>
    %107 = tpu.matmul %104, %105, %cst_37 {dimension_numbers = #tpu.dot_dimension_numbers<[1], [1], [0], [0], [0, 0, 1, 0], [], []>} : vector<256x256xf32>, vector<128x256xf32>, vector<256x128xf32> -> vector<256x128xf32>
    %108 = arith.maximumf %106, %107 : vector<256x128xf32>
    %c4 = arith.constant 4 : index
    %c0_38 = arith.constant 0 : index
    %109 = vector.load %arg4[%c4, %c0_38] : memref<6x128xf32, #tpu.memory_space<vmem>>, vector<1x128xf32>
    %110 = vector.broadcast %109 : vector<1x128xf32> to vector<256x128xf32>
    %111 = arith.mulf %108, %110 : vector<256x128xf32>
    %112 = arith.addf %86, %111 : vector<256x128xf32>
    %113 = vector.extract_strided_slice %1 {offsets = [0, 256], sizes = [128, 256], strides = [1, 1]} : vector<128x512xf32> to vector<128x256xf32>
    %cst_39 = arith.constant dense<0.000000e+00> : vector<256x128xf32>
    %114 = tpu.matmul %95, %113, %cst_39 {dimension_numbers = #tpu.dot_dimension_numbers<[1], [1], [0], [0], [0, 0, 1, 0], [], []>} : vector<256x256xf32>, vector<128x256xf32>, vector<256x128xf32> -> vector<256x128xf32>
    %cst_40 = arith.constant dense<0.000000e+00> : vector<256x128xf32>
    %115 = tpu.matmul %104, %113, %cst_40 {dimension_numbers = #tpu.dot_dimension_numbers<[1], [1], [0], [0], [0, 0, 1, 0], [], []>} : vector<256x256xf32>, vector<128x256xf32>, vector<256x128xf32> -> vector<256x128xf32>
    %116 = arith.maximumf %114, %115 : vector<256x128xf32>
    %c5 = arith.constant 5 : index
    %c0_41 = arith.constant 0 : index
    %117 = vector.load %arg4[%c5, %c0_41] : memref<6x128xf32, #tpu.memory_space<vmem>>, vector<1x128xf32>
    %118 = vector.broadcast %117 : vector<1x128xf32> to vector<256x128xf32>
    %119 = arith.mulf %116, %118 : vector<256x128xf32>
    %120 = arith.addf %112, %119 : vector<256x128xf32>
    %c0_42 = arith.constant 0 : index
    %c0_43 = arith.constant 0 : index
    %121 = vector.load %arg5[%c0_42, %c0_43] : memref<256x128xf32, #tpu.memory_space<vmem>>, vector<256x128xf32>
    tpu.vector_store %arg5[%c0_42, %c0_43], %120 {strides = array<i32>} : memref<256x128xf32, #tpu.memory_space<vmem>>, vector<256x128xf32>,
    return
  }
  func.func @transform_0(%arg0: i32, %arg1: i32) -> (i32, i32) {
    %c0_i32 = arith.constant 0 : i32
    %c0_i32_0 = arith.constant 0 : i32
    return %arg0, %c0_i32 : i32, i32
  }
  func.func @transform_1(%arg0: i32, %arg1: i32) -> (i32, i32) {
    %c0_i32 = arith.constant 0 : i32
    %c0_i32_0 = arith.constant 0 : i32
    return %arg1, %c0_i32 : i32, i32
  }
  func.func @transform_2(%arg0: i32, %arg1: i32) -> (i32, i32) {
    %c0_i32 = arith.constant 0 : i32
    %c0_i32_0 = arith.constant 0 : i32
    return %c0_i32, %arg1 : i32, i32
  }
  func.func @transform_3(%arg0: i32, %arg1: i32) -> (i32, i32) {
    %c0_i32 = arith.constant 0 : i32
    return %arg0, %arg1 : i32, i32
  }
}

</mosaic_0001>

<bundles_post_ra>
// kernel: tpu_custom_call.1
= control target key start
LH: loop header
LB: loop body
LE: loop exit
PB: predicated region body
PF: predicated region fallthrough
CT: control target
= control target key end

     0   :  { %s16389_s0 = inlined_call_operand.hbm [shape: f32[512,512], index: 0, kind: input, shape index: {}]   ;;  %s16390_s1 = inlined_call_operand.hbm [shape: f32[384,512], index: 1, kind: input, shape index: {}]   ;;  %s16391_s2 = inlined_call_operand.hbm [shape: f32[6,384], index: 2, kind: input, shape index: {}]   ;;  %s16392_s3 = inlined_call_operand.hbm [shape: f32[512,384], index: 3, kind: output, shape index: {}]  }
   0x1   :  { %17099 = sst [smem:[#allocation247_spill]] %s16390_s1 }
   0x2   :  { %17100 = sst [smem:[#allocation248_spill]] %s16392_s3 }
   0x3   :  { %8 = vsyncpa [#allocation3], 0 }
   0x4   :  { %10 = vsyncpa [#allocation3 + $0x1], 0 }
   0x5   :  { %11 = vsyncpa [#allocation6], 0 }
   0x6   :  { %13 = vsyncpa [#allocation6 + $0x1], 0 }
   0x7   :  { %14 = vsyncpa [#allocation4], 0 }
   0x8   :  { %16 = vsyncpa [#allocation4 + $0x1], 0  ;;  %s10982_s12 = smov 0   ;;  %s10984_s13 = smov 0  }
   0x9   :  { %s10986_s14 = smov 0   ;;  %s10988_s15 = smov 0  }
   0xa   :  { %s10990_s16 = smov 0   ;;  %s10992_s17 = smov 0  }
   0xb   :  { %s10994_s18 = smov 0   ;;  %s10996_s19 = smov 0  }
   0xc   :  { %s10998_s20 = smov 0   ;;  %s11000_s21 = smov 0  }
   0xd   :  { %s11002_s22 = smov 0   ;;  %s11004_s23 = smov 0  }
   0xe   :  { %s11006_s24 = smov 0   ;;  %s11008_s25 = smov 0  }
   0xf LB: > { %17101 = sst [smem:[#allocation12_spill]] %s10899_s12  ;;  %s11051_s26 = sadd.s32 4294967295, %s10951_s25   ;;  %s10951_s25 = sphi %s11008_s25, %s22_s25   ;;  %s10947_s24 = sphi %s11006_s24, %s18694_s24   ;;  %s10943_s23 = sphi %s11004_s23, %s18703_s23   ;;  %s10939_s22 = sphi %s11002_s22, %s18692_s22   ;;  %s10935_s21 = sphi %s11000_s21, %s18702_s21   ;;  %s10931_s20 = sphi %s10998_s20, %s18691_s20   ;;  %s10927_s19 = sphi %s10996_s19, %s18701_s19   ;;  %s10923_s18 = sphi %s10994_s18, %s18700_s18   ;;  %s10919_s17 = sphi %s10992_s17, %s18699_s17   ;;  %s10915_s16 = sphi %s10990_s16, %s18698_s16   ;;  %s10911_s15 = sphi %s10988_s15, %s18697_s15   ;;  %s10907_s14 = sphi %s10986_s14, %s18696_s14   ;;  %s10903_s13 = sphi %s10984_s13, %s18695_s13   ;;  %s10899_s12 = sphi %s10982_s12, %s18688_s12  }
  0x10   : > { %17102 = sst [smem:[#allocation13_spill]] %s10903_s13  ;;  %s31_s27 = sadd.s32 1, %s10943_s23 }
  0x11   : > { %17103 = sst [smem:[#allocation14_spill]] %s10931_s20  ;;  %p11054_p0 = scmp.ge.s32.totalorder %s31_s27, 3 }
  0x12   : > { %17104 = sst [smem:[#allocation15_spill]] %s10935_s21  ;;  %p16398_p1 = scmp.eq.s32.totalorder %s10951_s25, 0 }
  0x13   : > { %17105 = sst [smem:[#allocation16_spill]] %s10939_s22  ;;  %p16397_p2 = scmp.eq.s32.totalorder %s11051_s26, 0 }
  0x14   : > { %17106 = sst [smem:[#allocation17_spill]] %s10947_s24  ;;  %s67_s29 = sadd.s32 1, %s10919_s17 }
  0x15   : > { %s18705_s27 = smov (%p11054_p0, %s31_s27), 0  ;;  %p74_p3 = scmp.ne.s32.totalorder %s10919_s17, %s10915_s16 }
  0x16   : > { %17108 = sst [smem:[#allocation18_spill]] %s18705_s27  ;;  %p80_p4 = scmp.ne.s32.totalorder %s10915_s16, %s10911_s15 }
  0x17   : > { %s11070_s30 = ssub.s32 %s10943_s23, %s18705_s27  ;;  %p76_p7 = por %p74_p3, %p16398_p1 }
  0x18   : > { %p65_p6 = scmp.eq.s32.totalorder %s11070_s30, 0  ;;  %p11078_p8 = por %p80_p4, %p16397_p2 }
  0x19   : > { %p16396_p9 = scmp.lt.s32.totalorder %s10951_s25, 6  ;;  %s180_s6 = sand.u32 1, %s10951_s25  }
  0x1a   : > { %s17109_s4 = scalar_select %p11078_p8, 1, 0 }
  0x1b   : > { %s11083_s5 = scalar_select %p65_p6, %s10919_s17, %s67_s29  }
  0x1c   : > { %s16395_s7 = sand.u32 1, %s10919_s17   ;;  %s7263_s9 = sshll.u32 %s10943_s23, 13 }
  0x1d   : > { %17110 = sst [smem:[#allocation19_spill]] %s11083_s5  ;;  %s7237_s8 = sshll.u32 %s16395_s7, 9 }
  0x1e   : > { %s17111_s1 = sld [smem:[#allocation247_spill]]  ;;  %s184_s27 = scalar_lea.vmem [#allocation5], %s7237_s8 }
  0x1f   : > { %s192_s3 = sshll.u32 %s184_s27, 4  ;;  %p11098_p10 = pnand %p16396_p9, %p76_p7  ;;  %s11102_s3 = int_to_ptr.vmem [resolvable:$true] %s192_s3 }
  0x20   : > { %s11106_s10 = scalar_lea.sflag [#allocation6], %s180_s6 }
  0x21   : > { %p16400_p3 = pneg %p11098_p10 }
  0x24   : > { %s11094_s15 = scalar_lea.hbm %s17111_s1, %s7263_s9  ;;  %s10716_s11 = scalar_lea.hbm %s17111_s1, 24576 }
  0x25   : > { %s10711_s9 = scalar_lea.hbm %s11094_s15, 8192  ;;  %p10717_p7 = scmp.lt.u32.totalorder %s11094_s15, %s17111_s1 }
  0x26   : > { %p10712_p13 = scmp.ne.s32.totalorder %s11094_s15, %s10711_s9  ;;  %p10718_p9 = scmp.lt.u32.totalorder %s10716_s11, %s10711_s9 }
  0x27   : > { %p10720_p2 = scmp.lt.u32.totalorder %s10711_s9, %s11094_s15 }
  0x28   : > { %p10714_p4 = pnand %p16400_p3, %p10712_p13  ;;  %p10719_p5 = por %p10718_p9, %p10717_p7 }
  0x2a   : > { %p10715_p6 = pneg %p10714_p4  ;;  %p10721_p1 = por %p10720_p2, %p10719_p5 }
  0x2c   : > { %p10722_p11 = pnand %p10721_p1, %p10715_p6 }
  0x2e   : > { %10725 = shalt.err (!%p10722_p11)
}
  0x2f   : > { %s10726_s6 = scalar_lea.vmem %s11102_s3, 8192  ;;  %s10953_s27 = smov [#allocation5]  }
  0x30   : > { %p10727_p13 = scmp.ne.s32.totalorder %s11102_s3, %s10726_s6  ;;  %s10731_s8 = sshll.u32 %s10953_s27, 4  ;;  %s10732_s8 = int_to_ptr.vmem [resolvable:$false] %s10731_s8 }
  0x31   : > { %s10733_s5 = scalar_lea.vmem %s10732_s8, 16384  ;;  %p10734_p8 = scmp.lt.s32.totalorder %s11102_s3, %s10732_s8 }
  0x32   : > { %p10729_p4 = pnand %p10727_p13, %p16400_p3  ;;  %p10735_p9 = scmp.lt.s32.totalorder %s10733_s5, %s10726_s6 }
  0x34   : > { %p10730_p12 = pneg %p10729_p4  ;;  %p10736_p7 = por %p10735_p9, %p10734_p8 }
  0x36   : > { %p10737_p2 = pnand %p10736_p7, %p10730_p12 }
  0x38   : > { %10740 = shalt.err (!%p10737_p2)
}
  0x39   : > { %s16401_s7 = smov 512   ;;  %s16402_s9 = smov 32  }
  0x3a   : > { %9967 = dma.hbm_to_vmem [thread:$0]  (!%p11098_p10), %s11094_s15, 8192, %s11102_s3, %s11106_s10, %s16401_s7, %s16401_s7, %s16402_s9  }
  0x3b   : > { %p17113_p1 = scmp.lt.s32.totalorder %s10951_s25, 7  ;;  %p17114_p5 = scmp.ge.s32.totalorder %s10951_s25, 1 }
  0x3c   : > { %s7230_s6 = sadd.s32 4294967294, %s10951_s25   ;;  %s34_s27 = sadd.s32 1, %s10947_s24 }
  0x3d   : > { %p11141_p8 = pnand %p17114_p5, %p17113_p1  ;;  %s41_s8 = sadd.s32 1, %s10931_s20 }
  0x3e   : > { %s18707_s27 = smov (!%p11054_p0, %s34_s27), %s10947_s24  ;;  %p48_p11 = scmp.ne.s32.totalorder %s10931_s20, %s10927_s19 }
  0x3f   : > { %s17115_s11 = scalar_select %p11141_p8, 1, 0 }
  0x40   : > { %p54_p12 = scmp.ne.s32.totalorder %s10927_s19, %s10923_s18  ;;  %p36_p6 = scmp.ge.s32.totalorder %s18707_s27, 2 }
  0x41   : > { %s121_s3 = sadd.s32 1, %s10907_s14  ;;  %p17116_p13 = scmp.eq.s32.totalorder %s10951_s25, 0 }
  0x42   : > { %p17118_p9 = scmp.eq.s32.totalorder %s11051_s26, 0  ;;  %s18709_s27 = smov (%p36_p6, %s18707_s27), 0 }
  0x43   : > { %p11158_p4 = por %p17116_p13, %p48_p11  ;;  %17120 = sst [smem:[#allocation20_spill]] %s18709_s27 }
  0x44   : > { %p11164_p7 = por %p17118_p9, %p54_p12  ;;  %p131_p0 = scmp.ne.s32.totalorder %s10907_s14, %s10903_s13 }
  0x45   : > { %p137_p2 = scmp.ne.s32.totalorder %s10903_s13, %s10899_s12  ;;  %s38_s18 = ssub.s32 %s10947_s24, %s18709_s27 }
  0x46   : > { %s17119_s5 = scalar_select %p11164_p7, 1, 0 }
  0x47   : > { %p138_p1 = scmp.eq.s32.totalorder %s7230_s6, 5  ;;  %p39_p5 = scmp.eq.s32.totalorder %s38_s18, 0 }
  0x48   : > { %s118_s28 = sor.u32 %s11070_s30, %s38_s18  ;;  %p17121_p13 = scmp.eq.s32.totalorder %s11051_s26, 5 }
  0x49   : > { %p119_p11 = scmp.eq.s32.totalorder %s118_s28, 0  ;;  %p11189_p12 = por %p138_p1, %p137_p2 }
  0x4a   : > { %p11179_p3 = por %p17121_p13, %p131_p0  ;;  %s158_s27 = sand.u32 1, %s10931_s20  }
  0x4b   : > { %s11184_s9 = scalar_select %p39_p5, %s10931_s20, %s41_s8  }
  0x4c   : > { %s17122_s7 = scalar_select %p11179_p3, 1, 0 }
  0x4d   : > { %17123 = sst [smem:[#allocation21_spill]] %s11184_s9  ;;  %s7233_s6 = sshll.u32 %s158_s27, 10 }
  0x4e   : > { %s11187_s1 = scalar_select %p119_p11, %s10907_s14, %s121_s3  }
  0x4f   : > { %s17124_s12 = scalar_select %p11189_p12, 1, 0 }
  0x50   : > { %s7261_s21 = sshll.u32 %s10947_s24, 14  ;;  %s162_s18 = scalar_lea.vmem [#allocation2], %s7233_s6 }
  0x51   : > { %s11198_s30 = scalar_lea.hbm %s16389_s0, %s7261_s21  ;;  %s170_s8 = sshll.u32 %s162_s18, 4  ;;  %s11200_s8 = int_to_ptr.vmem [resolvable:$true] %s170_s8 }
  0x52   : > { %p17125_p6 = scmp.lt.s32.totalorder %s10951_s25, 6  ;;  %s17127_s28 = sand.u32 1, %s10919_s17  }
  0x53   : > { %s11212_s13 = sshll.u32 %s17127_s28, 3  ;;  %s7242_s21 = sshll.u32 %s10943_s23, 7 }
  0x54   : > { %p11206_p9 = pnand %p17125_p6, %p11158_p4  ;;  %s11215_s22 = scalar_lea.sflag [#allocation3], %s158_s27 }
  0x55   : > { %s10741_s24 = scalar_lea.hbm %s11198_s30, 16384  ;;  %s10746_s18 = scalar_lea.hbm %s16389_s0, 32768 }
  0x56   : > { %p10742_p0 = scmp.ne.s32.totalorder %s11198_s30, %s10741_s24  ;;  %p10743_p2 = pneg %p11206_p9 }
  0x57   : > { %p10747_p4 = scmp.lt.u32.totalorder %s11198_s30, %s16389_s0  ;;  %p10748_p11 = scmp.lt.u32.totalorder %s10746_s18, %s10741_s24 }
  0x58   : > { %p10744_p1 = pnand %p10743_p2, %p10742_p0  ;;  %p10750_p6 = scmp.lt.u32.totalorder %s10741_s24, %s11198_s30 }
  0x59   : > { %p10749_p13 = por %p10748_p11, %p10747_p4 }
  0x5a   : > { %p10745_p5 = pneg %p10744_p1 }
  0x5b   : > { %p10751_p12 = por %p10750_p6, %p10749_p13 }
  0x5d   : > { %p10752_p3 = pnand %p10751_p12, %p10745_p5 }
  0x5f   : > { %10755 = shalt.err (!%p10752_p3)
}
  0x60   : > { %s10756_s27 = scalar_lea.vmem %s11200_s8, 16384  ;;  %s10956_s28 = smov [#allocation2]  }
  0x61   : > { %p10757_p0 = scmp.ne.s32.totalorder %s11200_s8, %s10756_s27  ;;  %s10761_s15 = sshll.u32 %s10956_s28, 4  ;;  %s10762_s15 = int_to_ptr.vmem [resolvable:$false] %s10761_s15 }
  0x62   : > { %s10763_s20 = scalar_lea.vmem %s10762_s15, 32768  ;;  %p10764_p8 = scmp.lt.s32.totalorder %s11200_s8, %s10762_s15 }
  0x63   : > { %p10759_p1 = pnand %p10757_p0, %p10743_p2  ;;  %p10765_p4 = scmp.lt.s32.totalorder %s10763_s20, %s10756_s27 }
  0x65   : > { %p10760_p7 = pneg %p10759_p1  ;;  %p10766_p11 = por %p10765_p4, %p10764_p8 }
  0x67   : > { %p10767_p13 = pnand %p10766_p11, %p10760_p7 }
  0x69   : > { %10770 = shalt.err (!%p10767_p13)
}
  0x6a   : > { %s17128_s24 = smov 32   ;;  %s17129_s9 = smov 512  }
  0x6b   : > { %9964 = dma.hbm_to_vmem [thread:$0]  (!%p11206_p9), %s11198_s30, 16384, %s11200_s8, %s11215_s22, %s17129_s9, %s17129_s9, %s17128_s24  }
  0x6c   : > { %s11251_s27 = scalar_lea.hbm %s16391_s2, %s7242_s21  ;;  %s206_s3 = scalar_lea.vmem [#allocation7], %s11212_s13 }
  0x6d   : > { %s213_s28 = sshll.u32 %s206_s3, 4  ;;  %s10771_s15 = scalar_lea.hbm %s11251_s27, 128  ;;  %s214_s28 = int_to_ptr.vmem [resolvable:$true] %s213_s28 }
  0x6e   : > { %p10772_p3 = scmp.ne.s32.totalorder %s11251_s27, %s10771_s15  ;;  %p17130_p8 = pneg %p11098_p10 }
  0x6f   : > { %s10776_s22 = scalar_lea.hbm %s16391_s2, 384  ;;  %p10777_p9 = scmp.lt.u32.totalorder %s11251_s27, %s16391_s2 }
  0x70   : > { %p10774_p7 = pnand %p10772_p3, %p17130_p8  ;;  %p10778_p2 = scmp.lt.u32.totalorder %s10776_s22, %s10771_s15 }
  0x71   : > { %p10780_p6 = scmp.lt.u32.totalorder %s10771_s15, %s11251_s27 }
  0x72   : > { %p10775_p12 = pneg %p10774_p7  ;;  %p10779_p5 = por %p10778_p2, %p10777_p9 }
  0x74   : > { %p10781_p0 = por %p10780_p6, %p10779_p5 }
  0x76   : > { %p10782_p1 = pnand %p10781_p0, %p10775_p12 }
  0x78   : > { %10785 = shalt.err (!%p10782_p1)
}
  0x79   : > { %s10786_s13 = scalar_lea.vmem %s214_s28, 128  ;;  %p17131_p11 = pmov %p17130_p8 }
  0x7a   : > { %p10787_p4 = scmp.ne.s32.totalorder %s214_s28, %s10786_s13  ;;  %s10957_s24 = smov [#allocation7]  }
  0x7b   : > { %s10791_s9 = sshll.u32 %s10957_s24, 4  ;;  %s10792_s9 = int_to_ptr.vmem [resolvable:$false] %s10791_s9 }
  0x7c   : > { %p10789_p13 = pnand %p10787_p4, %p17131_p11  ;;  %s10793_s6 = scalar_lea.vmem %s10792_s9, 256 }
  0x7d   : > { %p10794_p8 = scmp.lt.s32.totalorder %s214_s28, %s10792_s9  ;;  %p10795_p7 = scmp.lt.s32.totalorder %s10793_s6, %s10786_s13 }
  0x7e   : > { %p10790_p3 = pneg %p10789_p13 }
  0x7f   : > { %p10796_p2 = por %p10795_p7, %p10794_p8 }
  0x81   : > { %p10797_p9 = pnand %p10796_p2, %p10790_p3 }
  0x83   : > { %10800 = shalt.err (!%p10797_p9)
}
  0x84   : > { %9970 = dma.hbm_to_vmem [thread:$0]  (!%p11098_p10), %s11251_s27, 128, %s214_s28, %s11106_s10  }
  0x85   : > { %p17132_p12 = scmp.ne.s32.totalorder %s17115_s11, 0 }
  0x87   : > { %222 = sbr.rel (%p17132_p12) target bundleno = 1469 (0x5bd), region = 32 }
  0x8e   : > { %s224_s18 = sand.u32 1, %s10927_s19   ;;  %p17133_p5 = scmp.ne.s32.totalorder %s17119_s5, 0 }
  0x8f   : > { %s7244_s3 = sshll.u32 %s224_s18, 10  ;;  %s225_s15 = scalar_lea.sflag [#allocation3], %s224_s18 }
  0x90   : > { %s11277_s30 = scalar_lea.vmem [#allocation2], %s7244_s3 }
  0x91   : > { %10886 = dma.done.wait (%p17133_p5), %s225_s15, 16384  }
  0x92   : > { %10888 = vsyncadd (%p17133_p5), %s225_s15, 4294950912  ;;  %s233_s29 = sand.u32 1, %s11051_s26   ;;  %s235_s10 = sand.u32 1, %s10915_s16  }
  0x93   : > { %s7245_s11 = sshll.u32 %s235_s10, 9  ;;  %s234_s27 = scalar_lea.sflag [#allocation6], %s233_s29 }
  0x94   : > { %s11287_s28 = scalar_lea.vmem [#allocation5], %s7245_s11  ;;  %p17134_p10 = scmp.ne.s32.totalorder %s17109_s4, 0 }
  0x96   : > { %10890 = dma.done.wait (%p17134_p10), %s234_s27, 8320  }
  0x97   : > { %10892 = vsyncadd (%p17134_p10), %s234_s27, 4294958976  ;;  %v11294_v0 = vld [vmem:[%s11277_s30 + $0x20] sm:$0xff]  ;;  %v11300_v2 = vld [vmem:[%s11277_s30 + $0x28] sm:$0xff]  ;;  %s7246_s26 = sshll.u32 %s235_s10, 3  ;;  %s18680_s5 = sld [smem:[#allocation13_spill]] }
  0x98   : > { %v11297_v1 = vld [vmem:[%s11277_s30] sm:$0xff]  ;;  %v475_v3 = vmul.f32 %v11294_v0, %v11294_v0  ;;  %v667_v5 = vmul.f32 %v11300_v2, %v11300_v2  ;;  %v11309_v6 = vld [vmem:[%s11277_s30 + $0x8] sm:$0xff]  ;;  %s13900_s4 = scalar_lea.vmem [#allocation7], %s7246_s26  ;;  %s18681_s21 = sld [smem:[#allocation16_spill]] }
  0x99   : > { %v474_v4 = vmul.f32 %v11297_v1, %v11297_v1  ;;  %v11312_v7 = vld [vmem:[%s11277_s30 + $0x48] sm:$0xff]  ;;  %v11315_v8 = vld [vmem:[%s11277_s30 + $0x40] sm:$0xff]  ;;  %v666_v9 = vmul.f32 %v11309_v6, %v11309_v6  ;;  %s18682_s13 = sld [smem:[#allocation15_spill]]  ;;  %p18684_p0 = scmp.ne.s32.totalorder %s17122_s7, 0 }
  0x9a   : > { %v668_v10 = vmul.f32 %v11312_v7, %v11312_v7  ;;  %v476_v11 = vmul.f32 %v11315_v8, %v11315_v8  ;;  %v11324_v12 = vld [vmem:[%s11277_s30 + $0x68] sm:$0xff]  ;;  %v11327_v13 = vld [vmem:[%s11277_s30 + $0x60] sm:$0xff]  ;;  %508 = vadd.xlane.f32.xlu1 %v475_v3  ;;  %v11332_v15 = vadd.f32 %v667_v5, %v475_v3  ;;  %s10958_s27 = smov [#allocation8]  }
  0x9b   : > { %v11330_v14 = vld [vmem:[%s11277_s30 + $0x88] sm:$0xff]  ;;  %506 = vadd.xlane.f32.xlu0 %v474_v4  ;;  %v11336_v16 = vmul.f32 %v11324_v12, %v11324_v12  ;;  %v11340_v17 = vmul.f32 %v11327_v13, %v11327_v13  ;;  %v11343_v18 = vld [vmem:[%s11277_s30 + $0x80] sm:$0xff]  ;;  %v11351_v21 = vadd.f32 %v666_v9, %v474_v4 }
  0x9c   : > { %17135 = vst [vmem:[#allocation22_spill] sm:$0xff] %v11332_v15  ;;  %v11346_v19 = vld [vmem:[%s11277_s30 + $0xa8] sm:$0xff]  ;;  %v11349_v20 = vld [vmem:[%s11277_s30 + $0xa0] sm:$0xff]  ;;  %v11353_v22 = vadd.f32 %v668_v10, %v476_v11  ;;  %v11357_v23 = vmul.f32 %v11330_v14, %v11330_v14  ;;  %v11361_v24 = vmul.f32 %v11343_v18, %v11343_v18 }
  0x9d   : > { %17136 = vst [vmem:[#allocation23_spill] sm:$0xff] %v11351_v21  ;;  %v11364_v25 = vld [vmem:[%s11277_s30 + $0xc8] sm:$0xff]  ;;  %v11367_v26 = vld [vmem:[%s11277_s30 + $0xc0] sm:$0xff]  ;;  %v11374_v28 = vadd.f32 %v11336_v16, %v11340_v17  ;;  %v11378_v29 = vmul.f32 %v11346_v19, %v11346_v19  ;;  %v11382_v30 = vmul.f32 %v11349_v20, %v11349_v20  ;;  %s276_s8 = sand.u32 1, %s18680_s5  }
  0x9e   : > { %17137 = vst [vmem:[#allocation24_spill] sm:$0xff] %v11353_v22  ;;  %v11370_v27 = vld [vmem:[%s11277_s30 + $0xe8] sm:$0xff]  ;;  %v11386_v31 = vmul.f32 %v11364_v25, %v11364_v25  ;;  %v11389_v32 = vld [vmem:[%s11277_s30 + $0xe0] sm:$0xff]  ;;  %v11399_v35 = vadd.f32 %v11357_v23, %v11361_v24  ;;  %v11403_v36 = vmul.f32 %v11367_v26, %v11367_v26  ;;  %700 = vadd.xlane.f32.xlu1 %v667_v5  ;;  %s7247_s22 = sshll.u32 %s276_s8, 8  ;;  %s9952_s24 = smul.u32 96, %s18681_s21 }
  0x9f   : > { %17138 = vst [vmem:[#allocation25_spill] sm:$0xff] %v11374_v28  ;;  %v11392_v33 = vld [vmem:[%s11277_s30 + $0x108] sm:$0xff]  ;;  %v11395_v34 = vld [vmem:[%s11277_s30 + $0x100] sm:$0xff]  ;;  %v11407_v37 = vmul.f32 %v11370_v27, %v11370_v27  ;;  %v11411_v38 = vmul.f32 %v11389_v32, %v11389_v32  ;;  %698 = vadd.xlane.f32.xlu0 %v666_v9  ;;  %v11424_v42 = vadd.f32 %v11378_v29, %v11382_v30  ;;  %s16205_s20 = scalar_lea.vmem [#allocation8], %s7247_s22  ;;  %s16313_s10 = scalar_lea.sflag [#allocation4], %s276_s8 }
  0xa0   : > { %17139 = vst [vmem:[#allocation26_spill] sm:$0xff] %v11399_v35  ;;  %v11414_v39 = vld [vmem:[%s11277_s30 + $0x128] sm:$0xff]  ;;  %v11417_v40 = vld [vmem:[%s11277_s30 + $0x120] sm:$0xff]  ;;  %v11428_v43 = vmul.f32 %v11392_v33, %v11392_v33  ;;  %v11432_v44 = vmul.f32 %v11395_v34, %v11395_v34  ;;  %v11443_v48 = vadd.f32 %v11386_v31, %v11403_v36  ;;  %s7097_s9 = sadd.s32 %s18682_s13, %s9952_s24  ;;  %s7100_s18 = sshll.u32 %s16205_s20, 4  ;;  %s16307_s18 = int_to_ptr.vmem [resolvable:$true] %s7100_s18 }
  0xa1   : > { %v11420_v41 = vld [vmem:[%s11277_s30 + $0x148] sm:$0xff]  ;;  %17140 = vst [vmem:[#allocation27_spill] sm:$0xff] %v11424_v42  ;;  %v11435_v45 = vld [vmem:[%s11277_s30 + $0x140] sm:$0xff]  ;;  %v11447_v49 = vadd.f32 %v11407_v37, %v11411_v38  ;;  %v11451_v50 = vmul.f32 %v11414_v39, %v11414_v39  ;;  %v11455_v51 = vmul.f32 %v11417_v40, %v11417_v40  ;;  %s7257_s6 = sshll.u32 %s7097_s9, 7  ;;  %s10801_s11 = scalar_lea.vmem %s16307_s18, 4096 }
  0xa2   : > { %17141 = vst [vmem:[#allocation28_spill] sm:$0xff] %v11435_v45  ;;  %v11438_v46 = vld [vmem:[%s11277_s30 + $0x168] sm:$0xff]  ;;  %v326_v47 = vld [vmem:[%s11277_s30 + $0x160] sm:$0xff]  ;;  %17143 = vst [vmem:[#allocation30_spill] sm:$0xff] %v11443_v48  ;;  %v11462_v55 = vadd.f32 %v11428_v43, %v11432_v44  ;;  %v11466_v56 = vmul.f32 %v11420_v41, %v11420_v41  ;;  %v11470_v57 = vmul.f32 %v11435_v45, %v11435_v45  ;;  %702 = vadd.xlane.f32.xlu1 %v668_v10  ;;  %p10802_p6 = scmp.ne.s32.totalorder %s16307_s18, %s10801_s11 }
  0xa3   : > { %17142 = vst [vmem:[#allocation29_spill] sm:$0xff] %v11438_v46  ;;  %17144 = vst [vmem:[#allocation31_spill] sm:$0xff] %v11447_v49  ;;  %v331_v52 = vld [vmem:[%s11277_s30 + $0x188] sm:$0xff]  ;;  %v330_v53 = vld [vmem:[%s11277_s30 + $0x180] sm:$0xff]  ;;  %v11474_v58 = vmul.f32 %v11438_v46, %v11438_v46  ;;  %v11481_v62 = vadd.f32 %v11451_v50, %v11455_v51  ;;  %v11483_v63 = vmul.f32 %v326_v47, %v326_v47  ;;  %510 = vadd.xlane.f32.xlu0 %v476_v11 }
  0xa4   : > { %v335_v54 = vld [vmem:[%s11277_s30 + $0x1a8] sm:$0xff]  ;;  %17145 = vst [vmem:[#allocation32_spill] sm:$0xff] %v11462_v55  ;;  %v334_v59 = vld [vmem:[%s11277_s30 + $0x1a0] sm:$0xff]  ;;  %v11485_v3 = vmul.f32 %v331_v52, %v331_v52  ;;  %v11487_v4 = vmul.f32 %v330_v53, %v330_v53  ;;  %v11494_v49 = vadd.f32 %v11466_v56, %v11470_v57  ;;  %p10803_p1 = pnand %p10802_p6, %p18684_p0 }
  0xa5   : > { %v339_v60 = vld [vmem:[%s11277_s30 + $0x1c8] sm:$0xff]  ;;  %v338_v61 = vld [vmem:[%s11277_s30 + $0x1c0] sm:$0xff]  ;;  %17146 = vst [vmem:[#allocation33_spill] sm:$0xff] %v11481_v62  ;;  %v11496_v48 = vmul.f32 %v335_v54, %v335_v54  ;;  %v11498_v47 = vmul.f32 %v334_v59, %v334_v59  ;;  %v11505_v42 = vadd.f32 %v11474_v58, %v11483_v63 }
  0xa6   : > { %v343_v5 = vld [vmem:[%s11277_s30 + $0x1e8] sm:$0xff]  ;;  %v342_v9 = vld [vmem:[%s11277_s30 + $0x1e0] sm:$0xff]  ;;  %17147 = vst [vmem:[#allocation34_spill] sm:$0xff] %v11494_v49  ;;  %v11509_v10 = vadd.f32 %v11485_v3, %v11487_v4  ;;  %v11511_v11 = vmul.f32 %v339_v60, %v339_v60  ;;  %v11513_v54 = vmul.f32 %v338_v61, %v338_v61  ;;  %704 = vadd.xlane.f32.xlu1 %v11336_v16  ;;  %p10804_p4 = pneg %p10803_p1 }
  0xa7   : > { %v347_v55 = vld [vmem:[%s11277_s30 + $0x208] sm:$0xff]  ;;  %v346_v52 = vld [vmem:[%s11277_s30 + $0x200] sm:$0xff]  ;;  %17148 = vst [vmem:[#allocation35_spill] sm:$0xff] %v11505_v42  ;;  %v11519_v35 = vadd.f32 %v11496_v48, %v11498_v47  ;;  %v11521_v28 = vmul.f32 %v343_v5, %v343_v5  ;;  %v11523_v22 = vmul.f32 %v342_v9, %v342_v9  ;;  %512 = vadd.xlane.f32.xlu0 %v11340_v17 }
  0xa8   : > { %v351_v53 = vld [vmem:[%s11277_s30 + $0x228] sm:$0xff]  ;;  %v350_v62 = vld [vmem:[%s11277_s30 + $0x220] sm:$0xff]  ;;  %17149 = vst [vmem:[#allocation36_spill] sm:$0xff] %v11509_v10  ;;  %v11525_v42 = vmul.f32 %v347_v55, %v347_v55  ;;  %v11531_v60 = vadd.f32 %v11511_v11, %v11513_v54  ;;  %v11533_v61 = vmul.f32 %v346_v52, %v346_v52 }
  0xa9   : > { %v355_v49 = vld [vmem:[%s11277_s30 + $0x248] sm:$0xff]  ;;  %v354_v59 = vld [vmem:[%s11277_s30 + $0x240] sm:$0xff]  ;;  %17150 = vst [vmem:[#allocation37_spill] sm:$0xff] %v11519_v35  ;;  %v11535_v10 = vmul.f32 %v351_v53, %v351_v53  ;;  %v11537_v46 = vmul.f32 %v350_v62, %v350_v62  ;;  %v11545_v55 = vadd.f32 %v11521_v28, %v11523_v22 }
  0xaa   : > { %v359_v15 = vld [vmem:[%s11277_s30 + $0x268] sm:$0xff]  ;;  %v358_v21 = vld [vmem:[%s11277_s30 + $0x260] sm:$0xff]  ;;  %17151 = vst [vmem:[#allocation38_spill] sm:$0xff] %v11531_v60  ;;  %v11547_v9 = vmul.f32 %v355_v49, %v355_v49  ;;  %v11549_v52 = vmul.f32 %v354_v59, %v354_v59  ;;  %v11553_v62 = vadd.f32 %v11525_v42, %v11533_v61  ;;  %706 = vadd.xlane.f32.xlu1 %v11357_v23 }
  0xab   : > { %v363_v5 = vld [vmem:[%s11277_s30 + $0x288] sm:$0xff]  ;;  %v362_v35 = vld [vmem:[%s11277_s30 + $0x280] sm:$0xff]  ;;  %17152 = vst [vmem:[#allocation39_spill] sm:$0xff] %v11545_v55  ;;  %v11557_v53 = vadd.f32 %v11535_v10, %v11537_v46  ;;  %v11559_v16 = vmul.f32 %v359_v15, %v359_v15  ;;  %v11561_v17 = vmul.f32 %v358_v21, %v358_v21  ;;  %514 = vadd.xlane.f32.xlu0 %v11361_v24 }
  0xac   : > { %17153 = vst [vmem:[#allocation40_spill] sm:$0xff] %v11553_v62  ;;  %v11565_v55 = vadd.f32 %v11547_v9, %v11549_v52  ;;  %v11567_v49 = vmul.f32 %v363_v5, %v363_v5  ;;  %v11569_v59 = vmul.f32 %v362_v35, %v362_v35  ;;  %v410_v60 = vld [vmem:[%s11287_s28] sm:$0xff] }
  0xad   : > { %v414_v45 = vld [vmem:[%s11287_s28 + $0x20] sm:$0xff]  ;;  %v11575_v62 = vadd.f32 %v11559_v16, %v11561_v17 }
  0xae   : > { %17154 = vst [vmem:[#allocation41_spill] sm:$0xff] %v11565_v55  ;;  %v11581_v15 = vadd.f32 %v11567_v49, %v11569_v59  ;;  %v418_v21 = vld [vmem:[%s11287_s28 + $0x40] sm:$0xff]  ;;  %v11585_v35 = vpack.c.bf16 %v414_v45, %v410_v60  ;;  %708 = vadd.xlane.f32.xlu1 %v11378_v29 }
  0xaf   : > { %v422_v5 = vld [vmem:[%s11287_s28 + $0x60] sm:$0xff]  ;;  %516 = vadd.xlane.f32.xlu0 %v11382_v30 }
  0xb0   : > { %17155 = vst [vmem:[#allocation42_spill] sm:$0xff] %v11581_v15  ;;  %17156 = vst [vmem:[#allocation43_spill] sm:$0xff] %v11585_v35  ;;  %9313 = vmatprep.subr.bf16.mxu0 %v11585_v35  ;;  %9345 = vmatprep.subr.bf16.mxu1 %v11585_v35  ;;  %v11589_v55 = vpack.c.bf16 %v422_v5, %v418_v21  ;;  %v426_v23 = vld [vmem:[%s11287_s28 + $0x80] sm:$0xff] }
  0xb1   : > { %9315 = vmatpush3.bf16.xpose.msra.mxu0 %v11585_v35  ;;  %9347 = vmatpush3.bf16.xpose.msra.mxu1 %v11585_v35  ;;  %v430_v24 = vld [vmem:[%s11287_s28 + $0xa0] sm:$0xff] }
  0xb2   : > { %17157 = vst [vmem:[#allocation44_spill] sm:$0xff] %v11589_v55  ;;  %9317 = vmatprep.subr.bf16.mxu0 %v11589_v55  ;;  %9349 = vmatprep.subr.bf16.mxu1 %v11589_v55  ;;  %v11601_v45 = vpack.c.bf16 %v430_v24, %v426_v23  ;;  %v434_v29 = vld [vmem:[%s11287_s28 + $0xc0] sm:$0xff]  ;;  %v387_v23 = vld [vmem:[%s11277_s30 + $0x348] sm:$0xff] }
  0xb3   : > { %710 = vadd.xlane.f32.xlu1 %v11386_v31  ;;  %518 = vadd.xlane.f32.xlu0 %v11403_v36  ;;  %v438_v30 = vld [vmem:[%s11287_s28 + $0xe0] sm:$0xff] }
  0xb4   : > { %17158 = vst [vmem:[#allocation45_spill] sm:$0xff] %v11601_v45  ;;  %v11613_v31 = vpack.c.bf16 %v438_v30, %v434_v29  ;;  %v442_v36 = vld [vmem:[%s11287_s28 + $0x100] sm:$0xff]  ;;  %v11721_v29 = vmul.f32 %v387_v23, %v387_v23 }
  0xb5   : > { %v386_v24 = vld [vmem:[%s11277_s30 + $0x340] sm:$0xff] }
  0xb6   : > { %17159 = vst [vmem:[#allocation46_spill] sm:$0xff] %v11613_v31  ;;  %17172 = vst [vmem:[#allocation59_spill] sm:$0xff] %v11721_v29  ;;  %v11723_v30 = vmul.f32 %v386_v24, %v386_v24 }
  0xb7   : > { %712 = vadd.xlane.f32.xlu1 %v11407_v37  ;;  %520 = vadd.xlane.f32.xlu0 %v11411_v38  ;;  %v446_v37 = vld [vmem:[%s11287_s28 + $0x120] sm:$0xff] }
  0xb8   : > { %v11625_v38 = vpack.c.bf16 %v446_v37, %v442_v36  ;;  %17173 = vst [vmem:[#allocation60_spill] sm:$0xff] %v11723_v30  ;;  %v391_v36 = vld [vmem:[%s11277_s30 + $0x368] sm:$0xff]  ;;  %v390_v37 = vld [vmem:[%s11277_s30 + $0x360] sm:$0xff] }
  0xb9   : > { %9319 = vmatpush3.bf16.xpose.msra.mxu0 %v11589_v55  ;;  %9351 = vmatpush3.bf16.xpose.msra.mxu1 %v11589_v55 }
  0xba   : > { %9321 = vmatprep.subr.bf16.mxu0 %v11601_v45  ;;  %9353 = vmatprep.subr.bf16.mxu1 %v11601_v45  ;;  %17160 = vst [vmem:[#allocation47_spill] sm:$0xff] %v11625_v38 }
  0xbb   : > { %714 = vadd.xlane.f32.xlu1 %v11428_v43  ;;  %522 = vadd.xlane.f32.xlu0 %v11432_v44  ;;  %v450_v43 = vld [vmem:[%s11287_s28 + $0x140] sm:$0xff] }
  0xbc   : > { %v454_v44 = vld [vmem:[%s11287_s28 + $0x160] sm:$0xff] }
  0xbf   : > { %716 = vadd.xlane.f32.xlu1 %v11451_v50  ;;  %524 = vadd.xlane.f32.xlu0 %v11455_v51  ;;  %v11637_v50 = vpack.c.bf16 %v454_v44, %v450_v43  ;;  %v458_v51 = vld [vmem:[%s11287_s28 + $0x180] sm:$0xff]  ;;  %v11729_v43 = vmul.f32 %v391_v36, %v391_v36  ;;  %v11731_v44 = vmul.f32 %v390_v37, %v390_v37  ;;  %v285_v36 = vld [vmem:[%s11277_s30 + $0x18] sm:$0xff]  ;;  %v284_v37 = vld [vmem:[%s11277_s30 + $0x10] sm:$0xff] }
  0xc1   : > { %9323 = vmatpush3.bf16.xpose.msra.mxu0 %v11601_v45  ;;  %9355 = vmatpush3.bf16.xpose.msra.mxu1 %v11601_v45  ;;  %17161 = vst [vmem:[#allocation48_spill] sm:$0xff] %v11637_v50  ;;  %17174 = vst [vmem:[#allocation61_spill] sm:$0xff] %v11729_v43 }
  0xc2   : > { %9325 = vmatprep.subr.bf16.mxu0 %v11613_v31  ;;  %9357 = vmatprep.subr.bf16.mxu1 %v11613_v31  ;;  %17175 = vst [vmem:[#allocation62_spill] sm:$0xff] %v11731_v44 }
  0xc3   : > { %718 = vadd.xlane.f32.xlu1 %v11466_v56  ;;  %526 = vadd.xlane.f32.xlu0 %v11470_v57  ;;  %v462_v56 = vld [vmem:[%s11287_s28 + $0x1a0] sm:$0xff] }
  0xc4   : > { %v11649_v57 = vpack.c.bf16 %v462_v56, %v458_v51  ;;  %v395_v51 = vld [vmem:[%s11277_s30 + $0x388] sm:$0xff]  ;;  %v394_v56 = vld [vmem:[%s11277_s30 + $0x380] sm:$0xff] }
  0xc6   : > { %17162 = vst [vmem:[#allocation49_spill] sm:$0xff] %v11649_v57 }
  0xc7   : > { %720 = vadd.xlane.f32.xlu1 %v11474_v58  ;;  %528 = vadd.xlane.f32.xlu0 %v11483_v63  ;;  %v470_v58 = vld [vmem:[%s11287_s28 + $0x1e0] sm:$0xff] }
  0xc9   : > { %9327 = vmatpush3.bf16.xpose.msra.mxu0 %v11613_v31  ;;  %9359 = vmatpush3.bf16.xpose.msra.mxu1 %v11613_v31 }
  0xca   : > { %9329 = vmatprep.subr.bf16.mxu0 %v11625_v38  ;;  %9361 = vmatprep.subr.bf16.mxu1 %v11625_v38 }
  0xcb   : > { %722 = vadd.xlane.f32.xlu1 %v11485_v3  ;;  %530 = vadd.xlane.f32.xlu0 %v11487_v4  ;;  %v371_v3 = vld [vmem:[%s11277_s30 + $0x2c8] sm:$0xff]  ;;  %v370_v4 = vld [vmem:[%s11277_s30 + $0x2c0] sm:$0xff] }
  0xcf   : > { %724 = vadd.xlane.f32.xlu1 %v11496_v48  ;;  %532 = vadd.xlane.f32.xlu0 %v11498_v47  ;;  %v466_v48 = vld [vmem:[%s11287_s28 + $0x1c0] sm:$0xff]  ;;  %v11689_v47 = vmul.f32 %v371_v3, %v371_v3 }
  0xd0   : > { %v11661_v63 = vpack.c.bf16 %v470_v58, %v466_v48  ;;  %v11737_v48 = vmul.f32 %v395_v51, %v395_v51  ;;  %v11739_v58 = vmul.f32 %v394_v56, %v394_v56  ;;  %v11769_v51 = vmul.f32 %v285_v36, %v285_v36 }
  0xd1   : > { %9331 = vmatpush3.bf16.xpose.msra.mxu0 %v11625_v38  ;;  %9363 = vmatpush3.bf16.xpose.msra.mxu1 %v11625_v38  ;;  %17164 = vst [vmem:[#allocation51_spill] sm:$0xff] %v11689_v47  ;;  %v11771_v56 = vmul.f32 %v284_v37, %v284_v37 }
  0xd2   : > { %9333 = vmatprep.subr.bf16.mxu0 %v11637_v50  ;;  %9365 = vmatprep.subr.bf16.mxu1 %v11637_v50  ;;  %17163 = vst [vmem:[#allocation50_spill] sm:$0xff] %v11661_v63  ;;  %17176 = vst [vmem:[#allocation63_spill] sm:$0xff] %v11737_v48 }
  0xd3   : > { %726 = vadd.xlane.f32.xlu1 %v11511_v11  ;;  %534 = vadd.xlane.f32.xlu0 %v11513_v54  ;;  %v375_v11 = vld [vmem:[%s11277_s30 + $0x2e8] sm:$0xff]  ;;  %v374_v54 = vld [vmem:[%s11277_s30 + $0x2e0] sm:$0xff]  ;;  %17177 = vst [vmem:[#allocation64_spill] sm:$0xff] %v11739_v58 }
  0xd4   : > { %v11697_v60 = vmul.f32 %v375_v11, %v375_v11  ;;  %v403_v11 = vld [vmem:[%s11277_s30 + $0x3c8] sm:$0xff] }
  0xd6   : > { %17166 = vst [vmem:[#allocation53_spill] sm:$0xff] %v11697_v60 }
  0xd7   : > { %728 = vadd.xlane.f32.xlu1 %v11521_v28  ;;  %536 = vadd.xlane.f32.xlu0 %v11523_v22  ;;  %v367_v22 = vld [vmem:[%s11277_s30 + $0x2a8] sm:$0xff]  ;;  %v366_v28 = vld [vmem:[%s11277_s30 + $0x2a0] sm:$0xff] }
  0xd9   : > { %9335 = vmatpush3.bf16.xpose.msra.mxu0 %v11637_v50  ;;  %9367 = vmatpush3.bf16.xpose.msra.mxu1 %v11637_v50 }
  0xda   : > { %9337 = vmatprep.subr.bf16.mxu0 %v11649_v57  ;;  %9369 = vmatprep.subr.bf16.mxu1 %v11649_v57 }
  0xdb   : > { %730 = vadd.xlane.f32.xlu1 %v11525_v42  ;;  %538 = vadd.xlane.f32.xlu0 %v11533_v61  ;;  %v11681_v42 = vmul.f32 %v367_v22, %v367_v22  ;;  %v11699_v61 = vmul.f32 %v374_v54, %v374_v54  ;;  %v399_v22 = vld [vmem:[%s11277_s30 + $0x3a8] sm:$0xff]  ;;  %v402_v54 = vld [vmem:[%s11277_s30 + $0x3c0] sm:$0xff] }
  0xdc   : > { %v11745_v3 = vmul.f32 %v399_v22, %v399_v22  ;;  %v289_v22 = vld [vmem:[%s11277_s30 + $0x38] sm:$0xff] }
  0xdd   : > { %17167 = vst [vmem:[#allocation54_spill] sm:$0xff] %v11699_v61 }
  0xde   : > { %17178 = vst [vmem:[#allocation65_spill] sm:$0xff] %v11745_v3 }
  0xdf   : > { %732 = vadd.xlane.f32.xlu1 %v11535_v10  ;;  %540 = vadd.xlane.f32.xlu0 %v11537_v46  ;;  %v11683_v46 = vmul.f32 %v366_v28, %v366_v28  ;;  %v11691_v10 = vmul.f32 %v370_v4, %v370_v4  ;;  %v398_v28 = vld [vmem:[%s11277_s30 + $0x3a0] sm:$0xff] }
  0xe0   : > { %v11747_v4 = vmul.f32 %v398_v28, %v398_v28  ;;  %v288_v28 = vld [vmem:[%s11277_s30 + $0x30] sm:$0xff] }
  0xe1   : > { %9339 = vmatpush3.bf16.xpose.msra.mxu0 %v11649_v57  ;;  %9371 = vmatpush3.bf16.xpose.msra.mxu1 %v11649_v57  ;;  %17165 = vst [vmem:[#allocation52_spill] sm:$0xff] %v11691_v10 }
  0xe2   : > { %9341 = vmatprep.subr.bf16.mxu0 %v11661_v63  ;;  %9373 = vmatprep.subr.bf16.mxu1 %v11661_v63  ;;  %17179 = vst [vmem:[#allocation66_spill] sm:$0xff] %v11747_v4 }
  0xe3   : > { %734 = vadd.xlane.f32.xlu1 %v11547_v9  ;;  %542 = vadd.xlane.f32.xlu0 %v11549_v52  ;;  %v379_v9 = vld [vmem:[%s11277_s30 + $0x308] sm:$0xff]  ;;  %v378_v52 = vld [vmem:[%s11277_s30 + $0x300] sm:$0xff] }
  0xe7   : > { %736 = vadd.xlane.f32.xlu1 %v11559_v16  ;;  %544 = vadd.xlane.f32.xlu0 %v11561_v17  ;;  %v11705_v16 = vmul.f32 %v379_v9, %v379_v9  ;;  %v11707_v17 = vmul.f32 %v378_v52, %v378_v52  ;;  %v11753_v9 = vmul.f32 %v403_v11, %v403_v11 }
  0xe8   : > { %v11755_v52 = vmul.f32 %v402_v54, %v402_v54  ;;  %v11777_v11 = vmul.f32 %v289_v22, %v289_v22  ;;  %v11779_v54 = vmul.f32 %v288_v28, %v288_v28 }
  0xe9   : > { %9343 = vmatpush3.bf16.xpose.msra.mxu0 %v11661_v63  ;;  %9375 = vmatpush3.bf16.xpose.msra.mxu1 %v11661_v63  ;;  %17168 = vst [vmem:[#allocation55_spill] sm:$0xff] %v11705_v16  ;;  %17169 = vst [vmem:[#allocation56_spill] sm:$0xff] %v11707_v17 }
  0xea   : > { %9377 = vmatprep.subr.bf16.mxu0 %v11585_v35  ;;  %9409 = vmatprep.subr.bf16.mxu1 %v11585_v35  ;;  %17180 = vst [vmem:[#allocation67_spill] sm:$0xff] %v11753_v9  ;;  %17181 = vst [vmem:[#allocation68_spill] sm:$0xff] %v11755_v52 }
  0xeb   : > { %738 = vadd.xlane.f32.xlu1 %v11567_v49  ;;  %546 = vadd.xlane.f32.xlu0 %v11569_v59  ;;  %v383_v49 = vld [vmem:[%s11277_s30 + $0x328] sm:$0xff]  ;;  %v382_v59 = vld [vmem:[%s11277_s30 + $0x320] sm:$0xff] }
  0xec   : > { %v11713_v21 = vmul.f32 %v383_v49, %v383_v49  ;;  %v11715_v5 = vmul.f32 %v382_v59, %v382_v59  ;;  %v407_v49 = vld [vmem:[%s11277_s30 + $0x3e8] sm:$0xff]  ;;  %v406_v59 = vld [vmem:[%s11277_s30 + $0x3e0] sm:$0xff] }
  0xed   : > { %v11761_v23 = vmul.f32 %v407_v49, %v407_v49  ;;  %v11763_v24 = vmul.f32 %v406_v59, %v406_v59  ;;  %v293_v49 = vld [vmem:[%s11277_s30 + $0x58] sm:$0xff]  ;;  %v292_v59 = vld [vmem:[%s11277_s30 + $0x50] sm:$0xff] }
  0xee   : > { %17170 = vst [vmem:[#allocation57_spill] sm:$0xff] %v11713_v21  ;;  %17171 = vst [vmem:[#allocation58_spill] sm:$0xff] %v11715_v5  ;;  %v11785_v36 = vmul.f32 %v293_v49, %v293_v49  ;;  %v11787_v37 = vmul.f32 %v292_v59, %v292_v59 }
  0xef   : > { %740 = vadd.xlane.f32.xlu1 %v11681_v42  ;;  %548 = vadd.xlane.f32.xlu0 %v11683_v46  ;;  %17182 = vst [vmem:[#allocation69_spill] sm:$0xff] %v11761_v23  ;;  %17183 = vst [vmem:[#allocation70_spill] sm:$0xff] %v11763_v24 }
  0xf3   : > { %742 = vadd.xlane.f32.xlu1 %v11689_v47  ;;  %550 = vadd.xlane.f32.xlu0 %v11691_v10  ;;  %v320_v10 = vld [vmem:[%s11277_s30 + $0x130] sm:$0xff] }
  0xf7   : > { %744 = vadd.xlane.f32.xlu1 %v11697_v60  ;;  %552 = vadd.xlane.f32.xlu0 %v11699_v61 }
  0xfb   : > { %746 = vadd.xlane.f32.xlu1 %v11705_v16  ;;  %554 = vadd.xlane.f32.xlu0 %v11707_v17 }
  0xff   : > { %748 = vadd.xlane.f32.xlu1 %v11713_v21  ;;  %556 = vadd.xlane.f32.xlu0 %v11715_v5 }
 0x103   : > { %750 = vadd.xlane.f32.xlu1 %v11721_v29  ;;  %558 = vadd.xlane.f32.xlu0 %v11723_v30  ;;  %v309_v29 = vld [vmem:[%s11277_s30 + $0xd8] sm:$0xff]  ;;  %v308_v30 = vld [vmem:[%s11277_s30 + $0xd0] sm:$0xff] }
 0x107   : > { %752 = vadd.xlane.f32.xlu1 %v11729_v43  ;;  %560 = vadd.xlane.f32.xlu0 %v11731_v44 }
 0x10b   : > { %754 = vadd.xlane.f32.xlu1 %v11737_v48  ;;  %562 = vadd.xlane.f32.xlu0 %v11739_v58  ;;  %v305_v48 = vld [vmem:[%s11277_s30 + $0xb8] sm:$0xff]  ;;  %v304_v58 = vld [vmem:[%s11277_s30 + $0xb0] sm:$0xff] }
 0x10c   : > { %v11811_v44 = vmul.f32 %v304_v58, %v304_v58 }
 0x10f   : > { %756 = vadd.xlane.f32.xlu1 %v11745_v3  ;;  %564 = vadd.xlane.f32.xlu0 %v11747_v4 }
 0x113   : > { %758 = vadd.xlane.f32.xlu1 %v11753_v9  ;;  %566 = vadd.xlane.f32.xlu0 %v11755_v52  ;;  %v301_v9 = vld [vmem:[%s11277_s30 + $0x98] sm:$0xff]  ;;  %v300_v52 = vld [vmem:[%s11277_s30 + $0x90] sm:$0xff] }
 0x114   : > { %v11801_v49 = vmul.f32 %v301_v9, %v301_v9  ;;  %v11803_v59 = vmul.f32 %v300_v52, %v300_v52 }
 0x117   : > { %760 = vadd.xlane.f32.xlu1 %v11761_v23  ;;  %568 = vadd.xlane.f32.xlu0 %v11763_v24  ;;  %v297_v23 = vld [vmem:[%s11277_s30 + $0x78] sm:$0xff]  ;;  %v296_v24 = vld [vmem:[%s11277_s30 + $0x70] sm:$0xff] }
 0x118   : > { %v11793_v22 = vmul.f32 %v297_v23, %v297_v23  ;;  %v11795_v28 = vmul.f32 %v296_v24, %v296_v24  ;;  %v11809_v24 = vmul.f32 %v305_v48, %v305_v48  ;;  %v11819_v48 = vmul.f32 %v308_v30, %v308_v30 }
 0x11b   : > { %1082 = vadd.xlane.f32.xlu1 %v11769_v51  ;;  %890 = vadd.xlane.f32.xlu0 %v11771_v56 }
 0x11f   : > { %1084 = vadd.xlane.f32.xlu1 %v11777_v11  ;;  %892 = vadd.xlane.f32.xlu0 %v11779_v54 }
 0x123   : > { %1086 = vadd.xlane.f32.xlu1 %v11785_v36  ;;  %894 = vadd.xlane.f32.xlu0 %v11787_v37 }
 0x127   : > { %1088 = vadd.xlane.f32.xlu1 %v11793_v22  ;;  %896 = vadd.xlane.f32.xlu0 %v11795_v28  ;;  %v509_v3 = vpop.xlane.xlu1 %508 }
 0x128   : > { %v507_v4 = vpop.xlane.xlu0 %506  ;;  %v571_v23 = vadd.f32 1e-16, %v509_v3  ;;  %v11817_v3 = vmul.f32 %v309_v29, %v309_v29 }
 0x129   : > { %v570_v43 = vadd.f32 1e-16, %v507_v4  ;;  %v313_v4 = vld [vmem:[%s11277_s30 + $0xf8] sm:$0xff] }
 0x12a   : > { %10094 = vrsqrt.f32 %v571_v23  ;;  %v312_v23 = vld [vmem:[%s11277_s30 + $0xf0] sm:$0xff] }
 0x12b   : > { %1090 = vadd.xlane.f32.xlu1 %v11801_v49  ;;  %898 = vadd.xlane.f32.xlu0 %v11803_v59  ;;  %10096 = vrsqrt.f32 %v570_v43  ;;  %v701_v9 = vpop.xlane.xlu1 %700  ;;  %v11827_v29 = vmul.f32 %v312_v23, %v312_v23 }
 0x12c   : > { %v699_v52 = vpop.xlane.xlu0 %698  ;;  %v763_v21 = vadd.f32 1e-16, %v701_v9 }
 0x12d   : > { %v762_v5 = vadd.f32 1e-16, %v699_v52  ;;  %v316_v52 = vld [vmem:[%s11277_s30 + $0x110] sm:$0xff] }
 0x12e   : > { %10098 = vrsqrt.f32 %v763_v21  ;;  %v11825_v21 = vmul.f32 %v313_v4, %v313_v4  ;;  %v11841_v23 = vmul.f32 %v316_v52, %v316_v52 }
 0x12f   : > { %1092 = vadd.xlane.f32.xlu1 %v11809_v24  ;;  %900 = vadd.xlane.f32.xlu0 %v11811_v44  ;;  %10100 = vrsqrt.f32 %v762_v5  ;;  %v703_v43 = vpop.xlane.xlu1 %702  ;;  %v317_v5 = vld [vmem:[%s11277_s30 + $0x118] sm:$0xff] }
 0x130   : > { %v511_v58 = vpop.xlane.xlu0 %510  ;;  %v764_v16 = vadd.f32 1e-16, %v703_v43  ;;  %v11839_v4 = vmul.f32 %v317_v5, %v317_v5 }
 0x131   : > { %v572_v17 = vadd.f32 1e-16, %v511_v58 }
 0x132   : > { %10102 = vrsqrt.f32 %v764_v16 }
 0x133   : > { %1094 = vadd.xlane.f32.xlu1 %v11817_v3  ;;  %902 = vadd.xlane.f32.xlu0 %v11819_v48  ;;  %10104 = vrsqrt.f32 %v572_v17  ;;  %v705_v30 = vpop.xlane.xlu1 %704 }
 0x134   : > { %v513_v9 = vpop.xlane.xlu0 %512  ;;  %v10095_v60 = vpop.eup %10094  ;;  %v765_v61 = vadd.f32 1e-16, %v705_v30 }
 0x135   : > { %v573_v43 = vadd.f32 1e-16, %v513_v9  ;;  %v10097_v58 = vpop.eup %10096  ;;  %v11832_v16 = vmul.f32 %v10095_v60, %v11294_v0  ;;  %v321_v9 = vld [vmem:[%s11277_s30 + $0x138] sm:$0xff] }
 0x136   : > { %10106 = vrsqrt.f32 %v765_v61  ;;  %v11837_v17 = vmul.f32 %v10097_v58, %v11297_v1  ;;  %v11855_v52 = vmul.f32 %v321_v9, %v321_v9 }
 0x137   : > { %17184 = vst [vmem:[#allocation71_spill] sm:$0xff] %v11832_v16  ;;  %1096 = vadd.xlane.f32.xlu1 %v11825_v21  ;;  %904 = vadd.xlane.f32.xlu0 %v11827_v29  ;;  %10108 = vrsqrt.f32 %v573_v43  ;;  %v707_v47 = vpop.xlane.xlu1 %706 }
 0x138   : > { %17185 = vst [vmem:[#allocation72_spill] sm:$0xff] %v11837_v17  ;;  %v515_v30 = vpop.xlane.xlu0 %514  ;;  %v10099_v15 = vpop.eup %10098  ;;  %v766_v0 = vadd.f32 1e-16, %v707_v47  ;;  %8064 = vmatprep.mubr.f32.mxu0 %v11837_v17  ;;  %v11857_v47 = vmul.f32 %v320_v10, %v320_v10 }
 0x139   : > { %v574_v60 = vadd.f32 1e-16, %v515_v30  ;;  %v10101_v61 = vpop.eup %10100  ;;  %8065 = vmatmul.mubr.f32.vlgmr.msra.gmra.mrb[0].mxu0 %v11832_v16  ;;  %v11848_v1 = vmul.f32 %v10099_v15, %v11300_v2  ;;  %v325_v30 = vld [vmem:[%s11277_s30 + $0x158] sm:$0xff]  ;;  %v324_v16 = vld [vmem:[%s11277_s30 + $0x150] sm:$0xff] }
 0x13a   : > { %10110 = vrsqrt.f32 %v766_v0  ;;  %v11853_v5 = vmul.f32 %v10101_v61, %v11309_v6  ;;  %9379 = vmatpush3.bf16.xpose.msra.mxu0 %v11585_v35  ;;  %v11875_v61 = vmul.f32 %v324_v16, %v324_v16 }
 0x13b   : > { %17186 = vst [vmem:[#allocation73_spill] sm:$0xff] %v11848_v1  ;;  %1098 = vadd.xlane.f32.xlu1 %v11839_v4  ;;  %906 = vadd.xlane.f32.xlu0 %v11841_v23  ;;  %10112 = vrsqrt.f32 %v574_v60  ;;  %v709_v43 = vpop.xlane.xlu1 %708  ;;  %v11873_v60 = vmul.f32 %v325_v30, %v325_v30 }
 0x13c   : > { %v517_v58 = vpop.xlane.xlu0 %516  ;;  %v10103_v2 = vpop.eup %10102  ;;  %v767_v15 = vadd.f32 1e-16, %v709_v43  ;;  %8144 = vmatprep.mubr.f32.mxu1 %v11853_v5  ;;  %9381 = vmatprep.subr.bf16.mxu0 %v11589_v55 }
 0x13d   : > { %v575_v0 = vadd.f32 1e-16, %v517_v58  ;;  %v10105_v6 = vpop.eup %10104  ;;  %8145 = vmatmul.mubr.f32.vlgmr.msra.gmra.mrb[0].mxu1 %v11848_v1  ;;  %v11866_v10 = vmul.f32 %v10103_v2, %v11312_v7  ;;  %v329_v1 = vld [vmem:[%s11277_s30 + $0x178] sm:$0xff]  ;;  %v328_v7 = vld [vmem:[%s11277_s30 + $0x170] sm:$0xff] }
 0x13e   : > { %10114 = vrsqrt.f32 %v767_v15  ;;  %v11871_v9 = vmul.f32 %v10105_v6, %v11315_v8  ;;  %9411 = vmatpush3.bf16.xpose.msra.mxu1 %v11585_v35  ;;  %v11891_v6 = vmul.f32 %v329_v1, %v329_v1 }
 0x13f   : > { %17187 = vst [vmem:[#allocation74_spill] sm:$0xff] %v11866_v10  ;;  %1100 = vadd.xlane.f32.xlu1 %v11855_v52  ;;  %908 = vadd.xlane.f32.xlu0 %v11857_v47  ;;  %10116 = vrsqrt.f32 %v575_v0 }
 0x140   : > { %17188 = vst [vmem:[#allocation75_spill] sm:$0xff] %v11871_v9  ;;  %v711_v43 = vpop.xlane.xlu1 %710  ;;  %8147 = vmatprep.mubr.f32.mxu1 %v11866_v10  ;;  %v519_v58 = vpop.xlane.xlu0 %518  ;;  %8067 = vmatprep.mubr.f32.mxu0 %v11871_v9  ;;  %v333_v9 = vld [vmem:[%s11277_s30 + $0x198] sm:$0xff] }
 0x141   : > { %v10107_v2 = vpop.eup %10106  ;;  %v768_v15 = vadd.f32 1e-16, %v711_v43  ;;  %v576_v8 = vadd.f32 1e-16, %v519_v58  ;;  %9413 = vmatprep.subr.bf16.mxu1 %v11589_v55  ;;  %v11893_v43 = vmul.f32 %v328_v7, %v328_v7 }
 0x142   : > { %v10109_v16 = vpop.eup %10108  ;;  %v11884_v30 = vmul.f32 %v10107_v2, %v11324_v12  ;;  %v332_v12 = vld [vmem:[%s11277_s30 + $0x190] sm:$0xff]  ;;  %9383 = vmatpush3.bf16.xpose.msra.mxu0 %v11589_v55 }
 0x143   : > { %10118 = vrsqrt.f32 %v768_v15  ;;  %1102 = vadd.xlane.f32.xlu1 %v11873_v60  ;;  %910 = vadd.xlane.f32.xlu0 %v11875_v61  ;;  %v11889_v0 = vmul.f32 %v10109_v16, %v11327_v13  ;;  %v11909_v16 = vmul.f32 %v333_v9, %v333_v9 }
 0x144   : > { %17189 = vst [vmem:[#allocation76_spill] sm:$0xff] %v11884_v30  ;;  %10120 = vrsqrt.f32 %v576_v8  ;;  %v713_v58 = vpop.xlane.xlu1 %712  ;;  %8148 = vmatmul.mubr.f32.gmra.mrb[2].mxu1 %v11884_v30  ;;  %v521_v35 = vpop.xlane.xlu0 %520  ;;  %9385 = vmatprep.subr.bf16.mxu0 %v11601_v45  ;;  %v337_v30 = vld [vmem:[%s11277_s30 + $0x1b8] sm:$0xff] }
 0x145   : > { %17190 = vst [vmem:[#allocation77_spill] sm:$0xff] %v11889_v0  ;;  %v10111_v2 = vpop.eup %10110  ;;  %v769_v15 = vadd.f32 1e-16, %v713_v58  ;;  %8068 = vmatmul.mubr.f32.gmra.mrb[2].mxu0 %v11889_v0  ;;  %v577_v13 = vadd.f32 1e-16, %v521_v35  ;;  %v11911_v58 = vmul.f32 %v332_v12, %v332_v12 }
 0x146   : > { %v10113_v1 = vpop.eup %10112  ;;  %v11902_v7 = vmul.f32 %v10111_v2, %v11330_v14  ;;  %v336_v14 = vld [vmem:[%s11277_s30 + $0x1b0] sm:$0xff]  ;;  %9415 = vmatpush3.bf16.xpose.msra.mxu1 %v11589_v55 }
 0x147   : > { %10122 = vrsqrt.f32 %v769_v15  ;;  %1104 = vadd.xlane.f32.xlu1 %v11891_v6  ;;  %912 = vadd.xlane.f32.xlu0 %v11893_v43  ;;  %v11907_v8 = vmul.f32 %v10113_v1, %v11343_v18  ;;  %v11927_v1 = vmul.f32 %v337_v30, %v337_v30 }
 0x148   : > { %17191 = vst [vmem:[#allocation78_spill] sm:$0xff] %v11902_v7  ;;  %10124 = vrsqrt.f32 %v577_v13  ;;  %v715_v35 = vpop.xlane.xlu1 %714  ;;  %8150 = vmatprep.mubr.f32.mxu1 %v11902_v7  ;;  %v523_v0 = vpop.xlane.xlu0 %522  ;;  %9417 = vmatprep.subr.bf16.mxu1 %v11601_v45 }
 0x149   : > { %17192 = vst [vmem:[#allocation79_spill] sm:$0xff] %v11907_v8  ;;  %v10115_v2 = vpop.eup %10114  ;;  %v770_v15 = vadd.f32 1e-16, %v715_v35  ;;  %8070 = vmatprep.mubr.f32.mxu0 %v11907_v8  ;;  %v578_v18 = vadd.f32 1e-16, %v523_v0  ;;  %v11929_v35 = vmul.f32 %v336_v14, %v336_v14  ;;  %v341_v8 = vld [vmem:[%s11277_s30 + $0x1d8] sm:$0xff] }
 0x14a   : > { %v10117_v9 = vpop.eup %10116  ;;  %v11920_v12 = vmul.f32 %v10115_v2, %v11346_v19  ;;  %v340_v19 = vld [vmem:[%s11277_s30 + $0x1d0] sm:$0xff]  ;;  %9387 = vmatpush3.bf16.xpose.msra.mxu0 %v11601_v45 }
 0x14b   : > { %10126 = vrsqrt.f32 %v770_v15  ;;  %1106 = vadd.xlane.f32.xlu1 %v11909_v16  ;;  %914 = vadd.xlane.f32.xlu0 %v11911_v58  ;;  %v11925_v13 = vmul.f32 %v10117_v9, %v11349_v20  ;;  %v11945_v9 = vmul.f32 %v341_v8, %v341_v8 }
 0x14c   : > { %17193 = vst [vmem:[#allocation80_spill] sm:$0xff] %v11920_v12  ;;  %10128 = vrsqrt.f32 %v578_v18  ;;  %v717_v0 = vpop.xlane.xlu1 %716  ;;  %8151 = vmatmul.mubr.f32.gmra.mrb[4].mxu1 %v11920_v12  ;;  %v525_v55 = vpop.xlane.xlu0 %524  ;;  %9389 = vmatprep.subr.bf16.mxu0 %v11613_v31  ;;  %v345_v12 = vld [vmem:[%s11277_s30 + $0x1f8] sm:$0xff] }
 0x14d   : > { %17194 = vst [vmem:[#allocation81_spill] sm:$0xff] %v11925_v13  ;;  %v10119_v2 = vpop.eup %10118  ;;  %v771_v15 = vadd.f32 1e-16, %v717_v0  ;;  %8071 = vmatmul.mubr.f32.gmra.mrb[4].mxu0 %v11925_v13  ;;  %v579_v20 = vadd.f32 1e-16, %v525_v55  ;;  %v11947_v0 = vmul.f32 %v340_v19, %v340_v19 }
 0x14e   : > { %v10121_v30 = vpop.eup %10120  ;;  %v11938_v14 = vmul.f32 %v10119_v2, %v11364_v25  ;;  %v344_v25 = vld [vmem:[%s11277_s30 + $0x1f0] sm:$0xff]  ;;  %9419 = vmatpush3.bf16.xpose.msra.mxu1 %v11601_v45 }
 0x14f   : > { %10130 = vrsqrt.f32 %v771_v15  ;;  %1108 = vadd.xlane.f32.xlu1 %v11927_v1  ;;  %916 = vadd.xlane.f32.xlu0 %v11929_v35  ;;  %v11943_v18 = vmul.f32 %v10121_v30, %v11367_v26  ;;  %v11963_v30 = vmul.f32 %v345_v12, %v345_v12 }
 0x150   : > { %17195 = vst [vmem:[#allocation82_spill] sm:$0xff] %v11938_v14  ;;  %10132 = vrsqrt.f32 %v579_v20  ;;  %v719_v55 = vpop.xlane.xlu1 %718  ;;  %8153 = vmatprep.mubr.f32.mxu1 %v11938_v14  ;;  %v527_v13 = vpop.xlane.xlu0 %526  ;;  %9421 = vmatprep.subr.bf16.mxu1 %v11613_v31 }
 0x151   : > { %17196 = vst [vmem:[#allocation83_spill] sm:$0xff] %v11943_v18  ;;  %v10123_v2 = vpop.eup %10122  ;;  %v772_v15 = vadd.f32 1e-16, %v719_v55  ;;  %8073 = vmatprep.mubr.f32.mxu0 %v11943_v18  ;;  %v580_v26 = vadd.f32 1e-16, %v527_v13  ;;  %v11965_v55 = vmul.f32 %v344_v25, %v344_v25  ;;  %v349_v18 = vld [vmem:[%s11277_s30 + $0x218] sm:$0xff] }
 0x152   : > { %v10125_v8 = vpop.eup %10124  ;;  %v11956_v19 = vmul.f32 %v10123_v2, %v11370_v27  ;;  %v348_v27 = vld [vmem:[%s11277_s30 + $0x210] sm:$0xff]  ;;  %9391 = vmatpush3.bf16.xpose.msra.mxu0 %v11613_v31 }
 0x153   : > { %10134 = vrsqrt.f32 %v772_v15  ;;  %1110 = vadd.xlane.f32.xlu1 %v11945_v9  ;;  %918 = vadd.xlane.f32.xlu0 %v11947_v0  ;;  %v11961_v20 = vmul.f32 %v10125_v8, %v11389_v32  ;;  %v11981_v8 = vmul.f32 %v349_v18, %v349_v18 }
 0x154   : > { %17197 = vst [vmem:[#allocation84_spill] sm:$0xff] %v11956_v19  ;;  %10136 = vrsqrt.f32 %v580_v26  ;;  %v721_v13 = vpop.xlane.xlu1 %720  ;;  %8154 = vmatmul.mubr.f32.gmra.mrb[6].mxu1 %v11956_v19  ;;  %v529_v45 = vpop.xlane.xlu0 %528  ;;  %9393 = vmatprep.subr.bf16.mxu0 %v11625_v38  ;;  %v353_v19 = vld [vmem:[%s11277_s30 + $0x238] sm:$0xff] }
 0x155   : > { %17198 = vst [vmem:[#allocation85_spill] sm:$0xff] %v11961_v20  ;;  %v10127_v2 = vpop.eup %10126  ;;  %v773_v15 = vadd.f32 1e-16, %v721_v13  ;;  %8074 = vmatmul.mubr.f32.gmra.mrb[6].mxu0 %v11961_v20  ;;  %v581_v32 = vadd.f32 1e-16, %v529_v45  ;;  %v11983_v13 = vmul.f32 %v348_v27, %v348_v27 }
 0x156   : > { %v10129_v12 = vpop.eup %10128  ;;  %v11974_v25 = vmul.f32 %v10127_v2, %v11392_v33  ;;  %v352_v33 = vld [vmem:[%s11277_s30 + $0x230] sm:$0xff]  ;;  %9423 = vmatpush3.bf16.xpose.msra.mxu1 %v11613_v31 }
 0x157   : > { %10138 = vrsqrt.f32 %v773_v15  ;;  %1112 = vadd.xlane.f32.xlu1 %v11963_v30  ;;  %920 = vadd.xlane.f32.xlu0 %v11965_v55  ;;  %v11979_v26 = vmul.f32 %v10129_v12, %v11395_v34  ;;  %v11999_v12 = vmul.f32 %v353_v19, %v353_v19 }
 0x158   : > { %17199 = vst [vmem:[#allocation86_spill] sm:$0xff] %v11974_v25  ;;  %10140 = vrsqrt.f32 %v581_v32  ;;  %v723_v45 = vpop.xlane.xlu1 %722  ;;  %8156 = vmatprep.mubr.f32.mxu1 %v11974_v25  ;;  %v531_v20 = vpop.xlane.xlu0 %530  ;;  %9425 = vmatprep.subr.bf16.mxu1 %v11625_v38 }
 0x159   : > { %17200 = vst [vmem:[#allocation87_spill] sm:$0xff] %v11979_v26  ;;  %v10131_v2 = vpop.eup %10130  ;;  %v774_v15 = vadd.f32 1e-16, %v723_v45  ;;  %8076 = vmatprep.mubr.f32.mxu0 %v11979_v26  ;;  %v582_v34 = vadd.f32 1e-16, %v531_v20  ;;  %17203 = vst [vmem:[#allocation90_spill] sm:$0xff] %v11999_v12  ;;  %v12001_v45 = vmul.f32 %v352_v33, %v352_v33 }
 0x15a   : > { %v10133_v18 = vpop.eup %10132  ;;  %v11992_v27 = vmul.f32 %v10131_v2, %v11414_v39  ;;  %v357_v26 = vld [vmem:[%s11277_s30 + $0x258] sm:$0xff]  ;;  %v356_v39 = vld [vmem:[%s11277_s30 + $0x250] sm:$0xff]  ;;  %9395 = vmatpush3.bf16.xpose.msra.mxu0 %v11625_v38 }
 0x15b   : > { %10142 = vrsqrt.f32 %v774_v15  ;;  %1114 = vadd.xlane.f32.xlu1 %v11981_v8  ;;  %922 = vadd.xlane.f32.xlu0 %v11983_v13  ;;  %v11997_v32 = vmul.f32 %v10133_v18, %v11417_v40  ;;  %17204 = vst [vmem:[#allocation91_spill] sm:$0xff] %v12001_v45 }
 0x15c   : > { %17201 = vst [vmem:[#allocation88_spill] sm:$0xff] %v11992_v27  ;;  %10144 = vrsqrt.f32 %v582_v34  ;;  %v725_v20 = vpop.xlane.xlu1 %724  ;;  %8157 = vmatmul.mubr.f32.gmra.mrb[8].mxu1 %v11992_v27  ;;  %v533_v31 = vpop.xlane.xlu0 %532  ;;  %9397 = vmatprep.subr.bf16.mxu0 %v11637_v50  ;;  %v17206_v34 = vld [vmem:[#allocation28_spill] sm:$0xff]  ;;  %v12019_v27 = vmul.f32 %v356_v39, %v356_v39  ;;  %v17210_v39 = vld [vmem:[#allocation29_spill] sm:$0xff] }
 0x15d   : > { %17202 = vst [vmem:[#allocation89_spill] sm:$0xff] %v11997_v32  ;;  %v10135_v2 = vpop.eup %10134  ;;  %v775_v15 = vadd.f32 1e-16, %v725_v20  ;;  %8077 = vmatmul.mubr.f32.gmra.mrb[8].mxu0 %v11997_v32  ;;  %v583_v40 = vadd.f32 1e-16, %v533_v31  ;;  %v12017_v20 = vmul.f32 %v357_v26, %v357_v26 }
 0x15e   : > { %v10137_v19 = vpop.eup %10136  ;;  %v12010_v33 = vmul.f32 %v10135_v2, %v11420_v41  ;;  %17209 = vst [vmem:[#allocation94_spill] sm:$0xff] %v12019_v27  ;;  %v361_v41 = vld [vmem:[%s11277_s30 + $0x278] sm:$0xff]  ;;  %v360_v2 = vld [vmem:[%s11277_s30 + $0x270] sm:$0xff]  ;;  %9427 = vmatpush3.bf16.xpose.msra.mxu1 %v11625_v38 }
 0x15f   : > { %10146 = vrsqrt.f32 %v775_v15  ;;  %1116 = vadd.xlane.f32.xlu1 %v11999_v12  ;;  %924 = vadd.xlane.f32.xlu0 %v12001_v45  ;;  %v12015_v18 = vmul.f32 %v10137_v19, %v17206_v34  ;;  %17208 = vst [vmem:[#allocation93_spill] sm:$0xff] %v12017_v20  ;;  %v10478_v34 = vld [vmem:[%s11277_s30 + $0x160] sm:$0xff]  ;;  %v12037_v45 = vmul.f32 %v360_v2, %v360_v2  ;;  %v10479_v2 = vld [vmem:[%s11277_s30 + $0x188] sm:$0xff] }
 0x160   : > { %17205 = vst [vmem:[#allocation92_spill] sm:$0xff] %v12010_v33  ;;  %10148 = vrsqrt.f32 %v583_v40  ;;  %v727_v31 = vpop.xlane.xlu1 %726  ;;  %8159 = vmatprep.mubr.f32.mxu1 %v12010_v33  ;;  %v535_v32 = vpop.xlane.xlu0 %534  ;;  %9429 = vmatprep.subr.bf16.mxu1 %v11637_v50 }
 0x161   : > { %17207 = vst [vmem:[#allocation28_spill] sm:$0xff] %v12015_v18  ;;  %v10139_v15 = vpop.eup %10138  ;;  %v776_v12 = vadd.f32 1e-16, %v727_v31  ;;  %8079 = vmatprep.mubr.f32.mxu0 %v12015_v18  ;;  %v584_v19 = vadd.f32 1e-16, %v535_v32  ;;  %v12035_v31 = vmul.f32 %v361_v41, %v361_v41  ;;  %17214 = vst [vmem:[#allocation97_spill] sm:$0xff] %v12037_v45 }
 0x162   : > { %v10141_v26 = vpop.eup %10140  ;;  %v12028_v40 = vmul.f32 %v10139_v15, %v17210_v39  ;;  %v365_v39 = vld [vmem:[%s11277_s30 + $0x298] sm:$0xff]  ;;  %9399 = vmatpush3.bf16.xpose.msra.mxu0 %v11637_v50 }
 0x163   : > { %10150 = vrsqrt.f32 %v776_v12  ;;  %1118 = vadd.xlane.f32.xlu1 %v12017_v20  ;;  %926 = vadd.xlane.f32.xlu0 %v12019_v27  ;;  %v12033_v38 = vmul.f32 %v10478_v34, %v10141_v26  ;;  %17213 = vst [vmem:[#allocation96_spill] sm:$0xff] %v12035_v31  ;;  %v364_v12 = vld [vmem:[%s11277_s30 + $0x290] sm:$0xff]  ;;  %v10480_v34 = vld [vmem:[%s11277_s30 + $0x180] sm:$0xff] }
 0x164   : > { %17211 = vst [vmem:[#allocation29_spill] sm:$0xff] %v12028_v40  ;;  %10152 = vrsqrt.f32 %v584_v19  ;;  %v729_v32 = vpop.xlane.xlu1 %728  ;;  %8160 = vmatmul.mubr.f32.gmra.mrb[10].mxu1 %v12028_v40  ;;  %v537_v15 = vpop.xlane.xlu0 %536  ;;  %9401 = vmatprep.subr.bf16.mxu0 %v11649_v57 }
 0x165   : > { %17212 = vst [vmem:[#allocation95_spill] sm:$0xff] %v12033_v38  ;;  %v10143_v20 = vpop.eup %10142  ;;  %v777_v27 = vadd.f32 1e-16, %v729_v32  ;;  %8080 = vmatmul.mubr.f32.gmra.mrb[10].mxu0 %v12033_v38  ;;  %v585_v26 = vadd.f32 1e-16, %v537_v15  ;;  %v12053_v32 = vmul.f32 %v365_v39, %v365_v39  ;;  %v12055_v15 = vmul.f32 %v364_v12, %v364_v12  ;;  %v10481_v12 = vld [vmem:[%s11277_s30 + $0x1a8] sm:$0xff] }
 0x166   : > { %v10145_v41 = vpop.eup %10144  ;;  %v12046_v19 = vmul.f32 %v10479_v2, %v10143_v20  ;;  %v369_v2 = vld [vmem:[%s11277_s30 + $0x2b8] sm:$0xff]  ;;  %9431 = vmatpush3.bf16.xpose.msra.mxu1 %v11637_v50 }
 0x167   : > { %10154 = vrsqrt.f32 %v777_v27  ;;  %1120 = vadd.xlane.f32.xlu1 %v12035_v31  ;;  %928 = vadd.xlane.f32.xlu0 %v12037_v45  ;;  %v12051_v40 = vmul.f32 %v10480_v34, %v10145_v41  ;;  %17217 = vst [vmem:[#allocation100_spill] sm:$0xff] %v12053_v32  ;;  %17218 = vst [vmem:[#allocation101_spill] sm:$0xff] %v12055_v15  ;;  %v368_v27 = vld [vmem:[%s11277_s30 + $0x2b0] sm:$0xff]  ;;  %v10482_v34 = vld [vmem:[%s11277_s30 + $0x1a0] sm:$0xff] }
 0x168   : > { %17215 = vst [vmem:[#allocation98_spill] sm:$0xff] %v12046_v19  ;;  %10156 = vrsqrt.f32 %v585_v26  ;;  %v731_v38 = vpop.xlane.xlu1 %730  ;;  %8162 = vmatprep.mubr.f32.mxu1 %v12046_v19  ;;  %v539_v20 = vpop.xlane.xlu0 %538  ;;  %9433 = vmatprep.subr.bf16.mxu1 %v11649_v57  ;;  %v10488_v19 = vld [vmem:[%s11277_s30 + $0x200] sm:$0xff] }
 0x169   : > { %17216 = vst [vmem:[#allocation99_spill] sm:$0xff] %v12051_v40  ;;  %v10147_v31 = vpop.eup %10146  ;;  %v778_v45 = vadd.f32 1e-16, %v731_v38  ;;  %8082 = vmatprep.mubr.f32.mxu0 %v12051_v40  ;;  %v586_v41 = vadd.f32 1e-16, %v539_v20  ;;  %v12071_v38 = vmul.f32 %v369_v2, %v369_v2  ;;  %v12073_v20 = vmul.f32 %v368_v27, %v368_v27  ;;  %v10483_v27 = vld [vmem:[%s11277_s30 + $0x1c8] sm:$0xff] }
 0x16a   : > { %v10149_v39 = vpop.eup %10148  ;;  %v12064_v26 = vmul.f32 %v10481_v12, %v10147_v31  ;;  %v373_v12 = vld [vmem:[%s11277_s30 + $0x2d8] sm:$0xff]  ;;  %9403 = vmatpush3.bf16.xpose.msra.mxu0 %v11649_v57 }
 0x16b   : > { %10158 = vrsqrt.f32 %v778_v45  ;;  %1122 = vadd.xlane.f32.xlu1 %v12053_v32  ;;  %930 = vadd.xlane.f32.xlu0 %v12055_v15  ;;  %v12069_v50 = vmul.f32 %v10482_v34, %v10149_v39  ;;  %17221 = vst [vmem:[#allocation104_spill] sm:$0xff] %v12071_v38  ;;  %17222 = vst [vmem:[#allocation105_spill] sm:$0xff] %v12073_v20  ;;  %v372_v45 = vld [vmem:[%s11277_s30 + $0x2d0] sm:$0xff]  ;;  %v10484_v34 = vld [vmem:[%s11277_s30 + $0x1c0] sm:$0xff] }
 0x16c   : > { %17219 = vst [vmem:[#allocation102_spill] sm:$0xff] %v12064_v26  ;;  %10160 = vrsqrt.f32 %v586_v41  ;;  %v733_v40 = vpop.xlane.xlu1 %732  ;;  %8163 = vmatmul.mubr.f32.gmra.mrb[12].mxu1 %v12064_v26  ;;  %v541_v31 = vpop.xlane.xlu0 %540  ;;  %9405 = vmatprep.subr.bf16.mxu0 %v11661_v63 }
 0x16d   : > { %17220 = vst [vmem:[#allocation103_spill] sm:$0xff] %v12069_v50  ;;  %v10151_v32 = vpop.eup %10150  ;;  %v779_v15 = vadd.f32 1e-16, %v733_v40  ;;  %8083 = vmatmul.mubr.f32.gmra.mrb[12].mxu0 %v12069_v50  ;;  %v587_v39 = vadd.f32 1e-16, %v541_v31  ;;  %v12089_v40 = vmul.f32 %v373_v12, %v373_v12  ;;  %v12091_v31 = vmul.f32 %v372_v45, %v372_v45  ;;  %v10485_v45 = vld [vmem:[%s11277_s30 + $0x1e8] sm:$0xff] }
 0x16e   : > { %v10153_v2 = vpop.eup %10152  ;;  %v12082_v41 = vmul.f32 %v10483_v27, %v10151_v32  ;;  %v377_v27 = vld [vmem:[%s11277_s30 + $0x2f8] sm:$0xff]  ;;  %9435 = vmatpush3.bf16.xpose.msra.mxu1 %v11649_v57 }
 0x16f   : > { %10162 = vrsqrt.f32 %v779_v15  ;;  %1124 = vadd.xlane.f32.xlu1 %v12071_v38  ;;  %932 = vadd.xlane.f32.xlu0 %v12073_v20  ;;  %v12087_v26 = vmul.f32 %v10484_v34, %v10153_v2  ;;  %17225 = vst [vmem:[#allocation108_spill] sm:$0xff] %v12089_v40  ;;  %17226 = vst [vmem:[#allocation109_spill] sm:$0xff] %v12091_v31  ;;  %v376_v15 = vld [vmem:[%s11277_s30 + $0x2f0] sm:$0xff]  ;;  %v10486_v34 = vld [vmem:[%s11277_s30 + $0x1e0] sm:$0xff] }
 0x170   : > { %17223 = vst [vmem:[#allocation106_spill] sm:$0xff] %v12082_v41  ;;  %10164 = vrsqrt.f32 %v587_v39  ;;  %v735_v50 = vpop.xlane.xlu1 %734  ;;  %8165 = vmatprep.mubr.f32.mxu1 %v12082_v41  ;;  %v543_v32 = vpop.xlane.xlu0 %542  ;;  %9437 = vmatprep.subr.bf16.mxu1 %v11661_v63 }
 0x171   : > { %17224 = vst [vmem:[#allocation107_spill] sm:$0xff] %v12087_v26  ;;  %v10155_v38 = vpop.eup %10154  ;;  %v780_v20 = vadd.f32 1e-16, %v735_v50  ;;  %8085 = vmatprep.mubr.f32.mxu0 %v12087_v26  ;;  %v588_v2 = vadd.f32 1e-16, %v543_v32  ;;  %v12107_v50 = vmul.f32 %v377_v27, %v377_v27  ;;  %v12109_v26 = vmul.f32 %v376_v15, %v376_v15  ;;  %v381_v32 = vld [vmem:[%s11277_s30 + $0x318] sm:$0xff] }
 0x172   : > { %v10157_v12 = vpop.eup %10156  ;;  %v12100_v39 = vmul.f32 %v10485_v45, %v10155_v38  ;;  %9407 = vmatpush3.bf16.xpose.msra.mxu0 %v11661_v63  ;;  %v10487_v15 = vld [vmem:[%s11277_s30 + $0x208] sm:$0xff] }
 0x173   : > { %10166 = vrsqrt.f32 %v780_v20  ;;  %1126 = vadd.xlane.f32.xlu1 %v12089_v40  ;;  %934 = vadd.xlane.f32.xlu0 %v12091_v31  ;;  %v12105_v57 = vmul.f32 %v10486_v34, %v10157_v12  ;;  %17229 = vst [vmem:[#allocation112_spill] sm:$0xff] %v12107_v50  ;;  %17230 = vst [vmem:[#allocation113_spill] sm:$0xff] %v12109_v26  ;;  %v380_v20 = vld [vmem:[%s11277_s30 + $0x310] sm:$0xff]  ;;  %v411_v31 = vld [vmem:[%s11287_s28 + $0x8] sm:$0xff] }
 0x174   : > { %17227 = vst [vmem:[#allocation110_spill] sm:$0xff] %v12100_v39  ;;  %10168 = vrsqrt.f32 %v588_v2  ;;  %v737_v41 = vpop.xlane.xlu1 %736  ;;  %8166 = vmatmul.mubr.f32.gmra.mrb[14].mxu1 %v12100_v39  ;;  %v545_v38 = vpop.xlane.xlu0 %544  ;;  %v12119_v2 = vmul.f32 %v381_v32, %v381_v32  ;;  %v415_v39 = vld [vmem:[%s11287_s28 + $0x28] sm:$0xff] }
 0x175   : > { %17228 = vst [vmem:[#allocation111_spill] sm:$0xff] %v12105_v57  ;;  %v10159_v45 = vpop.eup %10158  ;;  %v781_v40 = vadd.f32 1e-16, %v737_v41  ;;  %8086 = vmatmul.mubr.f32.gmra.mrb[14].mxu0 %v12105_v57  ;;  %v589_v27 = vadd.f32 1e-16, %v545_v38  ;;  %v12128_v38 = vmul.f32 %v380_v20, %v380_v20  ;;  %v12130_v57 = vpack.c.bf16 %v415_v39, %v411_v31  ;;  %v10489_v39 = vld [vmem:[%s11277_s30 + $0x228] sm:$0xff] }
 0x176   : > { %v10161_v12 = vpop.eup %10160  ;;  %v12117_v34 = vmul.f32 %v10487_v15, %v10159_v45  ;;  %17232 = vst [vmem:[#allocation115_spill] sm:$0xff] %v12119_v2  ;;  %v385_v15 = vld [vmem:[%s11277_s30 + $0x338] sm:$0xff]  ;;  %9439 = vmatpush3.bf16.xpose.msra.mxu1 %v11661_v63 }
 0x177   : > { %10170 = vrsqrt.f32 %v781_v40  ;;  %1128 = vadd.xlane.f32.xlu1 %v12107_v50  ;;  %936 = vadd.xlane.f32.xlu0 %v12109_v26  ;;  %v12126_v41 = vmul.f32 %v10488_v19, %v10161_v12  ;;  %17234 = vst [vmem:[#allocation117_spill] sm:$0xff] %v12128_v38  ;;  %17235 = vst [vmem:[#allocation118_spill] sm:$0xff] %v12130_v57  ;;  %v384_v40 = vld [vmem:[%s11277_s30 + $0x330] sm:$0xff] }
 0x178   : > { %17231 = vst [vmem:[#allocation114_spill] sm:$0xff] %v12117_v34  ;;  %10172 = vrsqrt.f32 %v589_v27  ;;  %v739_v45 = vpop.xlane.xlu1 %738  ;;  %8168 = vmatprep.mubr.f32.mxu1 %v12117_v34  ;;  %v547_v32 = vpop.xlane.xlu0 %546  ;;  %9441 = vmatprep.subr.bf16.mxu0 %v12130_v57  ;;  %v10490_v27 = vld [vmem:[%s11277_s30 + $0x220] sm:$0xff] }
 0x179   : > { %17233 = vst [vmem:[#allocation116_spill] sm:$0xff] %v12126_v41  ;;  %v10163_v50 = vpop.eup %10162  ;;  %v782_v26 = vadd.f32 1e-16, %v739_v45  ;;  %8088 = vmatprep.mubr.f32.mxu0 %v12126_v41  ;;  %v590_v19 = vadd.f32 1e-16, %v547_v32  ;;  %9473 = vmatprep.subr.bf16.mxu1 %v12130_v57  ;;  %v12147_v45 = vmul.f32 %v385_v15, %v385_v15  ;;  %v12149_v32 = vmul.f32 %v384_v40, %v384_v40  ;;  %v10491_v15 = vld [vmem:[%s11277_s30 + $0x248] sm:$0xff] }
 0x17a   : > { %v10165_v31 = vpop.eup %10164  ;;  %v12139_v20 = vmul.f32 %v10489_v39, %v10163_v50  ;;  %v389_v39 = vld [vmem:[%s11277_s30 + $0x358] sm:$0xff]  ;;  %v10492_v40 = vld [vmem:[%s11277_s30 + $0x240] sm:$0xff] }
 0x17b   : > { %10174 = vrsqrt.f32 %v782_v26  ;;  %1130 = vadd.xlane.f32.xlu1 %v12119_v2  ;;  %938 = vadd.xlane.f32.xlu0 %v12128_v38  ;;  %v12145_v12 = vmul.f32 %v10490_v27, %v10165_v31  ;;  %17238 = vst [vmem:[#allocation121_spill] sm:$0xff] %v12147_v45  ;;  %17239 = vst [vmem:[#allocation122_spill] sm:$0xff] %v12149_v32  ;;  %v388_v26 = vld [vmem:[%s11277_s30 + $0x350] sm:$0xff] }
 0x17c   : > { %17236 = vst [vmem:[#allocation119_spill] sm:$0xff] %v12139_v20  ;;  %10176 = vrsqrt.f32 %v590_v19  ;;  %v741_v63 = vpop.xlane.xlu1 %740  ;;  %8169 = vmatmul.mubr.f32.gmra.mrb[16].mxu1 %v12139_v20  ;;  %v549_v50 = vpop.xlane.xlu0 %548  ;;  %v12163_v20 = vmul.f32 %v389_v39, %v389_v39  ;;  %v10493_v39 = vld [vmem:[%s11277_s30 + $0x268] sm:$0xff] }
 0x17d   : > { %17237 = vst [vmem:[#allocation120_spill] sm:$0xff] %v12145_v12  ;;  %v10167_v41 = vpop.eup %10166  ;;  %v783_v2 = vadd.f32 1e-16, %v741_v63  ;;  %8089 = vmatmul.mubr.f32.gmra.mrb[16].mxu0 %v12145_v12  ;;  %v591_v38 = vadd.f32 1e-16, %v549_v50  ;;  %v12165_v63 = vmul.f32 %v388_v26, %v388_v26 }
 0x17e   : > { %v10169_v31 = vpop.eup %10168  ;;  %v12156_v27 = vmul.f32 %v10491_v15, %v10167_v41  ;;  %17242 = vst [vmem:[#allocation125_spill] sm:$0xff] %v12163_v20  ;;  %v393_v15 = vld [vmem:[%s11277_s30 + $0x378] sm:$0xff] }
 0x17f   : > { %10178 = vrsqrt.f32 %v783_v2  ;;  %1132 = vadd.xlane.f32.xlu1 %v12147_v45  ;;  %940 = vadd.xlane.f32.xlu0 %v12149_v32  ;;  %v12161_v19 = vmul.f32 %v10492_v40, %v10169_v31  ;;  %17243 = vst [vmem:[#allocation126_spill] sm:$0xff] %v12165_v63  ;;  %v392_v2 = vld [vmem:[%s11277_s30 + $0x370] sm:$0xff] }
 0x180   : > { %17240 = vst [vmem:[#allocation123_spill] sm:$0xff] %v12156_v27  ;;  %10180 = vrsqrt.f32 %v591_v38  ;;  %v743_v50 = vpop.xlane.xlu1 %742  ;;  %8171 = vmatprep.mubr.f32.mxu1 %v12156_v27  ;;  %v551_v41 = vpop.xlane.xlu0 %550  ;;  %v10494_v38 = vld [vmem:[%s11277_s30 + $0x260] sm:$0xff]  ;;  %v12179_v27 = vmul.f32 %v393_v15, %v393_v15  ;;  %v10495_v15 = vld [vmem:[%s11277_s30 + $0x288] sm:$0xff] }
 0x181   : > { %17241 = vst [vmem:[#allocation124_spill] sm:$0xff] %v12161_v19  ;;  %v10171_v12 = vpop.eup %10170  ;;  %v784_v45 = vadd.f32 1e-16, %v743_v50  ;;  %8091 = vmatprep.mubr.f32.mxu0 %v12161_v19  ;;  %v592_v32 = vadd.f32 1e-16, %v551_v41  ;;  %v12181_v50 = vmul.f32 %v392_v2, %v392_v2 }
 0x182   : > { %v10173_v31 = vpop.eup %10172  ;;  %v12172_v40 = vmul.f32 %v10493_v39, %v10171_v12  ;;  %17246 = vst [vmem:[#allocation129_spill] sm:$0xff] %v12179_v27  ;;  %v397_v39 = vld [vmem:[%s11277_s30 + $0x398] sm:$0xff] }
 0x183   : > { %10182 = vrsqrt.f32 %v784_v45  ;;  %1134 = vadd.xlane.f32.xlu1 %v12163_v20  ;;  %942 = vadd.xlane.f32.xlu0 %v12165_v63  ;;  %v12177_v26 = vmul.f32 %v10494_v38, %v10173_v31  ;;  %17247 = vst [vmem:[#allocation130_spill] sm:$0xff] %v12181_v50  ;;  %v396_v45 = vld [vmem:[%s11277_s30 + $0x390] sm:$0xff] }
 0x184   : > { %17244 = vst [vmem:[#allocation127_spill] sm:$0xff] %v12172_v40  ;;  %10184 = vrsqrt.f32 %v592_v32  ;;  %v745_v41 = vpop.xlane.xlu1 %744  ;;  %8172 = vmatmul.mubr.f32.gmra.mrb[18].mxu1 %v12172_v40  ;;  %v553_v12 = vpop.xlane.xlu0 %552  ;;  %v10496_v32 = vld [vmem:[%s11277_s30 + $0x280] sm:$0xff]  ;;  %v12195_v40 = vmul.f32 %v397_v39, %v397_v39  ;;  %v10497_v39 = vld [vmem:[%s11277_s30 + $0x2a8] sm:$0xff] }
 0x185   : > { %17245 = vst [vmem:[#allocation128_spill] sm:$0xff] %v12177_v26  ;;  %v10175_v19 = vpop.eup %10174  ;;  %v785_v20 = vadd.f32 1e-16, %v745_v41  ;;  %8092 = vmatmul.mubr.f32.gmra.mrb[18].mxu0 %v12177_v26  ;;  %v593_v63 = vadd.f32 1e-16, %v553_v12  ;;  %v12197_v41 = vmul.f32 %v396_v45, %v396_v45 }
 0x186   : > { %v10177_v31 = vpop.eup %10176  ;;  %v12188_v38 = vmul.f32 %v10495_v15, %v10175_v19  ;;  %17250 = vst [vmem:[#allocation133_spill] sm:$0xff] %v12195_v40  ;;  %v401_v15 = vld [vmem:[%s11277_s30 + $0x3b8] sm:$0xff] }
 0x187   : > { %10186 = vrsqrt.f32 %v785_v20  ;;  %1136 = vadd.xlane.f32.xlu1 %v12179_v27  ;;  %944 = vadd.xlane.f32.xlu0 %v12181_v50  ;;  %v12193_v2 = vmul.f32 %v10496_v32, %v10177_v31  ;;  %17251 = vst [vmem:[#allocation134_spill] sm:$0xff] %v12197_v41  ;;  %v400_v20 = vld [vmem:[%s11277_s30 + $0x3b0] sm:$0xff] }
 0x188   : > { %17248 = vst [vmem:[#allocation131_spill] sm:$0xff] %v12188_v38  ;;  %10188 = vrsqrt.f32 %v593_v63  ;;  %v747_v12 = vpop.xlane.xlu1 %746  ;;  %8174 = vmatprep.mubr.f32.mxu1 %v12188_v38  ;;  %v555_v19 = vpop.xlane.xlu0 %554  ;;  %v10498_v63 = vld [vmem:[%s11277_s30 + $0x2a0] sm:$0xff]  ;;  %v12211_v38 = vmul.f32 %v401_v15, %v401_v15  ;;  %v10499_v15 = vld [vmem:[%s11277_s30 + $0x2c8] sm:$0xff] }
 0x189   : > { %17249 = vst [vmem:[#allocation132_spill] sm:$0xff] %v12193_v2  ;;  %v10179_v26 = vpop.eup %10178  ;;  %v786_v27 = vadd.f32 1e-16, %v747_v12  ;;  %8094 = vmatprep.mubr.f32.mxu0 %v12193_v2  ;;  %v594_v50 = vadd.f32 1e-16, %v555_v19  ;;  %v12213_v12 = vmul.f32 %v400_v20, %v400_v20 }
 0x18a   : > { %v10181_v31 = vpop.eup %10180  ;;  %v12204_v32 = vmul.f32 %v10497_v39, %v10179_v26  ;;  %17254 = vst [vmem:[#allocation137_spill] sm:$0xff] %v12211_v38  ;;  %v405_v39 = vld [vmem:[%s11277_s30 + $0x3d8] sm:$0xff] }
 0x18b   : > { %10190 = vrsqrt.f32 %v786_v27  ;;  %1138 = vadd.xlane.f32.xlu1 %v12195_v40  ;;  %946 = vadd.xlane.f32.xlu0 %v12197_v41  ;;  %v12209_v45 = vmul.f32 %v10498_v63, %v10181_v31  ;;  %17255 = vst [vmem:[#allocation138_spill] sm:$0xff] %v12213_v12  ;;  %v404_v27 = vld [vmem:[%s11277_s30 + $0x3d0] sm:$0xff] }
 0x18c   : > { %17252 = vst [vmem:[#allocation135_spill] sm:$0xff] %v12204_v32  ;;  %10192 = vrsqrt.f32 %v594_v50  ;;  %v749_v19 = vpop.xlane.xlu1 %748  ;;  %8175 = vmatmul.mubr.f32.gmra.mrb[20].mxu1 %v12204_v32  ;;  %v557_v26 = vpop.xlane.xlu0 %556  ;;  %v10500_v50 = vld [vmem:[%s11277_s30 + $0x2c0] sm:$0xff]  ;;  %v12227_v32 = vmul.f32 %v405_v39, %v405_v39 }
 0x18d   : > { %17253 = vst [vmem:[#allocation136_spill] sm:$0xff] %v12209_v45  ;;  %v10183_v2 = vpop.eup %10182  ;;  %v787_v40 = vadd.f32 1e-16, %v749_v19  ;;  %8095 = vmatmul.mubr.f32.gmra.mrb[20].mxu0 %v12209_v45  ;;  %v595_v41 = vadd.f32 1e-16, %v557_v26  ;;  %v12229_v19 = vmul.f32 %v404_v27, %v404_v27 }
 0x18e   : > { %v10185_v31 = vpop.eup %10184  ;;  %v12220_v63 = vmul.f32 %v10499_v15, %v10183_v2  ;;  %17258 = vst [vmem:[#allocation141_spill] sm:$0xff] %v12227_v32  ;;  %v409_v15 = vld [vmem:[%s11277_s30 + $0x3f8] sm:$0xff] }
 0x18f   : > { %10194 = vrsqrt.f32 %v787_v40  ;;  %1140 = vadd.xlane.f32.xlu1 %v12211_v38  ;;  %948 = vadd.xlane.f32.xlu0 %v12213_v12  ;;  %v12225_v20 = vmul.f32 %v10500_v50, %v10185_v31  ;;  %17259 = vst [vmem:[#allocation142_spill] sm:$0xff] %v12229_v19  ;;  %v408_v40 = vld [vmem:[%s11277_s30 + $0x3f0] sm:$0xff]  ;;  %v10501_v31 = vld [vmem:[%s11277_s30 + $0x2e8] sm:$0xff]  ;;  %v12243_v27 = vmul.f32 %v409_v15, %v409_v15 }
 0x190   : > { %17256 = vst [vmem:[#allocation139_spill] sm:$0xff] %v12220_v63  ;;  %10196 = vrsqrt.f32 %v595_v41  ;;  %v751_v26 = vpop.xlane.xlu1 %750  ;;  %8177 = vmatprep.mubr.f32.mxu1 %v12220_v63  ;;  %v559_v2 = vpop.xlane.xlu0 %558  ;;  %v10502_v41 = vld [vmem:[%s11277_s30 + $0x2e0] sm:$0xff]  ;;  %v12245_v63 = vmul.f32 %v408_v40, %v408_v40 }
 0x191   : > { %17257 = vst [vmem:[#allocation140_spill] sm:$0xff] %v12225_v20  ;;  %v10187_v45 = vpop.eup %10186  ;;  %v788_v38 = vadd.f32 1e-16, %v751_v26  ;;  %8097 = vmatprep.mubr.f32.mxu0 %v12225_v20  ;;  %v596_v12 = vadd.f32 1e-16, %v559_v2  ;;  %17262 = vst [vmem:[#allocation145_spill] sm:$0xff] %v12243_v27 }
 0x192   : > { %v10189_v34 = vpop.eup %10188  ;;  %v12236_v50 = vmul.f32 %v10501_v31, %v10187_v45  ;;  %17263 = vst [vmem:[#allocation146_spill] sm:$0xff] %v12245_v63 }
 0x193   : > { %10198 = vrsqrt.f32 %v788_v38  ;;  %1142 = vadd.xlane.f32.xlu1 %v12227_v32  ;;  %950 = vadd.xlane.f32.xlu0 %v12229_v19  ;;  %v12241_v39 = vmul.f32 %v10502_v41, %v10189_v34  ;;  %v10503_v19 = vld [vmem:[%s11277_s30 + $0x308] sm:$0xff]  ;;  %v5726_v34 = vadd.f32 %v11769_v51, %v11771_v56 }
 0x194   : > { %17260 = vst [vmem:[#allocation143_spill] sm:$0xff] %v12236_v50  ;;  %10200 = vrsqrt.f32 %v596_v12  ;;  %v753_v26 = vpop.xlane.xlu1 %752  ;;  %8178 = vmatmul.mubr.f32.gmra.mrb[22].mxu1 %v12236_v50  ;;  %v561_v45 = vpop.xlane.xlu0 %560  ;;  %v10504_v12 = vld [vmem:[%s11277_s30 + $0x300] sm:$0xff]  ;;  %v10505_v56 = vld [vmem:[%s11277_s30 + $0x328] sm:$0xff] }
 0x195   : > { %17261 = vst [vmem:[#allocation144_spill] sm:$0xff] %v12241_v39  ;;  %v10191_v2 = vpop.eup %10190  ;;  %v789_v38 = vadd.f32 1e-16, %v753_v26  ;;  %8098 = vmatmul.mubr.f32.gmra.mrb[22].mxu0 %v12241_v39  ;;  %v597_v31 = vadd.f32 1e-16, %v561_v45 }
 0x196   : > { %v10193_v32 = vpop.eup %10192  ;;  %v12250_v20 = vmul.f32 %v10503_v19, %v10191_v2 }
 0x197   : > { %10202 = vrsqrt.f32 %v789_v38  ;;  %1144 = vadd.xlane.f32.xlu1 %v12243_v27  ;;  %952 = vadd.xlane.f32.xlu0 %v12245_v63  ;;  %v12257_v15 = vmul.f32 %v10504_v12, %v10193_v32  ;;  %v5729_v38 = vadd.f32 %v11777_v11, %v11779_v54  ;;  %v10506_v32 = vld [vmem:[%s11277_s30 + $0x320] sm:$0xff]  ;;  %v17268_v12 = vld [vmem:[#allocation23_spill] sm:$0xff]  ;;  %v10507_v11 = vld [vmem:[%s11277_s30 + $0x348] sm:$0xff] }
 0x198   : > { %17264 = vst [vmem:[#allocation147_spill] sm:$0xff] %v12250_v20  ;;  %10204 = vrsqrt.f32 %v597_v31  ;;  %v755_v40 = vpop.xlane.xlu1 %754  ;;  %8180 = vmatprep.mubr.f32.mxu1 %v12250_v20  ;;  %v563_v41 = vpop.xlane.xlu0 %562 }
 0x199   : > { %17265 = vst [vmem:[#allocation148_spill] sm:$0xff] %v12257_v15  ;;  %v10195_v19 = vpop.eup %10194  ;;  %v790_v26 = vadd.f32 1e-16, %v755_v40  ;;  %8100 = vmatprep.mubr.f32.mxu0 %v12257_v15  ;;  %v598_v45 = vadd.f32 1e-16, %v563_v41 }
 0x19a   : > { %v10197_v51 = vpop.eup %10196  ;;  %v12262_v2 = vmul.f32 %v10505_v56, %v10195_v19 }
 0x19b   : > { %10206 = vrsqrt.f32 %v790_v26  ;;  %v12267_v31 = vmul.f32 %v10506_v32, %v10197_v51  ;;  %5727 = vadd.xlane.f32.xlu1 %v5726_v34  ;;  %5503 = vadd.xlane.f32.xlu0 %v17268_v12  ;;  %v5732_v34 = vadd.f32 %v11785_v36, %v11787_v37  ;;  %v10508_v26 = vld [vmem:[%s11277_s30 + $0x340] sm:$0xff]  ;;  %v17271_v51 = vld [vmem:[#allocation22_spill] sm:$0xff]  ;;  %v10509_v36 = vld [vmem:[%s11277_s30 + $0x368] sm:$0xff] }
 0x19c   : > { %17266 = vst [vmem:[#allocation149_spill] sm:$0xff] %v12262_v2  ;;  %10208 = vrsqrt.f32 %v598_v45  ;;  %v757_v40 = vpop.xlane.xlu1 %756  ;;  %8181 = vmatmul.mubr.f32.gmra.mrb[24].mxu1 %v12262_v2  ;;  %v565_v41 = vpop.xlane.xlu0 %564 }
 0x19d   : > { %17267 = vst [vmem:[#allocation150_spill] sm:$0xff] %v12267_v31  ;;  %v10199_v27 = vpop.eup %10198  ;;  %v791_v19 = vadd.f32 1e-16, %v757_v40  ;;  %8101 = vmatmul.mubr.f32.gmra.mrb[24].mxu0 %v12267_v31  ;;  %v599_v56 = vadd.f32 1e-16, %v565_v41 }
 0x19e   : > { %v10201_v63 = vpop.eup %10200  ;;  %v12273_v54 = vmul.f32 %v10507_v11, %v10199_v27 }
 0x19f   : > { %10210 = vrsqrt.f32 %v791_v19  ;;  %v12278_v45 = vmul.f32 %v10508_v26, %v10201_v63  ;;  %5730 = vadd.xlane.f32.xlu1 %v5729_v38  ;;  %5506 = vadd.xlane.f32.xlu0 %v17271_v51  ;;  %v5735_v63 = vadd.f32 %v11793_v22, %v11795_v28  ;;  %v10510_v38 = vld [vmem:[%s11277_s30 + $0x360] sm:$0xff]  ;;  %v10511_v22 = vld [vmem:[%s11277_s30 + $0x388] sm:$0xff] }
 0x1a0   : > { %17269 = vst [vmem:[#allocation23_spill] sm:$0xff] %v12273_v54  ;;  %10212 = vrsqrt.f32 %v599_v56  ;;  %v759_v32 = vpop.xlane.xlu1 %758  ;;  %8183 = vmatprep.mubr.f32.mxu1 %v12273_v54  ;;  %v567_v12 = vpop.xlane.xlu0 %566  ;;  %v17274_v56 = vld [vmem:[#allocation24_spill] sm:$0xff] }
 0x1a1   : > { %17270 = vst [vmem:[#allocation151_spill] sm:$0xff] %v12278_v45  ;;  %v10203_v40 = vpop.eup %10202  ;;  %v792_v27 = vadd.f32 1e-16, %v759_v32  ;;  %8103 = vmatprep.mubr.f32.mxu0 %v12278_v45  ;;  %v600_v41 = vadd.f32 1e-16, %v567_v12 }
 0x1a2   : > { %v10205_v11 = vpop.eup %10204  ;;  %v12284_v37 = vmul.f32 %v10509_v36, %v10203_v40 }
 0x1a3   : > { %10214 = vrsqrt.f32 %v792_v27  ;;  %v12289_v19 = vmul.f32 %v10510_v38, %v10205_v11  ;;  %5733 = vadd.xlane.f32.xlu1 %v5732_v34  ;;  %5509 = vadd.xlane.f32.xlu0 %v17274_v56  ;;  %v5738_v34 = vadd.f32 %v11801_v49, %v11803_v59  ;;  %v10512_v27 = vld [vmem:[%s11277_s30 + $0x380] sm:$0xff]  ;;  %v17277_v11 = vld [vmem:[#allocation25_spill] sm:$0xff] }
 0x1a4   : > { %17272 = vst [vmem:[#allocation22_spill] sm:$0xff] %v12284_v37  ;;  %10216 = vrsqrt.f32 %v600_v41  ;;  %v761_v26 = vpop.xlane.xlu1 %760  ;;  %8184 = vmatmul.mubr.f32.gmra.mrb[26].mxu1 %v12284_v37  ;;  %v569_v51 = vpop.xlane.xlu0 %568  ;;  %v10513_v49 = vld [vmem:[%s11277_s30 + $0x3a8] sm:$0xff] }
 0x1a5   : > { %17273 = vst [vmem:[#allocation152_spill] sm:$0xff] %v12289_v19  ;;  %v10207_v32 = vpop.eup %10206  ;;  %v793_v12 = vadd.f32 1e-16, %v761_v26  ;;  %8104 = vmatmul.mubr.f32.gmra.mrb[26].mxu0 %v12289_v19  ;;  %v601_v40 = vadd.f32 1e-16, %v569_v51 }
 0x1a6   : > { %v10209_v36 = vpop.eup %10208  ;;  %v12295_v28 = vmul.f32 %v10511_v22, %v10207_v32 }
 0x1a7   : > { %10218 = vrsqrt.f32 %v793_v12  ;;  %v12300_v41 = vmul.f32 %v10512_v27, %v10209_v36  ;;  %5736 = vadd.xlane.f32.xlu1 %v5735_v63  ;;  %5512 = vadd.xlane.f32.xlu0 %v17277_v11  ;;  %v5741_v63 = vadd.f32 %v11809_v24, %v11811_v44  ;;  %v10514_v12 = vld [vmem:[%s11277_s30 + $0x3a0] sm:$0xff]  ;;  %v17280_v36 = vld [vmem:[#allocation26_spill] sm:$0xff]  ;;  %v10515_v44 = vld [vmem:[%s11277_s30 + $0x3c8] sm:$0xff] }
 0x1a8   : > { %17275 = vst [vmem:[#allocation24_spill] sm:$0xff] %v12295_v28  ;;  %10220 = vrsqrt.f32 %v601_v40  ;;  %v1083_v38 = vpop.xlane.xlu1 %1082  ;;  %8186 = vmatprep.mubr.f32.mxu1 %v12295_v28  ;;  %v891_v56 = vpop.xlane.xlu0 %890 }
 0x1a9   : > { %17276 = vst [vmem:[#allocation153_spill] sm:$0xff] %v12300_v41  ;;  %v10211_v26 = vpop.eup %10210  ;;  %v1146_v51 = vadd.f32 1e-16, %v1083_v38  ;;  %8106 = vmatprep.mubr.f32.mxu0 %v12300_v41  ;;  %v954_v32 = vadd.f32 1e-16, %v891_v56 }
 0x1aa   : > { %v10213_v22 = vpop.eup %10212  ;;  %v12306_v59 = vmul.f32 %v10513_v49, %v10211_v26 }
 0x1ab   : > { %10222 = vrsqrt.f32 %v1146_v51  ;;  %v12311_v40 = vmul.f32 %v10514_v12, %v10213_v22  ;;  %5739 = vadd.xlane.f32.xlu1 %v5738_v34  ;;  %5515 = vadd.xlane.f32.xlu0 %v17280_v36  ;;  %v5744_v34 = vadd.f32 %v11817_v3, %v11819_v48  ;;  %v10516_v51 = vld [vmem:[%s11277_s30 + $0x3c0] sm:$0xff]  ;;  %v17283_v22 = vld [vmem:[#allocation27_spill] sm:$0xff]  ;;  %v10517_v3 = vld [vmem:[%s11277_s30 + $0x3e8] sm:$0xff] }
 0x1ac   : > { %17278 = vst [vmem:[#allocation25_spill] sm:$0xff] %v12306_v59  ;;  %10224 = vrsqrt.f32 %v954_v32  ;;  %v1085_v27 = vpop.xlane.xlu1 %1084  ;;  %8187 = vmatmul.mubr.f32.gmra.mrb[28].mxu1 %v12306_v59  ;;  %v893_v11 = vpop.xlane.xlu0 %892 }
 0x1ad   : > { %17279 = vst [vmem:[#allocation154_spill] sm:$0xff] %v12311_v40  ;;  %v10215_v38 = vpop.eup %10214  ;;  %v1147_v56 = vadd.f32 1e-16, %v1085_v27  ;;  %8107 = vmatmul.mubr.f32.gmra.mrb[28].mxu0 %v12311_v40  ;;  %v955_v26 = vadd.f32 1e-16, %v893_v11 }
 0x1ae   : > { %v10217_v49 = vpop.eup %10216  ;;  %v12317_v24 = vmul.f32 %v10515_v44, %v10215_v38 }
 0x1af   : > { %10226 = vrsqrt.f32 %v1147_v56  ;;  %v12322_v32 = vmul.f32 %v10516_v51, %v10217_v49  ;;  %5742 = vadd.xlane.f32.xlu1 %v5741_v63  ;;  %5518 = vadd.xlane.f32.xlu0 %v17283_v22  ;;  %v5747_v63 = vadd.f32 %v11825_v21, %v11827_v29  ;;  %v10518_v56 = vld [vmem:[%s11277_s30 + $0x3e0] sm:$0xff]  ;;  %v17286_v49 = vld [vmem:[#allocation30_spill] sm:$0xff] }
 0x1b0   : > { %17281 = vst [vmem:[#allocation26_spill] sm:$0xff] %v12317_v24  ;;  %10228 = vrsqrt.f32 %v955_v26  ;;  %v1087_v12 = vpop.xlane.xlu1 %1086  ;;  %8189 = vmatprep.mubr.f32.mxu1 %v12317_v24  ;;  %v895_v36 = vpop.xlane.xlu0 %894 }
 0x1b1   : > { %17282 = vst [vmem:[#allocation155_spill] sm:$0xff] %v12322_v32  ;;  %v10219_v27 = vpop.eup %10218  ;;  %v1148_v11 = vadd.f32 1e-16, %v1087_v12  ;;  %8109 = vmatprep.mubr.f32.mxu0 %v12322_v32  ;;  %v956_v38 = vadd.f32 1e-16, %v895_v36 }
 0x1b2   : > { %v10221_v44 = vpop.eup %10220  ;;  %v12328_v48 = vmul.f32 %v10517_v3, %v10219_v27  ;;  %v10519_v27 = vld [vmem:[%s11277_s30 + $0x18] sm:$0xff]  ;;  %v419_v3 = vld [vmem:[%s11287_s28 + $0x48] sm:$0xff] }
 0x1b3   : > { %10230 = vrsqrt.f32 %v1148_v11  ;;  %v12333_v26 = vmul.f32 %v10518_v56, %v10221_v44  ;;  %5745 = vadd.xlane.f32.xlu1 %v5744_v34  ;;  %5521 = vadd.xlane.f32.xlu0 %v17286_v49  ;;  %v5750_v34 = vadd.f32 %v11839_v4, %v11841_v23  ;;  %v423_v56 = vld [vmem:[%s11287_s28 + $0x68] sm:$0xff]  ;;  %v17289_v49 = vld [vmem:[#allocation31_spill] sm:$0xff] }
 0x1b4   : > { %17284 = vst [vmem:[#allocation27_spill] sm:$0xff] %v12328_v48  ;;  %10232 = vrsqrt.f32 %v956_v38  ;;  %v1089_v51 = vpop.xlane.xlu1 %1088  ;;  %8190 = vmatmul.mubr.f32.gmra.mrb[30].mxu1 %v12328_v48  ;;  %v897_v22 = vpop.xlane.xlu0 %896  ;;  %v10520_v38 = vld [vmem:[%s11277_s30 + $0x10] sm:$0xff] }
 0x1b5   : > { %17285 = vst [vmem:[#allocation156_spill] sm:$0xff] %v12333_v26  ;;  %v10223_v12 = vpop.eup %10222  ;;  %v1149_v36 = vadd.f32 1e-16, %v1089_v51  ;;  %8110 = vmatmul.mubr.f32.gmra.mrb[30].mxu0 %v12333_v26  ;;  %v957_v21 = vadd.f32 1e-16, %v897_v22  ;;  %v17293_v26 = vld [vmem:[#allocation32_spill] sm:$0xff] }
 0x1b6   : > { %v10225_v29 = vpop.eup %10224  ;;  %v12339_v11 = vmul.f32 %v10519_v27, %v10223_v12 }
 0x1b7   : > { %10234 = vrsqrt.f32 %v1149_v36  ;;  %v12344_v44 = vmul.f32 %v10520_v38, %v10225_v29  ;;  %5748 = vadd.xlane.f32.xlu1 %v5747_v63  ;;  %5524 = vadd.xlane.f32.xlu0 %v17289_v49  ;;  %v10521_v36 = vld [vmem:[%s11277_s30 + $0x38] sm:$0xff]  ;;  %v12354_v38 = vpack.c.bf16 %v423_v56, %v419_v3  ;;  %v5753_v63 = vadd.f32 %v11855_v52, %v11857_v47 }
 0x1b8   : > { %17287 = vst [vmem:[#allocation30_spill] sm:$0xff] %v12339_v11  ;;  %10236 = vrsqrt.f32 %v957_v21  ;;  %v1091_v51 = vpop.xlane.xlu1 %1090  ;;  %8304 = vmatprep.mubr.f32.mxu1 %v12339_v11  ;;  %v899_v22 = vpop.xlane.xlu0 %898  ;;  %v10522_v21 = vld [vmem:[%s11277_s30 + $0x30] sm:$0xff] }
 0x1b9   : > { %17288 = vst [vmem:[#allocation157_spill] sm:$0xff] %v12344_v44  ;;  %v10227_v12 = vpop.eup %10226  ;;  %v1150_v27 = vadd.f32 1e-16, %v1091_v51  ;;  %8224 = vmatprep.mubr.f32.mxu0 %v12344_v44  ;;  %v958_v4 = vadd.f32 1e-16, %v899_v22  ;;  %17291 = vst [vmem:[#allocation158_spill] sm:$0xff] %v12354_v38 }
 0x1ba   : > { %v10229_v23 = vpop.eup %10228  ;;  %v12352_v29 = vmul.f32 %v10521_v36, %v10227_v12  ;;  %v10523_v12 = vld [vmem:[%s11277_s30 + $0x58] sm:$0xff]  ;;  %v431_v36 = vld [vmem:[%s11287_s28 + $0xa8] sm:$0xff] }
 0x1bb   : > { %10238 = vrsqrt.f32 %v1150_v27  ;;  %v12359_v49 = vmul.f32 %v10522_v21, %v10229_v23  ;;  %5751 = vadd.xlane.f32.xlu1 %v5750_v34  ;;  %5527 = vadd.xlane.f32.xlu0 %v17293_v26  ;;  %v5756_v26 = vadd.f32 %v11873_v60, %v11875_v61  ;;  %v10524_v27 = vld [vmem:[%s11277_s30 + $0x50] sm:$0xff]  ;;  %v427_v23 = vld [vmem:[%s11287_s28 + $0x88] sm:$0xff] }
 0x1bc   : > { %17290 = vst [vmem:[#allocation31_spill] sm:$0xff] %v12352_v29  ;;  %10240 = vrsqrt.f32 %v958_v4  ;;  %v1093_v51 = vpop.xlane.xlu1 %1092  ;;  %8305 = vmatmul.mubr.f32.vlgmr.msra.gmra.mrb[32].mxu1 %v12352_v29  ;;  %v901_v22 = vpop.xlane.xlu0 %900 }
 0x1bd   : > { %17292 = vst [vmem:[#allocation159_spill] sm:$0xff] %v12359_v49  ;;  %v10231_v3 = vpop.eup %10230  ;;  %v1151_v56 = vadd.f32 1e-16, %v1093_v51  ;;  %8225 = vmatmul.mubr.f32.vlgmr.msra.gmra.mrb[32].mxu0 %v12359_v49  ;;  %v959_v52 = vadd.f32 1e-16, %v901_v22  ;;  %9475 = vmatpush3.bf16.xpose.msra.mxu1 %v12130_v57  ;;  %v17296_v22 = vld [vmem:[#allocation33_spill] sm:$0xff] }
 0x1be   : > { %v10233_v47 = vpop.eup %10232  ;;  %v12366_v34 = vmul.f32 %v10523_v12, %v10231_v3  ;;  %9443 = vmatpush3.bf16.xpose.msra.mxu0 %v12130_v57  ;;  %9477 = vmatprep.subr.bf16.mxu1 %v12354_v38 }
 0x1bf   : > { %10242 = vrsqrt.f32 %v1151_v56  ;;  %v12373_v4 = vmul.f32 %v10524_v27, %v10233_v47  ;;  %9445 = vmatprep.subr.bf16.mxu0 %v12354_v38  ;;  %5754 = vadd.xlane.f32.xlu1 %v5753_v63  ;;  %v10525_v47 = vld [vmem:[%s11277_s30 + $0x78] sm:$0xff]  ;;  %v12384_v27 = vpack.c.bf16 %v431_v36, %v427_v23  ;;  %v5759_v63 = vadd.f32 %v11891_v6, %v11893_v43 }
 0x1c0   : > { %17294 = vst [vmem:[#allocation32_spill] sm:$0xff] %v12366_v34  ;;  %10244 = vrsqrt.f32 %v959_v52  ;;  %v1095_v21 = vpop.xlane.xlu1 %1094  ;;  %8307 = vmatprep.mubr.f32.mxu1 %v12366_v34  ;;  %v903_v51 = vpop.xlane.xlu0 %902  ;;  %5530 = vadd.xlane.f32.xlu0 %v17296_v22  ;;  %v10526_v52 = vld [vmem:[%s11277_s30 + $0x70] sm:$0xff] }
 0x1c1   : > { %17295 = vst [vmem:[#allocation160_spill] sm:$0xff] %v12373_v4  ;;  %v10235_v3 = vpop.eup %10234  ;;  %v1152_v60 = vadd.f32 1e-16, %v1095_v21  ;;  %8227 = vmatprep.mubr.f32.mxu0 %v12373_v4  ;;  %v960_v61 = vadd.f32 1e-16, %v903_v51  ;;  %17298 = vst [vmem:[#allocation161_spill] sm:$0xff] %v12384_v27 }
 0x1c2   : > { %v10237_v56 = vpop.eup %10236  ;;  %v12382_v12 = vmul.f32 %v10525_v47, %v10235_v3  ;;  %v17300_v22 = vld [vmem:[#allocation34_spill] sm:$0xff]  ;;  %v10527_v3 = vld [vmem:[%s11277_s30 + $0x98] sm:$0xff]  ;;  %v435_v47 = vld [vmem:[%s11287_s28 + $0xc8] sm:$0xff] }
 0x1c3   : > { %10246 = vrsqrt.f32 %v1152_v60  ;;  %v12389_v49 = vmul.f32 %v10526_v52, %v10237_v56  ;;  %5757 = vadd.xlane.f32.xlu1 %v5756_v26  ;;  %v5762_v60 = vadd.f32 %v11909_v16, %v11911_v58  ;;  %v439_v52 = vld [vmem:[%s11287_s28 + $0xe8] sm:$0xff] }
 0x1c4   : > { %17297 = vst [vmem:[#allocation33_spill] sm:$0xff] %v12382_v12  ;;  %10248 = vrsqrt.f32 %v960_v61  ;;  %v1097_v21 = vpop.xlane.xlu1 %1096  ;;  %8308 = vmatmul.mubr.f32.gmra.mrb[34].mxu1 %v12382_v12  ;;  %v905_v51 = vpop.xlane.xlu0 %904  ;;  %5533 = vadd.xlane.f32.xlu0 %v17300_v22  ;;  %v10528_v61 = vld [vmem:[%s11277_s30 + $0x90] sm:$0xff]  ;;  %v17303_v22 = vld [vmem:[#allocation35_spill] sm:$0xff] }
 0x1c5   : > { %17299 = vst [vmem:[#allocation162_spill] sm:$0xff] %v12389_v49  ;;  %v10239_v23 = vpop.eup %10238  ;;  %v1153_v36 = vadd.f32 1e-16, %v1097_v21  ;;  %8228 = vmatmul.mubr.f32.gmra.mrb[34].mxu0 %v12389_v49  ;;  %v961_v6 = vadd.f32 1e-16, %v905_v51  ;;  %9479 = vmatpush3.bf16.xpose.msra.mxu1 %v12354_v38 }
 0x1c6   : > { %v10241_v43 = vpop.eup %10240  ;;  %v12396_v26 = vmul.f32 %v10527_v3, %v10239_v23  ;;  %9447 = vmatpush3.bf16.xpose.msra.mxu0 %v12354_v38  ;;  %9481 = vmatprep.subr.bf16.mxu1 %v12384_v27 }
 0x1c7   : > { %10250 = vrsqrt.f32 %v1153_v36  ;;  %v12403_v56 = vmul.f32 %v10528_v61, %v10241_v43  ;;  %9449 = vmatprep.subr.bf16.mxu0 %v12384_v27  ;;  %5760 = vadd.xlane.f32.xlu1 %v5759_v63  ;;  %v10529_v43 = vld [vmem:[%s11277_s30 + $0xb8] sm:$0xff]  ;;  %v12414_v61 = vpack.c.bf16 %v439_v52, %v435_v47  ;;  %v5765_v63 = vadd.f32 %v11927_v1, %v11929_v35 }
 0x1c8   : > { %17301 = vst [vmem:[#allocation34_spill] sm:$0xff] %v12396_v26  ;;  %10252 = vrsqrt.f32 %v961_v6  ;;  %v1099_v21 = vpop.xlane.xlu1 %1098  ;;  %8310 = vmatprep.mubr.f32.mxu1 %v12396_v26  ;;  %v907_v51 = vpop.xlane.xlu0 %906  ;;  %5536 = vadd.xlane.f32.xlu0 %v17303_v22  ;;  %v10530_v6 = vld [vmem:[%s11277_s30 + $0xb0] sm:$0xff]  ;;  %v17307_v22 = vld [vmem:[#allocation36_spill] sm:$0xff] }
 0x1c9   : > { %17302 = vst [vmem:[#allocation163_spill] sm:$0xff] %v12403_v56  ;;  %v10243_v23 = vpop.eup %10242  ;;  %v1154_v16 = vadd.f32 1e-16, %v1099_v21  ;;  %8230 = vmatprep.mubr.f32.mxu0 %v12403_v56  ;;  %v962_v58 = vadd.f32 1e-16, %v907_v51  ;;  %17305 = vst [vmem:[#allocation164_spill] sm:$0xff] %v12414_v61 }
 0x1ca   : > { %v10245_v36 = vpop.eup %10244  ;;  %v12412_v3 = vmul.f32 %v10529_v43, %v10243_v23  ;;  %v10531_v23 = vld [vmem:[%s11277_s30 + $0xd8] sm:$0xff]  ;;  %v443_v43 = vld [vmem:[%s11287_s28 + $0x108] sm:$0xff] }
 0x1cb   : > { %10254 = vrsqrt.f32 %v1154_v16  ;;  %v12419_v49 = vmul.f32 %v10530_v6, %v10245_v36  ;;  %5763 = vadd.xlane.f32.xlu1 %v5762_v60  ;;  %v5768_v16 = vadd.f32 %v11945_v9, %v11947_v0  ;;  %v447_v6 = vld [vmem:[%s11287_s28 + $0x128] sm:$0xff] }
 0x1cc   : > { %17304 = vst [vmem:[#allocation35_spill] sm:$0xff] %v12412_v3  ;;  %10256 = vrsqrt.f32 %v962_v58  ;;  %v1101_v21 = vpop.xlane.xlu1 %1100  ;;  %8311 = vmatmul.mubr.f32.gmra.mrb[36].mxu1 %v12412_v3  ;;  %v909_v51 = vpop.xlane.xlu0 %908  ;;  %5539 = vadd.xlane.f32.xlu0 %v17307_v22  ;;  %v10532_v58 = vld [vmem:[%s11277_s30 + $0xd0] sm:$0xff]  ;;  %v17310_v22 = vld [vmem:[#allocation37_spill] sm:$0xff] }
 0x1cd   : > { %17306 = vst [vmem:[#allocation165_spill] sm:$0xff] %v12419_v49  ;;  %v10247_v47 = vpop.eup %10246  ;;  %v1155_v52 = vadd.f32 1e-16, %v1101_v21  ;;  %8231 = vmatmul.mubr.f32.gmra.mrb[36].mxu0 %v12419_v49  ;;  %v963_v1 = vadd.f32 1e-16, %v909_v51  ;;  %9483 = vmatpush3.bf16.xpose.msra.mxu1 %v12384_v27 }
 0x1ce   : > { %v10249_v35 = vpop.eup %10248  ;;  %v12426_v60 = vmul.f32 %v10531_v23, %v10247_v47  ;;  %9451 = vmatpush3.bf16.xpose.msra.mxu0 %v12384_v27  ;;  %9485 = vmatprep.subr.bf16.mxu1 %v12414_v61 }
 0x1cf   : > { %10258 = vrsqrt.f32 %v1155_v52  ;;  %v12433_v36 = vmul.f32 %v10532_v58, %v10249_v35  ;;  %9453 = vmatprep.subr.bf16.mxu0 %v12414_v61  ;;  %5766 = vadd.xlane.f32.xlu1 %v5765_v63  ;;  %v10533_v35 = vld [vmem:[%s11277_s30 + $0xf8] sm:$0xff]  ;;  %v12444_v58 = vpack.c.bf16 %v447_v6, %v443_v43  ;;  %v5771_v63 = vadd.f32 %v11963_v30, %v11965_v55 }
 0x1d0   : > { %17308 = vst [vmem:[#allocation36_spill] sm:$0xff] %v12426_v60  ;;  %10260 = vrsqrt.f32 %v963_v1  ;;  %v1103_v21 = vpop.xlane.xlu1 %1102  ;;  %8313 = vmatprep.mubr.f32.mxu1 %v12426_v60  ;;  %v911_v51 = vpop.xlane.xlu0 %910  ;;  %5542 = vadd.xlane.f32.xlu0 %v17310_v22  ;;  %v10534_v1 = vld [vmem:[%s11277_s30 + $0xf0] sm:$0xff] }
 0x1d1   : > { %17309 = vst [vmem:[#allocation166_spill] sm:$0xff] %v12433_v36  ;;  %v10251_v47 = vpop.eup %10250  ;;  %v1156_v9 = vadd.f32 1e-16, %v1103_v21  ;;  %8233 = vmatprep.mubr.f32.mxu0 %v12433_v36  ;;  %v964_v0 = vadd.f32 1e-16, %v911_v51  ;;  %17312 = vst [vmem:[#allocation167_spill] sm:$0xff] %v12444_v58 }
 0x1d2   : > { %v10253_v52 = vpop.eup %10252  ;;  %v12442_v23 = vmul.f32 %v10533_v35, %v10251_v47  ;;  %v17314_v22 = vld [vmem:[#allocation38_spill] sm:$0xff]  ;;  %v10535_v47 = vld [vmem:[%s11277_s30 + $0x118] sm:$0xff]  ;;  %v451_v35 = vld [vmem:[%s11287_s28 + $0x148] sm:$0xff] }
 0x1d3   : > { %10262 = vrsqrt.f32 %v1156_v9  ;;  %v12449_v49 = vmul.f32 %v10534_v1, %v10253_v52  ;;  %5769 = vadd.xlane.f32.xlu1 %v5768_v16  ;;  %v5774_v9 = vadd.f32 %v11981_v8, %v11983_v13  ;;  %v455_v1 = vld [vmem:[%s11287_s28 + $0x168] sm:$0xff] }
 0x1d4   : > { %17311 = vst [vmem:[#allocation37_spill] sm:$0xff] %v12442_v23  ;;  %10264 = vrsqrt.f32 %v964_v0  ;;  %v1105_v21 = vpop.xlane.xlu1 %1104  ;;  %8314 = vmatmul.mubr.f32.gmra.mrb[38].mxu1 %v12442_v23  ;;  %v913_v51 = vpop.xlane.xlu0 %912  ;;  %5545 = vadd.xlane.f32.xlu0 %v17314_v22  ;;  %v10536_v0 = vld [vmem:[%s11277_s30 + $0x110] sm:$0xff]  ;;  %v17317_v22 = vld [vmem:[#allocation39_spill] sm:$0xff] }
 0x1d5   : > { %17313 = vst [vmem:[#allocation168_spill] sm:$0xff] %v12449_v49  ;;  %v10255_v43 = vpop.eup %10254  ;;  %v1157_v6 = vadd.f32 1e-16, %v1105_v21  ;;  %8234 = vmatmul.mubr.f32.gmra.mrb[38].mxu0 %v12449_v49  ;;  %v965_v30 = vadd.f32 1e-16, %v913_v51  ;;  %9487 = vmatpush3.bf16.xpose.msra.mxu1 %v12414_v61 }
 0x1d6   : > { %v10257_v55 = vpop.eup %10256  ;;  %v12456_v16 = vmul.f32 %v10535_v47, %v10255_v43  ;;  %9455 = vmatpush3.bf16.xpose.msra.mxu0 %v12414_v61  ;;  %9489 = vmatprep.subr.bf16.mxu1 %v12444_v58 }
 0x1d7   : > { %10266 = vrsqrt.f32 %v1157_v6  ;;  %v12463_v52 = vmul.f32 %v10536_v0, %v10257_v55  ;;  %9457 = vmatprep.subr.bf16.mxu0 %v12444_v58  ;;  %5772 = vadd.xlane.f32.xlu1 %v5771_v63  ;;  %v10537_v55 = vld [vmem:[%s11277_s30 + $0x138] sm:$0xff]  ;;  %v12474_v0 = vpack.c.bf16 %v455_v1, %v451_v35  ;;  %v10538_v63 = vld [vmem:[%s11277_s30 + $0x130] sm:$0xff] }
 0x1d8   : > { %17315 = vst [vmem:[#allocation38_spill] sm:$0xff] %v12456_v16  ;;  %10268 = vrsqrt.f32 %v965_v30  ;;  %v1107_v21 = vpop.xlane.xlu1 %1106  ;;  %8316 = vmatprep.mubr.f32.mxu1 %v12456_v16  ;;  %v915_v51 = vpop.xlane.xlu0 %914  ;;  %5548 = vadd.xlane.f32.xlu0 %v17317_v22 }
 0x1d9   : > { %17316 = vst [vmem:[#allocation169_spill] sm:$0xff] %v12463_v52  ;;  %v10259_v43 = vpop.eup %10258  ;;  %v1158_v8 = vadd.f32 1e-16, %v1107_v21  ;;  %8236 = vmatprep.mubr.f32.mxu0 %v12463_v52  ;;  %v966_v13 = vadd.f32 1e-16, %v915_v51  ;;  %17319 = vst [vmem:[#allocation170_spill] sm:$0xff] %v12474_v0 }
 0x1da   : > { %v10261_v6 = vpop.eup %10260  ;;  %v12472_v47 = vmul.f32 %v10537_v55, %v10259_v43  ;;  %v17321_v52 = vld [vmem:[#allocation40_spill] sm:$0xff]  ;;  %v463_v55 = vld [vmem:[%s11287_s28 + $0x1a8] sm:$0xff] }
 0x1db   : > { %10270 = vrsqrt.f32 %v1158_v8  ;;  %v12477_v30 = vmul.f32 %v10538_v63, %v10261_v6  ;;  %5775 = vadd.xlane.f32.xlu1 %v5774_v9  ;;  %v10539_v8 = vld [vmem:[%s11277_s30 + $0x158] sm:$0xff]  ;;  %v459_v6 = vld [vmem:[%s11287_s28 + $0x188] sm:$0xff] }
 0x1dc   : > { %17318 = vst [vmem:[#allocation39_spill] sm:$0xff] %v12472_v47  ;;  %10272 = vrsqrt.f32 %v966_v13  ;;  %v1109_v22 = vpop.xlane.xlu1 %1108  ;;  %8317 = vmatmul.mubr.f32.gmra.mrb[40].mxu1 %v12472_v47  ;;  %v917_v21 = vpop.xlane.xlu0 %916  ;;  %5551 = vadd.xlane.f32.xlu0 %v17321_v52  ;;  %v10540_v13 = vld [vmem:[%s11277_s30 + $0x150] sm:$0xff] }
 0x1dd   : > { %17320 = vst [vmem:[#allocation171_spill] sm:$0xff] %v12477_v30  ;;  %v10263_v51 = vpop.eup %10262  ;;  %v1159_v43 = vadd.f32 1e-16, %v1109_v22  ;;  %8237 = vmatmul.mubr.f32.gmra.mrb[40].mxu0 %v12477_v30  ;;  %v967_v35 = vadd.f32 1e-16, %v917_v21  ;;  %9491 = vmatpush3.bf16.xpose.msra.mxu1 %v12444_v58  ;;  %v12500_v30 = vpack.c.bf16 %v463_v55, %v459_v6 }
 0x1de   : > { %v10265_v1 = vpop.eup %10264  ;;  %v12484_v9 = vmul.f32 %v10539_v8, %v10263_v51  ;;  %9459 = vmatpush3.bf16.xpose.msra.mxu0 %v12444_v58  ;;  %9493 = vmatprep.subr.bf16.mxu1 %v12474_v0 }
 0x1df   : > { %10274 = vrsqrt.f32 %v1159_v43  ;;  %v12489_v52 = vmul.f32 %v10540_v13, %v10265_v1  ;;  %9461 = vmatprep.subr.bf16.mxu0 %v12474_v0  ;;  %v10541_v1 = vld [vmem:[%s11277_s30 + $0x178] sm:$0xff]  ;;  %17325 = vst [vmem:[#allocation174_spill] sm:$0xff] %v12500_v30 }
 0x1e0   : > { %17322 = vst [vmem:[#allocation40_spill] sm:$0xff] %v12484_v9  ;;  %10276 = vrsqrt.f32 %v967_v35  ;;  %v1111_v63 = vpop.xlane.xlu1 %1110  ;;  %8319 = vmatprep.mubr.f32.mxu1 %v12484_v9  ;;  %v919_v22 = vpop.xlane.xlu0 %918  ;;  %5554 = vadd.xlane.f32.xlu0 %v11557_v53  ;;  %v10542_v35 = vld [vmem:[%s11277_s30 + $0x170] sm:$0xff] }
 0x1e1   : > { %17323 = vst [vmem:[#allocation172_spill] sm:$0xff] %v12489_v52  ;;  %v10267_v21 = vpop.eup %10266  ;;  %v1160_v51 = vadd.f32 1e-16, %v1111_v63  ;;  %8239 = vmatprep.mubr.f32.mxu0 %v12489_v52  ;;  %v968_v43 = vadd.f32 1e-16, %v919_v22  ;;  %v17327_v63 = vld [vmem:[#allocation41_spill] sm:$0xff] }
 0x1e2   : > { %v10269_v8 = vpop.eup %10268  ;;  %v12498_v13 = vmul.f32 %v10541_v1, %v10267_v21 }
 0x1e3   : > { %10278 = vrsqrt.f32 %v1160_v51  ;;  %v12503_v47 = vmul.f32 %v10542_v35, %v10269_v8  ;;  %v10543_v51 = vld [vmem:[%s11277_s30 + $0x198] sm:$0xff]  ;;  %v471_v35 = vld [vmem:[%s11287_s28 + $0x1e8] sm:$0xff] }
 0x1e4   : > { %17324 = vst [vmem:[#allocation173_spill] sm:$0xff] %v12498_v13  ;;  %10280 = vrsqrt.f32 %v968_v43  ;;  %v1113_v9 = vpop.xlane.xlu1 %1112  ;;  %8320 = vmatmul.mubr.f32.gmra.mrb[42].mxu1 %v12498_v13  ;;  %v921_v53 = vpop.xlane.xlu0 %920  ;;  %5557 = vadd.xlane.f32.xlu0 %v17327_v63  ;;  %v10544_v43 = vld [vmem:[%s11277_s30 + $0x190] sm:$0xff] }
 0x1e5   : > { %17326 = vst [vmem:[#allocation175_spill] sm:$0xff] %v12503_v47  ;;  %v10271_v22 = vpop.eup %10270  ;;  %v1161_v21 = vadd.f32 1e-16, %v1113_v9  ;;  %8240 = vmatmul.mubr.f32.gmra.mrb[42].mxu0 %v12503_v47  ;;  %v969_v6 = vadd.f32 1e-16, %v921_v53  ;;  %9495 = vmatpush3.bf16.xpose.msra.mxu1 %v12474_v0  ;;  %v467_v9 = vld [vmem:[%s11287_s28 + $0x1c8] sm:$0xff] }
 0x1e6   : > { %v10273_v55 = vpop.eup %10272  ;;  %v12510_v8 = vmul.f32 %v10543_v51, %v10271_v22  ;;  %9463 = vmatpush3.bf16.xpose.msra.mxu0 %v12474_v0  ;;  %9497 = vmatprep.subr.bf16.mxu1 %v12500_v30  ;;  %v12526_v13 = vpack.c.bf16 %v471_v35, %v467_v9  ;;  %v10547_v35 = vld [vmem:[%s11277_s30 + $0x1d8] sm:$0xff] }
 0x1e7   : > { %10282 = vrsqrt.f32 %v1161_v21  ;;  %v12515_v1 = vmul.f32 %v10544_v43, %v10273_v55  ;;  %9465 = vmatprep.subr.bf16.mxu0 %v12500_v30  ;;  %v10545_v55 = vld [vmem:[%s11277_s30 + $0x1b8] sm:$0xff] }
 0x1e8   : > { %17328 = vst [vmem:[#allocation41_spill] sm:$0xff] %v12510_v8  ;;  %10284 = vrsqrt.f32 %v969_v6  ;;  %v1115_v53 = vpop.xlane.xlu1 %1114  ;;  %8322 = vmatprep.mubr.f32.mxu1 %v12510_v8  ;;  %v923_v63 = vpop.xlane.xlu0 %922  ;;  %5560 = vadd.xlane.f32.xlu0 %v11575_v62  ;;  %17331 = vst [vmem:[#allocation178_spill] sm:$0xff] %v12526_v13  ;;  %v10546_v6 = vld [vmem:[%s11277_s30 + $0x1b0] sm:$0xff]  ;;  %v5565_v8 = vadd.f32 %v11681_v42, %v11683_v46 }
 0x1e9   : > { %17329 = vst [vmem:[#allocation176_spill] sm:$0xff] %v12515_v1  ;;  %v10275_v22 = vpop.eup %10274  ;;  %v1162_v51 = vadd.f32 1e-16, %v1115_v53  ;;  %8242 = vmatprep.mubr.f32.mxu0 %v12515_v1  ;;  %v970_v21 = vadd.f32 1e-16, %v923_v63  ;;  %v17333_v63 = vld [vmem:[#allocation42_spill] sm:$0xff] }
 0x1ea   : > { %v10277_v47 = vpop.eup %10276  ;;  %v12524_v43 = vmul.f32 %v10545_v55, %v10275_v22  ;;  %v10548_v42 = vld [vmem:[%s11277_s30 + $0x1d0] sm:$0xff] }
 0x1eb   : > { %10286 = vrsqrt.f32 %v1162_v51  ;;  %v12529_v52 = vmul.f32 %v10546_v6, %v10277_v47  ;;  %v17337_v6 = vld [vmem:[#allocation51_spill] sm:$0xff] }
 0x1ec   : > { %17330 = vst [vmem:[#allocation177_spill] sm:$0xff] %v12524_v43  ;;  %10288 = vrsqrt.f32 %v970_v21  ;;  %v1117_v62 = vpop.xlane.xlu1 %1116  ;;  %8323 = vmatmul.mubr.f32.gmra.mrb[44].mxu1 %v12524_v43  ;;  %v925_v53 = vpop.xlane.xlu0 %924  ;;  %5563 = vadd.xlane.f32.xlu0 %v17333_v63  ;;  %v17336_v21 = vld [vmem:[#allocation52_spill] sm:$0xff]  ;;  %v10550_v43 = vld [vmem:[%s11277_s30 + $0x1f0] sm:$0xff] }
 0x1ed   : > { %17332 = vst [vmem:[#allocation179_spill] sm:$0xff] %v12529_v52  ;;  %v10279_v22 = vpop.eup %10278  ;;  %v1163_v55 = vadd.f32 1e-16, %v1117_v62  ;;  %8243 = vmatmul.mubr.f32.gmra.mrb[44].mxu0 %v12529_v52  ;;  %v971_v9 = vadd.f32 1e-16, %v925_v53  ;;  %9499 = vmatpush3.bf16.xpose.msra.mxu1 %v12500_v30  ;;  %v5568_v62 = vadd.f32 %v17337_v6, %v17336_v21  ;;  %v17341_v21 = vld [vmem:[#allocation53_spill] sm:$0xff] }
 0x1ee   : > { %v10281_v47 = vpop.eup %10280  ;;  %v12538_v51 = vmul.f32 %v10547_v35, %v10279_v22  ;;  %9467 = vmatpush3.bf16.xpose.msra.mxu0 %v12500_v30  ;;  %9501 = vmatprep.subr.bf16.mxu1 %v12526_v13 }
 0x1ef   : > { %10290 = vrsqrt.f32 %v1163_v55  ;;  %v12543_v46 = vmul.f32 %v10548_v42, %v10281_v47  ;;  %9469 = vmatprep.subr.bf16.mxu0 %v12526_v13  ;;  %v10549_v47 = vld [vmem:[%s11277_s30 + $0x1f8] sm:$0xff] }
 0x1f0   : > { %17334 = vst [vmem:[#allocation42_spill] sm:$0xff] %v12538_v51  ;;  %10292 = vrsqrt.f32 %v971_v9  ;;  %v1119_v53 = vpop.xlane.xlu1 %1118  ;;  %8325 = vmatprep.mubr.f32.mxu1 %v12538_v51  ;;  %v927_v63 = vpop.xlane.xlu0 %926  ;;  %5566 = vadd.xlane.f32.xlu0 %v5565_v8  ;;  %v17340_v9 = vld [vmem:[#allocation54_spill] sm:$0xff] }
 0x1f1   : > { %17335 = vst [vmem:[#allocation180_spill] sm:$0xff] %v12543_v46  ;;  %v10283_v22 = vpop.eup %10282  ;;  %v1164_v35 = vadd.f32 1e-16, %v1119_v53  ;;  %8245 = vmatprep.mubr.f32.mxu0 %v12543_v46  ;;  %v972_v55 = vadd.f32 1e-16, %v927_v63  ;;  %v5571_v6 = vadd.f32 %v17341_v21, %v17340_v9  ;;  %v17345_v9 = vld [vmem:[#allocation55_spill] sm:$0xff] }
 0x1f2   : > { %v10285_v52 = vpop.eup %10284  ;;  %v12551_v42 = vmul.f32 %v10549_v47, %v10283_v22 }
 0x1f3   : > { %10294 = vrsqrt.f32 %v1164_v35  ;;  %v12554_v1 = vmul.f32 %v10550_v43, %v10285_v52  ;;  %v10551_v52 = vld [vmem:[%s11277_s30 + $0x218] sm:$0xff] }
 0x1f4   : > { %17338 = vst [vmem:[#allocation52_spill] sm:$0xff] %v12551_v42  ;;  %10296 = vrsqrt.f32 %v972_v55  ;;  %v1121_v8 = vpop.xlane.xlu1 %1120  ;;  %8326 = vmatmul.mubr.f32.gmra.mrb[46].mxu1 %v12551_v42  ;;  %v929_v53 = vpop.xlane.xlu0 %928  ;;  %5569 = vadd.xlane.f32.xlu0 %v5568_v62  ;;  %v10552_v55 = vld [vmem:[%s11277_s30 + $0x210] sm:$0xff]  ;;  %v17344_v62 = vld [vmem:[#allocation56_spill] sm:$0xff] }
 0x1f5   : > { %17339 = vst [vmem:[#allocation51_spill] sm:$0xff] %v12554_v1  ;;  %v10287_v63 = vpop.eup %10286  ;;  %v1165_v46 = vadd.f32 1e-16, %v1121_v8  ;;  %8246 = vmatmul.mubr.f32.gmra.mrb[46].mxu0 %v12554_v1  ;;  %v973_v22 = vadd.f32 1e-16, %v929_v53  ;;  %9503 = vmatpush3.bf16.xpose.msra.mxu1 %v12526_v13  ;;  %v5574_v21 = vadd.f32 %v17345_v9, %v17344_v62  ;;  %v10554_v42 = vld [vmem:[%s11277_s30 + $0x230] sm:$0xff] }
 0x1f6   : > { %v10289_v35 = vpop.eup %10288  ;;  %v12562_v43 = vmul.f32 %v10551_v52, %v10287_v63  ;;  %9471 = vmatpush3.bf16.xpose.msra.mxu0 %v12526_v13  ;;  %9537 = vmatprep.subr.bf16.mxu1 %v12130_v57  ;;  %v17349_v9 = vld [vmem:[#allocation57_spill] sm:$0xff] }
 0x1f7   : > { %10298 = vrsqrt.f32 %v1165_v46  ;;  %v12567_v47 = vmul.f32 %v10552_v55, %v10289_v35  ;;  %9505 = vmatprep.subr.bf16.mxu0 %v12130_v57  ;;  %v10553_v35 = vld [vmem:[%s11277_s30 + $0x238] sm:$0xff] }
 0x1f8   : > { %17342 = vst [vmem:[#allocation54_spill] sm:$0xff] %v12562_v43  ;;  %10300 = vrsqrt.f32 %v973_v22  ;;  %v1123_v8 = vpop.xlane.xlu1 %1122  ;;  %8328 = vmatprep.mubr.f32.mxu1 %v12562_v43  ;;  %v931_v53 = vpop.xlane.xlu0 %930  ;;  %5572 = vadd.xlane.f32.xlu0 %v5571_v6  ;;  %v17348_v22 = vld [vmem:[#allocation58_spill] sm:$0xff] }
 0x1f9   : > { %17343 = vst [vmem:[#allocation53_spill] sm:$0xff] %v12567_v47  ;;  %v10291_v63 = vpop.eup %10290  ;;  %v1166_v52 = vadd.f32 1e-16, %v1123_v8  ;;  %8248 = vmatprep.mubr.f32.mxu0 %v12567_v47  ;;  %v974_v46 = vadd.f32 1e-16, %v931_v53  ;;  %v5577_v43 = vadd.f32 %v17349_v9, %v17348_v22  ;;  %v17353_v22 = vld [vmem:[#allocation59_spill] sm:$0xff] }
 0x1fa   : > { %v10293_v1 = vpop.eup %10292  ;;  %v12575_v55 = vmul.f32 %v10553_v35, %v10291_v63 }
 0x1fb   : > { %10302 = vrsqrt.f32 %v1166_v52  ;;  %v12578_v62 = vmul.f32 %v10554_v42, %v10293_v1  ;;  %v10555_v52 = vld [vmem:[%s11277_s30 + $0x258] sm:$0xff]  ;;  %v10556_v1 = vld [vmem:[%s11277_s30 + $0x250] sm:$0xff] }
 0x1fc   : > { %17346 = vst [vmem:[#allocation56_spill] sm:$0xff] %v12575_v55  ;;  %10304 = vrsqrt.f32 %v974_v46  ;;  %v1125_v6 = vpop.xlane.xlu1 %1124  ;;  %8329 = vmatmul.mubr.f32.gmra.mrb[48].mxu1 %v12575_v55  ;;  %v933_v8 = vpop.xlane.xlu0 %932  ;;  %5575 = vadd.xlane.f32.xlu0 %v5574_v21  ;;  %v17352_v46 = vld [vmem:[#allocation60_spill] sm:$0xff] }
 0x1fd   : > { %17347 = vst [vmem:[#allocation55_spill] sm:$0xff] %v12578_v62  ;;  %v10295_v53 = vpop.eup %10294  ;;  %v1167_v47 = vadd.f32 1e-16, %v1125_v6  ;;  %8249 = vmatmul.mubr.f32.gmra.mrb[48].mxu0 %v12578_v62  ;;  %v975_v63 = vadd.f32 1e-16, %v933_v8  ;;  %v5580_v9 = vadd.f32 %v17353_v22, %v17352_v46  ;;  %v17357_v46 = vld [vmem:[#allocation61_spill] sm:$0xff] }
 0x1fe   : > { %v10297_v35 = vpop.eup %10296  ;;  %v12585_v51 = vmul.f32 %v10555_v52, %v10295_v53 }
 0x1ff   : > { %10306 = vrsqrt.f32 %v1167_v47  ;;  %v12588_v42 = vmul.f32 %v10556_v1, %v10297_v35  ;;  %v10557_v47 = vld [vmem:[%s11277_s30 + $0x278] sm:$0xff]  ;;  %v10558_v35 = vld [vmem:[%s11277_s30 + $0x270] sm:$0xff] }
 0x200   : > { %17350 = vst [vmem:[#allocation58_spill] sm:$0xff] %v12585_v51  ;;  %10308 = vrsqrt.f32 %v975_v63  ;;  %v1127_v21 = vpop.xlane.xlu1 %1126  ;;  %8331 = vmatprep.mubr.f32.mxu1 %v12585_v51  ;;  %v935_v6 = vpop.xlane.xlu0 %934  ;;  %5578 = vadd.xlane.f32.xlu0 %v5577_v43  ;;  %v17356_v63 = vld [vmem:[#allocation62_spill] sm:$0xff] }
 0x201   : > { %17351 = vst [vmem:[#allocation57_spill] sm:$0xff] %v12588_v42  ;;  %v10299_v8 = vpop.eup %10298  ;;  %v1168_v62 = vadd.f32 1e-16, %v1127_v21  ;;  %8251 = vmatprep.mubr.f32.mxu0 %v12588_v42  ;;  %v976_v53 = vadd.f32 1e-16, %v935_v6  ;;  %v5583_v22 = vadd.f32 %v17357_v46, %v17356_v63  ;;  %v17361_v63 = vld [vmem:[#allocation63_spill] sm:$0xff] }
 0x202   : > { %v10301_v52 = vpop.eup %10300  ;;  %v12595_v55 = vmul.f32 %v10557_v47, %v10299_v8 }
 0x203   : > { %10310 = vrsqrt.f32 %v1168_v62  ;;  %v12598_v1 = vmul.f32 %v10558_v35, %v10301_v52  ;;  %v10559_v62 = vld [vmem:[%s11277_s30 + $0x298] sm:$0xff]  ;;  %v10560_v52 = vld [vmem:[%s11277_s30 + $0x290] sm:$0xff] }
 0x204   : > { %17354 = vst [vmem:[#allocation60_spill] sm:$0xff] %v12595_v55  ;;  %10312 = vrsqrt.f32 %v976_v53  ;;  %v1129_v43 = vpop.xlane.xlu1 %1128  ;;  %8332 = vmatmul.mubr.f32.gmra.mrb[50].mxu1 %v12595_v55  ;;  %v937_v21 = vpop.xlane.xlu0 %936  ;;  %5581 = vadd.xlane.f32.xlu0 %v5580_v9  ;;  %v17360_v53 = vld [vmem:[#allocation64_spill] sm:$0xff] }
 0x205   : > { %17355 = vst [vmem:[#allocation59_spill] sm:$0xff] %v12598_v1  ;;  %v10303_v6 = vpop.eup %10302  ;;  %v1169_v42 = vadd.f32 1e-16, %v1129_v43  ;;  %8252 = vmatmul.mubr.f32.gmra.mrb[50].mxu0 %v12598_v1  ;;  %v977_v8 = vadd.f32 1e-16, %v937_v21  ;;  %v5586_v46 = vadd.f32 %v17361_v63, %v17360_v53  ;;  %v17365_v53 = vld [vmem:[#allocation65_spill] sm:$0xff] }
 0x206   : > { %v10305_v47 = vpop.eup %10304  ;;  %v12605_v51 = vmul.f32 %v10559_v62, %v10303_v6 }
 0x207   : > { %10314 = vrsqrt.f32 %v1169_v42  ;;  %v12608_v35 = vmul.f32 %v10560_v52, %v10305_v47  ;;  %v10561_v42 = vld [vmem:[%s11277_s30 + $0x2b8] sm:$0xff]  ;;  %v10562_v47 = vld [vmem:[%s11277_s30 + $0x2b0] sm:$0xff] }
 0x208   : > { %17358 = vst [vmem:[#allocation62_spill] sm:$0xff] %v12605_v51  ;;  %10316 = vrsqrt.f32 %v977_v8  ;;  %v1131_v9 = vpop.xlane.xlu1 %1130  ;;  %8334 = vmatprep.mubr.f32.mxu1 %v12605_v51  ;;  %v939_v43 = vpop.xlane.xlu0 %938  ;;  %5584 = vadd.xlane.f32.xlu0 %v5583_v22  ;;  %v17364_v8 = vld [vmem:[#allocation66_spill] sm:$0xff] }
 0x209   : > { %17359 = vst [vmem:[#allocation61_spill] sm:$0xff] %v12608_v35  ;;  %v10307_v21 = vpop.eup %10306  ;;  %v1170_v1 = vadd.f32 1e-16, %v1131_v9  ;;  %8254 = vmatprep.mubr.f32.mxu0 %v12608_v35  ;;  %v978_v6 = vadd.f32 1e-16, %v939_v43  ;;  %v5589_v63 = vadd.f32 %v17365_v53, %v17364_v8  ;;  %v17368_v53 = vld [vmem:[#allocation68_spill] sm:$0xff] }
 0x20a   : > { %v10309_v62 = vpop.eup %10308  ;;  %v12615_v55 = vmul.f32 %v10561_v42, %v10307_v21  ;;  %v10563_v42 = vld [vmem:[%s11277_s30 + $0x2d8] sm:$0xff] }
 0x20b   : > { %10318 = vrsqrt.f32 %v1170_v1  ;;  %v12618_v52 = vmul.f32 %v10562_v47, %v10309_v62 }
 0x20c   : > { %17362 = vst [vmem:[#allocation64_spill] sm:$0xff] %v12615_v55  ;;  %10320 = vrsqrt.f32 %v978_v6  ;;  %v1133_v22 = vpop.xlane.xlu1 %1132  ;;  %8335 = vmatmul.mubr.f32.gmra.mrb[52].mxu1 %v12615_v55  ;;  %v941_v9 = vpop.xlane.xlu0 %940  ;;  %5587 = vadd.xlane.f32.xlu0 %v5586_v46  ;;  %v10564_v6 = vld [vmem:[%s11277_s30 + $0x2d0] sm:$0xff]  ;;  %v17369_v46 = vld [vmem:[#allocation67_spill] sm:$0xff] }
 0x20d   : > { %17363 = vst [vmem:[#allocation63_spill] sm:$0xff] %v12618_v52  ;;  %v10311_v43 = vpop.eup %10310  ;;  %v1171_v35 = vadd.f32 1e-16, %v1133_v22  ;;  %v12623_v51 = vpop.f32.mrb[0].mxu0  ;;  %8255 = vmatmul.mubr.f32.gmra.mrb[52].mxu0 %v12618_v52  ;;  %v979_v1 = vadd.f32 1e-16, %v941_v9  ;;  %v5592_v55 = vadd.f32 %v17369_v46, %v17368_v53 }
 0x20e   : > { %v10313_v21 = vpop.eup %10312  ;;  %v12626_v62 = vpop.f32.mrb[1].mxu0  ;;  %v12629_v47 = vmul.f32 %v10563_v42, %v10311_v43  ;;  %v10566_v53 = vld [vmem:[%s11277_s30 + $0x2f0] sm:$0xff] }
 0x20f   : > { %10322 = vrsqrt.f32 %v1171_v35  ;;  %v12632_v8 = vmul.f32 %v10564_v6, %v10313_v21 }
 0x210   : > { %17366 = vst [vmem:[#allocation66_spill] sm:$0xff] %v12629_v47  ;;  %10324 = vrsqrt.f32 %v979_v1  ;;  %v1135_v22 = vpop.xlane.xlu1 %1134  ;;  %8337 = vmatprep.mubr.f32.mxu1 %v12629_v47  ;;  %v943_v9 = vpop.xlane.xlu0 %942  ;;  %5590 = vadd.xlane.f32.xlu0 %v5589_v63  ;;  %v10565_v1 = vld [vmem:[%s11277_s30 + $0x2f8] sm:$0xff] }
 0x211   : > { %17367 = vst [vmem:[#allocation65_spill] sm:$0xff] %v12632_v8  ;;  %v10315_v52 = vpop.eup %10314  ;;  %v1172_v49 = vadd.f32 1e-16, %v1135_v22  ;;  %v12637_v16 = vpop.f32.mrb[0].mxu1  ;;  %8257 = vmatprep.mubr.f32.mxu0 %v12632_v8  ;;  %v980_v35 = vadd.f32 1e-16, %v943_v9 }
 0x212   : > { %17370 = vst [vmem:[#allocation68_spill] sm:$0xff] %v12637_v16  ;;  %v10317_v43 = vpop.eup %10316  ;;  %v12642_v42 = vpop.f32.mrb[1].mxu1  ;;  %v12645_v6 = vmul.f32 %v10565_v1, %v10315_v52  ;;  %v17374_v22 = vld [vmem:[#allocation70_spill] sm:$0xff]  ;;  %v17375_v8 = vld [vmem:[#allocation69_spill] sm:$0xff]  ;;  %v10567_v63 = vld [vmem:[%s11277_s30 + $0x318] sm:$0xff] }
 0x213   : > { %17371 = vst [vmem:[#allocation67_spill] sm:$0xff] %v12642_v42  ;;  %10326 = vrsqrt.f32 %v1172_v49  ;;  %v12650_v46 = vmul.f32 %v10566_v53, %v10317_v43  ;;  %v5595_v9 = vadd.f32 %v17375_v8, %v17374_v22  ;;  %v10568_v53 = vld [vmem:[%s11277_s30 + $0x310] sm:$0xff] }
 0x214   : > { %17372 = vst [vmem:[#allocation181_spill] sm:$0xff] %v12645_v6  ;;  %10328 = vrsqrt.f32 %v980_v35  ;;  %v1137_v47 = vpop.xlane.xlu1 %1136  ;;  %8338 = vmatmul.mubr.f32.gmra.mrb[54].mxu1 %v12645_v6  ;;  %v945_v21 = vpop.xlane.xlu0 %944  ;;  %5593 = vadd.xlane.f32.xlu0 %v5592_v55 }
 0x215   : > { %17373 = vst [vmem:[#allocation182_spill] sm:$0xff] %v12650_v46  ;;  %v10319_v52 = vpop.eup %10318  ;;  %v1173_v1 = vadd.f32 1e-16, %v1137_v47  ;;  %8258 = vmatmul.mubr.f32.gmra.mrb[54].mxu0 %v12650_v46  ;;  %v981_v49 = vadd.f32 1e-16, %v945_v21  ;;  %v10570_v21 = vld [vmem:[%s11277_s30 + $0x330] sm:$0xff] }
 0x216   : > { %v10321_v16 = vpop.eup %10320  ;;  %v12657_v42 = vmul.f32 %v10567_v63, %v10319_v52 }
 0x217   : > { %10330 = vrsqrt.f32 %v1173_v1  ;;  %v12659_v43 = vpop.f32.mrb[2].mxu1  ;;  %v12662_v8 = vmul.f32 %v10568_v53, %v10321_v16  ;;  %v10569_v53 = vld [vmem:[%s11277_s30 + $0x338] sm:$0xff] }
 0x218   : > { %17376 = vst [vmem:[#allocation70_spill] sm:$0xff] %v12657_v42  ;;  %17377 = vst [vmem:[#allocation69_spill] sm:$0xff] %v12659_v43  ;;  %10332 = vrsqrt.f32 %v981_v49  ;;  %v12664_v35 = vpop.f32.mrb[2].mxu0  ;;  %v1139_v55 = vpop.xlane.xlu1 %1138  ;;  %8340 = vmatprep.mubr.f32.mxu1 %v12657_v42  ;;  %5596 = vadd.xlane.f32.xlu0 %v5595_v9 }
 0x219   : > { %17378 = vst [vmem:[#allocation183_spill] sm:$0xff] %v12662_v8  ;;  %v10323_v47 = vpop.eup %10322  ;;  %v1174_v63 = vadd.f32 1e-16, %v1139_v55  ;;  %v12669_v22 = vpop.f32.mrb[3].mxu0  ;;  %8260 = vmatprep.mubr.f32.mxu0 %v12662_v8 }
 0x21a   : > { %17379 = vst [vmem:[#allocation184_spill] sm:$0xff] %v12669_v22  ;;  %v12671_v52 = vpop.f32.mrb[3].mxu1  ;;  %v10325_v16 = vpop.eup %10324  ;;  %v12677_v46 = vmul.f32 %v10569_v53, %v10323_v47  ;;  %v10571_v22 = vld [vmem:[%s11277_s30 + $0x358] sm:$0xff] }
 0x21b   : > { %17380 = vst [vmem:[#allocation185_spill] sm:$0xff] %v12671_v52  ;;  %v947_v49 = vpop.xlane.xlu0 %946  ;;  %10334 = vrsqrt.f32 %v1174_v63  ;;  %v12680_v55 = vmul.f32 %v10570_v21, %v10325_v16  ;;  %v10572_v21 = vld [vmem:[%s11277_s30 + $0x350] sm:$0xff] }
 0x21c   : > { %17381 = vst [vmem:[#allocation186_spill] sm:$0xff] %v12677_v46  ;;  %v982_v9 = vadd.f32 1e-16, %v947_v49  ;;  %v1141_v42 = vpop.xlane.xlu1 %1140  ;;  %8341 = vmatmul.mubr.f32.gmra.mrb[56].mxu1 %v12677_v46  ;;  %v10574_v46 = vld [vmem:[%s11277_s30 + $0x370] sm:$0xff] }
 0x21d   : > { %17382 = vst [vmem:[#allocation187_spill] sm:$0xff] %v12680_v55  ;;  %v10327_v6 = vpop.eup %10326  ;;  %v1175_v8 = vadd.f32 1e-16, %v1141_v42  ;;  %8261 = vmatmul.mubr.f32.gmra.mrb[56].mxu0 %v12680_v55  ;;  %v10573_v55 = vld [vmem:[%s11277_s30 + $0x378] sm:$0xff] }
 0x21e   : > { %10336 = vrsqrt.f32 %v982_v9  ;;  %v10329_v1 = vpop.eup %10328  ;;  %v12685_v43 = vmul.f32 %v10571_v22, %v10327_v6  ;;  %v10575_v9 = vld [vmem:[%s11277_s30 + $0x398] sm:$0xff] }
 0x21f   : > { %v949_v52 = vpop.xlane.xlu0 %948  ;;  %10338 = vrsqrt.f32 %v1175_v8  ;;  %v12687_v63 = vpop.f32.mrb[4].mxu1  ;;  %v12690_v16 = vmul.f32 %v10572_v21, %v10329_v1 }
 0x220   : > { %17383 = vst [vmem:[#allocation188_spill] sm:$0xff] %v12685_v43  ;;  %v983_v47 = vadd.f32 1e-16, %v949_v52  ;;  %17384 = vst [vmem:[#allocation189_spill] sm:$0xff] %v12687_v63  ;;  %v12692_v49 = vpop.f32.mrb[4].mxu0  ;;  %v1143_v53 = vpop.xlane.xlu1 %1142  ;;  %8343 = vmatprep.mubr.f32.mxu1 %v12685_v43 }
 0x221   : > { %17385 = vst [vmem:[#allocation190_spill] sm:$0xff] %v12690_v16  ;;  %17386 = vst [vmem:[#allocation191_spill] sm:$0xff] %v12692_v49  ;;  %v10331_v42 = vpop.eup %10330  ;;  %v1176_v22 = vadd.f32 1e-16, %v1143_v53  ;;  %v12697_v8 = vpop.f32.mrb[5].mxu0  ;;  %8263 = vmatprep.mubr.f32.mxu0 %v12690_v16 }
 0x222   : > { %10340 = vrsqrt.f32 %v983_v47  ;;  %v12699_v52 = vpop.f32.mrb[5].mxu1  ;;  %v10333_v1 = vpop.eup %10332  ;;  %v12705_v43 = vmul.f32 %v10573_v55, %v10331_v42 }
 0x223   : > { %17387 = vst [vmem:[#allocation192_spill] sm:$0xff] %v12699_v52  ;;  %v951_v21 = vpop.xlane.xlu0 %950  ;;  %10342 = vrsqrt.f32 %v1176_v22  ;;  %v12708_v6 = vmul.f32 %v10574_v46, %v10333_v1 }
 0x224   : > { %17388 = vst [vmem:[#allocation193_spill] sm:$0xff] %v12705_v43  ;;  %v984_v47 = vadd.f32 1e-16, %v951_v21  ;;  %v1145_v53 = vpop.xlane.xlu1 %1144  ;;  %8344 = vmatmul.mubr.f32.gmra.mrb[58].mxu1 %v12705_v43  ;;  %v10576_v21 = vld [vmem:[%s11277_s30 + $0x390] sm:$0xff] }
 0x225   : > { %17389 = vst [vmem:[#allocation194_spill] sm:$0xff] %v12708_v6  ;;  %v10335_v63 = vpop.eup %10334  ;;  %v1177_v16 = vadd.f32 1e-16, %v1145_v53  ;;  %8264 = vmatmul.mubr.f32.gmra.mrb[58].mxu0 %v12708_v6 }
 0x226   : > { %10344 = vrsqrt.f32 %v984_v47  ;;  %v12713_v52 = vmul.f32 %v10575_v9, %v10335_v63  ;;  %v10577_v9 = vld [vmem:[%s11277_s30 + $0x3b8] sm:$0xff] }
 0x227   : > { %v953_v49 = vpop.xlane.xlu0 %952  ;;  %10346 = vrsqrt.f32 %v1177_v16  ;;  %v12715_v46 = vpop.f32.mrb[6].mxu1  ;;  %v10579_v63 = vld [vmem:[%s11277_s30 + $0x3d8] sm:$0xff] }
 0x228   : > { %17390 = vst [vmem:[#allocation195_spill] sm:$0xff] %v12713_v52  ;;  %v10337_v55 = vpop.eup %10336  ;;  %v985_v42 = vadd.f32 1e-16, %v953_v49  ;;  %17391 = vst [vmem:[#allocation196_spill] sm:$0xff] %v12715_v46  ;;  %v12717_v22 = vpop.f32.mrb[6].mxu0  ;;  %8346 = vmatprep.mubr.f32.mxu1 %v12713_v52 }
 0x229   : > { %17392 = vst [vmem:[#allocation197_spill] sm:$0xff] %v12717_v22  ;;  %v12719_v1 = vpop.f32.mrb[7].mxu1  ;;  %v12722_v47 = vmul.f32 %v10576_v21, %v10337_v55  ;;  %v10339_v53 = vpop.eup %10338  ;;  %v10578_v21 = vld [vmem:[%s11277_s30 + $0x3b0] sm:$0xff] }
 0x22a   : > { %17393 = vst [vmem:[#allocation198_spill] sm:$0xff] %v12719_v1  ;;  %10348 = vrsqrt.f32 %v985_v42  ;;  %v12727_v16 = vpop.f32.mrb[7].mxu0  ;;  %v12733_v6 = vmul.f32 %v10577_v9, %v10339_v53  ;;  %v10580_v9 = vld [vmem:[%s11277_s30 + $0x3d0] sm:$0xff] }
 0x22b   : > { %17394 = vst [vmem:[#allocation199_spill] sm:$0xff] %v12722_v47  ;;  %17395 = vst [vmem:[#allocation200_spill] sm:$0xff] %v12727_v16  ;;  %8266 = vmatprep.mubr.f32.mxu0 %v12722_v47  ;;  %v10582_v22 = vld [vmem:[%s11277_s30 + $0x3f0] sm:$0xff] }
 0x22c   : > { %17396 = vst [vmem:[#allocation201_spill] sm:$0xff] %v12733_v6  ;;  %v10341_v55 = vpop.eup %10340  ;;  %8347 = vmatmul.mubr.f32.gmra.mrb[60].mxu1 %v12733_v6 }
 0x22d   : > { %v12736_v43 = vmul.f32 %v10578_v21, %v10341_v55  ;;  %v10343_v42 = vpop.eup %10342 }
 0x22e   : > { %v12741_v52 = vmul.f32 %v10579_v63, %v10343_v42  ;;  %v10581_v42 = vld [vmem:[%s11277_s30 + $0x3f8] sm:$0xff] }
 0x22f   : > { %17397 = vst [vmem:[#allocation202_spill] sm:$0xff] %v12736_v43  ;;  %8267 = vmatmul.mubr.f32.gmra.mrb[60].mxu0 %v12736_v43  ;;  %v12743_v1 = vpop.f32.mrb[8].mxu1 }
 0x230   : > { %17398 = vst [vmem:[#allocation203_spill] sm:$0xff] %v12741_v52  ;;  %v10345_v49 = vpop.eup %10344  ;;  %v12745_v47 = vpop.f32.mrb[8].mxu0  ;;  %8349 = vmatprep.mubr.f32.mxu1 %v12741_v52 }
 0x231   : > { %v12747_v53 = vpop.f32.mrb[9].mxu1  ;;  %v12750_v55 = vmul.f32 %v10580_v9, %v10345_v49  ;;  %v10347_v21 = vpop.eup %10346 }
 0x232   : > { %v12755_v6 = vpop.f32.mrb[9].mxu0  ;;  %v12761_v16 = vmul.f32 %v10581_v42, %v10347_v21  ;;  %v17404_v21 = vld [vmem:[#allocation73_spill] sm:$0xff] }
 0x233   : > { %17399 = vst [vmem:[#allocation204_spill] sm:$0xff] %v12750_v55  ;;  %8269 = vmatprep.mubr.f32.mxu0 %v12750_v55 }
 0x234   : > { %17400 = vst [vmem:[#allocation205_spill] sm:$0xff] %v12761_v16  ;;  %v10349_v46 = vpop.eup %10348  ;;  %8350 = vmatmul.mubr.f32.gmra.mrb[62].mxu1 %v12761_v16 }
 0x235   : > { %v12764_v49 = vmul.f32 %v10582_v22, %v10349_v46  ;;  %8464 = vmatprep.mubr.f32.mxu1 %v11853_v5  ;;  %v17408_v46 = vld [vmem:[#allocation77_spill] sm:$0xff] }
 0x237   : > { %17401 = vst [vmem:[#allocation206_spill] sm:$0xff] %v12764_v49  ;;  %8270 = vmatmul.mubr.f32.gmra.mrb[62].mxu0 %v12764_v49  ;;  %v12770_v9 = vpop.f32.mrb[10].mxu1  ;;  %v17406_v49 = vld [vmem:[#allocation75_spill] sm:$0xff] }
 0x238   : > { %8384 = vmatprep.mubr.f32.mxu0 %v11837_v17  ;;  %17402 = vst [vmem:[#allocation207_spill] sm:$0xff] %v12770_v9  ;;  %v12772_v63 = vpop.f32.mrb[10].mxu0  ;;  %v12774_v43 = vpop.f32.mrb[11].mxu1  ;;  %8465 = vmatmul.mubr.f32.vlgmr.msra.gmra.mrb[64].mxu1 %v17404_v21  ;;  %v17405_v17 = vld [vmem:[#allocation71_spill] sm:$0xff]  ;;  %v17407_v21 = vld [vmem:[#allocation76_spill] sm:$0xff] }
 0x239   : > { %17403 = vst [vmem:[#allocation208_spill] sm:$0xff] %v12774_v43  ;;  %v12779_v22 = vpop.f32.mrb[11].mxu0  ;;  %9539 = vmatpush3.bf16.xpose.msra.mxu1 %v12130_v57  ;;  %8467 = vmatprep.mubr.f32.mxu1 %v11866_v10  ;;  %v17409_v10 = vld [vmem:[#allocation79_spill] sm:$0xff]  ;;  %v17412_v43 = vld [vmem:[#allocation80_spill] sm:$0xff] }
 0x23a   : > { %9541 = vmatprep.subr.bf16.mxu1 %v12354_v38 }
 0x23b   : > { %8385 = vmatmul.mubr.f32.vlgmr.msra.gmra.mrb[64].mxu0 %v17405_v17 }
 0x23c   : > { %9507 = vmatpush3.bf16.xpose.msra.mxu0 %v12130_v57  ;;  %8387 = vmatprep.mubr.f32.mxu0 %v17406_v49  ;;  %v17416_v57 = vld [vmem:[#allocation85_spill] sm:$0xff] }
 0x23d   : > { %8468 = vmatmul.mubr.f32.gmra.mrb[66].mxu1 %v17407_v21  ;;  %9509 = vmatprep.subr.bf16.mxu0 %v12354_v38 }
 0x23e   : > { %8470 = vmatprep.mubr.f32.mxu1 %v11902_v7  ;;  %v17414_v7 = vld [vmem:[#allocation83_spill] sm:$0xff] }
 0x23f   : > { %8388 = vmatmul.mubr.f32.gmra.mrb[66].mxu0 %v17408_v46  ;;  %v12794_v9 = vpop.f32.mrb[12].mxu1  ;;  %v17413_v46 = vld [vmem:[#allocation81_spill] sm:$0xff] }
 0x240   : > { %8390 = vmatprep.mubr.f32.mxu0 %v17409_v10  ;;  %17410 = vst [vmem:[#allocation75_spill] sm:$0xff] %v12794_v9  ;;  %v12796_v42 = vpop.f32.mrb[12].mxu0  ;;  %v12798_v17 = vpop.f32.mrb[13].mxu1 }
 0x241   : > { %17411 = vst [vmem:[#allocation209_spill] sm:$0xff] %v12798_v17  ;;  %8471 = vmatmul.mubr.f32.gmra.mrb[68].mxu1 %v17412_v43  ;;  %v12803_v21 = vpop.f32.mrb[13].mxu0  ;;  %v17415_v43 = vld [vmem:[#allocation84_spill] sm:$0xff] }
 0x242   : > { %9543 = vmatpush3.bf16.xpose.msra.mxu1 %v12354_v38  ;;  %8473 = vmatprep.mubr.f32.mxu1 %v11938_v14  ;;  %v17417_v14 = vld [vmem:[#allocation87_spill] sm:$0xff]  ;;  %v17421_v17 = vld [vmem:[#allocation88_spill] sm:$0xff] }
 0x243   : > { %8391 = vmatmul.mubr.f32.gmra.mrb[68].mxu0 %v17413_v46  ;;  %9545 = vmatprep.subr.bf16.mxu1 %v12384_v27 }
 0x244   : > { %9511 = vmatpush3.bf16.xpose.msra.mxu0 %v12354_v38  ;;  %8393 = vmatprep.mubr.f32.mxu0 %v17414_v7  ;;  %v17424_v38 = vld [vmem:[#allocation98_spill] sm:$0xff] }
 0x245   : > { %8474 = vmatmul.mubr.f32.gmra.mrb[70].mxu1 %v17415_v43  ;;  %9513 = vmatprep.subr.bf16.mxu0 %v12384_v27 }
 0x246   : > { %8476 = vmatprep.mubr.f32.mxu1 %v11974_v25 }
 0x247   : > { %8394 = vmatmul.mubr.f32.gmra.mrb[70].mxu0 %v17416_v57  ;;  %v12818_v9 = vpop.f32.mrb[14].mxu1  ;;  %v17422_v57 = vld [vmem:[#allocation89_spill] sm:$0xff] }
 0x248   : > { %8396 = vmatprep.mubr.f32.mxu0 %v17417_v14  ;;  %17418 = vst [vmem:[#allocation83_spill] sm:$0xff] %v12818_v9  ;;  %v12820_v10 = vpop.f32.mrb[14].mxu0  ;;  %v12822_v46 = vpop.f32.mrb[15].mxu1  ;;  %v17425_v9 = vld [vmem:[#allocation95_spill] sm:$0xff] }
 0x249   : > { %17419 = vst [vmem:[#allocation210_spill] sm:$0xff] %v12820_v10  ;;  %17420 = vst [vmem:[#allocation211_spill] sm:$0xff] %v12822_v46  ;;  %8477 = vmatmul.mubr.f32.gmra.mrb[72].mxu1 %v17421_v17  ;;  %v12827_v43 = vpop.f32.mrb[15].mxu0  ;;  %v17423_v17 = vld [vmem:[#allocation29_spill] sm:$0xff]  ;;  %v17430_v46 = vld [vmem:[#allocation102_spill] sm:$0xff] }
 0x24a   : > { %9547 = vmatpush3.bf16.xpose.msra.mxu1 %v12384_v27  ;;  %8479 = vmatprep.mubr.f32.mxu1 %v12010_v33  ;;  %v17426_v33 = vld [vmem:[#allocation99_spill] sm:$0xff] }
 0x24b   : > { %8397 = vmatmul.mubr.f32.gmra.mrb[72].mxu0 %v17422_v57  ;;  %9549 = vmatprep.subr.bf16.mxu1 %v12414_v61 }
 0x24c   : > { %9515 = vmatpush3.bf16.xpose.msra.mxu0 %v12384_v27  ;;  %8399 = vmatprep.mubr.f32.mxu0 %v12015_v18  ;;  %v17433_v18 = vld [vmem:[#allocation107_spill] sm:$0xff]  ;;  %v17435_v27 = vld [vmem:[#allocation114_spill] sm:$0xff] }
 0x24d   : > { %8480 = vmatmul.mubr.f32.gmra.mrb[74].mxu1 %v17423_v17  ;;  %9517 = vmatprep.subr.bf16.mxu0 %v12414_v61 }
 0x24e   : > { %8482 = vmatprep.mubr.f32.mxu1 %v17424_v38  ;;  %v17431_v38 = vld [vmem:[#allocation106_spill] sm:$0xff] }
 0x24f   : > { %8400 = vmatmul.mubr.f32.gmra.mrb[74].mxu0 %v17425_v9  ;;  %v12842_v10 = vpop.f32.mrb[16].mxu1  ;;  %v17432_v9 = vld [vmem:[#allocation103_spill] sm:$0xff] }
 0x250   : > { %8402 = vmatprep.mubr.f32.mxu0 %v17426_v33  ;;  %17427 = vst [vmem:[#allocation212_spill] sm:$0xff] %v12842_v10  ;;  %v12844_v14 = vpop.f32.mrb[16].mxu0  ;;  %v12846_v57 = vpop.f32.mrb[17].mxu1  ;;  %v17436_v10 = vld [vmem:[#allocation111_spill] sm:$0xff] }
 0x251   : > { %17428 = vst [vmem:[#allocation213_spill] sm:$0xff] %v12844_v14  ;;  %17429 = vst [vmem:[#allocation214_spill] sm:$0xff] %v12846_v57  ;;  %8483 = vmatmul.mubr.f32.gmra.mrb[76].mxu1 %v17430_v46  ;;  %v12851_v17 = vpop.f32.mrb[17].mxu0  ;;  %v17434_v46 = vld [vmem:[#allocation110_spill] sm:$0xff]  ;;  %v17441_v57 = vld [vmem:[#allocation119_spill] sm:$0xff] }
 0x252   : > { %9551 = vmatpush3.bf16.xpose.msra.mxu1 %v12414_v61  ;;  %8485 = vmatprep.mubr.f32.mxu1 %v17431_v38  ;;  %v17437_v38 = vld [vmem:[#allocation116_spill] sm:$0xff] }
 0x253   : > { %8403 = vmatmul.mubr.f32.gmra.mrb[76].mxu0 %v17432_v9  ;;  %9553 = vmatprep.subr.bf16.mxu1 %v12444_v58 }
 0x254   : > { %9519 = vmatpush3.bf16.xpose.msra.mxu0 %v12414_v61  ;;  %8405 = vmatprep.mubr.f32.mxu0 %v17433_v18  ;;  %v17444_v18 = vld [vmem:[#allocation124_spill] sm:$0xff]  ;;  %v17446_v61 = vld [vmem:[#allocation131_spill] sm:$0xff] }
 0x255   : > { %8486 = vmatmul.mubr.f32.gmra.mrb[78].mxu1 %v17434_v46  ;;  %9521 = vmatprep.subr.bf16.mxu0 %v12444_v58 }
 0x256   : > { %8488 = vmatprep.mubr.f32.mxu1 %v17435_v27  ;;  %v17442_v27 = vld [vmem:[#allocation123_spill] sm:$0xff] }
 0x257   : > { %8406 = vmatmul.mubr.f32.gmra.mrb[78].mxu0 %v17436_v10  ;;  %v12866_v14 = vpop.f32.mrb[18].mxu1  ;;  %v17443_v10 = vld [vmem:[#allocation120_spill] sm:$0xff] }
 0x258   : > { %8408 = vmatprep.mubr.f32.mxu0 %v17437_v38  ;;  %17438 = vst [vmem:[#allocation215_spill] sm:$0xff] %v12866_v14  ;;  %v12868_v33 = vpop.f32.mrb[18].mxu0  ;;  %v12870_v9 = vpop.f32.mrb[19].mxu1  ;;  %v17447_v14 = vld [vmem:[#allocation128_spill] sm:$0xff] }
 0x259   : > { %17439 = vst [vmem:[#allocation216_spill] sm:$0xff] %v12868_v33  ;;  %17440 = vst [vmem:[#allocation217_spill] sm:$0xff] %v12870_v9  ;;  %8489 = vmatmul.mubr.f32.gmra.mrb[80].mxu1 %v17441_v57  ;;  %v12875_v46 = vpop.f32.mrb[19].mxu0  ;;  %v17445_v57 = vld [vmem:[#allocation127_spill] sm:$0xff] }
 0x25a   : > { %9555 = vmatpush3.bf16.xpose.msra.mxu1 %v12444_v58  ;;  %8491 = vmatprep.mubr.f32.mxu1 %v17442_v27  ;;  %v17448_v27 = vld [vmem:[#allocation132_spill] sm:$0xff]  ;;  %v17449_v9 = vld [vmem:[#allocation135_spill] sm:$0xff] }
 0x25b   : > { %8409 = vmatmul.mubr.f32.gmra.mrb[80].mxu0 %v17443_v10  ;;  %9557 = vmatprep.subr.bf16.mxu1 %v12474_v0 }
 0x25c   : > { %9523 = vmatpush3.bf16.xpose.msra.mxu0 %v12444_v58  ;;  %8411 = vmatprep.mubr.f32.mxu0 %v17444_v18  ;;  %v17452_v18 = vld [vmem:[#allocation140_spill] sm:$0xff] }
 0x25d   : > { %8492 = vmatmul.mubr.f32.gmra.mrb[82].mxu1 %v17445_v57  ;;  %9525 = vmatprep.subr.bf16.mxu0 %v12474_v0 }
 0x25e   : > { %8494 = vmatprep.mubr.f32.mxu1 %v17446_v61  ;;  %v17450_v61 = vld [vmem:[#allocation139_spill] sm:$0xff] }
 0x25f   : > { %8412 = vmatmul.mubr.f32.gmra.mrb[82].mxu0 %v17447_v14  ;;  %v12890_v33 = vpop.f32.mrb[20].mxu1  ;;  %v17451_v14 = vld [vmem:[#allocation136_spill] sm:$0xff] }
 0x260   : > { %8414 = vmatprep.mubr.f32.mxu0 %v17448_v27  ;;  %v12892_v38 = vpop.f32.mrb[20].mxu0  ;;  %v12894_v10 = vpop.f32.mrb[21].mxu1 }
 0x261   : > { %8495 = vmatmul.mubr.f32.gmra.mrb[84].mxu1 %v17449_v9  ;;  %v12899_v57 = vpop.f32.mrb[21].mxu0 }
 0x262   : > { %9559 = vmatpush3.bf16.xpose.msra.mxu1 %v12474_v0  ;;  %8497 = vmatprep.mubr.f32.mxu1 %v17450_v61 }
 0x263   : > { %8415 = vmatmul.mubr.f32.gmra.mrb[84].mxu0 %v17451_v14  ;;  %9561 = vmatprep.subr.bf16.mxu1 %v12500_v30 }
 0x264   : > { %9527 = vmatpush3.bf16.xpose.msra.mxu0 %v12474_v0  ;;  %8417 = vmatprep.mubr.f32.mxu0 %v17452_v18 }
 0x265   : > { %8498 = vmatmul.mubr.f32.gmra.mrb[86].mxu1 %v12236_v50  ;;  %9529 = vmatprep.subr.bf16.mxu0 %v12500_v30 }
 0x266   : > { %8500 = vmatprep.mubr.f32.mxu1 %v12250_v20 }
 0x267   : > { %8418 = vmatmul.mubr.f32.gmra.mrb[86].mxu0 %v12241_v39  ;;  %v12914_v27 = vpop.f32.mrb[22].mxu1  ;;  %v416_v39 = vld [vmem:[%s11287_s28 + $0x30] sm:$0xff] }
 0x268   : > { %8420 = vmatprep.mubr.f32.mxu0 %v12257_v15  ;;  %v12916_v58 = vpop.f32.mrb[22].mxu0  ;;  %v12918_v14 = vpop.f32.mrb[23].mxu1 }
 0x269   : > { %8501 = vmatmul.mubr.f32.gmra.mrb[88].mxu1 %v12262_v2  ;;  %v12923_v50 = vpop.f32.mrb[23].mxu0  ;;  %v412_v2 = vld [vmem:[%s11287_s28 + $0x10] sm:$0xff] }
 0x26a   : > { %9563 = vmatpush3.bf16.xpose.msra.mxu1 %v12500_v30  ;;  %8503 = vmatprep.mubr.f32.mxu1 %v12273_v54  ;;  %v12939_v15 = vpack.c.bf16 %v416_v39, %v412_v2  ;;  %v420_v2 = vld [vmem:[%s11287_s28 + $0x50] sm:$0xff] }
 0x26b   : > { %8421 = vmatmul.mubr.f32.gmra.mrb[88].mxu0 %v12267_v31  ;;  %9565 = vmatprep.subr.bf16.mxu1 %v12526_v13 }
 0x26c   : > { %9531 = vmatpush3.bf16.xpose.msra.mxu0 %v12500_v30  ;;  %8423 = vmatprep.mubr.f32.mxu0 %v12278_v45  ;;  %17453 = vst [vmem:[#allocation218_spill] sm:$0xff] %v12939_v15 }
 0x26d   : > { %8504 = vmatmul.mubr.f32.gmra.mrb[90].mxu1 %v12284_v37  ;;  %9533 = vmatprep.subr.bf16.mxu0 %v12526_v13  ;;  %v17454_v37 = vld [vmem:[#allocation156_spill] sm:$0xff] }
 0x26e   : > { %8506 = vmatprep.mubr.f32.mxu1 %v12295_v28 }
 0x26f   : > { %8424 = vmatmul.mubr.f32.gmra.mrb[90].mxu0 %v12289_v19  ;;  %v12942_v0 = vpop.f32.mrb[24].mxu1 }
 0x270   : > { %8426 = vmatprep.mubr.f32.mxu0 %v12300_v41  ;;  %v12944_v30 = vpop.f32.mrb[24].mxu0  ;;  %v12946_v45 = vpop.f32.mrb[25].mxu1 }
 0x271   : > { %8507 = vmatmul.mubr.f32.gmra.mrb[92].mxu1 %v12306_v59  ;;  %v12951_v28 = vpop.f32.mrb[25].mxu0  ;;  %v424_v59 = vld [vmem:[%s11287_s28 + $0x70] sm:$0xff] }
 0x272   : > { %9567 = vmatpush3.bf16.xpose.msra.mxu1 %v12526_v13  ;;  %8509 = vmatprep.mubr.f32.mxu1 %v12317_v24  ;;  %v12967_v39 = vpack.c.bf16 %v424_v59, %v420_v2  ;;  %v17459_v2 = vld [vmem:[#allocation159_spill] sm:$0xff] }
 0x273   : > { %8427 = vmatmul.mubr.f32.gmra.mrb[92].mxu0 %v12311_v40  ;;  %9601 = vmatprep.subr.bf16.mxu1 %v12939_v15 }
 0x274   : > { %9535 = vmatpush3.bf16.xpose.msra.mxu0 %v12526_v13  ;;  %8429 = vmatprep.mubr.f32.mxu0 %v12322_v32  ;;  %17455 = vst [vmem:[#allocation219_spill] sm:$0xff] %v12967_v39 }
 0x275   : > { %8510 = vmatmul.mubr.f32.gmra.mrb[94].mxu1 %v12328_v48  ;;  %9569 = vmatprep.subr.bf16.mxu0 %v12939_v15  ;;  %v17460_v48 = vld [vmem:[#allocation162_spill] sm:$0xff] }
 0x276   : > { %8624 = vmatprep.mubr.f32.mxu1 %v12339_v11 }
 0x277   : > { %8430 = vmatmul.mubr.f32.gmra.mrb[94].mxu0 %v17454_v37  ;;  %v12970_v40 = vpop.f32.mrb[26].mxu1 }
 0x278   : > { %8544 = vmatprep.mubr.f32.mxu0 %v12344_v44  ;;  %17456 = vst [vmem:[#allocation220_spill] sm:$0xff] %v12970_v40  ;;  %v12972_v13 = vpop.f32.mrb[26].mxu0  ;;  %v12974_v32 = vpop.f32.mrb[27].mxu1  ;;  %v432_v44 = vld [vmem:[%s11287_s28 + $0xb0] sm:$0xff]  ;;  %v17549_v40 = vld [vmem:[#allocation187_spill] sm:$0xff] }
 0x279   : > { %17457 = vst [vmem:[#allocation221_spill] sm:$0xff] %v12974_v32  ;;  %8625 = vmatmul.mubr.f32.vlgmr.msra.gmra.mrb[96].mxu1 %v12352_v29  ;;  %v12979_v11 = vpop.f32.mrb[27].mxu0  ;;  %v428_v29 = vld [vmem:[%s11287_s28 + $0x90] sm:$0xff] }
 0x27a   : > { %17458 = vst [vmem:[#allocation222_spill] sm:$0xff] %v12979_v11  ;;  %9603 = vmatpush3.bf16.xpose.msra.mxu1 %v12939_v15  ;;  %8627 = vmatprep.mubr.f32.mxu1 %v12366_v34  ;;  %v12995_v59 = vpack.c.bf16 %v432_v44, %v428_v29  ;;  %v17466_v29 = vld [vmem:[#allocation165_spill] sm:$0xff]  ;;  %v17494_v34 = vld [vmem:[#allocation179_spill] sm:$0xff] }
 0x27b   : > { %8545 = vmatmul.mubr.f32.vlgmr.msra.gmra.mrb[96].mxu0 %v17459_v2  ;;  %9605 = vmatprep.subr.bf16.mxu1 %v12967_v39 }
 0x27c   : > { %9571 = vmatpush3.bf16.xpose.msra.mxu0 %v12939_v15  ;;  %8547 = vmatprep.mubr.f32.mxu0 %v12373_v4  ;;  %17461 = vst [vmem:[#allocation223_spill] sm:$0xff] %v12995_v59 }
 0x27d   : > { %8628 = vmatmul.mubr.f32.gmra.mrb[98].mxu1 %v12382_v12  ;;  %9573 = vmatprep.subr.bf16.mxu0 %v12967_v39  ;;  %v17467_v12 = vld [vmem:[#allocation38_spill] sm:$0xff] }
 0x27e   : > { %8630 = vmatprep.mubr.f32.mxu1 %v12396_v26 }
 0x27f   : > { %8548 = vmatmul.mubr.f32.gmra.mrb[98].mxu0 %v17460_v48  ;;  %v12998_v2 = vpop.f32.mrb[28].mxu1 }
 0x280   : > { %8550 = vmatprep.mubr.f32.mxu0 %v12403_v56  ;;  %17462 = vst [vmem:[#allocation224_spill] sm:$0xff] %v12998_v2  ;;  %v13000_v32 = vpop.f32.mrb[28].mxu0  ;;  %v13002_v4 = vpop.f32.mrb[29].mxu1  ;;  %v440_v56 = vld [vmem:[%s11287_s28 + $0xf0] sm:$0xff]  ;;  %v17468_v2 = vld [vmem:[#allocation168_spill] sm:$0xff] }
 0x281   : > { %17463 = vst [vmem:[#allocation225_spill] sm:$0xff] %v13000_v32  ;;  %17464 = vst [vmem:[#allocation226_spill] sm:$0xff] %v13002_v4  ;;  %8631 = vmatmul.mubr.f32.gmra.mrb[100].mxu1 %v12412_v3  ;;  %v13007_v26 = vpop.f32.mrb[29].mxu0  ;;  %v436_v3 = vld [vmem:[%s11287_s28 + $0xd0] sm:$0xff]  ;;  %v17470_v4 = vld [vmem:[#allocation169_spill] sm:$0xff] }
 0x282   : > { %17465 = vst [vmem:[#allocation227_spill] sm:$0xff] %v13007_v26  ;;  %9607 = vmatpush3.bf16.xpose.msra.mxu1 %v12967_v39  ;;  %8633 = vmatprep.mubr.f32.mxu1 %v12426_v60  ;;  %v13023_v44 = vpack.c.bf16 %v440_v56, %v436_v3  ;;  %v17474_v32 = vld [vmem:[#allocation39_spill] sm:$0xff]  ;;  %v17476_v56 = vld [vmem:[#allocation40_spill] sm:$0xff]  ;;  %v448_v60 = vld [vmem:[%s11287_s28 + $0x130] sm:$0xff] }
 0x283   : > { %8551 = vmatmul.mubr.f32.gmra.mrb[100].mxu0 %v17466_v29  ;;  %9609 = vmatprep.subr.bf16.mxu1 %v12995_v59  ;;  %v17483_v3 = vld [vmem:[#allocation176_spill] sm:$0xff] }
 0x284   : > { %9575 = vmatpush3.bf16.xpose.msra.mxu0 %v12967_v39  ;;  %8553 = vmatprep.mubr.f32.mxu0 %v12433_v36  ;;  %17469 = vst [vmem:[#allocation228_spill] sm:$0xff] %v13023_v44 }
 0x285   : > { %8634 = vmatmul.mubr.f32.gmra.mrb[102].mxu1 %v12442_v23  ;;  %9577 = vmatprep.subr.bf16.mxu0 %v12995_v59  ;;  %v17479_v23 = vld [vmem:[#allocation173_spill] sm:$0xff] }
 0x286   : > { %8636 = vmatprep.mubr.f32.mxu1 %v17467_v12 }
 0x287   : > { %8554 = vmatmul.mubr.f32.gmra.mrb[102].mxu0 %v17468_v2  ;;  %v13026_v26 = vpop.f32.mrb[30].mxu1  ;;  %v17478_v2 = vld [vmem:[#allocation172_spill] sm:$0xff] }
 0x288   : > { %8556 = vmatprep.mubr.f32.mxu0 %v17470_v4  ;;  %17471 = vst [vmem:[#allocation229_spill] sm:$0xff] %v13026_v26  ;;  %v13028_v29 = vpop.f32.mrb[30].mxu0  ;;  %v13030_v36 = vpop.f32.mrb[31].mxu1  ;;  %v17477_v4 = vld [vmem:[#allocation171_spill] sm:$0xff]  ;;  %v17480_v26 = vld [vmem:[#allocation41_spill] sm:$0xff] }
 0x289   : > { %17472 = vst [vmem:[#allocation230_spill] sm:$0xff] %v13028_v29  ;;  %17473 = vst [vmem:[#allocation231_spill] sm:$0xff] %v13030_v36  ;;  %8637 = vmatmul.mubr.f32.gmra.mrb[104].mxu1 %v17474_v32  ;;  %v13035_v12 = vpop.f32.mrb[31].mxu0  ;;  %v444_v32 = vld [vmem:[%s11287_s28 + $0x110] sm:$0xff]  ;;  %v17481_v29 = vld [vmem:[#allocation175_spill] sm:$0xff] }
 0x28a   : > { %17475 = vst [vmem:[#allocation232_spill] sm:$0xff] %v13035_v12  ;;  %9611 = vmatpush3.bf16.xpose.msra.mxu1 %v12995_v59  ;;  %8639 = vmatprep.mubr.f32.mxu1 %v17476_v56  ;;  %v13051_v56 = vpack.c.bf16 %v448_v60, %v444_v32  ;;  %v17490_v32 = vld [vmem:[#allocation42_spill] sm:$0xff]  ;;  %v17491_v60 = vld [vmem:[#allocation67_spill] sm:$0xff] }
 0x28b   : > { %8557 = vmatmul.mubr.f32.gmra.mrb[104].mxu0 %v17477_v4  ;;  %9613 = vmatprep.subr.bf16.mxu1 %v13023_v44  ;;  %v17486_v4 = vld [vmem:[#allocation177_spill] sm:$0xff] }
 0x28c   : > { %9579 = vmatpush3.bf16.xpose.msra.mxu0 %v12995_v59  ;;  %8559 = vmatprep.mubr.f32.mxu0 %v17478_v2  ;;  %17482 = vst [vmem:[#allocation233_spill] sm:$0xff] %v13051_v56 }
 0x28d   : > { %8640 = vmatmul.mubr.f32.gmra.mrb[106].mxu1 %v17479_v23  ;;  %9581 = vmatprep.subr.bf16.mxu0 %v13023_v44  ;;  %v17487_v23 = vld [vmem:[#allocation68_spill] sm:$0xff] }
 0x28e   : > { %8642 = vmatprep.mubr.f32.mxu1 %v17480_v26  ;;  %v17488_v48 = vmax.f32 %v12623_v51, %v17487_v23  ;;  %v456_v23 = vld [vmem:[%s11287_s28 + $0x170] sm:$0xff]  ;;  %v17503_v51 = vld [vmem:[#allocation56_spill] sm:$0xff] }
 0x28f   : > { %8560 = vmatmul.mubr.f32.gmra.mrb[106].mxu0 %v17481_v29  ;;  %v13054_v36 = vpop.f32.mrb[32].mxu1 }
 0x290   : > { %8562 = vmatprep.mubr.f32.mxu0 %v17483_v3  ;;  %17484 = vst [vmem:[#allocation234_spill] sm:$0xff] %v13054_v36  ;;  %v8226_v12 = vpop.f32.mrb[32].mxu0  ;;  %v13056_v2 = vpop.f32.mrb[33].mxu1  ;;  %v17492_v3 = vmax.f32 %v12626_v62, %v17491_v60  ;;  %v17498_v62 = vld [vmem:[#allocation51_spill] sm:$0xff]  ;;  %v17500_v60 = vld [vmem:[#allocation53_spill] sm:$0xff] }
 0x291   : > { %17485 = vst [vmem:[#allocation235_spill] sm:$0xff] %v13056_v2  ;;  %8643 = vmatmul.mubr.f32.gmra.mrb[108].mxu1 %v17486_v4  ;;  %v13062_v11 = vmax.f32 %v17488_v48, %v8226_v12  ;;  %v1790_v26 = vpop.f32.mrb[33].mxu0  ;;  %v17495_v48 = vld [vmem:[#allocation180_spill] sm:$0xff]  ;;  %v452_v12 = vld [vmem:[%s11287_s28 + $0x150] sm:$0xff]  ;;  %v17504_v2 = vld [vmem:[#allocation69_spill] sm:$0xff] }
 0x292   : > { %9615 = vmatpush3.bf16.xpose.msra.mxu1 %v13023_v44  ;;  %8645 = vmatprep.mubr.f32.mxu1 %v17490_v32  ;;  %v13069_v29 = vmax.f32 %v17492_v3, %v1790_v26  ;;  %v17496_v32 = vld [vmem:[#allocation52_spill] sm:$0xff]  ;;  %v17497_v26 = vld [vmem:[#allocation54_spill] sm:$0xff]  ;;  %v13085_v3 = vpack.c.bf16 %v456_v23, %v452_v12 }
 0x293   : > { %17489 = vst [vmem:[#allocation68_spill] sm:$0xff] %v13062_v11  ;;  %8563 = vmatmul.mubr.f32.gmra.mrb[108].mxu0 %v17494_v34  ;;  %9617 = vmatprep.subr.bf16.mxu1 %v13051_v56  ;;  %v17507_v12 = vld [vmem:[#allocation58_spill] sm:$0xff]  ;;  %v17508_v23 = vld [vmem:[#allocation184_spill] sm:$0xff]  ;;  %v17512_v34 = vld [vmem:[#allocation55_spill] sm:$0xff] }
 0x294   : > { %17493 = vst [vmem:[#allocation67_spill] sm:$0xff] %v13069_v29  ;;  %9583 = vmatpush3.bf16.xpose.msra.mxu0 %v13023_v44  ;;  %8565 = vmatprep.mubr.f32.mxu0 %v17495_v48  ;;  %17499 = vst [vmem:[#allocation236_spill] sm:$0xff] %v13085_v3  ;;  %v17505_v29 = vmax.f32 %v12664_v35, %v17504_v2  ;;  %v460_v35 = vld [vmem:[%s11287_s28 + $0x190] sm:$0xff] }
 0x295   : > { %8646 = vmatmul.mubr.f32.gmra.mrb[110].mxu1 %v17496_v32  ;;  %9585 = vmatprep.subr.bf16.mxu0 %v13051_v56  ;;  %v464_v2 = vld [vmem:[%s11287_s28 + $0x1b0] sm:$0xff] }
 0x296   : > { %8648 = vmatprep.mubr.f32.mxu1 %v17497_v26 }
 0x297   : > { %8566 = vmatmul.mubr.f32.gmra.mrb[110].mxu0 %v17498_v62  ;;  %v13088_v4 = vpop.f32.mrb[34].mxu1 }
 0x298   : > { %8568 = vmatprep.mubr.f32.mxu0 %v17500_v60  ;;  %17501 = vst [vmem:[#allocation237_spill] sm:$0xff] %v13088_v4  ;;  %v8229_v36 = vpop.f32.mrb[34].mxu0  ;;  %v13090_v11 = vpop.f32.mrb[35].mxu1  ;;  %v17509_v60 = vld [vmem:[#allocation185_spill] sm:$0xff] }
 0x299   : > { %17502 = vst [vmem:[#allocation238_spill] sm:$0xff] %v13090_v11  ;;  %8649 = vmatmul.mubr.f32.gmra.mrb[112].mxu1 %v17503_v51  ;;  %v13096_v32 = vmax.f32 %v17505_v29, %v8229_v36  ;;  %v1800_v26 = vpop.f32.mrb[35].mxu0  ;;  %v17510_v62 = vmax.f32 %v17508_v23, %v17509_v60  ;;  %v17513_v36 = vld [vmem:[#allocation57_spill] sm:$0xff]  ;;  %v13119_v60 = vpack.c.bf16 %v464_v2, %v460_v35  ;;  %v17521_v29 = vld [vmem:[#allocation64_spill] sm:$0xff]  ;;  %v17522_v11 = vld [vmem:[#allocation191_spill] sm:$0xff] }
 0x29a   : > { %9619 = vmatpush3.bf16.xpose.msra.mxu1 %v13051_v56  ;;  %8651 = vmatprep.mubr.f32.mxu1 %v17507_v12  ;;  %v17514_v12 = vld [vmem:[#allocation60_spill] sm:$0xff]  ;;  %v17518_v23 = vld [vmem:[#allocation61_spill] sm:$0xff]  ;;  %v17526_v35 = vld [vmem:[#allocation66_spill] sm:$0xff] }
 0x29b   : > { %17506 = vst [vmem:[#allocation69_spill] sm:$0xff] %v13096_v32  ;;  %v13103_v48 = vmax.f32 %v17510_v62, %v1800_v26  ;;  %8569 = vmatmul.mubr.f32.gmra.mrb[112].mxu0 %v17512_v34  ;;  %9621 = vmatprep.subr.bf16.mxu1 %v13085_v3  ;;  %v17515_v26 = vld [vmem:[#allocation62_spill] sm:$0xff]  ;;  %v17516_v62 = vld [vmem:[#allocation59_spill] sm:$0xff]  ;;  %17517 = vst [vmem:[#allocation185_spill] sm:$0xff] %v13119_v60 }
 0x29c   : > { %9587 = vmatpush3.bf16.xpose.msra.mxu0 %v13051_v56  ;;  %8571 = vmatprep.mubr.f32.mxu0 %v17513_v36  ;;  %v17527_v2 = vld [vmem:[#allocation192_spill] sm:$0xff]  ;;  %v17530_v34 = vld [vmem:[#allocation63_spill] sm:$0xff] }
 0x29d   : > { %17511 = vst [vmem:[#allocation184_spill] sm:$0xff] %v13103_v48  ;;  %8652 = vmatmul.mubr.f32.gmra.mrb[114].mxu1 %v17514_v12  ;;  %9589 = vmatprep.subr.bf16.mxu0 %v13085_v3  ;;  %v17523_v48 = vld [vmem:[#allocation189_spill] sm:$0xff] }
 0x29e   : > { %8654 = vmatprep.mubr.f32.mxu1 %v17515_v26  ;;  %v17524_v12 = vmax.f32 %v17522_v11, %v17523_v48  ;;  %v17531_v11 = vld [vmem:[#allocation65_spill] sm:$0xff]  ;;  %v472_v48 = vld [vmem:[%s11287_s28 + $0x1f0] sm:$0xff] }
 0x29f   : > { %8572 = vmatmul.mubr.f32.gmra.mrb[114].mxu0 %v17516_v62  ;;  %v13122_v51 = vpop.f32.mrb[36].mxu1 }
 0x2a0   : > { %8574 = vmatprep.mubr.f32.mxu0 %v17518_v23  ;;  %17519 = vst [vmem:[#allocation239_spill] sm:$0xff] %v13122_v51  ;;  %v8232_v4 = vpop.f32.mrb[36].mxu0  ;;  %v13124_v32 = vpop.f32.mrb[37].mxu1  ;;  %v17528_v23 = vmax.f32 %v12697_v8, %v17527_v2  ;;  %v17533_v8 = vld [vmem:[#allocation70_spill] sm:$0xff]  ;;  %v17536_v2 = vld [vmem:[#allocation183_spill] sm:$0xff] }
 0x2a1   : > { %17520 = vst [vmem:[#allocation240_spill] sm:$0xff] %v13124_v32  ;;  %8655 = vmatmul.mubr.f32.gmra.mrb[116].mxu1 %v17521_v29  ;;  %v13130_v36 = vmax.f32 %v17524_v12, %v8232_v4  ;;  %v1810_v26 = vpop.f32.mrb[37].mxu0  ;;  %v468_v4 = vld [vmem:[%s11287_s28 + $0x1d0] sm:$0xff]  ;;  %v17540_v12 = vld [vmem:[#allocation197_spill] sm:$0xff]  ;;  %v17541_v32 = vld [vmem:[#allocation196_spill] sm:$0xff] }
 0x2a2   : > { %9623 = vmatpush3.bf16.xpose.msra.mxu1 %v13085_v3  ;;  %8657 = vmatprep.mubr.f32.mxu1 %v17526_v35  ;;  %v13137_v62 = vmax.f32 %v17528_v23, %v1810_v26  ;;  %v17532_v35 = vld [vmem:[#allocation181_spill] sm:$0xff]  ;;  %v17534_v26 = vld [vmem:[#allocation182_spill] sm:$0xff]  ;;  %v13153_v23 = vpack.c.bf16 %v472_v48, %v468_v4  ;;  %v17545_v4 = vld [vmem:[#allocation200_spill] sm:$0xff] }
 0x2a3   : > { %17525 = vst [vmem:[#allocation191_spill] sm:$0xff] %v13130_v36  ;;  %8575 = vmatmul.mubr.f32.gmra.mrb[116].mxu0 %v17530_v34  ;;  %9625 = vmatprep.subr.bf16.mxu1 %v13119_v60  ;;  %v17546_v48 = vld [vmem:[#allocation198_spill] sm:$0xff] }
 0x2a4   : > { %17529 = vst [vmem:[#allocation189_spill] sm:$0xff] %v13137_v62  ;;  %9591 = vmatpush3.bf16.xpose.msra.mxu0 %v13085_v3  ;;  %8577 = vmatprep.mubr.f32.mxu0 %v17531_v11  ;;  %17535 = vst [vmem:[#allocation192_spill] sm:$0xff] %v13153_v23  ;;  %v17539_v11 = vld [vmem:[#allocation186_spill] sm:$0xff]  ;;  %v17542_v62 = vmax.f32 %v17540_v12, %v17541_v32 }
 0x2a5   : > { %8658 = vmatmul.mubr.f32.gmra.mrb[118].mxu1 %v17532_v35  ;;  %9593 = vmatprep.subr.bf16.mxu0 %v13119_v60  ;;  %v17550_v32 = vld [vmem:[#allocation190_spill] sm:$0xff] }
 0x2a6   : > { %8660 = vmatprep.mubr.f32.mxu1 %v17533_v8  ;;  %v17553_v12 = vld [vmem:[#allocation194_spill] sm:$0xff] }
 0x2a7   : > { %8578 = vmatmul.mubr.f32.gmra.mrb[118].mxu0 %v17534_v26  ;;  %v13156_v29 = vpop.f32.mrb[38].mxu1  ;;  %v17544_v26 = vld [vmem:[#allocation188_spill] sm:$0xff] }
 0x2a8   : > { %8580 = vmatprep.mubr.f32.mxu0 %v17536_v2  ;;  %17537 = vst [vmem:[#allocation241_spill] sm:$0xff] %v13156_v29  ;;  %v8235_v51 = vpop.f32.mrb[38].mxu0  ;;  %v13158_v36 = vpop.f32.mrb[39].mxu1  ;;  %v17547_v2 = vmax.f32 %v17545_v4, %v17546_v48  ;;  %v17557_v29 = vld [vmem:[#allocation201_spill] sm:$0xff] }
 0x2a9   : > { %17538 = vst [vmem:[#allocation242_spill] sm:$0xff] %v13158_v36  ;;  %8661 = vmatmul.mubr.f32.gmra.mrb[120].mxu1 %v17539_v11  ;;  %v13164_v35 = vmax.f32 %v17542_v62, %v8235_v51  ;;  %v1820_v34 = vpop.f32.mrb[39].mxu0  ;;  %v17551_v62 = vld [vmem:[#allocation193_spill] sm:$0xff]  ;;  %v17558_v51 = vmax.f32 %v12745_v47, %v12743_v1  ;;  %v17564_v47 = vld [vmem:[#allocation72_spill] sm:$0xff] }
 0x2aa   : > { %9627 = vmatpush3.bf16.xpose.msra.mxu1 %v13119_v60  ;;  %8663 = vmatprep.mubr.f32.mxu1 %v17544_v26  ;;  %v13171_v8 = vmax.f32 %v17547_v2, %v1820_v34  ;;  %v17552_v34 = vld [vmem:[#allocation195_spill] sm:$0xff] }
 0x2ab   : > { %17543 = vst [vmem:[#allocation197_spill] sm:$0xff] %v13164_v35  ;;  %8581 = vmatmul.mubr.f32.gmra.mrb[120].mxu0 %v17549_v40  ;;  %9629 = vmatprep.subr.bf16.mxu1 %v13153_v23  ;;  %v17554_v2 = vld [vmem:[#allocation199_spill] sm:$0xff]  ;;  %v17560_v35 = vmax.f32 %v12755_v6, %v12747_v53  ;;  %v17563_v6 = vld [vmem:[#allocation206_spill] sm:$0xff] }
 0x2ac   : > { %17548 = vst [vmem:[#allocation196_spill] sm:$0xff] %v13171_v8  ;;  %9595 = vmatpush3.bf16.xpose.msra.mxu0 %v13119_v60  ;;  %8583 = vmatprep.mubr.f32.mxu0 %v17550_v32 }
 0x2ad   : > { %8664 = vmatmul.mubr.f32.gmra.mrb[122].mxu1 %v17551_v62  ;;  %9597 = vmatprep.subr.bf16.mxu0 %v13153_v23 }
 0x2ae   : > { %8666 = vmatprep.mubr.f32.mxu1 %v17552_v34 }
 0x2af   : > { %8584 = vmatmul.mubr.f32.gmra.mrb[122].mxu0 %v17553_v12  ;;  %v13186_v4 = vpop.f32.mrb[40].mxu1  ;;  %v17562_v12 = vld [vmem:[#allocation202_spill] sm:$0xff] }
 0x2b0   : > { %8586 = vmatprep.mubr.f32.mxu0 %v17554_v2  ;;  %17555 = vst [vmem:[#allocation200_spill] sm:$0xff] %v13186_v4  ;;  %v8238_v48 = vpop.f32.mrb[40].mxu0  ;;  %v13188_v11 = vpop.f32.mrb[41].mxu1  ;;  %v17572_v4 = vld [vmem:[#allocation208_spill] sm:$0xff] }
 0x2b1   : > { %17556 = vst [vmem:[#allocation198_spill] sm:$0xff] %v13188_v11  ;;  %8667 = vmatmul.mubr.f32.gmra.mrb[124].mxu1 %v17557_v29  ;;  %v13194_v36 = vmax.f32 %v17558_v51, %v8238_v48  ;;  %v1830_v8 = vpop.f32.mrb[41].mxu0  ;;  %v17567_v51 = vld [vmem:[#allocation73_spill] sm:$0xff]  ;;  %v17568_v48 = vld [vmem:[#allocation207_spill] sm:$0xff] }
 0x2b2   : > { %9631 = vmatpush3.bf16.xpose.msra.mxu1 %v13153_v23  ;;  %8669 = vmatprep.mubr.f32.mxu1 %v12741_v52  ;;  %v13201_v2 = vmax.f32 %v17560_v35, %v1830_v8  ;;  %v17569_v1 = vmax.f32 %v12772_v63, %v17568_v48 }
 0x2b3   : > { %17559 = vst [vmem:[#allocation243_spill] sm:$0xff] %v13194_v36  ;;  %8587 = vmatmul.mubr.f32.gmra.mrb[124].mxu0 %v17562_v12  ;;  %9665 = vmatprep.subr.bf16.mxu1 %v12939_v15  ;;  %v17573_v36 = vmax.f32 %v12779_v22, %v17572_v4  ;;  %v17577_v22 = vld [vmem:[#allocation78_spill] sm:$0xff] }
 0x2b4   : > { %17561 = vst [vmem:[#allocation244_spill] sm:$0xff] %v13201_v2  ;;  %9599 = vmatpush3.bf16.xpose.msra.mxu0 %v13153_v23  ;;  %8589 = vmatprep.mubr.f32.mxu0 %v12750_v55  ;;  %v17571_v2 = vld [vmem:[#allocation74_spill] sm:$0xff] }
 0x2b5   : > { %8670 = vmatmul.mubr.f32.gmra.mrb[126].mxu1 %v12761_v16  ;;  %9633 = vmatprep.subr.bf16.mxu0 %v12939_v15 }
 0x2b6   : > { %8784 = vmatprep.mubr.f32.mxu1 %v11853_v5 }
 0x2b7   : > { %8590 = vmatmul.mubr.f32.gmra.mrb[126].mxu0 %v17563_v6  ;;  %v13216_v53 = vpop.f32.mrb[42].mxu1  ;;  %v17575_v6 = vld [vmem:[#allocation71_spill] sm:$0xff] }
 0x2b8   : > { %8704 = vmatprep.mubr.f32.mxu0 %v17564_v47  ;;  %17565 = vst [vmem:[#allocation245_spill] sm:$0xff] %v13216_v53  ;;  %v8241_v35 = vpop.f32.mrb[42].mxu0  ;;  %v13218_v8 = vpop.f32.mrb[43].mxu1  ;;  %v17586_v53 = vld [vmem:[#allocation82_spill] sm:$0xff] }
 0x2b9   : > { %17566 = vst [vmem:[#allocation246_spill] sm:$0xff] %v13218_v8  ;;  %8785 = vmatmul.mubr.f32.vlgmr.msra.gmra.mrb[128].mxu1 %v17567_v51  ;;  %v13224_v29 = vmax.f32 %v17569_v1, %v8241_v35  ;;  %v1840_v11 = vpop.f32.mrb[43].mxu0  ;;  %v17576_v1 = vld [vmem:[#allocation76_spill] sm:$0xff] }
 0x2ba   : > { %9667 = vmatpush3.bf16.xpose.msra.mxu1 %v12939_v15  ;;  %8787 = vmatprep.mubr.f32.mxu1 %v17571_v2  ;;  %v13231_v47 = vmax.f32 %v17573_v36, %v1840_v11  ;;  %v17578_v36 = vld [vmem:[#allocation77_spill] sm:$0xff]  ;;  %v17579_v11 = vld [vmem:[#allocation79_spill] sm:$0xff]  ;;  %v17582_v51 = vld [vmem:[#allocation80_spill] sm:$0xff] }
 0x2bb   : > { %17570 = vst [vmem:[#allocation207_spill] sm:$0xff] %v13224_v29  ;;  %8705 = vmatmul.mubr.f32.vlgmr.msra.gmra.mrb[128].mxu0 %v17575_v6  ;;  %9669 = vmatprep.subr.bf16.mxu1 %v12967_v39  ;;  %v17587_v29 = vld [vmem:[#allocation209_spill] sm:$0xff] }
 0x2bc   : > { %17574 = vst [vmem:[#allocation74_spill] sm:$0xff] %v13231_v47  ;;  %9635 = vmatpush3.bf16.xpose.msra.mxu0 %v12939_v15  ;;  %8707 = vmatprep.mubr.f32.mxu0 %v17406_v49  ;;  %v17583_v15 = vld [vmem:[#allocation75_spill] sm:$0xff] }
 0x2bd   : > { %8788 = vmatmul.mubr.f32.gmra.mrb[130].mxu1 %v17576_v1  ;;  %9637 = vmatprep.subr.bf16.mxu0 %v12967_v39  ;;  %v17584_v63 = vmax.f32 %v12796_v42, %v17583_v15  ;;  %v17591_v42 = vld [vmem:[#allocation84_spill] sm:$0xff] }
 0x2be   : > { %8790 = vmatprep.mubr.f32.mxu1 %v17577_v22  ;;  %v17590_v22 = vld [vmem:[#allocation81_spill] sm:$0xff] }
 0x2bf   : > { %8708 = vmatmul.mubr.f32.gmra.mrb[130].mxu0 %v17578_v36  ;;  %v13246_v4 = vpop.f32.mrb[44].mxu1 }
 0x2c0   : > { %8710 = vmatprep.mubr.f32.mxu0 %v17579_v11  ;;  %17580 = vst [vmem:[#allocation208_spill] sm:$0xff] %v13246_v4  ;;  %v8244_v35 = vpop.f32.mrb[44].mxu0  ;;  %v13248_v48 = vpop.f32.mrb[45].mxu1  ;;  %v17588_v11 = vmax.f32 %v12803_v21, %v17587_v29  ;;  %v17592_v21 = vld [vmem:[#allocation85_spill] sm:$0xff]  ;;  %v17593_v29 = vld [vmem:[#allocation87_spill] sm:$0xff]  ;;  %v17601_v4 = vld [vmem:[#allocation92_spill] sm:$0xff] }
 0x2c1   : > { %17581 = vst [vmem:[#allocation71_spill] sm:$0xff] %v13248_v48  ;;  %8791 = vmatmul.mubr.f32.gmra.mrb[132].mxu1 %v17582_v51  ;;  %v13254_v8 = vmax.f32 %v17584_v63, %v8244_v35  ;;  %v1850_v47 = vpop.f32.mrb[45].mxu0  ;;  %v17596_v35 = vld [vmem:[#allocation88_spill] sm:$0xff]  ;;  %v17597_v51 = vld [vmem:[#allocation210_spill] sm:$0xff] }
 0x2c2   : > { %9671 = vmatpush3.bf16.xpose.msra.mxu1 %v12967_v39  ;;  %8793 = vmatprep.mubr.f32.mxu1 %v17586_v53  ;;  %v13261_v36 = vmax.f32 %v17588_v11, %v1850_v47 }
 0x2c3   : > { %17585 = vst [vmem:[#allocation76_spill] sm:$0xff] %v13254_v8  ;;  %8711 = vmatmul.mubr.f32.gmra.mrb[132].mxu0 %v17590_v22  ;;  %9673 = vmatprep.subr.bf16.mxu1 %v12995_v59  ;;  %v17602_v8 = vld [vmem:[#allocation211_spill] sm:$0xff] }
 0x2c4   : > { %17589 = vst [vmem:[#allocation75_spill] sm:$0xff] %v13261_v36  ;;  %9639 = vmatpush3.bf16.xpose.msra.mxu0 %v12967_v39  ;;  %8713 = vmatprep.mubr.f32.mxu0 %v17414_v7  ;;  %v17598_v39 = vld [vmem:[#allocation83_spill] sm:$0xff] }
 0x2c5   : > { %8794 = vmatmul.mubr.f32.gmra.mrb[134].mxu1 %v17591_v42  ;;  %9641 = vmatprep.subr.bf16.mxu0 %v12995_v59  ;;  %v17599_v15 = vmax.f32 %v17597_v51, %v17598_v39  ;;  %v17606_v39 = vld [vmem:[#allocation28_spill] sm:$0xff] }
 0x2c6   : > { %8796 = vmatprep.mubr.f32.mxu1 %v11974_v25  ;;  %v17605_v25 = vld [vmem:[#allocation89_spill] sm:$0xff] }
 0x2c7   : > { %8714 = vmatmul.mubr.f32.gmra.mrb[134].mxu0 %v17592_v21  ;;  %v13276_v47 = vpop.f32.mrb[46].mxu1 }
 0x2c8   : > { %8716 = vmatprep.mubr.f32.mxu0 %v17593_v29  ;;  %17594 = vst [vmem:[#allocation82_spill] sm:$0xff] %v13276_v47  ;;  %v8247_v63 = vpop.f32.mrb[46].mxu0  ;;  %v13278_v11 = vpop.f32.mrb[47].mxu1  ;;  %v17603_v29 = vmax.f32 %v12827_v43, %v17602_v8  ;;  %v17608_v43 = vld [vmem:[#allocation98_spill] sm:$0xff]  ;;  %v17609_v8 = vld [vmem:[#allocation95_spill] sm:$0xff]  ;;  %v17614_v47 = vld [vmem:[#allocation213_spill] sm:$0xff] }
 0x2c9   : > { %17595 = vst [vmem:[#allocation209_spill] sm:$0xff] %v13278_v11  ;;  %8797 = vmatmul.mubr.f32.gmra.mrb[136].mxu1 %v17596_v35  ;;  %v13284_v48 = vmax.f32 %v17599_v15, %v8247_v63  ;;  %v1860_v36 = vpop.f32.mrb[47].mxu0  ;;  %v17607_v15 = vld [vmem:[#allocation29_spill] sm:$0xff] }
 0x2ca   : > { %9675 = vmatpush3.bf16.xpose.msra.mxu1 %v12995_v59  ;;  %8799 = vmatprep.mubr.f32.mxu1 %v17601_v4  ;;  %v13291_v21 = vmax.f32 %v17603_v29, %v1860_v36  ;;  %v17610_v36 = vld [vmem:[#allocation99_spill] sm:$0xff] }
 0x2cb   : > { %17600 = vst [vmem:[#allocation81_spill] sm:$0xff] %v13284_v48  ;;  %8717 = vmatmul.mubr.f32.gmra.mrb[136].mxu0 %v17605_v25  ;;  %9677 = vmatprep.subr.bf16.mxu1 %v13023_v44  ;;  %v17615_v48 = vld [vmem:[#allocation212_spill] sm:$0xff] }
 0x2cc   : > { %17604 = vst [vmem:[#allocation84_spill] sm:$0xff] %v13291_v21  ;;  %9643 = vmatpush3.bf16.xpose.msra.mxu0 %v12995_v59  ;;  %8719 = vmatprep.mubr.f32.mxu0 %v17606_v39  ;;  %v17613_v59 = vld [vmem:[#allocation102_spill] sm:$0xff]  ;;  %v17616_v51 = vmax.f32 %v17614_v47, %v17615_v48  ;;  %v17622_v39 = vld [vmem:[#allocation103_spill] sm:$0xff] }
 0x2cd   : > { %8800 = vmatmul.mubr.f32.gmra.mrb[138].mxu1 %v17607_v15  ;;  %9645 = vmatprep.subr.bf16.mxu0 %v13023_v44  ;;  %v17623_v48 = vld [vmem:[#allocation107_spill] sm:$0xff] }
 0x2ce   : > { %8802 = vmatprep.mubr.f32.mxu1 %v17608_v43  ;;  %v17618_v43 = vld [vmem:[#allocation106_spill] sm:$0xff] }
 0x2cf   : > { %8720 = vmatmul.mubr.f32.gmra.mrb[138].mxu0 %v17609_v8  ;;  %v13306_v29 = vpop.f32.mrb[48].mxu1  ;;  %v17619_v8 = vld [vmem:[#allocation214_spill] sm:$0xff] }
 0x2d0   : > { %8722 = vmatprep.mubr.f32.mxu0 %v17610_v36  ;;  %17611 = vst [vmem:[#allocation210_spill] sm:$0xff] %v13306_v29  ;;  %v8250_v63 = vpop.f32.mrb[48].mxu0  ;;  %v13308_v35 = vpop.f32.mrb[49].mxu1  ;;  %v17620_v36 = vmax.f32 %v12851_v17, %v17619_v8  ;;  %v17625_v17 = vld [vmem:[#allocation114_spill] sm:$0xff]  ;;  %v17627_v8 = vld [vmem:[#allocation116_spill] sm:$0xff] }
 0x2d1   : > { %17612 = vst [vmem:[#allocation83_spill] sm:$0xff] %v13308_v35  ;;  %8803 = vmatmul.mubr.f32.gmra.mrb[140].mxu1 %v17613_v59  ;;  %v13314_v11 = vmax.f32 %v17616_v51, %v8250_v63  ;;  %v1870_v21 = vpop.f32.mrb[49].mxu0  ;;  %v17624_v51 = vld [vmem:[#allocation110_spill] sm:$0xff]  ;;  %v17631_v29 = vld [vmem:[#allocation216_spill] sm:$0xff] }
 0x2d2   : > { %9679 = vmatpush3.bf16.xpose.msra.mxu1 %v13023_v44  ;;  %8805 = vmatprep.mubr.f32.mxu1 %v17618_v43  ;;  %v13321_v15 = vmax.f32 %v17620_v36, %v1870_v21  ;;  %v17626_v21 = vld [vmem:[#allocation111_spill] sm:$0xff] }
 0x2d3   : > { %17617 = vst [vmem:[#allocation92_spill] sm:$0xff] %v13314_v11  ;;  %8723 = vmatmul.mubr.f32.gmra.mrb[140].mxu0 %v17622_v39  ;;  %9681 = vmatprep.subr.bf16.mxu1 %v13051_v56  ;;  %v17632_v11 = vld [vmem:[#allocation215_spill] sm:$0xff] }
 0x2d4   : > { %17621 = vst [vmem:[#allocation211_spill] sm:$0xff] %v13321_v15  ;;  %9647 = vmatpush3.bf16.xpose.msra.mxu0 %v13023_v44  ;;  %8725 = vmatprep.mubr.f32.mxu0 %v17623_v48  ;;  %v17630_v44 = vld [vmem:[#allocation119_spill] sm:$0xff]  ;;  %v17633_v47 = vmax.f32 %v17631_v29, %v17632_v11  ;;  %v17639_v48 = vld [vmem:[#allocation120_spill] sm:$0xff]  ;;  %v17649_v29 = vmax.f32 %v12892_v38, %v12890_v33 }
 0x2d5   : > { %8806 = vmatmul.mubr.f32.gmra.mrb[142].mxu1 %v17624_v51  ;;  %9649 = vmatprep.subr.bf16.mxu0 %v13051_v56  ;;  %v17640_v11 = vld [vmem:[#allocation124_spill] sm:$0xff] }
 0x2d6   : > { %8808 = vmatprep.mubr.f32.mxu1 %v17625_v17  ;;  %v17635_v17 = vld [vmem:[#allocation123_spill] sm:$0xff] }
 0x2d7   : > { %8726 = vmatmul.mubr.f32.gmra.mrb[142].mxu0 %v17626_v21  ;;  %v13336_v36 = vpop.f32.mrb[50].mxu1  ;;  %v17636_v21 = vld [vmem:[#allocation217_spill] sm:$0xff] }
 0x2d8   : > { %8728 = vmatprep.mubr.f32.mxu0 %v17627_v8  ;;  %17628 = vst [vmem:[#allocation89_spill] sm:$0xff] %v13336_v36  ;;  %v8253_v63 = vpop.f32.mrb[50].mxu0  ;;  %v13338_v59 = vpop.f32.mrb[51].mxu1  ;;  %v17637_v8 = vmax.f32 %v12875_v46, %v17636_v21  ;;  %v17642_v46 = vld [vmem:[#allocation131_spill] sm:$0xff] }
 0x2d9   : > { %17629 = vst [vmem:[#allocation213_spill] sm:$0xff] %v13338_v59  ;;  %8809 = vmatmul.mubr.f32.gmra.mrb[144].mxu1 %v17630_v44  ;;  %v13344_v35 = vmax.f32 %v17633_v47, %v8253_v63  ;;  %v1880_v15 = vpop.f32.mrb[51].mxu0  ;;  %v17641_v47 = vld [vmem:[#allocation127_spill] sm:$0xff] }
 0x2da   : > { %9683 = vmatpush3.bf16.xpose.msra.mxu1 %v13051_v56  ;;  %8811 = vmatprep.mubr.f32.mxu1 %v17635_v17  ;;  %v13351_v51 = vmax.f32 %v17637_v8, %v1880_v15  ;;  %v17643_v15 = vld [vmem:[#allocation128_spill] sm:$0xff]  ;;  %v17644_v21 = vld [vmem:[#allocation91_spill] sm:$0xff]  ;;  %v17645_v8 = vld [vmem:[#allocation90_spill] sm:$0xff] }
 0x2db   : > { %17634 = vst [vmem:[#allocation212_spill] sm:$0xff] %v13344_v35  ;;  %8729 = vmatmul.mubr.f32.gmra.mrb[144].mxu0 %v17639_v48  ;;  %9685 = vmatprep.subr.bf16.mxu1 %v13085_v3  ;;  %v5777_v63 = vadd.f32 %v17645_v8, %v17644_v21  ;;  %v17646_v48 = vld [vmem:[#allocation132_spill] sm:$0xff]  ;;  %v17651_v21 = vmax.f32 %v12899_v57, %v12894_v10  ;;  %v17656_v57 = vld [vmem:[#allocation143_spill] sm:$0xff] }
 0x2dc   : > { %17638 = vst [vmem:[#allocation106_spill] sm:$0xff] %v13351_v51  ;;  %9651 = vmatpush3.bf16.xpose.msra.mxu0 %v13051_v56  ;;  %8731 = vmatprep.mubr.f32.mxu0 %v17640_v11  ;;  %v17653_v35 = vld [vmem:[#allocation136_spill] sm:$0xff] }
 0x2dd   : > { %8812 = vmatmul.mubr.f32.gmra.mrb[146].mxu1 %v17641_v47  ;;  %9653 = vmatprep.subr.bf16.mxu0 %v13085_v3  ;;  %v17657_v10 = vld [vmem:[#allocation144_spill] sm:$0xff] }
 0x2de   : > { %8814 = vmatprep.mubr.f32.mxu1 %v17642_v46  ;;  %5778 = vadd.xlane.f32.xlu1 %v5777_v63  ;;  %v17654_v63 = vld [vmem:[#allocation94_spill] sm:$0xff] }
 0x2df   : > { %8732 = vmatmul.mubr.f32.gmra.mrb[146].mxu0 %v17643_v15  ;;  %v13368_v44 = vpop.f32.mrb[52].mxu1  ;;  %v469_v15 = vld [vmem:[%s11287_s28 + $0x1d8] sm:$0xff] }
 0x2e0   : > { %8734 = vmatprep.mubr.f32.mxu0 %v17646_v48  ;;  %17647 = vst [vmem:[#allocation214_spill] sm:$0xff] %v13368_v44  ;;  %v8256_v56 = vpop.f32.mrb[52].mxu0  ;;  %v13370_v36 = vpop.f32.mrb[53].mxu1 }
 0x2e1   : > { %17648 = vst [vmem:[#allocation103_spill] sm:$0xff] %v13370_v36  ;;  %8815 = vmatmul.mubr.f32.gmra.mrb[148].mxu1 %v17449_v9  ;;  %v13376_v59 = vmax.f32 %v17649_v29, %v8256_v56  ;;  %v1890_v51 = vpop.f32.mrb[53].mxu0  ;;  %v17655_v9 = vld [vmem:[#allocation93_spill] sm:$0xff] }
 0x2e2   : > { %9687 = vmatpush3.bf16.xpose.msra.mxu1 %v13085_v3  ;;  %8817 = vmatprep.mubr.f32.mxu1 %v17450_v61  ;;  %v13383_v8 = vmax.f32 %v17651_v21, %v1890_v51  ;;  %v5780_v48 = vadd.f32 %v17655_v9, %v17654_v63  ;;  %v17658_v9 = vld [vmem:[#allocation148_spill] sm:$0xff]  ;;  %v17661_v21 = vld [vmem:[#allocation149_spill] sm:$0xff]  ;;  %v17662_v63 = vmax.f32 %v12916_v58, %v12914_v27  ;;  %v17668_v58 = vld [vmem:[#allocation151_spill] sm:$0xff] }
 0x2e3   : > { %17650 = vst [vmem:[#allocation216_spill] sm:$0xff] %v13376_v59  ;;  %8735 = vmatmul.mubr.f32.gmra.mrb[148].mxu0 %v17653_v35  ;;  %9689 = vmatprep.subr.bf16.mxu1 %v13119_v60  ;;  %v17681_v59 = vld [vmem:[#allocation154_spill] sm:$0xff] }
 0x2e4   : > { %17652 = vst [vmem:[#allocation215_spill] sm:$0xff] %v13383_v8  ;;  %9655 = vmatpush3.bf16.xpose.msra.mxu0 %v13085_v3  ;;  %8737 = vmatprep.mubr.f32.mxu0 %v17452_v18  ;;  %v17665_v3 = vld [vmem:[#allocation96_spill] sm:$0xff]  ;;  %v17666_v8 = vmax.f32 %v12923_v50, %v12918_v14  ;;  %v17782_v18 = vld [vmem:[#allocation181_spill] sm:$0xff] }
 0x2e5   : > { %8818 = vmatmul.mubr.f32.gmra.mrb[150].mxu1 %v17656_v57  ;;  %9657 = vmatprep.subr.bf16.mxu0 %v13119_v60  ;;  %v17670_v14 = vld [vmem:[#allocation24_spill] sm:$0xff] }
 0x2e6   : > { %8820 = vmatprep.mubr.f32.mxu1 %v12250_v20  ;;  %5781 = vadd.xlane.f32.xlu1 %v5780_v48  ;;  %v17664_v48 = vld [vmem:[#allocation97_spill] sm:$0xff] }
 0x2e7   : > { %8738 = vmatmul.mubr.f32.gmra.mrb[150].mxu0 %v17657_v10  ;;  %v13400_v56 = vpop.f32.mrb[54].mxu1  ;;  %v5783_v36 = vadd.f32 %v17665_v3, %v17664_v48  ;;  %v17669_v48 = vld [vmem:[#allocation22_spill] sm:$0xff]  ;;  %v17674_v3 = vld [vmem:[#allocation25_spill] sm:$0xff] }
 0x2e8   : > { %8740 = vmatprep.mubr.f32.mxu0 %v17658_v9  ;;  %17659 = vst [vmem:[#allocation123_spill] sm:$0xff] %v13400_v56  ;;  %v8259_v51 = vpop.f32.mrb[54].mxu0  ;;  %v13402_v29 = vpop.f32.mrb[55].mxu1  ;;  %v17679_v56 = vmax.f32 %v12951_v28, %v12946_v45  ;;  %v17684_v45 = vld [vmem:[#allocation30_spill] sm:$0xff]  ;;  %v461_v9 = vld [vmem:[%s11287_s28 + $0x198] sm:$0xff] }
 0x2e9   : > { %17660 = vst [vmem:[#allocation217_spill] sm:$0xff] %v13402_v29  ;;  %8821 = vmatmul.mubr.f32.gmra.mrb[152].mxu1 %v17661_v21  ;;  %v13408_v38 = vmax.f32 %v17662_v63, %v8259_v51  ;;  %v1900_v33 = vpop.f32.mrb[55].mxu0  ;;  %v413_v51 = vld [vmem:[%s11287_s28 + $0x18] sm:$0xff]  ;;  %v17762_v21 = vld [vmem:[#allocation57_spill] sm:$0xff]  ;;  %v17767_v10 = vld [vmem:[#allocation62_spill] sm:$0xff] }
 0x2ea   : > { %9691 = vmatpush3.bf16.xpose.msra.mxu1 %v13119_v60  ;;  %8823 = vmatprep.mubr.f32.mxu1 %v12273_v54  ;;  %v13417_v44 = vmax.f32 %v17666_v8, %v1900_v33  ;;  %v417_v63 = vld [vmem:[%s11287_s28 + $0x38] sm:$0xff] }
 0x2eb   : > { %17663 = vst [vmem:[#allocation124_spill] sm:$0xff] %v13408_v38  ;;  %8741 = vmatmul.mubr.f32.gmra.mrb[152].mxu0 %v12267_v31  ;;  %9693 = vmatprep.subr.bf16.mxu1 %v13153_v23  ;;  %v13433_v50 = vpack.c.bf16 %v417_v63, %v413_v51  ;;  %v17677_v51 = vld [vmem:[#allocation101_spill] sm:$0xff]  ;;  %v17678_v63 = vld [vmem:[#allocation100_spill] sm:$0xff]  ;;  %v17761_v54 = vld [vmem:[#allocation55_spill] sm:$0xff] }
 0x2ec   : > { %17667 = vst [vmem:[#allocation127_spill] sm:$0xff] %v13417_v44  ;;  %9659 = vmatpush3.bf16.xpose.msra.mxu0 %v13119_v60  ;;  %8743 = vmatprep.mubr.f32.mxu0 %v17668_v58  ;;  %v17675_v60 = vmax.f32 %v12944_v30, %v12942_v0  ;;  %v5786_v44 = vadd.f32 %v17678_v63, %v17677_v51  ;;  %v17682_v30 = vld [vmem:[#allocation155_spill] sm:$0xff] }
 0x2ed   : > { %8824 = vmatmul.mubr.f32.gmra.mrb[154].mxu1 %v17669_v48  ;;  %9661 = vmatprep.subr.bf16.mxu0 %v13153_v23  ;;  %17671 = vst [vmem:[#allocation131_spill] sm:$0xff] %v13433_v50  ;;  %v17683_v63 = vld [vmem:[#allocation27_spill] sm:$0xff]  ;;  %v17765_v48 = vld [vmem:[#allocation60_spill] sm:$0xff] }
 0x2ee   : > { %8826 = vmatprep.mubr.f32.mxu1 %v17670_v14  ;;  %5784 = vadd.xlane.f32.xlu1 %v5783_v36  ;;  %v17689_v51 = vld [vmem:[#allocation31_spill] sm:$0xff] }
 0x2ef   : > { %8744 = vmatmul.mubr.f32.gmra.mrb[154].mxu0 %v12289_v19  ;;  %v13436_v8 = vpop.f32.mrb[56].mxu1 }
 0x2f0   : > { %8746 = vmatprep.mubr.f32.mxu0 %v12300_v41  ;;  %17672 = vst [vmem:[#allocation91_spill] sm:$0xff] %v13436_v8  ;;  %v8262_v33 = vpop.f32.mrb[56].mxu0  ;;  %v13438_v27 = vpop.f32.mrb[57].mxu1  ;;  %v17754_v41 = vld [vmem:[#allocation54_spill] sm:$0xff] }
 0x2f1   : > { %17673 = vst [vmem:[#allocation90_spill] sm:$0xff] %v13438_v27  ;;  %8827 = vmatmul.mubr.f32.gmra.mrb[156].mxu1 %v17674_v3  ;;  %v13444_v29 = vmax.f32 %v17675_v60, %v8262_v33  ;;  %v1910_v36 = vpop.f32.mrb[57].mxu0  ;;  %v421_v60 = vld [vmem:[%s11287_s28 + $0x58] sm:$0xff]  ;;  %v17690_v27 = vld [vmem:[#allocation220_spill] sm:$0xff] }
 0x2f2   : > { %9695 = vmatpush3.bf16.xpose.msra.mxu1 %v13153_v23  ;;  %8829 = vmatprep.mubr.f32.mxu1 %v12317_v24  ;;  %v13453_v38 = vmax.f32 %v17679_v56, %v1910_v36  ;;  %v425_v33 = vld [vmem:[%s11287_s28 + $0x78] sm:$0xff]  ;;  %v17686_v56 = vld [vmem:[#allocation157_spill] sm:$0xff] }
 0x2f3   : > { %17676 = vst [vmem:[#allocation94_spill] sm:$0xff] %v13444_v29  ;;  %8747 = vmatmul.mubr.f32.gmra.mrb[156].mxu0 %v17681_v59  ;;  %9729 = vmatprep.subr.bf16.mxu1 %v13433_v50  ;;  %v13469_v28 = vpack.c.bf16 %v425_v33, %v421_v60  ;;  %v17693_v60 = vld [vmem:[#allocation32_spill] sm:$0xff]  ;;  %v17694_v33 = vld [vmem:[#allocation105_spill] sm:$0xff]  ;;  %v17700_v59 = vld [vmem:[#allocation159_spill] sm:$0xff] }
 0x2f4   : > { %17680 = vst [vmem:[#allocation93_spill] sm:$0xff] %v13453_v38  ;;  %9663 = vmatpush3.bf16.xpose.msra.mxu0 %v13153_v23  ;;  %8749 = vmatprep.mubr.f32.mxu0 %v17682_v30  ;;  %v17691_v38 = vmax.f32 %v12972_v13, %v17690_v27  ;;  %v17695_v29 = vld [vmem:[#allocation104_spill] sm:$0xff]  ;;  %v429_v27 = vld [vmem:[%s11287_s28 + $0x98] sm:$0xff] }
 0x2f5   : > { %8830 = vmatmul.mubr.f32.gmra.mrb[158].mxu1 %v17683_v63  ;;  %9697 = vmatprep.subr.bf16.mxu0 %v13433_v50  ;;  %17685 = vst [vmem:[#allocation97_spill] sm:$0xff] %v13469_v28  ;;  %v453_v3 = vld [vmem:[%s11287_s28 + $0x158] sm:$0xff] }
 0x2f6   : > { %8944 = vmatprep.mubr.f32.mxu1 %v17684_v45  ;;  %5787 = vadd.xlane.f32.xlu1 %v5786_v44  ;;  %v17697_v45 = vld [vmem:[#allocation221_spill] sm:$0xff] }
 0x2f7   : > { %8750 = vmatmul.mubr.f32.gmra.mrb[158].mxu0 %v17454_v37  ;;  %v13472_v36 = vpop.f32.mrb[58].mxu1  ;;  %v17696_v37 = vld [vmem:[#allocation222_spill] sm:$0xff] }
 0x2f8   : > { %8864 = vmatprep.mubr.f32.mxu0 %v17686_v56  ;;  %17687 = vst [vmem:[#allocation96_spill] sm:$0xff] %v13472_v36  ;;  %v8265_v0 = vpop.f32.mrb[58].mxu0  ;;  %v13474_v23 = vpop.f32.mrb[59].mxu1  ;;  %v5789_v56 = vadd.f32 %v17695_v29, %v17694_v33  ;;  %v17698_v63 = vmax.f32 %v17696_v37, %v17697_v45  ;;  %v17702_v33 = vld [vmem:[#allocation33_spill] sm:$0xff]  ;;  %v17703_v37 = vld [vmem:[#allocation34_spill] sm:$0xff]  ;;  %v17709_v29 = vld [vmem:[#allocation35_spill] sm:$0xff] }
 0x2f9   : > { %17688 = vst [vmem:[#allocation101_spill] sm:$0xff] %v13474_v23  ;;  %8945 = vmatmul.mubr.f32.vlgmr.msra.gmra.mrb[160].mxu1 %v17689_v51  ;;  %v13480_v8 = vmax.f32 %v17691_v38, %v8265_v0  ;;  %v1920_v44 = vpop.f32.mrb[59].mxu0  ;;  %v17701_v38 = vld [vmem:[#allocation160_spill] sm:$0xff]  ;;  %v433_v0 = vld [vmem:[%s11287_s28 + $0xb8] sm:$0xff] }
 0x2fa   : > { %9731 = vmatpush3.bf16.xpose.msra.mxu1 %v13433_v50  ;;  %8947 = vmatprep.mubr.f32.mxu1 %v17693_v60  ;;  %v13489_v30 = vmax.f32 %v17698_v63, %v1920_v44  ;;  %v17704_v63 = vld [vmem:[#allocation162_spill] sm:$0xff]  ;;  %v13505_v45 = vpack.c.bf16 %v433_v0, %v429_v27  ;;  %v17706_v44 = vld [vmem:[#allocation163_spill] sm:$0xff]  ;;  %v17713_v27 = vld [vmem:[#allocation225_spill] sm:$0xff] }
 0x2fb   : > { %17692 = vst [vmem:[#allocation100_spill] sm:$0xff] %v13480_v8  ;;  %8865 = vmatmul.mubr.f32.vlgmr.msra.gmra.mrb[160].mxu0 %v17700_v59  ;;  %9733 = vmatprep.subr.bf16.mxu1 %v13469_v28  ;;  %v17712_v8 = vld [vmem:[#allocation108_spill] sm:$0xff]  ;;  %v17718_v59 = vld [vmem:[#allocation227_spill] sm:$0xff] }
 0x2fc   : > { %17699 = vst [vmem:[#allocation220_spill] sm:$0xff] %v13489_v30  ;;  %9699 = vmatpush3.bf16.xpose.msra.mxu0 %v13433_v50  ;;  %8867 = vmatprep.mubr.f32.mxu0 %v17701_v38  ;;  %17705 = vst [vmem:[#allocation105_spill] sm:$0xff] %v13505_v45  ;;  %v17710_v30 = vld [vmem:[#allocation36_spill] sm:$0xff]  ;;  %v17717_v38 = vld [vmem:[#allocation165_spill] sm:$0xff] }
 0x2fd   : > { %8948 = vmatmul.mubr.f32.gmra.mrb[162].mxu1 %v17702_v33  ;;  %9701 = vmatprep.subr.bf16.mxu0 %v13469_v28  ;;  %v17714_v0 = vld [vmem:[#allocation224_spill] sm:$0xff] }
 0x2fe   : > { %8950 = vmatprep.mubr.f32.mxu1 %v17703_v37  ;;  %5790 = vadd.xlane.f32.xlu1 %v5789_v56  ;;  %v17711_v56 = vld [vmem:[#allocation109_spill] sm:$0xff]  ;;  %v17715_v37 = vmax.f32 %v17713_v27, %v17714_v0  ;;  %v17724_v0 = vld [vmem:[#allocation38_spill] sm:$0xff]  ;;  %v17730_v27 = vld [vmem:[#allocation40_spill] sm:$0xff] }
 0x2ff   : > { %8868 = vmatmul.mubr.f32.gmra.mrb[162].mxu0 %v17704_v63  ;;  %v13508_v13 = vpop.f32.mrb[60].mxu1  ;;  %v5792_v63 = vadd.f32 %v17712_v8, %v17711_v56  ;;  %v437_v8 = vld [vmem:[%s11287_s28 + $0xd8] sm:$0xff] }
 0x300   : > { %8870 = vmatprep.mubr.f32.mxu0 %v17706_v44  ;;  %17707 = vst [vmem:[#allocation104_spill] sm:$0xff] %v13508_v13  ;;  %v13510_v36 = vpop.f32.mrb[61].mxu1  ;;  %v441_v56 = vld [vmem:[%s11287_s28 + $0xf8] sm:$0xff] }
 0x301   : > { %17708 = vst [vmem:[#allocation222_spill] sm:$0xff] %v13510_v36  ;;  %8951 = vmatmul.mubr.f32.gmra.mrb[164].mxu1 %v17709_v29  ;;  %v17719_v29 = vld [vmem:[#allocation226_spill] sm:$0xff]  ;;  %v17729_v13 = vld [vmem:[#allocation39_spill] sm:$0xff]  ;;  %v17732_v36 = vld [vmem:[#allocation112_spill] sm:$0xff] }
 0x302   : > { %v8268_v23 = vpop.f32.mrb[60].mxu0  ;;  %9735 = vmatpush3.bf16.xpose.msra.mxu1 %v13469_v28  ;;  %8953 = vmatprep.mubr.f32.mxu1 %v17710_v30  ;;  %v17720_v60 = vmax.f32 %v17718_v59, %v17719_v29  ;;  %v17722_v30 = vld [vmem:[#allocation166_spill] sm:$0xff]  ;;  %v17725_v59 = vld [vmem:[#allocation168_spill] sm:$0xff]  ;;  %v17726_v29 = vld [vmem:[#allocation169_spill] sm:$0xff] }
 0x303   : > { %v13520_v33 = vmax.f32 %v17715_v37, %v8268_v23  ;;  %v1930_v44 = vpop.f32.mrb[61].mxu0  ;;  %8871 = vmatmul.mubr.f32.gmra.mrb[164].mxu0 %v17717_v38  ;;  %9737 = vmatprep.subr.bf16.mxu1 %v13505_v45  ;;  %v17723_v37 = vld [vmem:[#allocation37_spill] sm:$0xff] }
 0x304   : > { %v13527_v51 = vmax.f32 %v17720_v60, %v1930_v44  ;;  %9703 = vmatpush3.bf16.xpose.msra.mxu0 %v13469_v28  ;;  %8873 = vmatprep.mubr.f32.mxu0 %v17722_v30  ;;  %v13541_v60 = vpack.c.bf16 %v441_v56, %v437_v8  ;;  %v17733_v8 = vld [vmem:[#allocation230_spill] sm:$0xff]  ;;  %v17734_v56 = vld [vmem:[#allocation229_spill] sm:$0xff]  ;;  %v17738_v30 = vld [vmem:[#allocation232_spill] sm:$0xff] }
 0x305   : > { %17716 = vst [vmem:[#allocation221_spill] sm:$0xff] %v13520_v33  ;;  %8954 = vmatmul.mubr.f32.gmra.mrb[166].mxu1 %v17723_v37  ;;  %9705 = vmatprep.subr.bf16.mxu0 %v13505_v45  ;;  %v17737_v37 = vld [vmem:[#allocation171_spill] sm:$0xff] }
 0x306   : > { %17721 = vst [vmem:[#allocation109_spill] sm:$0xff] %v13527_v51  ;;  %8956 = vmatprep.mubr.f32.mxu1 %v17724_v0  ;;  %5793 = vadd.xlane.f32.xlu1 %v5792_v63  ;;  %v17731_v63 = vld [vmem:[#allocation113_spill] sm:$0xff] }
 0x307   : > { %8874 = vmatmul.mubr.f32.gmra.mrb[166].mxu0 %v17725_v59  ;;  %v13544_v44 = vpop.f32.mrb[62].mxu1  ;;  %v5795_v51 = vadd.f32 %v17732_v36, %v17731_v63  ;;  %v17735_v59 = vmax.f32 %v17733_v8, %v17734_v56  ;;  %v445_v63 = vld [vmem:[%s11287_s28 + $0x118] sm:$0xff]  ;;  %v17743_v56 = vld [vmem:[#allocation173_spill] sm:$0xff] }
 0x308   : > { %8876 = vmatprep.mubr.f32.mxu0 %v17726_v29  ;;  %17727 = vst [vmem:[#allocation108_spill] sm:$0xff] %v13544_v44  ;;  %v13546_v23 = vpop.f32.mrb[63].mxu1  ;;  %v449_v8 = vld [vmem:[%s11287_s28 + $0x138] sm:$0xff] }
 0x309   : > { %17728 = vst [vmem:[#allocation225_spill] sm:$0xff] %v13546_v23  ;;  %8957 = vmatmul.mubr.f32.gmra.mrb[168].mxu1 %v17729_v13  ;;  %v17739_v13 = vld [vmem:[#allocation231_spill] sm:$0xff]  ;;  %v13587_v44 = vpack.c.bf16 %v449_v8, %v445_v63  ;;  %v17749_v63 = vld [vmem:[#allocation117_spill] sm:$0xff] }
 0x30a   : > { %v8271_v33 = vpop.f32.mrb[62].mxu0  ;;  %9739 = vmatpush3.bf16.xpose.msra.mxu1 %v13505_v45  ;;  %8959 = vmatprep.mubr.f32.mxu1 %v17730_v27  ;;  %v17740_v38 = vmax.f32 %v17738_v30, %v17739_v13  ;;  %v17742_v27 = vld [vmem:[#allocation172_spill] sm:$0xff]  ;;  %v17750_v8 = vld [vmem:[#allocation115_spill] sm:$0xff] }
 0x30b   : > { %v13556_v29 = vmax.f32 %v17735_v59, %v8271_v33  ;;  %v1940_v0 = vpop.f32.mrb[63].mxu0  ;;  %8877 = vmatmul.mubr.f32.gmra.mrb[168].mxu0 %v17737_v37  ;;  %9741 = vmatprep.subr.bf16.mxu1 %v13541_v60  ;;  %v13567_v36 = vpop.f32.mrb[64].mxu1  ;;  %v17745_v33 = vld [vmem:[#allocation175_spill] sm:$0xff]  ;;  %v17752_v37 = vld [vmem:[#allocation180_spill] sm:$0xff] }
 0x30c   : > { %v13563_v24 = vmax.f32 %v17740_v38, %v1940_v0  ;;  %9707 = vmatpush3.bf16.xpose.msra.mxu0 %v13505_v45  ;;  %8879 = vmatprep.mubr.f32.mxu0 %v17742_v27  ;;  %v13573_v59 = vpop.f32.mrb[65].mxu1  ;;  %v17744_v38 = vld [vmem:[#allocation41_spill] sm:$0xff] }
 0x30d   : > { %17736 = vst [vmem:[#allocation224_spill] sm:$0xff] %v13556_v29  ;;  %8960 = vmatmul.mubr.f32.gmra.mrb[170].mxu1 %v17743_v56  ;;  %9709 = vmatprep.subr.bf16.mxu0 %v13541_v60  ;;  %v17746_v56 = vld [vmem:[#allocation176_spill] sm:$0xff] }
 0x30e   : > { %17741 = vst [vmem:[#allocation227_spill] sm:$0xff] %v13563_v24  ;;  %v13579_v13 = vpop.f32.mrb[64].mxu0  ;;  %8962 = vmatprep.mubr.f32.mxu1 %v17744_v38  ;;  %5796 = vadd.xlane.f32.xlu1 %v5795_v51  ;;  %v17747_v51 = vld [vmem:[#allocation177_spill] sm:$0xff]  ;;  %v17748_v24 = vld [vmem:[#allocation42_spill] sm:$0xff]  ;;  %v17751_v38 = vld [vmem:[#allocation179_spill] sm:$0xff] }
 0x30f   : > { %v13584_v27 = vpop.f32.mrb[65].mxu0  ;;  %8880 = vmatmul.mubr.f32.gmra.mrb[170].mxu0 %v17745_v33  ;;  %v5798_v33 = vadd.f32 %v17750_v8, %v17749_v63  ;;  %v457_v63 = vld [vmem:[%s11287_s28 + $0x178] sm:$0xff]  ;;  %v17753_v29 = vld [vmem:[#allocation52_spill] sm:$0xff] }
 0x310   : > { %8882 = vmatprep.mubr.f32.mxu0 %v17746_v56  ;;  %v13592_v30 = vpop.f32.mrb[66].mxu1  ;;  %v13629_v14 = vpack.c.bf16 %v457_v63, %v453_v3  ;;  %v17759_v3 = vld [vmem:[#allocation122_spill] sm:$0xff]  ;;  %v17760_v63 = vld [vmem:[#allocation121_spill] sm:$0xff] }
 0x311   : > { %v13594_v23 = vpop.f32.mrb[67].mxu1  ;;  %8963 = vmatmul.mubr.f32.gmra.mrb[172].mxu1 %v17747_v51  ;;  %v5801_v31 = vadd.f32 %v17760_v63, %v17759_v3  ;;  %v465_v3 = vld [vmem:[%s11287_s28 + $0x1b8] sm:$0xff] }
 0x312   : > { %v13597_v0 = vpop.f32.mrb[66].mxu0  ;;  %9743 = vmatpush3.bf16.xpose.msra.mxu1 %v13541_v60  ;;  %8965 = vmatprep.mubr.f32.mxu1 %v17748_v24  ;;  %v13671_v57 = vpack.c.bf16 %v465_v3, %v461_v9  ;;  %v17777_v9 = vld [vmem:[#allocation126_spill] sm:$0xff]  ;;  %v17778_v3 = vld [vmem:[#allocation125_spill] sm:$0xff] }
 0x313   : > { %v13605_v56 = vpop.f32.mrb[67].mxu0  ;;  %8883 = vmatmul.mubr.f32.gmra.mrb[172].mxu0 %v17751_v38  ;;  %9745 = vmatprep.subr.bf16.mxu1 %v13587_v44  ;;  %v5804_v61 = vadd.f32 %v17778_v3, %v17777_v9  ;;  %v473_v9 = vld [vmem:[%s11287_s28 + $0x1f8] sm:$0xff]  ;;  %s10805_s28 = sshll.u32 %s10958_s27, 4  ;;  %s10806_s28 = int_to_ptr.vmem [resolvable:$false] %s10805_s28 }
 0x314   : > { %9711 = vmatpush3.bf16.xpose.msra.mxu0 %v13541_v60  ;;  %8885 = vmatprep.mubr.f32.mxu0 %v17752_v37  ;;  %v13613_v24 = vpop.f32.mrb[68].mxu1  ;;  %v17755_v37 = vld [vmem:[#allocation51_spill] sm:$0xff]  ;;  %17770 = vst [vmem:[#allocation229_spill] sm:$0xff] %v13671_v57  ;;  %s10807_s26 = scalar_lea.vmem %s10806_s28, 8192  ;;  %p10808_p11 = scmp.lt.s32.totalorder %s16307_s18, %s10806_s28 }
 0x315   : > { %v13617_v8 = vpop.f32.mrb[69].mxu1  ;;  %8966 = vmatmul.mubr.f32.gmra.mrb[174].mxu1 %v17753_v29  ;;  %9713 = vmatprep.subr.bf16.mxu0 %v13587_v44  ;;  %v17756_v29 = vld [vmem:[#allocation53_spill] sm:$0xff]  ;;  %p10809_p13 = scmp.lt.s32.totalorder %s10807_s26, %s10801_s11 }
 0x316   : > { %v13621_v38 = vpop.f32.mrb[68].mxu0  ;;  %8968 = vmatprep.mubr.f32.mxu1 %v17754_v41  ;;  %5799 = vadd.xlane.f32.xlu1 %v5798_v33  ;;  %v17757_v33 = vld [vmem:[#allocation56_spill] sm:$0xff] }
 0x317   : > { %v13626_v19 = vpop.f32.mrb[69].mxu0  ;;  %8886 = vmatmul.mubr.f32.gmra.mrb[174].mxu0 %v17755_v37  ;;  %v17758_v37 = vld [vmem:[#allocation58_spill] sm:$0xff]  ;;  %p10810_p3 = por %p10809_p13, %p10808_p11 }
 0x318   : > { %8888 = vmatprep.mubr.f32.mxu0 %v17756_v29  ;;  %v13634_v58 = vpop.f32.mrb[70].mxu1 }
 0x319   : > { %v13636_v41 = vpop.f32.mrb[71].mxu1  ;;  %8969 = vmatmul.mubr.f32.gmra.mrb[176].mxu1 %v17757_v33  ;;  %p10811_p8 = pnand %p10810_p3, %p10804_p4 }
 0x31a   : > { %v13639_v51 = vpop.f32.mrb[70].mxu0  ;;  %9747 = vmatpush3.bf16.xpose.msra.mxu1 %v13587_v44  ;;  %8971 = vmatprep.mubr.f32.mxu1 %v17758_v37 }
 0x31b   : > { %v13647_v29 = vpop.f32.mrb[71].mxu0  ;;  %8889 = vmatmul.mubr.f32.gmra.mrb[176].mxu0 %v17761_v54  ;;  %9749 = vmatprep.subr.bf16.mxu1 %v13629_v14 }
 0x31c   : > { %9715 = vmatpush3.bf16.xpose.msra.mxu0 %v13587_v44  ;;  %8891 = vmatprep.mubr.f32.mxu0 %v17762_v21  ;;  %v13655_v37 = vpop.f32.mrb[72].mxu1  ;;  %v17769_v21 = vld [vmem:[#allocation59_spill] sm:$0xff] }
 0x31d   : > { %17763 = vst [vmem:[#allocation226_spill] sm:$0xff] %v13655_v37  ;;  %v13659_v63 = vpop.f32.mrb[73].mxu1  ;;  %8972 = vmatmul.mubr.f32.gmra.mrb[178].mxu1 %v17765_v48  ;;  %9717 = vmatprep.subr.bf16.mxu0 %v13629_v14  ;;  %v17771_v48 = vld [vmem:[#allocation61_spill] sm:$0xff] }
 0x31e   : > { %17764 = vst [vmem:[#allocation113_spill] sm:$0xff] %v13659_v63  ;;  %v13663_v54 = vpop.f32.mrb[72].mxu0  ;;  %8974 = vmatprep.mubr.f32.mxu1 %v17767_v10  ;;  %5802 = vadd.xlane.f32.xlu1 %v5801_v31  ;;  %v17774_v31 = vld [vmem:[#allocation64_spill] sm:$0xff]  ;;  %v17780_v63 = vld [vmem:[#allocation63_spill] sm:$0xff] }
 0x31f   : > { %17766 = vst [vmem:[#allocation112_spill] sm:$0xff] %v13663_v54  ;;  %v13668_v20 = vpop.f32.mrb[73].mxu0  ;;  %8892 = vmatmul.mubr.f32.gmra.mrb[178].mxu0 %v17769_v21  ;;  %v17776_v21 = vld [vmem:[#allocation66_spill] sm:$0xff] }
 0x320   : > { %17768 = vst [vmem:[#allocation230_spill] sm:$0xff] %v13668_v20  ;;  %8894 = vmatprep.mubr.f32.mxu0 %v17771_v48  ;;  %v13676_v35 = vpop.f32.mrb[74].mxu1  ;;  %v17781_v20 = vld [vmem:[#allocation65_spill] sm:$0xff] }
 0x321   : > { %17772 = vst [vmem:[#allocation232_spill] sm:$0xff] %v13676_v35  ;;  %v13678_v10 = vpop.f32.mrb[75].mxu1  ;;  %8975 = vmatmul.mubr.f32.gmra.mrb[180].mxu1 %v17774_v31  ;;  %v17783_v35 = vld [vmem:[#allocation70_spill] sm:$0xff] }
 0x322   : > { %17773 = vst [vmem:[#allocation231_spill] sm:$0xff] %v13678_v10  ;;  %v13681_v33 = vpop.f32.mrb[74].mxu0  ;;  %9751 = vmatpush3.bf16.xpose.msra.mxu1 %v13629_v14  ;;  %8977 = vmatprep.mubr.f32.mxu1 %v17776_v21  ;;  %v17789_v31 = vld [vmem:[#allocation130_spill] sm:$0xff] }
 0x323   : > { %17775 = vst [vmem:[#allocation117_spill] sm:$0xff] %v13681_v33  ;;  %v13689_v48 = vpop.f32.mrb[75].mxu0  ;;  %8895 = vmatmul.mubr.f32.gmra.mrb[180].mxu0 %v17780_v63  ;;  %9753 = vmatprep.subr.bf16.mxu1 %v13671_v57  ;;  %v17793_v33 = vld [vmem:[#allocation194_spill] sm:$0xff] }
 0x324   : > { %17779 = vst [vmem:[#allocation115_spill] sm:$0xff] %v13689_v48  ;;  %9719 = vmatpush3.bf16.xpose.msra.mxu0 %v13629_v14  ;;  %8897 = vmatprep.mubr.f32.mxu0 %v17781_v20  ;;  %v13697_v21 = vpop.f32.mrb[76].mxu1  ;;  %v17784_v20 = vld [vmem:[#allocation182_spill] sm:$0xff]  ;;  %v13713_v48 = vpack.c.bf16 %v473_v9, %v469_v15  ;;  %v17790_v15 = vld [vmem:[#allocation129_spill] sm:$0xff] }
 0x325   : > { %v13701_v3 = vpop.f32.mrb[77].mxu1  ;;  %8978 = vmatmul.mubr.f32.gmra.mrb[182].mxu1 %v17782_v18  ;;  %9721 = vmatprep.subr.bf16.mxu0 %v13671_v57  ;;  %v17786_v18 = vld [vmem:[#allocation183_spill] sm:$0xff]  ;;  %v5807_v9 = vadd.f32 %v17790_v15, %v17789_v31  ;;  %v17798_v15 = vld [vmem:[#allocation133_spill] sm:$0xff] }
 0x326   : > { %v13705_v63 = vpop.f32.mrb[76].mxu0  ;;  %8980 = vmatprep.mubr.f32.mxu1 %v17783_v35  ;;  %5805 = vadd.xlane.f32.xlu1 %v5804_v61  ;;  %17785 = vst [vmem:[#allocation122_spill] sm:$0xff] %v13713_v48  ;;  %v17788_v35 = vld [vmem:[#allocation186_spill] sm:$0xff] }
 0x327   : > { %v13710_v10 = vpop.f32.mrb[77].mxu0  ;;  %8898 = vmatmul.mubr.f32.gmra.mrb[182].mxu0 %v17784_v20 }
 0x328   : > { %8900 = vmatprep.mubr.f32.mxu0 %v17786_v18  ;;  %v13718_v37 = vpop.f32.mrb[78].mxu1 }
 0x329   : > { %v13720_v54 = vpop.f32.mrb[79].mxu1  ;;  %8981 = vmatmul.mubr.f32.gmra.mrb[184].mxu1 %v17788_v35 }
 0x32a   : > { %17787 = vst [vmem:[#allocation121_spill] sm:$0xff] %v13720_v54  ;;  %v13723_v61 = vpop.f32.mrb[78].mxu0  ;;  %9755 = vmatpush3.bf16.xpose.msra.mxu1 %v13671_v57  ;;  %8983 = vmatprep.mubr.f32.mxu1 %v17544_v26 }
 0x32b   : > { %v13731_v20 = vpop.f32.mrb[79].mxu0  ;;  %8901 = vmatmul.mubr.f32.gmra.mrb[184].mxu0 %v17549_v40  ;;  %9757 = vmatprep.subr.bf16.mxu1 %v13713_v48  ;;  %v17794_v40 = vld [vmem:[#allocation199_spill] sm:$0xff] }
 0x32c   : > { %17791 = vst [vmem:[#allocation126_spill] sm:$0xff] %v13731_v20  ;;  %9723 = vmatpush3.bf16.xpose.msra.mxu0 %v13671_v57  ;;  %8903 = vmatprep.mubr.f32.mxu0 %v17550_v32  ;;  %v13739_v26 = vpop.f32.mrb[80].mxu1  ;;  %v17796_v20 = vld [vmem:[#allocation201_spill] sm:$0xff]  ;;  %v17801_v32 = vld [vmem:[#allocation206_spill] sm:$0xff] }
 0x32d   : > { %v13741_v18 = vpop.f32.mrb[81].mxu1  ;;  %8984 = vmatmul.mubr.f32.gmra.mrb[186].mxu1 %v17551_v62  ;;  %9725 = vmatprep.subr.bf16.mxu0 %v13713_v48 }
 0x32e   : > { %17792 = vst [vmem:[#allocation125_spill] sm:$0xff] %v13741_v18  ;;  %v13745_v31 = vpop.f32.mrb[80].mxu0  ;;  %8986 = vmatprep.mubr.f32.mxu1 %v17552_v34  ;;  %5808 = vadd.xlane.f32.xlu1 %v5807_v9  ;;  %v17797_v9 = vld [vmem:[#allocation134_spill] sm:$0xff] }
 0x32f   : > { %v13750_v35 = vpop.f32.mrb[81].mxu0  ;;  %8904 = vmatmul.mubr.f32.gmra.mrb[186].mxu0 %v17793_v33  ;;  %v5810_v33 = vadd.f32 %v17798_v15, %v17797_v9  ;;  %v17806_v9 = vld [vmem:[#allocation137_spill] sm:$0xff] }
 0x330   : > { %8906 = vmatprep.mubr.f32.mxu0 %v17794_v40  ;;  %v13756_v62 = vpop.f32.mrb[82].mxu1 }
 0x331   : > { %v13758_v54 = vpop.f32.mrb[83].mxu1  ;;  %8987 = vmatmul.mubr.f32.gmra.mrb[188].mxu1 %v17796_v20 }
 0x332   : > { %17795 = vst [vmem:[#allocation130_spill] sm:$0xff] %v13758_v54  ;;  %v13761_v34 = vpop.f32.mrb[82].mxu0  ;;  %9759 = vmatpush3.bf16.xpose.msra.mxu1 %v13713_v48  ;;  %8989 = vmatprep.mubr.f32.mxu1 %v12741_v52 }
 0x333   : > { %v13769_v18 = vpop.f32.mrb[83].mxu0  ;;  %8907 = vmatmul.mubr.f32.gmra.mrb[188].mxu0 %v17562_v12  ;;  %9793 = vmatprep.subr.bf16.mxu1 %v13433_v50  ;;  %v17802_v12 = vld [vmem:[#allocation72_spill] sm:$0xff] }
 0x334   : > { %17799 = vst [vmem:[#allocation129_spill] sm:$0xff] %v13769_v18  ;;  %9727 = vmatpush3.bf16.xpose.msra.mxu0 %v13713_v48  ;;  %8909 = vmatprep.mubr.f32.mxu0 %v12750_v55  ;;  %v13777_v52 = vpop.f32.mrb[84].mxu1  ;;  %v17804_v18 = vld [vmem:[#allocation73_spill] sm:$0xff] }
 0x335   : > { %v13779_v40 = vpop.f32.mrb[85].mxu1  ;;  %8990 = vmatmul.mubr.f32.gmra.mrb[190].mxu1 %v12761_v16  ;;  %9761 = vmatprep.subr.bf16.mxu0 %v13433_v50  ;;  %v17810_v55 = vld [vmem:[#allocation77_spill] sm:$0xff] }
 0x336   : > { %17800 = vst [vmem:[#allocation134_spill] sm:$0xff] %v13779_v40  ;;  %v13783_v15 = vpop.f32.mrb[84].mxu0  ;;  %9104 = vmatprep.mubr.f32.mxu1 %v11853_v5  ;;  %5811 = vadd.xlane.f32.xlu1 %v5810_v33  ;;  %v17805_v33 = vld [vmem:[#allocation138_spill] sm:$0xff] }
 0x337   : > { %v13788_v20 = vpop.f32.mrb[85].mxu0  ;;  %8910 = vmatmul.mubr.f32.gmra.mrb[190].mxu0 %v17801_v32  ;;  %v5813_v32 = vadd.f32 %v17806_v9, %v17805_v33  ;;  %v17816_v33 = vld [vmem:[#allocation141_spill] sm:$0xff] }
 0x338   : > { %9024 = vmatprep.mubr.f32.mxu0 %v17802_v12  ;;  %v13794_v16 = vpop.f32.mrb[86].mxu1 }
 0x339   : > { %v13796_v54 = vpop.f32.mrb[87].mxu1  ;;  %9105 = vmatmul.mubr.f32.vlgmr.msra.gmra.mrb[192].mxu1 %v17804_v18 }
 0x33a   : > { %17803 = vst [vmem:[#allocation133_spill] sm:$0xff] %v13796_v54  ;;  %v13799_v5 = vpop.f32.mrb[86].mxu0  ;;  %9795 = vmatpush3.bf16.xpose.msra.mxu1 %v13433_v50  ;;  %9107 = vmatprep.mubr.f32.mxu1 %v17571_v2 }
 0x33b   : > { %v13807_v40 = vpop.f32.mrb[87].mxu0  ;;  %9025 = vmatmul.mubr.f32.vlgmr.msra.gmra.mrb[192].mxu0 %v17575_v6  ;;  %9797 = vmatprep.subr.bf16.mxu1 %v13469_v28  ;;  %v17809_v6 = vld [vmem:[#allocation78_spill] sm:$0xff] }
 0x33c   : > { %17807 = vst [vmem:[#allocation72_spill] sm:$0xff] %v13807_v40  ;;  %9763 = vmatpush3.bf16.xpose.msra.mxu0 %v13433_v50  ;;  %9027 = vmatprep.mubr.f32.mxu0 %v17406_v49  ;;  %v13815_v12 = vpop.f32.mrb[88].mxu1  ;;  %v17811_v50 = vld [vmem:[#allocation79_spill] sm:$0xff]  ;;  %v17814_v40 = vld [vmem:[#allocation80_spill] sm:$0xff] }
 0x33d   : > { %v13817_v2 = vpop.f32.mrb[89].mxu1  ;;  %9108 = vmatmul.mubr.f32.gmra.mrb[194].mxu1 %v17576_v1  ;;  %9765 = vmatprep.subr.bf16.mxu0 %v13469_v28 }
 0x33e   : > { %17808 = vst [vmem:[#allocation73_spill] sm:$0xff] %v13817_v2  ;;  %v13821_v9 = vpop.f32.mrb[88].mxu0  ;;  %9110 = vmatprep.mubr.f32.mxu1 %v17809_v6  ;;  %5814 = vadd.xlane.f32.xlu1 %v5813_v32  ;;  %v17815_v32 = vld [vmem:[#allocation142_spill] sm:$0xff] }
 0x33f   : > { %v13826_v18 = vpop.f32.mrb[89].mxu0  ;;  %9028 = vmatmul.mubr.f32.gmra.mrb[194].mxu0 %v17810_v55  ;;  %v5816_v55 = vadd.f32 %v17816_v33, %v17815_v32 }
 0x340   : > { %9030 = vmatprep.mubr.f32.mxu0 %v17811_v50  ;;  %v13832_v1 = vpop.f32.mrb[90].mxu1 }
 0x341   : > { %17812 = vst [vmem:[#allocation138_spill] sm:$0xff] %v13832_v1  ;;  %v13834_v54 = vpop.f32.mrb[91].mxu1  ;;  %9111 = vmatmul.mubr.f32.gmra.mrb[196].mxu1 %v17814_v40 }
 0x342   : > { %17813 = vst [vmem:[#allocation137_spill] sm:$0xff] %v13834_v54  ;;  %v13837_v6 = vpop.f32.mrb[90].mxu0  ;;  %9799 = vmatpush3.bf16.xpose.msra.mxu1 %v13469_v28  ;;  %9113 = vmatprep.mubr.f32.mxu1 %v17586_v53 }
 0x343   : > { %v13845_v2 = vpop.f32.mrb[91].mxu0  ;;  %9031 = vmatmul.mubr.f32.gmra.mrb[196].mxu0 %v17590_v22  ;;  %9801 = vmatprep.subr.bf16.mxu1 %v13505_v45  ;;  %v17821_v22 = vld [vmem:[#allocation86_spill] sm:$0xff] }
 0x344   : > { %17817 = vst [vmem:[#allocation78_spill] sm:$0xff] %v13845_v2  ;;  %9767 = vmatpush3.bf16.xpose.msra.mxu0 %v13469_v28  ;;  %9033 = vmatprep.mubr.f32.mxu0 %v17414_v7  ;;  %v13853_v53 = vpop.f32.mrb[92].mxu1  ;;  %v17823_v7 = vld [vmem:[#allocation85_spill] sm:$0xff]  ;;  %v17824_v28 = vld [vmem:[#allocation87_spill] sm:$0xff]  ;;  %v17827_v2 = vld [vmem:[#allocation88_spill] sm:$0xff] }
 0x345   : > { %17818 = vst [vmem:[#allocation77_spill] sm:$0xff] %v13853_v53  ;;  %v13855_v50 = vpop.f32.mrb[93].mxu1  ;;  %9114 = vmatmul.mubr.f32.gmra.mrb[198].mxu1 %v17591_v42  ;;  %9769 = vmatprep.subr.bf16.mxu0 %v13505_v45  ;;  %v17833_v53 = vld [vmem:[#allocation29_spill] sm:$0xff] }
 0x346   : > { %17819 = vst [vmem:[#allocation79_spill] sm:$0xff] %v13855_v50  ;;  %v13859_v33 = vpop.f32.mrb[92].mxu0  ;;  %9116 = vmatprep.mubr.f32.mxu1 %v17821_v22  ;;  %5817 = vadd.xlane.f32.xlu1 %v5816_v55  ;;  %v17829_v22 = vld [vmem:[#allocation146_spill] sm:$0xff]  ;;  %v17832_v50 = vld [vmem:[#allocation28_spill] sm:$0xff] }
 0x347   : > { %17820 = vst [vmem:[#allocation80_spill] sm:$0xff] %v13859_v33  ;;  %v13864_v40 = vpop.f32.mrb[93].mxu0  ;;  %9034 = vmatmul.mubr.f32.gmra.mrb[198].mxu0 %v17823_v7  ;;  %v17830_v7 = vld [vmem:[#allocation145_spill] sm:$0xff] }
 0x348   : > { %17822 = vst [vmem:[#allocation142_spill] sm:$0xff] %v13864_v40  ;;  %9036 = vmatprep.mubr.f32.mxu0 %v17824_v28  ;;  %v13870_v42 = vpop.f32.mrb[94].mxu1  ;;  %v5819_v32 = vadd.f32 %v17830_v7, %v17829_v22  ;;  %v17834_v7 = vld [vmem:[#allocation98_spill] sm:$0xff] }
 0x349   : > { %17825 = vst [vmem:[#allocation141_spill] sm:$0xff] %v13870_v42  ;;  %v13872_v54 = vpop.f32.mrb[95].mxu1  ;;  %9117 = vmatmul.mubr.f32.gmra.mrb[200].mxu1 %v17827_v2  ;;  %v17836_v2 = vld [vmem:[#allocation95_spill] sm:$0xff] }
 0x34a   : > { %17826 = vst [vmem:[#allocation86_spill] sm:$0xff] %v13872_v54  ;;  %v13877_v55 = vpop.f32.mrb[94].mxu0  ;;  %9803 = vmatpush3.bf16.xpose.msra.mxu1 %v13505_v45  ;;  %9119 = vmatprep.mubr.f32.mxu1 %v17601_v4 }
 0x34b   : > { %17828 = vst [vmem:[#allocation85_spill] sm:$0xff] %v13877_v55  ;;  %v13885_v49 = vpop.f32.mrb[95].mxu0  ;;  %9037 = vmatmul.mubr.f32.gmra.mrb[200].mxu0 %v17605_v25  ;;  %9805 = vmatprep.subr.bf16.mxu1 %v13541_v60  ;;  %v17835_v25 = vmax.f32 %v13579_v13, %v13567_v36  ;;  %v17841_v55 = vld [vmem:[#allocation234_spill] sm:$0xff] }
 0x34c   : > { %17831 = vst [vmem:[#allocation87_spill] sm:$0xff] %v13885_v49  ;;  %9771 = vmatpush3.bf16.xpose.msra.mxu0 %v13505_v45  ;;  %9039 = vmatprep.mubr.f32.mxu0 %v17832_v50  ;;  %v8626_v4 = vpop.f32.mrb[96].mxu1  ;;  %v13903_v50 = vld [vmem:[%s13900_s4] ss:$0 sm:$0xff]  ;;  %v17837_v45 = vmax.f32 %v13584_v27, %v13573_v59  ;;  %v17843_v27 = vmax.f32 %v13597_v0, %v13592_v30  ;;  %v17848_v30 = vld [vmem:[#allocation107_spill] sm:$0xff] }
 0x34d   : > { %v3112_v40 = vpop.f32.mrb[97].mxu1  ;;  %9120 = vmatmul.mubr.f32.gmra.mrb[202].mxu1 %v17833_v53  ;;  %9773 = vmatprep.subr.bf16.mxu0 %v13541_v60  ;;  %v13906_v53 = vld [vmem:[%s13900_s4 + $0x1] ss:$0 sm:$0xff] }
 0x34e   : > { %v8546_v22 = vpop.f32.mrb[96].mxu0  ;;  %9122 = vmatprep.mubr.f32.mxu1 %v17834_v7  ;;  %5820 = vadd.xlane.f32.xlu1 %v5819_v32  ;;  %v17838_v32 = vld [vmem:[#allocation99_spill] sm:$0xff]  ;;  %v17840_v49 = vld [vmem:[#allocation68_spill] sm:$0xff] }
 0x34f   : > { %v3015_v28 = vmax.f32 %v17835_v25, %v8546_v22  ;;  %v2855_v42 = vpop.f32.mrb[97].mxu0  ;;  %9040 = vmatmul.mubr.f32.gmra.mrb[202].mxu0 %v17836_v2  ;;  %v17839_v22 = vld [vmem:[#allocation102_spill] sm:$0xff]  ;;  %v17842_v33 = vmax.f32 %v17840_v49, %v17841_v55 }
 0x350   : > { %v3014_v7 = vmax.f32 %v17837_v45, %v2855_v42  ;;  %9042 = vmatprep.mubr.f32.mxu0 %v17838_v32  ;;  %v8629_v54 = vpop.f32.mrb[98].mxu1  ;;  %v17849_v32 = vld [vmem:[#allocation110_spill] sm:$0xff] }
 0x351   : > { %v3272_v36 = vmax.f32 %v3015_v28, %v8626_v4  ;;  %v3122_v13 = vpop.f32.mrb[99].mxu1  ;;  %9123 = vmatmul.mubr.f32.gmra.mrb[204].mxu1 %v17839_v22  ;;  %v2244_v1 = vmul.f32 %v13903_v50, %v17842_v33  ;;  %v17845_v28 = vld [vmem:[#allocation235_spill] sm:$0xff]  ;;  %v17847_v33 = vmax.f32 %v13605_v56, %v13594_v23  ;;  %v17851_v23 = vld [vmem:[#allocation69_spill] sm:$0xff] }
 0x352   : > { %v3271_v2 = vmax.f32 %v3014_v7, %v3112_v40  ;;  %v8549_v25 = vpop.f32.mrb[98].mxu0  ;;  %9807 = vmatpush3.bf16.xpose.msra.mxu1 %v13541_v60  ;;  %9125 = vmatprep.mubr.f32.mxu1 %v17618_v43  ;;  %v17844_v40 = vld [vmem:[#allocation67_spill] sm:$0xff]  ;;  %v17852_v56 = vld [vmem:[#allocation237_spill] sm:$0xff] }
 0x353   : > { %v3309_v45 = vmul.f32 %v13906_v53, %v3272_v36  ;;  %v3017_v59 = vmax.f32 %v17843_v27, %v8549_v25  ;;  %v2865_v42 = vpop.f32.mrb[99].mxu0  ;;  %9043 = vmatmul.mubr.f32.gmra.mrb[204].mxu0 %v17622_v39  ;;  %9809 = vmatprep.subr.bf16.mxu1 %v13587_v44  ;;  %v17846_v4 = vmax.f32 %v17844_v40, %v17845_v28 }
 0x354   : > { %v3308_v49 = vmul.f32 %v13906_v53, %v3271_v2  ;;  %v3016_v55 = vmax.f32 %v17847_v33, %v2865_v42  ;;  %9775 = vmatpush3.bf16.xpose.msra.mxu0 %v13541_v60  ;;  %9045 = vmatprep.mubr.f32.mxu0 %v17848_v30  ;;  %v8632_v0 = vpop.f32.mrb[100].mxu1  ;;  %v17850_v2 = vld [vmem:[#allocation114_spill] sm:$0xff]  ;;  %v17853_v42 = vmax.f32 %v17851_v23, %v17852_v56 }
 0x355   : > { %v2243_v43 = vmul.f32 %v13903_v50, %v17846_v4  ;;  %v3274_v7 = vmax.f32 %v3017_v59, %v8629_v54  ;;  %v3132_v39 = vpop.f32.mrb[101].mxu1  ;;  %9126 = vmatmul.mubr.f32.gmra.mrb[206].mxu1 %v17849_v32  ;;  %9777 = vmatprep.subr.bf16.mxu0 %v13587_v44  ;;  %v13937_v36 = vadd.f32 %v3309_v45, %v2244_v1  ;;  %v17855_v1 = vld [vmem:[#allocation111_spill] sm:$0xff]  ;;  %v17857_v45 = vld [vmem:[#allocation238_spill] sm:$0xff]  ;;  %v17860_v32 = vld [vmem:[#allocation116_spill] sm:$0xff] }
 0x356   : > { %v3273_v22 = vmax.f32 %v3016_v55, %v3122_v13  ;;  %v8552_v25 = vpop.f32.mrb[100].mxu0  ;;  %9128 = vmatprep.mubr.f32.mxu1 %v17850_v2  ;;  %v2246_v40 = vmul.f32 %v13903_v50, %v17853_v42  ;;  %v17854_v59 = vmax.f32 %v13621_v38, %v13613_v24  ;;  %v17856_v13 = vld [vmem:[#allocation184_spill] sm:$0xff]  ;;  %v17859_v55 = vmax.f32 %v13626_v19, %v13617_v8  ;;  %v17861_v38 = vld [vmem:[#allocation119_spill] sm:$0xff] }
 0x357   : > { %v13940_v27 = vadd.f32 %v3308_v49, %v2243_v43  ;;  %v3311_v54 = vmul.f32 %v13906_v53, %v3274_v7  ;;  %v2875_v4 = vpop.f32.mrb[101].mxu0  ;;  %9046 = vmatmul.mubr.f32.gmra.mrb[206].mxu0 %v17855_v1  ;;  %v17858_v33 = vmax.f32 %v17856_v13, %v17857_v45  ;;  %v17862_v42 = vld [vmem:[#allocation191_spill] sm:$0xff] }
 0x358   : > { %v3019_v28 = vmax.f32 %v17854_v59, %v8552_v25  ;;  %v3310_v49 = vmul.f32 %v13906_v53, %v3273_v22  ;;  %v3018_v30 = vmax.f32 %v17859_v55, %v2875_v4  ;;  %9048 = vmatprep.mubr.f32.mxu0 %v17860_v32  ;;  %v8635_v7 = vpop.f32.mrb[102].mxu1  ;;  %v17863_v19 = vld [vmem:[#allocation239_spill] sm:$0xff]  ;;  %v17867_v4 = vld [vmem:[#allocation189_spill] sm:$0xff] }
 0x359   : > { %v2245_v43 = vmul.f32 %v13903_v50, %v17858_v33  ;;  %v3142_v24 = vpop.f32.mrb[103].mxu1  ;;  %9129 = vmatmul.mubr.f32.gmra.mrb[208].mxu1 %v17861_v38  ;;  %v13961_v25 = vadd.f32 %v3311_v54, %v2246_v40  ;;  %v17864_v8 = vmax.f32 %v17862_v42, %v17863_v19  ;;  %v17870_v33 = vmax.f32 %v13647_v29, %v13636_v41  ;;  %v17872_v41 = vld [vmem:[#allocation197_spill] sm:$0xff] }
 0x35a   : > { %v3276_v2 = vmax.f32 %v3019_v28, %v8632_v0  ;;  %v3275_v23 = vmax.f32 %v3018_v30, %v3132_v39  ;;  %v8555_v56 = vpop.f32.mrb[102].mxu0  ;;  %9811 = vmatpush3.bf16.xpose.msra.mxu1 %v13587_v44  ;;  %9131 = vmatprep.mubr.f32.mxu1 %v17635_v17  ;;  %v17865_v28 = vmax.f32 %v13639_v51, %v13634_v58  ;;  %v17866_v39 = vld [vmem:[#allocation120_spill] sm:$0xff]  ;;  %v17873_v29 = vld [vmem:[#allocation241_spill] sm:$0xff] }
 0x35b   : > { %v13965_v22 = vadd.f32 %v3310_v49, %v2245_v43  ;;  %v2248_v59 = vmul.f32 %v13903_v50, %v17864_v8  ;;  %v2885_v54 = vpop.f32.mrb[103].mxu0  ;;  %9049 = vmatmul.mubr.f32.gmra.mrb[208].mxu0 %v17866_v39  ;;  %9813 = vmatprep.subr.bf16.mxu1 %v13629_v14  ;;  %v17868_v17 = vld [vmem:[#allocation240_spill] sm:$0xff]  ;;  %v17874_v38 = vmax.f32 %v17872_v41, %v17873_v29  ;;  %v14019_v29 = vpop.xlane.xlu0 %5503 }
 0x35c   : > { %v3313_v0 = vmul.f32 %v13906_v53, %v3276_v2  ;;  %v3021_v40 = vmax.f32 %v17865_v28, %v8555_v56  ;;  %v17869_v1 = vmax.f32 %v17867_v4, %v17868_v17  ;;  %v3312_v45 = vmul.f32 %v13906_v53, %v3275_v23  ;;  %9779 = vmatpush3.bf16.xpose.msra.mxu0 %v13587_v44  ;;  %v8638_v58 = vpop.f32.mrb[104].mxu1  ;;  %v17875_v23 = vld [vmem:[#allocation112_spill] sm:$0xff]  ;;  %v17876_v56 = vld [vmem:[#allocation226_spill] sm:$0xff] }
 0x35d   : > { %v3020_v43 = vmax.f32 %v17870_v33, %v2885_v54  ;;  %9051 = vmatprep.mubr.f32.mxu0 %v17640_v11  ;;  %v3152_v49 = vpop.f32.mrb[105].mxu1  ;;  %9132 = vmatmul.mubr.f32.gmra.mrb[210].mxu1 %v17641_v47  ;;  %v2250_v11 = vmul.f32 %v13903_v50, %v17874_v38  ;;  %v17877_v47 = vmax.f32 %v17875_v23, %v17876_v56  ;;  %v17878_v8 = vld [vmem:[#allocation128_spill] sm:$0xff]  ;;  %v17883_v54 = vld [vmem:[#allocation113_spill] sm:$0xff]  ;;  %v17890_v23 = vld [vmem:[#allocation243_spill] sm:$0xff] }
 0x35e   : > { %v2247_v13 = vmul.f32 %v13903_v50, %v17869_v1  ;;  %v3278_v51 = vmax.f32 %v3021_v40, %v8635_v7  ;;  %9781 = vmatprep.subr.bf16.mxu0 %v13629_v14  ;;  %v13989_v55 = vadd.f32 %v3313_v0, %v2248_v59  ;;  %v8558_v32 = vpop.f32.mrb[104].mxu0  ;;  %9134 = vmatprep.mubr.f32.mxu1 %v17642_v46  ;;  %v17880_v59 = vld [vmem:[#allocation242_spill] sm:$0xff]  ;;  %v17885_v17 = vld [vmem:[#allocation132_spill] sm:$0xff] }
 0x35f   : > { %v3277_v30 = vmax.f32 %v3020_v43, %v3142_v24  ;;  %v3023_v42 = vmax.f32 %v17877_v47, %v8558_v32  ;;  %v2895_v19 = vpop.f32.mrb[105].mxu0  ;;  %9052 = vmatmul.mubr.f32.gmra.mrb[210].mxu0 %v17878_v8  ;;  %v17879_v24 = vld [vmem:[#allocation196_spill] sm:$0xff]  ;;  %v17882_v40 = vld [vmem:[#allocation230_spill] sm:$0xff]  ;;  %v17886_v43 = vld [vmem:[#allocation135_spill] sm:$0xff] }
 0x360   : > { %v13992_v2 = vadd.f32 %v3312_v45, %v2247_v13  ;;  %v3315_v7 = vmul.f32 %v13906_v53, %v3278_v51  ;;  %v17881_v0 = vmax.f32 %v17879_v24, %v17880_v59  ;;  %v17884_v39 = vmax.f32 %v17882_v40, %v17883_v54  ;;  %9054 = vmatprep.mubr.f32.mxu0 %v17885_v17  ;;  %v8641_v1 = vpop.f32.mrb[106].mxu1  ;;  %v14012_v13 = vpop.xlane.xlu1 %5727  ;;  %v17891_v56 = vld [vmem:[#allocation200_spill] sm:$0xff]  ;;  %v17900_v54 = vld [vmem:[#allocation115_spill] sm:$0xff] }
 0x361   : > { %v3314_v28 = vmul.f32 %v13906_v53, %v3277_v30  ;;  %v3280_v45 = vmax.f32 %v3023_v42, %v8638_v58  ;;  %v3162_v33 = vpop.f32.mrb[107].mxu1  ;;  %9135 = vmatmul.mubr.f32.gmra.mrb[212].mxu1 %v17886_v43  ;;  %v17888_v30 = vld [vmem:[#allocation139_spill] sm:$0xff]  ;;  %v17892_v47 = vmax.f32 %v17890_v23, %v17891_v56  ;;  %v17896_v24 = vld [vmem:[#allocation136_spill] sm:$0xff] }
 0x362   : > { %17871 = vst [vmem:[#allocation88_spill] sm:$0xff] %v13992_v2  ;;  %v2249_v46 = vmul.f32 %v13903_v50, %v17881_v0  ;;  %v3022_v4 = vmax.f32 %v17884_v39, %v2895_v19  ;;  %v14015_v51 = vadd.f32 %v3315_v7, %v2250_v11  ;;  %v8561_v41 = vpop.f32.mrb[106].mxu0  ;;  %9815 = vmatpush3.bf16.xpose.msra.mxu1 %v13629_v14  ;;  %v17893_v19 = vld [vmem:[#allocation117_spill] sm:$0xff]  ;;  %v17894_v11 = vld [vmem:[#allocation232_spill] sm:$0xff]  ;;  %v17898_v0 = vld [vmem:[#allocation198_spill] sm:$0xff] }
 0x363   : > { %9137 = vmatprep.mubr.f32.mxu1 %v17888_v30  ;;  %v2252_v58 = vmul.f32 %v13903_v50, %v17892_v47  ;;  %v3317_v42 = vmul.f32 %v13906_v53, %v3280_v45  ;;  %v17895_v7 = vmax.f32 %v17893_v19, %v17894_v11  ;;  %v2905_v8 = vpop.f32.mrb[107].mxu0  ;;  %9055 = vmatmul.mubr.f32.gmra.mrb[212].mxu0 %v17896_v24  ;;  %v17897_v59 = vld [vmem:[#allocation244_spill] sm:$0xff]  ;;  %v17901_v39 = vld [vmem:[#allocation231_spill] sm:$0xff]  ;;  %v17909_v24 = vld [vmem:[#allocation245_spill] sm:$0xff] }
 0x364   : > { %17887 = vst [vmem:[#allocation146_spill] sm:$0xff] %v14015_v51  ;;  %v3279_v32 = vmax.f32 %v3022_v4, %v3152_v49  ;;  %v14021_v38 = vadd.f32 %v3314_v28, %v2249_v46  ;;  %9817 = vmatprep.subr.bf16.mxu1 %v13671_v57  ;;  %v17899_v46 = vmax.f32 %v17897_v59, %v17898_v0  ;;  %v17903_v45 = vld [vmem:[#allocation140_spill] sm:$0xff]  ;;  %v8644_v43 = vpop.f32.mrb[108].mxu1  ;;  %v17904_v23 = vld [vmem:[#allocation143_spill] sm:$0xff]  ;;  %v14048_v11 = vpop.xlane.xlu1 %5730  ;;  %v18118_v51 = vld [vmem:[#allocation65_spill] sm:$0xff] }
 0x365   : > { %v3025_v49 = vmax.f32 %v17895_v7, %v8561_v41  ;;  %v17902_v4 = vmax.f32 %v17900_v54, %v17901_v39  ;;  %9783 = vmatpush3.bf16.xpose.msra.mxu0 %v13629_v14  ;;  %9057 = vmatprep.mubr.f32.mxu0 %v17903_v45  ;;  %v3172_v30 = vpop.f32.mrb[109].mxu1  ;;  %v14045_v56 = vadd.f32 %v3317_v42, %v2252_v58  ;;  %v17914_v54 = vld [vmem:[#allocation246_spill] sm:$0xff]  ;;  %v17917_v45 = vld [vmem:[#allocation148_spill] sm:$0xff] }
 0x366   : > { %17889 = vst [vmem:[#allocation145_spill] sm:$0xff] %v14021_v38  ;;  %v2251_v28 = vmul.f32 %v13903_v50, %v17899_v46  ;;  %v3316_v40 = vmul.f32 %v13906_v53, %v3279_v32  ;;  %9138 = vmatmul.mubr.f32.gmra.mrb[214].mxu1 %v17904_v23  ;;  %9785 = vmatprep.subr.bf16.mxu0 %v13671_v57  ;;  %v8564_v19 = vpop.f32.mrb[108].mxu0  ;;  %v17906_v32 = vld [vmem:[#allocation147_spill] sm:$0xff]  ;;  %v17913_v46 = vld [vmem:[#allocation74_spill] sm:$0xff]  ;;  %v14070_v23 = vpop.xlane.xlu0 %5506 }
 0x367   : > { %v3024_v17 = vmax.f32 %v17902_v4, %v2905_v8  ;;  %v3282_v41 = vmax.f32 %v3025_v49, %v8641_v1  ;;  %17905 = vst [vmem:[#allocation28_spill] sm:$0xff] %v14045_v56  ;;  %9140 = vmatprep.mubr.f32.mxu1 %v17906_v32  ;;  %v17908_v8 = vld [vmem:[#allocation207_spill] sm:$0xff]  ;;  %v17911_v0 = vmax.f32 %v13705_v63, %v13697_v21  ;;  %v2915_v42 = vpop.f32.mrb[109].mxu0  ;;  %v18114_v56 = vld [vmem:[#allocation66_spill] sm:$0xff] }
 0x368   : > { %v14050_v7 = vadd.f32 %v3316_v40, %v2251_v28  ;;  %v17910_v59 = vmax.f32 %v17908_v8, %v17909_v24  ;;  %v17915_v39 = vmax.f32 %v17913_v46, %v17914_v54  ;;  %v17916_v4 = vmax.f32 %v13710_v10, %v13701_v3  ;;  %v17922_v10 = vld [vmem:[#allocation76_spill] sm:$0xff]  ;;  %v17928_v46 = vld [vmem:[#allocation71_spill] sm:$0xff]  ;;  %v18117_v38 = vld [vmem:[#allocation174_spill] sm:$0xff] }
 0x369   : > { %v3281_v47 = vmax.f32 %v3024_v17, %v3162_v33  ;;  %v3319_v49 = vmul.f32 %v13906_v53, %v3282_v41  ;;  %v3027_v58 = vmax.f32 %v17911_v0, %v8564_v19  ;;  %v17912_v33 = vld [vmem:[#allocation144_spill] sm:$0xff]  ;;  %v8647_v41 = vpop.f32.mrb[110].mxu1  ;;  %v17918_v19 = vld [vmem:[#allocation149_spill] sm:$0xff] }
 0x36a   : > { %17907 = vst [vmem:[#allocation29_spill] sm:$0xff] %v14050_v7  ;;  %v2254_v1 = vmul.f32 %v13903_v50, %v17910_v59  ;;  %9058 = vmatmul.mubr.f32.gmra.mrb[214].mxu0 %v17912_v33  ;;  %v2253_v28 = vmul.f32 %v13903_v50, %v17915_v39  ;;  %v3026_v17 = vmax.f32 %v17916_v4, %v2915_v42  ;;  %v3182_v63 = vpop.f32.mrb[111].mxu1  ;;  %v8567_v24 = vpop.f32.mrb[110].mxu0  ;;  %v17923_v3 = vld [vmem:[#allocation208_spill] sm:$0xff]  ;;  %v17927_v33 = vld [vmem:[#allocation75_spill] sm:$0xff]  ;;  %v17931_v4 = vld [vmem:[#allocation121_spill] sm:$0xff] }
 0x36b   : > { %v3318_v40 = vmul.f32 %v13906_v53, %v3281_v47  ;;  %9060 = vmatprep.mubr.f32.mxu0 %v17917_v45  ;;  %v3284_v21 = vmax.f32 %v3027_v58, %v8644_v43  ;;  %9141 = vmatmul.mubr.f32.gmra.mrb[216].mxu1 %v17918_v19  ;;  %v17920_v47 = vld [vmem:[#allocation23_spill] sm:$0xff]  ;;  %v17924_v0 = vmax.f32 %v17922_v10, %v17923_v3 }
 0x36c   : > { %v14073_v32 = vadd.f32 %v3319_v49, %v2254_v1  ;;  %v3283_v8 = vmax.f32 %v3026_v17, %v3172_v30  ;;  %9819 = vmatpush3.bf16.xpose.msra.mxu1 %v13671_v57  ;;  %9143 = vmatprep.mubr.f32.mxu1 %v17920_v47  ;;  %v17925_v58 = vmax.f32 %v13723_v61, %v13718_v37  ;;  %v2925_v49 = vpop.f32.mrb[111].mxu0  ;;  %v17926_v30 = vld [vmem:[#allocation150_spill] sm:$0xff]  ;;  %v17933_v37 = vld [vmem:[#allocation151_spill] sm:$0xff]  ;;  %v8650_v61 = vpop.f32.mrb[112].mxu1 }
 0x36d   : > { %v14077_v59 = vadd.f32 %v3318_v40, %v2253_v28  ;;  %v2256_v42 = vmul.f32 %v13903_v50, %v17924_v0  ;;  %v3321_v43 = vmul.f32 %v13906_v53, %v3284_v21  ;;  %9821 = vmatprep.subr.bf16.mxu1 %v13713_v48  ;;  %v17929_v54 = vmax.f32 %v17927_v33, %v17928_v46  ;;  %v17930_v40 = vld [vmem:[#allocation126_spill] sm:$0xff]  ;;  %v14099_v21 = vpop.xlane.xlu1 %5733  ;;  %v17936_v0 = vld [vmem:[#allocation24_spill] sm:$0xff] }
 0x36e   : > { %17919 = vst [vmem:[#allocation98_spill] sm:$0xff] %v14073_v32  ;;  %v3029_v1 = vmax.f32 %v17925_v58, %v8567_v24  ;;  %9061 = vmatmul.mubr.f32.gmra.mrb[216].mxu0 %v17926_v30  ;;  %v3320_v28 = vmul.f32 %v13906_v53, %v3283_v8  ;;  %v17932_v17 = vmax.f32 %v17930_v40, %v17931_v4  ;;  %v3192_v24 = vpop.f32.mrb[113].mxu1  ;;  %v17934_v47 = vld [vmem:[#allocation22_spill] sm:$0xff]  ;;  %v8570_v3 = vpop.f32.mrb[112].mxu0  ;;  %v17938_v30 = vld [vmem:[#allocation81_spill] sm:$0xff]  ;;  %v17943_v40 = vld [vmem:[#allocation84_spill] sm:$0xff] }
 0x36f   : > { %17921 = vst [vmem:[#allocation95_spill] sm:$0xff] %v14077_v59  ;;  %v2255_v39 = vmul.f32 %v13903_v50, %v17929_v54  ;;  %9787 = vmatpush3.bf16.xpose.msra.mxu0 %v13671_v57  ;;  %9063 = vmatprep.mubr.f32.mxu0 %v17933_v37  ;;  %v14103_v10 = vadd.f32 %v3321_v43, %v2256_v42  ;;  %v14106_v58 = vpop.xlane.xlu0 %5509  ;;  %v17939_v33 = vld [vmem:[#allocation82_spill] sm:$0xff]  ;;  %v2935_v43 = vpop.f32.mrb[113].mxu0  ;;  %v17944_v4 = vld [vmem:[#allocation209_spill] sm:$0xff]  ;;  %v18111_v32 = vld [vmem:[#allocation64_spill] sm:$0xff] }
 0x370   : > { %v3028_v45 = vmax.f32 %v17932_v17, %v2925_v49  ;;  %v3286_v19 = vmax.f32 %v3029_v1, %v8647_v41  ;;  %9144 = vmatmul.mubr.f32.gmra.mrb[218].mxu1 %v17934_v47  ;;  %9789 = vmatprep.subr.bf16.mxu0 %v13713_v48  ;;  %v17940_v46 = vmax.f32 %v17938_v30, %v17939_v33  ;;  %v18108_v59 = vld [vmem:[#allocation61_spill] sm:$0xff]  ;;  %v18116_v57 = vld [vmem:[#allocation63_spill] sm:$0xff] }
 0x371   : > { %17935 = vst [vmem:[#allocation99_spill] sm:$0xff] %v14103_v10  ;;  %9146 = vmatprep.mubr.f32.mxu1 %v17936_v0  ;;  %v14108_v49 = vadd.f32 %v3320_v28, %v2255_v39  ;;  %v17941_v54 = vmax.f32 %v13745_v31, %v13739_v26  ;;  %v17945_v17 = vmax.f32 %v17943_v40, %v17944_v4  ;;  %v17948_v0 = vld [vmem:[#allocation153_spill] sm:$0xff]  ;;  %v17957_v4 = vld [vmem:[#allocation154_spill] sm:$0xff] }
 0x372   : > { %v3285_v8 = vmax.f32 %v3028_v45, %v3182_v63  ;;  %v2258_v41 = vmul.f32 %v13903_v50, %v17940_v46  ;;  %v3323_v1 = vmul.f32 %v13906_v53, %v3286_v19  ;;  %v17942_v63 = vld [vmem:[#allocation152_spill] sm:$0xff]  ;;  %v17946_v45 = vld [vmem:[#allocation125_spill] sm:$0xff]  ;;  %v8653_v19 = vpop.f32.mrb[114].mxu1  ;;  %v8573_v46 = vpop.f32.mrb[114].mxu0 }
 0x373   : > { %17937 = vst [vmem:[#allocation102_spill] sm:$0xff] %v14108_v49  ;;  %v3031_v42 = vmax.f32 %v17941_v54, %v8570_v3  ;;  %9064 = vmatmul.mubr.f32.gmra.mrb[218].mxu0 %v17942_v63  ;;  %v2257_v39 = vmul.f32 %v13903_v50, %v17945_v17  ;;  %v17947_v37 = vmax.f32 %v13750_v35, %v17946_v45  ;;  %v3202_v26 = vpop.f32.mrb[115].mxu1  ;;  %v17949_v31 = vld [vmem:[#allocation25_spill] sm:$0xff]  ;;  %v17951_v54 = vld [vmem:[#allocation26_spill] sm:$0xff]  ;;  %v17953_v35 = vld [vmem:[#allocation92_spill] sm:$0xff] }
 0x374   : > { %v3322_v28 = vmul.f32 %v13906_v53, %v3285_v8  ;;  %9066 = vmatprep.mubr.f32.mxu0 %v17948_v0  ;;  %9147 = vmatmul.mubr.f32.gmra.mrb[220].mxu1 %v17949_v31  ;;  %v14129_v3 = vadd.f32 %v3323_v1, %v2258_v41  ;;  %v14133_v8 = vpop.xlane.xlu1 %5736  ;;  %v17956_v41 = vmax.f32 %v13761_v34, %v13756_v62  ;;  %v2945_v1 = vpop.f32.mrb[115].mxu0  ;;  %v17958_v17 = vld [vmem:[#allocation118_spill] sm:$0xff]  ;;  %v17959_v45 = vld [vmem:[#allocation211_spill] sm:$0xff]  ;;  %v17962_v0 = vld [vmem:[#allocation129_spill] sm:$0xff] }
 0x375   : > { %v3030_v47 = vmax.f32 %v17947_v37, %v2935_v43  ;;  %v3288_v30 = vmax.f32 %v3031_v42, %v8650_v61  ;;  %9823 = vmatpush3.bf16.xpose.msra.mxu1 %v13713_v48  ;;  %9149 = vmatprep.mubr.f32.mxu1 %v17951_v54  ;;  %v17954_v43 = vld [vmem:[#allocation210_spill] sm:$0xff]  ;;  %v17960_v37 = vld [vmem:[#allocation83_spill] sm:$0xff]  ;;  %v8656_v34 = vpop.f32.mrb[116].mxu1 }
 0x376   : > { %17950 = vst [vmem:[#allocation68_spill] sm:$0xff] %v14129_v3  ;;  %v14135_v63 = vadd.f32 %v3322_v28, %v2257_v39  ;;  %v17955_v40 = vmax.f32 %v17953_v35, %v17954_v43  ;;  %9857 = vmatprep.subr.bf16.mxu1 %v17958_v17  ;;  %v17961_v39 = vmax.f32 %v17959_v45, %v17960_v37  ;;  %v17963_v31 = vld [vmem:[#allocation130_spill] sm:$0xff]  ;;  %v17965_v62 = vld [vmem:[#allocation155_spill] sm:$0xff]  ;;  %v3212_v43 = vpop.f32.mrb[117].mxu1  ;;  %v17970_v37 = vld [vmem:[#allocation212_spill] sm:$0xff] }
 0x377   : > { %v3287_v33 = vmax.f32 %v3030_v47, %v3192_v24  ;;  %v3325_v42 = vmul.f32 %v13906_v53, %v3288_v30  ;;  %v3033_v24 = vmax.f32 %v17956_v41, %v8573_v46  ;;  %9067 = vmatmul.mubr.f32.gmra.mrb[220].mxu0 %v17957_v4  ;;  %v17964_v54 = vmax.f32 %v17962_v0, %v17963_v31  ;;  %v14157_v46 = vpop.xlane.xlu0 %5512  ;;  %v8576_v4 = vpop.f32.mrb[116].mxu0  ;;  %v17968_v45 = vld [vmem:[#allocation30_spill] sm:$0xff] }
 0x378   : > { %17952 = vst [vmem:[#allocation234_spill] sm:$0xff] %v14135_v63  ;;  %v2260_v61 = vmul.f32 %v13903_v50, %v17955_v40  ;;  %v2259_v28 = vmul.f32 %v13903_v50, %v17961_v39  ;;  %9791 = vmatpush3.bf16.xpose.msra.mxu0 %v13713_v48  ;;  %9069 = vmatprep.mubr.f32.mxu0 %v17965_v62  ;;  %v17966_v40 = vld [vmem:[#allocation27_spill] sm:$0xff]  ;;  %v17971_v39 = vld [vmem:[#allocation89_spill] sm:$0xff]  ;;  %v17978_v62 = vld [vmem:[#allocation134_spill] sm:$0xff] }
 0x379   : > { %v3324_v47 = vmul.f32 %v13906_v53, %v3287_v33  ;;  %v3032_v30 = vmax.f32 %v17964_v54, %v2945_v1  ;;  %v3290_v35 = vmax.f32 %v3033_v24, %v8653_v19  ;;  %9150 = vmatmul.mubr.f32.gmra.mrb[222].mxu1 %v17966_v40  ;;  %9825 = vmatprep.subr.bf16.mxu0 %v17958_v17  ;;  %v2955_v17 = vpop.f32.mrb[117].mxu0  ;;  %v18105_v49 = vld [vmem:[#allocation62_spill] sm:$0xff] }
 0x37a   : > { %v14161_v41 = vadd.f32 %v3325_v42, %v2260_v61  ;;  %9264 = vmatprep.mubr.f32.mxu1 %v17968_v45  ;;  %v17972_v0 = vmax.f32 %v17970_v37, %v17971_v39  ;;  %v17973_v24 = vmax.f32 %v13783_v15, %v13777_v52  ;;  %v17974_v61 = vld [vmem:[#allocation156_spill] sm:$0xff]  ;;  %v17976_v42 = vld [vmem:[#allocation213_spill] sm:$0xff]  ;;  %v17979_v40 = vmax.f32 %v13788_v20, %v17978_v62  ;;  %v14184_v39 = vpop.xlane.xlu1 %5739 }
 0x37b   : > { %v3289_v33 = vmax.f32 %v3032_v30, %v3202_v26  ;;  %v14164_v1 = vadd.f32 %v3324_v47, %v2259_v28  ;;  %v3327_v19 = vmul.f32 %v13906_v53, %v3290_v35  ;;  %9070 = vmatmul.mubr.f32.gmra.mrb[222].mxu0 %v17974_v61  ;;  %v17975_v26 = vld [vmem:[#allocation106_spill] sm:$0xff]  ;;  %v17980_v37 = vld [vmem:[#allocation157_spill] sm:$0xff]  ;;  %v8659_v35 = vpop.f32.mrb[118].mxu1  ;;  %v8579_v61 = vpop.f32.mrb[118].mxu0 }
 0x37c   : > { %17967 = vst [vmem:[#allocation67_spill] sm:$0xff] %v14161_v41  ;;  %v2262_v31 = vmul.f32 %v13903_v50, %v17972_v0  ;;  %v3035_v54 = vmax.f32 %v17973_v24, %v8576_v4  ;;  %v17977_v30 = vmax.f32 %v17975_v26, %v17976_v42  ;;  %v3034_v45 = vmax.f32 %v17979_v40, %v2955_v17  ;;  %v3222_v15 = vpop.f32.mrb[119].mxu1  ;;  %v17981_v4 = vld [vmem:[#allocation31_spill] sm:$0xff]  ;;  %v14191_v42 = vpop.xlane.xlu0 %5515  ;;  %v17986_v17 = vld [vmem:[#allocation216_spill] sm:$0xff] }
 0x37d   : > { %17969 = vst [vmem:[#allocation235_spill] sm:$0xff] %v14164_v1  ;;  %v3326_v47 = vmul.f32 %v13906_v53, %v3289_v33  ;;  %9184 = vmatprep.mubr.f32.mxu0 %v17980_v37  ;;  %9265 = vmatmul.mubr.f32.vlgmr.msra.gmra.mrb[224].mxu1 %v17981_v4  ;;  %v17983_v26 = vld [vmem:[#allocation43_spill] sm:$0xff]  ;;  %v17984_v33 = vld [vmem:[#allocation32_spill] sm:$0xff]  ;;  %v18099_v1 = vld [vmem:[#allocation170_spill] sm:$0xff] }
 0x37e   : > { %v2261_v28 = vmul.f32 %v13903_v50, %v17977_v30  ;;  %v3292_v52 = vmax.f32 %v3035_v54, %v8656_v34  ;;  %v14187_v0 = vadd.f32 %v3327_v19, %v2262_v31  ;;  %v3291_v24 = vmax.f32 %v3034_v45, %v3212_v43  ;;  %9859 = vmatpush1.bf16.xpose.msra.mxu1 %v17983_v26  ;;  %v17987_v30 = vld [vmem:[#allocation214_spill] sm:$0xff]  ;;  %v2965_v19 = vpop.f32.mrb[119].mxu0  ;;  %v17990_v40 = vld [vmem:[#allocation159_spill] sm:$0xff] }
 0x37f   : > { %9267 = vmatprep.mubr.f32.mxu1 %v17984_v33  ;;  %v17988_v62 = vmax.f32 %v17986_v17, %v17987_v30  ;;  %v17989_v31 = vmax.f32 %v13799_v5, %v13794_v16  ;;  %9185 = vmatmul.mubr.f32.vlgmr.msra.gmra.mrb[224].mxu0 %v17990_v40  ;;  %v17991_v45 = vld [vmem:[#allocation158_spill] sm:$0xff]  ;;  %v17992_v37 = vld [vmem:[#allocation215_spill] sm:$0xff]  ;;  %v17995_v17 = vld [vmem:[#allocation72_spill] sm:$0xff]  ;;  %v8662_v5 = vpop.f32.mrb[120].mxu1 }
 0x380   : > { %17982 = vst [vmem:[#allocation107_spill] sm:$0xff] %v14187_v0  ;;  %v14193_v20 = vadd.f32 %v3326_v47, %v2261_v28  ;;  %v3329_v54 = vmul.f32 %v13906_v53, %v3292_v52  ;;  %9861 = vmatprep.subr.bf16.mxu1 %v17991_v45  ;;  %v17993_v4 = vld [vmem:[#allocation103_spill] sm:$0xff]  ;;  %v3328_v33 = vmul.f32 %v13906_v53, %v3291_v24  ;;  %v17996_v30 = vld [vmem:[#allocation133_spill] sm:$0xff]  ;;  %v17998_v16 = vld [vmem:[#allocation160_spill] sm:$0xff] }
 0x381   : > { %v2264_v34 = vmul.f32 %v13903_v50, %v17988_v62  ;;  %v3037_v43 = vmax.f32 %v17989_v31, %v8579_v61  ;;  %v17994_v28 = vmax.f32 %v17992_v37, %v17993_v4  ;;  %v17997_v62 = vmax.f32 %v17995_v17, %v17996_v30  ;;  %9827 = vmatpush1.bf16.xpose.msra.mxu0 %v17983_v26  ;;  %v3232_v31 = vpop.f32.mrb[121].mxu1  ;;  %v17999_v40 = vld [vmem:[#allocation33_spill] sm:$0xff]  ;;  %v18001_v24 = vld [vmem:[#allocation34_spill] sm:$0xff]  ;;  %v18003_v26 = vld [vmem:[#allocation124_spill] sm:$0xff] }
 0x382   : > { %17985 = vst [vmem:[#allocation110_spill] sm:$0xff] %v14193_v20  ;;  %9187 = vmatprep.mubr.f32.mxu0 %v17998_v16  ;;  %9268 = vmatmul.mubr.f32.gmra.mrb[226].mxu1 %v17999_v40  ;;  %v14220_v20 = vpop.xlane.xlu1 %5742  ;;  %v18004_v17 = vld [vmem:[#allocation123_spill] sm:$0xff]  ;;  %v18011_v40 = vld [vmem:[#allocation73_spill] sm:$0xff]  ;;  %v18097_v0 = vld [vmem:[#allocation58_spill] sm:$0xff] }
 0x383   : > { %v2263_v47 = vmul.f32 %v13903_v50, %v17994_v28  ;;  %v3036_v52 = vmax.f32 %v17997_v62, %v2965_v19  ;;  %v3294_v61 = vmax.f32 %v3037_v43, %v8659_v35  ;;  %9829 = vmatprep.subr.bf16.mxu0 %v17991_v45  ;;  %v14217_v37 = vadd.f32 %v3329_v54, %v2264_v34  ;;  %v8582_v28 = vpop.f32.mrb[120].mxu0  ;;  %v18008_v62 = vld [vmem:[#allocation127_spill] sm:$0xff] }
 0x384   : > { %9270 = vmatprep.mubr.f32.mxu1 %v18001_v24  ;;  %v18005_v30 = vmax.f32 %v18003_v26, %v18004_v17  ;;  %v18006_v45 = vmax.f32 %v13821_v9, %v13815_v12  ;;  %v2975_v54 = vpop.f32.mrb[121].mxu0  ;;  %v18012_v24 = vmax.f32 %v13826_v18, %v18011_v40  ;;  %v18013_v17 = vld [vmem:[#allocation163_spill] sm:$0xff]  ;;  %v18019_v18 = vld [vmem:[#allocation94_spill] sm:$0xff] }
 0x385   : > { %18000 = vst [vmem:[#allocation114_spill] sm:$0xff] %v14217_v37  ;;  %v3293_v4 = vmax.f32 %v3036_v52, %v3222_v15  ;;  %v14222_v19 = vadd.f32 %v3328_v33, %v2263_v47  ;;  %v3331_v43 = vmul.f32 %v13906_v53, %v3294_v61  ;;  %v18007_v15 = vld [vmem:[#allocation162_spill] sm:$0xff]  ;;  %v18009_v52 = vld [vmem:[#allocation217_spill] sm:$0xff]  ;;  %v8665_v61 = vpop.f32.mrb[122].mxu1  ;;  %v18107_v41 = vld [vmem:[#allocation59_spill] sm:$0xff] }
 0x386   : > { %v2266_v35 = vmul.f32 %v13903_v50, %v18005_v30  ;;  %v3039_v34 = vmax.f32 %v18006_v45, %v8582_v28  ;;  %9188 = vmatmul.mubr.f32.gmra.mrb[226].mxu0 %v18007_v15  ;;  %v18010_v16 = vmax.f32 %v18008_v62, %v18009_v52  ;;  %v3038_v26 = vmax.f32 %v18012_v24, %v2975_v54  ;;  %v14242_v30 = vpop.xlane.xlu0 %5518  ;;  %v3242_v9 = vpop.f32.mrb[123].mxu1  ;;  %v18014_v28 = vld [vmem:[#allocation35_spill] sm:$0xff]  ;;  %v18016_v52 = vld [vmem:[#allocation44_spill] sm:$0xff] }
 0x387   : > { %18002 = vst [vmem:[#allocation69_spill] sm:$0xff] %v14222_v19  ;;  %v3330_v33 = vmul.f32 %v13906_v53, %v3293_v4  ;;  %9190 = vmatprep.mubr.f32.mxu0 %v18013_v17  ;;  %9271 = vmatmul.mubr.f32.gmra.mrb[228].mxu1 %v18014_v28  ;;  %v8585_v62 = vpop.f32.mrb[122].mxu0  ;;  %v18017_v4 = vld [vmem:[#allocation36_spill] sm:$0xff]  ;;  %v18020_v54 = vld [vmem:[#allocation91_spill] sm:$0xff]  ;;  %v18026_v28 = vld [vmem:[#allocation93_spill] sm:$0xff] }
 0x388   : > { %v2265_v47 = vmul.f32 %v13903_v50, %v18010_v16  ;;  %v3296_v12 = vmax.f32 %v3039_v34, %v8662_v5  ;;  %v14245_v45 = vadd.f32 %v3331_v43, %v2266_v35  ;;  %v3295_v15 = vmax.f32 %v3038_v26, %v3232_v31  ;;  %9863 = vmatpush1.bf16.xpose.msra.mxu1 %v18016_v52  ;;  %v18022_v34 = vld [vmem:[#allocation138_spill] sm:$0xff]  ;;  %v2985_v43 = vpop.f32.mrb[123].mxu0  ;;  %v18024_v31 = vld [vmem:[#allocation165_spill] sm:$0xff] }
 0x389   : > { %9273 = vmatprep.mubr.f32.mxu1 %v18017_v4  ;;  %v18021_v40 = vmax.f32 %v18019_v18, %v18020_v54  ;;  %v18023_v17 = vmax.f32 %v13837_v6, %v18022_v34  ;;  %v18025_v26 = vld [vmem:[#allocation161_spill] sm:$0xff]  ;;  %v18027_v4 = vld [vmem:[#allocation90_spill] sm:$0xff]  ;;  %9831 = vmatpush1.bf16.xpose.msra.mxu0 %v18016_v52  ;;  %v14271_v34 = vpop.xlane.xlu1 %5745 }
 0x38a   : > { %18015 = vst [vmem:[#allocation237_spill] sm:$0xff] %v14245_v45  ;;  %v14249_v16 = vadd.f32 %v3330_v33, %v2265_v47  ;;  %v3333_v5 = vmul.f32 %v13906_v53, %v3296_v12  ;;  %9191 = vmatmul.mubr.f32.gmra.mrb[228].mxu0 %v18024_v31  ;;  %9865 = vmatprep.subr.bf16.mxu1 %v18025_v26  ;;  %v18029_v54 = vld [vmem:[#allocation78_spill] sm:$0xff]  ;;  %v18033_v45 = vld [vmem:[#allocation37_spill] sm:$0xff] }
 0x38b   : > { %v2268_v24 = vmul.f32 %v13903_v50, %v18021_v40  ;;  %v3041_v35 = vmax.f32 %v18023_v17, %v8585_v62  ;;  %v18028_v47 = vmax.f32 %v18026_v28, %v18027_v4  ;;  %v3332_v18 = vmul.f32 %v13906_v53, %v3295_v15  ;;  %v18030_v40 = vld [vmem:[#allocation137_spill] sm:$0xff]  ;;  %v18032_v6 = vld [vmem:[#allocation166_spill] sm:$0xff]  ;;  %v8668_v62 = vpop.f32.mrb[124].mxu1  ;;  %9274 = vmatmul.mubr.f32.gmra.mrb[230].mxu1 %v18033_v45  ;;  %v8588_v4 = vpop.f32.mrb[124].mxu0  ;;  %v18040_v45 = vld [vmem:[#allocation80_spill] sm:$0xff] }
 0x38c   : > { %18018 = vst [vmem:[#allocation111_spill] sm:$0xff] %v14249_v16  ;;  %v18031_v16 = vmax.f32 %v18029_v54, %v18030_v40  ;;  %9193 = vmatprep.mubr.f32.mxu0 %v18032_v6  ;;  %v3252_v31 = vpop.f32.mrb[125].mxu1  ;;  %9833 = vmatprep.subr.bf16.mxu0 %v18025_v26  ;;  %v18038_v54 = vld [vmem:[#allocation96_spill] sm:$0xff]  ;;  %v18041_v6 = vld [vmem:[#allocation77_spill] sm:$0xff] }
 0x38d   : > { %v2267_v33 = vmul.f32 %v13903_v50, %v18028_v47  ;;  %v3298_v17 = vmax.f32 %v3041_v35, %v8665_v61  ;;  %v14275_v28 = vadd.f32 %v3333_v5, %v2268_v24  ;;  %v18035_v47 = vld [vmem:[#allocation38_spill] sm:$0xff]  ;;  %v18042_v26 = vmax.f32 %v18040_v45, %v18041_v6  ;;  %v2995_v5 = vpop.f32.mrb[125].mxu0  ;;  %v18050_v19 = vld [vmem:[#allocation169_spill] sm:$0xff] }
 0x38e   : > { %v3040_v12 = vmax.f32 %v18031_v16, %v2985_v43  ;;  %9276 = vmatprep.mubr.f32.mxu1 %v18035_v47  ;;  %v14278_v16 = vpop.xlane.xlu0 %5521  ;;  %v18037_v43 = vld [vmem:[#allocation100_spill] sm:$0xff]  ;;  %v18045_v47 = vld [vmem:[#allocation101_spill] sm:$0xff] }
 0x38f   : > { %18034 = vst [vmem:[#allocation184_spill] sm:$0xff] %v14275_v28  ;;  %v14280_v52 = vadd.f32 %v3332_v18, %v2267_v33  ;;  %v18039_v40 = vmax.f32 %v18037_v43, %v18038_v54  ;;  %v3335_v35 = vmul.f32 %v13906_v53, %v3298_v17  ;;  %v3043_v24 = vmax.f32 %v18042_v26, %v8588_v4  ;;  %v18048_v43 = vld [vmem:[#allocation79_spill] sm:$0xff]  ;;  %v8671_v17 = vpop.f32.mrb[126].mxu1 }
 0x390   : > { %v3297_v15 = vmax.f32 %v3040_v12, %v3242_v9  ;;  %v18043_v9 = vld [vmem:[#allocation168_spill] sm:$0xff]  ;;  %v3262_v45 = vpop.f32.mrb[127].mxu1  ;;  %v18051_v4 = vld [vmem:[#allocation39_spill] sm:$0xff] }
 0x391   : > { %18036 = vst [vmem:[#allocation238_spill] sm:$0xff] %v14280_v52  ;;  %v2270_v61 = vmul.f32 %v13903_v50, %v18039_v40  ;;  %9194 = vmatmul.mubr.f32.gmra.mrb[230].mxu0 %v18043_v9  ;;  %v18044_v12 = vld [vmem:[#allocation220_spill] sm:$0xff]  ;;  %v18047_v52 = vld [vmem:[#allocation142_spill] sm:$0xff]  ;;  %v3300_v37 = vmax.f32 %v3043_v24, %v8668_v62  ;;  %9277 = vmatmul.mubr.f32.gmra.mrb[232].mxu1 %v18051_v4  ;;  %v8591_v9 = vpop.f32.mrb[126].mxu0 }
 0x392   : > { %v18046_v28 = vmax.f32 %v18044_v12, %v18045_v47  ;;  %v3334_v18 = vmul.f32 %v13906_v53, %v3297_v15  ;;  %v18049_v54 = vmax.f32 %v18047_v52, %v18048_v43  ;;  %9196 = vmatprep.mubr.f32.mxu0 %v18050_v19  ;;  %v18053_v12 = vld [vmem:[#allocation45_spill] sm:$0xff]  ;;  %v14305_v15 = vpop.xlane.xlu1 %5748  ;;  %v18063_v4 = vld [vmem:[#allocation164_spill] sm:$0xff] }
 0x393   : > { %v14301_v6 = vadd.f32 %v3335_v35, %v2270_v61  ;;  %9867 = vmatpush1.bf16.xpose.msra.mxu1 %v18053_v12  ;;  %v18056_v52 = vld [vmem:[#allocation221_spill] sm:$0xff]  ;;  %v3337_v24 = vmul.f32 %v13906_v53, %v3300_v37  ;;  %9835 = vmatpush1.bf16.xpose.msra.mxu0 %v18053_v12 }
 0x394   : > { %v2269_v33 = vmul.f32 %v13903_v50, %v18046_v28  ;;  %v3042_v40 = vmax.f32 %v18049_v54, %v2995_v5  ;;  %v18054_v28 = vld [vmem:[#allocation40_spill] sm:$0xff]  ;;  %v18059_v43 = vld [vmem:[#allocation85_spill] sm:$0xff]  ;;  %v3005_v54 = vpop.f32.mrb[127].mxu0  ;;  %9869 = vmatprep.subr.bf16.mxu1 %v18063_v4  ;;  %9837 = vmatprep.subr.bf16.mxu0 %v18063_v4 }
 0x395   : > { %18052 = vst [vmem:[#allocation116_spill] sm:$0xff] %v14301_v6  ;;  %9279 = vmatprep.mubr.f32.mxu1 %v18054_v28  ;;  %v18057_v5 = vld [vmem:[#allocation104_spill] sm:$0xff]  ;;  %v18060_v61 = vld [vmem:[#allocation141_spill] sm:$0xff]  ;;  %v18065_v6 = vld [vmem:[#allocation222_spill] sm:$0xff] }
 0x396   : > { %v3299_v26 = vmax.f32 %v3042_v40, %v3252_v31  ;;  %v14307_v47 = vadd.f32 %v3334_v18, %v2269_v33  ;;  %v18058_v19 = vmax.f32 %v18056_v52, %v18057_v5  ;;  %v18061_v35 = vmax.f32 %v18059_v43, %v18060_v61  ;;  %v18062_v40 = vld [vmem:[#allocation171_spill] sm:$0xff]  ;;  %v18064_v28 = vld [vmem:[#allocation109_spill] sm:$0xff]  ;;  %v18070_v43 = vld [vmem:[#allocation172_spill] sm:$0xff]  ;;  %v14331_v61 = vpop.xlane.xlu0 %5524 }
 0x397   : > { %9197 = vmatmul.mubr.f32.gmra.mrb[232].mxu0 %v18062_v40  ;;  %v18066_v33 = vmax.f32 %v18064_v28, %v18065_v6  ;;  %v18067_v5 = vld [vmem:[#allocation87_spill] sm:$0xff]  ;;  %v18071_v6 = vld [vmem:[#allocation173_spill] sm:$0xff] }
 0x398   : > { %18055 = vst [vmem:[#allocation119_spill] sm:$0xff] %v14307_v47  ;;  %v2272_v62 = vmul.f32 %v13903_v50, %v18058_v19  ;;  %v3045_v31 = vmax.f32 %v18061_v35, %v8591_v9  ;;  %v3336_v52 = vmul.f32 %v13906_v53, %v3299_v26  ;;  %v18068_v19 = vld [vmem:[#allocation86_spill] sm:$0xff]  ;;  %9199 = vmatprep.mubr.f32.mxu0 %v18070_v43  ;;  %v14329_v9 = vpop.f32.mrb[128].mxu1 }
 0x399   : > { %v2271_v18 = vmul.f32 %v13903_v50, %v18066_v33  ;;  %v18069_v47 = vmax.f32 %v18067_v5, %v18068_v19  ;;  %v14333_v40 = vpop.f32.mrb[129].mxu1  ;;  %9280 = vmatmul.mubr.f32.gmra.mrb[234].mxu1 %v18071_v6  ;;  %v14339_v33 = vpop.f32.mrb[128].mxu0  ;;  %v18076_v5 = vld [vmem:[#allocation108_spill] sm:$0xff]  ;;  %v18088_v6 = vld [vmem:[#allocation179_spill] sm:$0xff] }
 0x39a   : > { %v3302_v35 = vmax.f32 %v3045_v31, %v8671_v17  ;;  %v14337_v26 = vadd.f32 %v3337_v24, %v2272_v62  ;;  %v14351_v4 = vpop.f32.mrb[129].mxu0  ;;  %v18078_v62 = vld [vmem:[#allocation175_spill] sm:$0xff]  ;;  %v18080_v24 = vld [vmem:[#allocation225_spill] sm:$0xff] }
 0x39b   : > { %v3044_v37 = vmax.f32 %v18069_v47, %v3005_v54  ;;  %v18073_v47 = vld [vmem:[#allocation41_spill] sm:$0xff]  ;;  %v14342_v12 = vadd.f32 %v3336_v52, %v2271_v18  ;;  %v18075_v54 = vld [vmem:[#allocation224_spill] sm:$0xff]  ;;  %9200 = vmatmul.mubr.f32.gmra.mrb[234].mxu0 %v18078_v62 }
 0x39c   : > { %18072 = vst [vmem:[#allocation191_spill] sm:$0xff] %v14337_v26  ;;  %9282 = vmatprep.mubr.f32.mxu1 %v18073_v47  ;;  %v18077_v19 = vmax.f32 %v18075_v54, %v18076_v5  ;;  %v3339_v31 = vmul.f32 %v13906_v53, %v3302_v35  ;;  %v18082_v47 = vld [vmem:[#allocation176_spill] sm:$0xff]  ;;  %v14362_v35 = vpop.f32.mrb[130].mxu1  ;;  %v14364_v54 = vpop.xlane.xlu1 %5751 }
 0x39d   : > { %v3301_v28 = vmax.f32 %v3044_v37, %v3262_v45  ;;  %18074 = vst [vmem:[#allocation239_spill] sm:$0xff] %v14342_v12  ;;  %v18079_v45 = vld [vmem:[#allocation227_spill] sm:$0xff]  ;;  %9202 = vmatprep.mubr.f32.mxu0 %v18082_v47  ;;  %v14366_v5 = vpop.f32.mrb[131].mxu1 }
 0x39e   : > { %v2274_v17 = vmul.f32 %v13903_v50, %v18077_v19  ;;  %v18081_v37 = vmax.f32 %v18079_v45, %v18080_v24  ;;  %v18083_v19 = vld [vmem:[#allocation177_spill] sm:$0xff]  ;;  %v14371_v45 = vpop.f32.mrb[130].mxu0 }
 0x39f   : > { %v3338_v52 = vmul.f32 %v13906_v53, %v3301_v28  ;;  %9283 = vmatmul.mubr.f32.gmra.mrb[236].mxu1 %v18083_v19  ;;  %v18086_v53 = vld [vmem:[#allocation42_spill] sm:$0xff]  ;;  %v14375_v28 = vpop.xlane.xlu0 %5527  ;;  %v14381_v47 = vpop.f32.mrb[131].mxu0  ;;  %9203 = vmatmul.mubr.f32.gmra.mrb[236].mxu0 %v18088_v6  ;;  %v18089_v19 = vld [vmem:[#allocation167_spill] sm:$0xff] }
 0x3a0   : > { %v2273_v18 = vmul.f32 %v13903_v50, %v18081_v37  ;;  %v14369_v62 = vadd.f32 %v3339_v31, %v2274_v17  ;;  %v18085_v50 = vld [vmem:[#allocation46_spill] sm:$0xff]  ;;  %9285 = vmatprep.mubr.f32.mxu1 %v18086_v53  ;;  %v18090_v31 = vld [vmem:[#allocation180_spill] sm:$0xff]  ;;  %v14389_v53 = vpop.f32.mrb[132].mxu1  ;;  %v14395_v37 = vpop.f32.mrb[132].mxu0  ;;  %v18096_v17 = vld [vmem:[#allocation47_spill] sm:$0xff] }
 0x3a1   : > { %9871 = vmatpush1.bf16.xpose.msra.mxu1 %v18085_v50  ;;  %9839 = vmatpush1.bf16.xpose.msra.mxu0 %v18085_v50  ;;  %v18092_v6 = vld [vmem:[#allocation54_spill] sm:$0xff]  ;;  %v14398_v43 = vpop.xlane.xlu1 %5754  ;;  %v14402_v50 = vpop.f32.mrb[133].mxu0 }
 0x3a2   : > { %18084 = vst [vmem:[#allocation120_spill] sm:$0xff] %v14369_v62  ;;  %v14377_v24 = vadd.f32 %v3338_v52, %v2273_v18  ;;  %9873 = vmatprep.subr.bf16.mxu1 %v18089_v19  ;;  %9205 = vmatprep.mubr.f32.mxu0 %v18090_v31  ;;  %v14391_v18 = vpop.f32.mrb[133].mxu1  ;;  %v18091_v52 = vld [vmem:[#allocation52_spill] sm:$0xff]  ;;  %v18093_v31 = vld [vmem:[#allocation51_spill] sm:$0xff]  ;;  %v18094_v62 = vld [vmem:[#allocation53_spill] sm:$0xff]  ;;  %v14415_v26 = vpop.f32.mrb[134].mxu0 }
 0x3a3   : > { %9286 = vmatmul.mubr.f32.gmra.mrb[238].mxu1 %v18091_v52  ;;  %9841 = vmatprep.subr.bf16.mxu0 %v18089_v19  ;;  %v14408_v52 = vpop.f32.mrb[134].mxu1  ;;  %v14410_v19 = vpop.xlane.xlu0 %5530 }
 0x3a4   : > { %18087 = vst [vmem:[#allocation189_spill] sm:$0xff] %v14377_v24  ;;  %9288 = vmatprep.mubr.f32.mxu1 %v18092_v6  ;;  %9206 = vmatmul.mubr.f32.gmra.mrb[238].mxu0 %v18093_v31  ;;  %v14412_v12 = vpop.f32.mrb[135].mxu1  ;;  %v18095_v6 = vld [vmem:[#allocation56_spill] sm:$0xff]  ;;  %v14421_v24 = vpop.f32.mrb[135].mxu0 }
 0x3a5   : > { %9208 = vmatprep.mubr.f32.mxu0 %v18094_v62  ;;  %v18098_v62 = vld [vmem:[#allocation55_spill] sm:$0xff]  ;;  %v14429_v63 = vpop.f32.mrb[136].mxu1  ;;  %v14431_v3 = vpop.xlane.xlu1 %5757  ;;  %v18103_v31 = vld [vmem:[#allocation60_spill] sm:$0xff] }
 0x3a6   : > { %18101 = vst [vmem:[#allocation240_spill] sm:$0xff] %v14429_v63 }
 0x3a7   : > { %9289 = vmatmul.mubr.f32.gmra.mrb[240].mxu1 %v18095_v6  ;;  %v18100_v6 = vld [vmem:[#allocation57_spill] sm:$0xff]  ;;  %v14440_v10 = vpop.xlane.xlu0 %5533 }
 0x3a8   : > { %9291 = vmatprep.mubr.f32.mxu1 %v18097_v0  ;;  %9209 = vmatmul.mubr.f32.gmra.mrb[240].mxu0 %v18098_v62  ;;  %v14433_v0 = vpop.f32.mrb[137].mxu1  ;;  %v14437_v62 = vpop.f32.mrb[136].mxu0 }
 0x3a9   : > { %9875 = vmatpush1.bf16.xpose.msra.mxu1 %v18096_v17  ;;  %9843 = vmatpush1.bf16.xpose.msra.mxu0 %v18096_v17  ;;  %18102 = vst [vmem:[#allocation197_spill] sm:$0xff] %v14433_v0  ;;  %18104 = vst [vmem:[#allocation241_spill] sm:$0xff] %v14437_v62  ;;  %v18113_v17 = vld [vmem:[#allocation48_spill] sm:$0xff] }
 0x3aa   : > { %9877 = vmatprep.subr.bf16.mxu1 %v18099_v1  ;;  %9211 = vmatprep.mubr.f32.mxu0 %v18100_v6  ;;  %v14444_v6 = vpop.f32.mrb[137].mxu0 }
 0x3ab   : > { %9292 = vmatmul.mubr.f32.gmra.mrb[242].mxu1 %v18103_v31  ;;  %9845 = vmatprep.subr.bf16.mxu0 %v18099_v1  ;;  %18106 = vst [vmem:[#allocation112_spill] sm:$0xff] %v14444_v6  ;;  %v14450_v31 = vpop.f32.mrb[138].mxu1  ;;  %v14456_v7 = vpop.f32.mrb[138].mxu0 }
 0x3ac   : > { %9294 = vmatprep.mubr.f32.mxu1 %v18105_v49  ;;  %9212 = vmatmul.mubr.f32.gmra.mrb[242].mxu0 %v18107_v41  ;;  %18109 = vst [vmem:[#allocation226_spill] sm:$0xff] %v14450_v31  ;;  %v14452_v1 = vpop.f32.mrb[139].mxu1  ;;  %v5822_v49 = vadd.f32 1e-16, %v14012_v13  ;;  %18112 = vst [vmem:[#allocation196_spill] sm:$0xff] %v14456_v7  ;;  %v14460_v41 = vpop.xlane.xlu1 %5760  ;;  %v18121_v31 = vld [vmem:[#allocation181_spill] sm:$0xff] }
 0x3ad   : > { %9214 = vmatprep.mubr.f32.mxu0 %v18108_v59  ;;  %18110 = vst [vmem:[#allocation128_spill] sm:$0xff] %v14452_v1  ;;  %v14464_v59 = vpop.f32.mrb[139].mxu0  ;;  %v14475_v0 = vpop.xlane.xlu0 %5536  ;;  %v18123_v13 = vld [vmem:[#allocation70_spill] sm:$0xff] }
 0x3ae   : > { %18115 = vst [vmem:[#allocation242_spill] sm:$0xff] %v14464_v59  ;;  %10350 = vrsqrt.f32 %v5822_v49  ;;  %v18125_v1 = vld [vmem:[#allocation182_spill] sm:$0xff]  ;;  %v5599_v59 = vadd.f32 1e-16, %v14070_v23  ;;  %v18132_v23 = vld [vmem:[#allocation188_spill] sm:$0xff] }
 0x3af   : > { %9295 = vmatmul.mubr.f32.gmra.mrb[244].mxu1 %v18111_v32  ;;  %v5598_v32 = vadd.f32 1e-16, %v14019_v29  ;;  %v14482_v29 = vpop.f32.mrb[140].mxu0  ;;  %v18129_v7 = vld [vmem:[#allocation186_spill] sm:$0xff] }
 0x3b0   : > { %9297 = vmatprep.mubr.f32.mxu1 %v18114_v56  ;;  %9215 = vmatmul.mubr.f32.gmra.mrb[244].mxu0 %v18116_v57  ;;  %v14473_v56 = vpop.f32.mrb[140].mxu1  ;;  %v5823_v57 = vadd.f32 1e-16, %v14048_v11  ;;  %18122 = vst [vmem:[#allocation132_spill] sm:$0xff] %v14482_v29  ;;  %v14496_v49 = vpop.xlane.xlu1 %5763 }
 0x3b1   : > { %9879 = vmatpush1.bf16.xpose.msra.mxu1 %v18113_v17  ;;  %9847 = vmatpush1.bf16.xpose.msra.mxu0 %v18113_v17  ;;  %18119 = vst [vmem:[#allocation230_spill] sm:$0xff] %v14473_v56  ;;  %v14477_v48 = vpop.f32.mrb[141].mxu1  ;;  %v14487_v17 = vpop.f32.mrb[141].mxu0  ;;  %10352 = vrsqrt.f32 %v5598_v32  ;;  %v18131_v32 = vld [vmem:[#allocation49_spill] sm:$0xff] }
 0x3b2   : > { %9881 = vmatprep.subr.bf16.mxu1 %v18117_v38  ;;  %9217 = vmatprep.mubr.f32.mxu0 %v18118_v51  ;;  %18120 = vst [vmem:[#allocation113_spill] sm:$0xff] %v14477_v48  ;;  %18124 = vst [vmem:[#allocation135_spill] sm:$0xff] %v14487_v17  ;;  %v14494_v11 = vpop.f32.mrb[142].mxu1  ;;  %10354 = vrsqrt.f32 %v5823_v57  ;;  %v5824_v51 = vadd.f32 1e-16, %v14099_v21  ;;  %v18134_v17 = vld [vmem:[#allocation187_spill] sm:$0xff] }
 0x3b3   : > { %9298 = vmatmul.mubr.f32.gmra.mrb[246].mxu1 %v18121_v31  ;;  %9849 = vmatprep.subr.bf16.mxu0 %v18117_v38  ;;  %v18126_v38 = vld [vmem:[#allocation183_spill] sm:$0xff]  ;;  %18127 = vst [vmem:[#allocation139_spill] sm:$0xff] %v14494_v11  ;;  %v14506_v31 = vpop.xlane.xlu0 %5539  ;;  %10356 = vrsqrt.f32 %v5599_v59  ;;  %v5600_v21 = vadd.f32 1e-16, %v14106_v58  ;;  %v5825_v59 = vadd.f32 1e-16, %v14133_v8 }
 0x3b4   : > { %9300 = vmatprep.mubr.f32.mxu1 %v18123_v13  ;;  %9218 = vmatmul.mubr.f32.gmra.mrb[246].mxu0 %v18125_v1  ;;  %v14498_v13 = vpop.f32.mrb[143].mxu1  ;;  %v14502_v1 = vpop.f32.mrb[142].mxu0  ;;  %10358 = vrsqrt.f32 %v5824_v51  ;;  %v18141_v58 = vld [vmem:[#allocation195_spill] sm:$0xff]  ;;  %v5601_v51 = vadd.f32 1e-16, %v14157_v46  ;;  %v18149_v46 = vld [vmem:[#allocation50_spill] sm:$0xff] }
 0x3b5   : > { %9220 = vmatprep.mubr.f32.mxu0 %v18126_v38  ;;  %18128 = vst [vmem:[#allocation243_spill] sm:$0xff] %v14498_v13  ;;  %18130 = vst [vmem:[#allocation200_spill] sm:$0xff] %v14502_v1  ;;  %v14510_v48 = vpop.f32.mrb[143].mxu0  ;;  %v14519_v56 = vpop.f32.mrb[144].mxu1  ;;  %v18139_v38 = vld [vmem:[#allocation193_spill] sm:$0xff]  ;;  %10360 = vrsqrt.f32 %v5600_v21  ;;  %v18150_v8 = vld [vmem:[#allocation203_spill] sm:$0xff] }
 0x3b6   : > { %18133 = vst [vmem:[#allocation117_spill] sm:$0xff] %v14510_v48  ;;  %18137 = vst [vmem:[#allocation232_spill] sm:$0xff] %v14519_v56  ;;  %v14521_v29 = vpop.f32.mrb[145].mxu1  ;;  %v14529_v57 = vpop.xlane.xlu1 %5766  ;;  %v18143_v48 = vld [vmem:[#allocation194_spill] sm:$0xff]  ;;  %10362 = vrsqrt.f32 %v5825_v59  ;;  %v10584_v56 = vld [vmem:[%s11277_s30 + $0x8] sm:$0xff] }
 0x3b7   : > { %9301 = vmatmul.mubr.f32.gmra.mrb[248].mxu1 %v18129_v7  ;;  %v18135_v7 = vld [vmem:[#allocation178_spill] sm:$0xff]  ;;  %18138 = vst [vmem:[#allocation136_spill] sm:$0xff] %v14521_v29  ;;  %10364 = vrsqrt.f32 %v5601_v51 }
 0x3b8   : > { %9303 = vmatprep.mubr.f32.mxu1 %v18132_v23  ;;  %9221 = vmatmul.mubr.f32.gmra.mrb[248].mxu0 %v18134_v17  ;;  %v18136_v23 = vld [vmem:[#allocation190_spill] sm:$0xff]  ;;  %v14526_v17 = vpop.f32.mrb[144].mxu0 }
 0x3b9   : > { %9883 = vmatpush1.bf16.xpose.msra.mxu1 %v18131_v32  ;;  %9851 = vmatpush1.bf16.xpose.msra.mxu0 %v18131_v32  ;;  %18140 = vst [vmem:[#allocation244_spill] sm:$0xff] %v14526_v17  ;;  %v10351_v32 = vpop.eup %10350  ;;  %v14533_v13 = vpop.f32.mrb[145].mxu0  ;;  %v18153_v59 = vld [vmem:[#allocation202_spill] sm:$0xff] }
 0x3ba   : > { %9885 = vmatprep.subr.bf16.mxu1 %v18135_v7  ;;  %9223 = vmatprep.mubr.f32.mxu0 %v18136_v23  ;;  %18142 = vst [vmem:[#allocation198_spill] sm:$0xff] %v14533_v13  ;;  %v18147_v23 = vld [vmem:[#allocation201_spill] sm:$0xff]  ;;  %v14548_v21 = vpop.f32.mrb[146].mxu0 }
 0x3bb   : > { %9304 = vmatmul.mubr.f32.gmra.mrb[250].mxu1 %v18139_v38  ;;  %9853 = vmatprep.subr.bf16.mxu0 %v18135_v7  ;;  %v18144_v38 = vld [vmem:[#allocation199_spill] sm:$0xff]  ;;  %v14540_v7 = vpop.f32.mrb[146].mxu1  ;;  %v10353_v11 = vpop.eup %10352  ;;  %18148 = vst [vmem:[#allocation140_spill] sm:$0xff] %v14548_v21  ;;  %v10585_v21 = vld [vmem:[%s11277_s30 + $0x10] sm:$0xff] }
 0x3bc   : > { %9306 = vmatprep.mubr.f32.mxu1 %v18141_v58  ;;  %9224 = vmatmul.mubr.f32.gmra.mrb[250].mxu0 %v18143_v48  ;;  %18145 = vst [vmem:[#allocation115_spill] sm:$0xff] %v14540_v7  ;;  %v14542_v58 = vpop.xlane.xlu0 %5542  ;;  %v14544_v1 = vpop.f32.mrb[147].mxu1  ;;  %v5826_v48 = vadd.f32 1e-16, %v14184_v39  ;;  %v18154_v39 = vld [vmem:[#allocation131_spill] sm:$0xff]  ;;  %v14569_v7 = vmul.f32 %v10584_v56, %v10353_v11  ;;  %v14574_v63 = vmul.f32 %v10585_v21, %v10351_v32  ;;  %v10587_v21 = vld [vmem:[%s11277_s30] sm:$0xff] }
 0x3bd   : > { %9226 = vmatprep.mubr.f32.mxu0 %v18144_v38  ;;  %18146 = vst [vmem:[#allocation231_spill] sm:$0xff] %v14544_v1  ;;  %v10583_v38 = vld [vmem:[%s11277_s30 + $0x18] sm:$0xff]  ;;  %v10355_v13 = vpop.eup %10354  ;;  %v14557_v17 = vpop.f32.mrb[147].mxu0  ;;  %v14590_v62 = vmul.f32 %v10587_v21, %v10353_v11  ;;  %v10588_v11 = vld [vmem:[%s11277_s30 + $0x28] sm:$0xff] }
 0x3be   : > { %v14553_v29 = vmul.f32 %v10583_v38, %v10351_v32  ;;  %18152 = vst [vmem:[#allocation147_spill] sm:$0xff] %v14557_v17  ;;  %v18155_v38 = vld [vmem:[#allocation204_spill] sm:$0xff]  ;;  %v14566_v6 = vpop.f32.mrb[148].mxu1  ;;  %18157 = vst [vmem:[#allocation245_spill] sm:$0xff] %v14569_v7  ;;  %v10357_v51 = vpop.eup %10356  ;;  %10366 = vrsqrt.f32 %v5826_v48  ;;  %v10586_v56 = vld [vmem:[%s11277_s30 + $0x38] sm:$0xff] }
 0x3bf   : > { %9307 = vmatmul.mubr.f32.gmra.mrb[252].mxu1 %v18147_v23  ;;  %v5602_v23 = vadd.f32 1e-16, %v14191_v42  ;;  %18156 = vst [vmem:[#allocation207_spill] sm:$0xff] %v14566_v6  ;;  %18158 = vst [vmem:[#allocation144_spill] sm:$0xff] %v14574_v63  ;;  %v14576_v42 = vpop.f32.mrb[149].mxu1  ;;  %v14585_v1 = vmul.f32 %v10586_v56, %v10355_v13  ;;  %v10359_v32 = vpop.eup %10358  ;;  %v14604_v21 = vmul.f32 %v10588_v11, %v10357_v51  ;;  %v10590_v11 = vld [vmem:[%s11277_s30 + $0x58] sm:$0xff] }
 0x3c0   : > { %9309 = vmatprep.mubr.f32.mxu1 %v18150_v8  ;;  %18151 = vst [vmem:[#allocation143_spill] sm:$0xff] %v14553_v29  ;;  %9227 = vmatmul.mubr.f32.gmra.mrb[252].mxu0 %v18153_v59  ;;  %v14571_v59 = vpop.xlane.xlu1 %5769  ;;  %18159 = vst [vmem:[#allocation74_spill] sm:$0xff] %v14576_v42  ;;  %v18160_v8 = vld [vmem:[#allocation205_spill] sm:$0xff]  ;;  %v14587_v17 = vpop.xlane.xlu0 %5545  ;;  %v18170_v42 = vld [vmem:[#allocation218_spill] sm:$0xff] }
 0x3c1   : > { %9887 = vmatpush1.bf16.xpose.msra.mxu1 %v18149_v46  ;;  %9855 = vmatpush1.bf16.xpose.msra.mxu0 %v18149_v46  ;;  %v5827_v46 = vadd.f32 1e-16, %v14220_v20  ;;  %18162 = vst [vmem:[#allocation148_spill] sm:$0xff] %v14585_v1  ;;  %18163 = vst [vmem:[#allocation149_spill] sm:$0xff] %v14590_v62  ;;  %v18165_v20 = vld [vmem:[#allocation206_spill] sm:$0xff]  ;;  %10368 = vrsqrt.f32 %v5602_v23  ;;  %v10361_v2 = vpop.eup %10360  ;;  %v18174_v6 = vld [vmem:[#allocation97_spill] sm:$0xff] }
 0x3c2   : > { %9921 = vmatprep.subr.bf16.mxu1 %v18154_v39  ;;  %9229 = vmatprep.mubr.f32.mxu0 %v18155_v38  ;;  %v14581_v38 = vpop.f32.mrb[148].mxu0  ;;  %18167 = vst [vmem:[#allocation208_spill] sm:$0xff] %v14604_v21  ;;  %v10589_v23 = vld [vmem:[%s11277_s30 + $0x30] sm:$0xff] }
 0x3c3   : > { %9310 = vmatmul.mubr.f32.gmra.mrb[254].mxu1 %v18160_v8  ;;  %9889 = vmatprep.subr.bf16.mxu0 %v18154_v39  ;;  %18161 = vst [vmem:[#allocation246_spill] sm:$0xff] %v14581_v38  ;;  %v14594_v39 = vpop.f32.mrb[149].mxu0  ;;  %v5603_v8 = vadd.f32 1e-16, %v14242_v30  ;;  %10370 = vrsqrt.f32 %v5827_v46  ;;  %v14610_v30 = vmul.f32 %v10589_v23, %v10355_v13  ;;  %v10592_v46 = vld [vmem:[%s11277_s30 + $0x48] sm:$0xff] }
 0x3c4   : > { %6239 = vmatprep.mubr.f32.mxu1 %v14553_v29  ;;  %18164 = vst [vmem:[#allocation23_spill] sm:$0xff] %v14594_v39  ;;  %9230 = vmatmul.mubr.f32.gmra.mrb[254].mxu0 %v18165_v20  ;;  %v14600_v29 = vpop.f32.mrb[150].mxu1  ;;  %v5828_v20 = vadd.f32 1e-16, %v14271_v34  ;;  %v14613_v56 = vpop.f32.mrb[150].mxu0  ;;  %v10591_v34 = vld [vmem:[%s11277_s30 + $0x20] sm:$0xff] }
 0x3c5   : > { %18166 = vst [vmem:[#allocation76_spill] sm:$0xff] %v14600_v29  ;;  %6014 = vmatprep.mubr.f32.mxu0 %v14569_v7  ;;  %v14606_v48 = vpop.f32.mrb[151].mxu1  ;;  %18169 = vst [vmem:[#allocation75_spill] sm:$0xff] %v14610_v30  ;;  %v14618_v7 = vmul.f32 %v10590_v11, %v10359_v32  ;;  %v14620_v39 = vpop.xlane.xlu1 %5772  ;;  %10372 = vrsqrt.f32 %v5603_v8  ;;  %v14628_v23 = vmul.f32 %v10591_v34, %v10357_v51  ;;  %v5829_v51 = vadd.f32 1e-16, %v14305_v15  ;;  %v10594_v15 = vld [vmem:[%s11277_s30 + $0x78] sm:$0xff] }
 0x3c6   : > { %18168 = vst [vmem:[#allocation150_spill] sm:$0xff] %v14606_v48  ;;  %v14624_v13 = vpop.f32.mrb[151].mxu0  ;;  %v14635_v38 = vpop.f32.mrb[152].mxu1  ;;  %v14639_v8 = vmul.f32 %v10592_v46, %v10361_v2  ;;  %10374 = vrsqrt.f32 %v5828_v20  ;;  %v5605_v48 = vadd.f32 1e-16, %v14331_v61  ;;  %v10595_v61 = vld [vmem:[%s11277_s30 + $0x40] sm:$0xff]  ;;  %v18211_v29 = vmax.f32 %v14351_v4, %v14333_v40 }
 0x3c7   : > { %18171 = vst [vmem:[#allocation71_spill] sm:$0xff] %v14618_v7  ;;  %18172 = vst [vmem:[#allocation126_spill] sm:$0xff] %v14624_v13  ;;  %v14642_v34 = vpop.xlane.xlu0 %5548  ;;  %v14652_v46 = vpop.f32.mrb[152].mxu0  ;;  %v10617_v40 = vld [vmem:[%s11277_s30 + $0x100] sm:$0xff] }
 0x3c8   : > { %6240 = vmatmul.mubr.f32.vlgmr.msra.gmra.mrb[0].mxu1 %v14574_v63  ;;  %v10363_v63 = vpop.eup %10362  ;;  %6015 = vmatmul.mubr.f32.vlgmr.msra.gmra.mrb[0].mxu0 %v14590_v62  ;;  %18173 = vst [vmem:[#allocation121_spill] sm:$0xff] %v14628_v23  ;;  %18175 = vst [vmem:[#allocation151_spill] sm:$0xff] %v14635_v38  ;;  %v14644_v62 = vpop.f32.mrb[153].mxu1 }
 0x3c9   : > { %9923 = vmatpush1.bf16.xpose.msra.mxu1 %v18170_v42  ;;  %6244 = vmatprep.mubr.f32.mxu1 %v14585_v1  ;;  %v5604_v1 = vadd.f32 1e-16, %v14278_v16  ;;  %18176 = vst [vmem:[#allocation22_spill] sm:$0xff] %v14639_v8  ;;  %v10365_v16 = vpop.eup %10364  ;;  %18177 = vst [vmem:[#allocation24_spill] sm:$0xff] %v14644_v62  ;;  %v14660_v20 = vpop.f32.mrb[153].mxu0  ;;  %v18189_v62 = vld [vmem:[#allocation219_spill] sm:$0xff] }
 0x3ca   : > { %9925 = vmatprep.subr.bf16.mxu1 %v18174_v6  ;;  %9891 = vmatpush1.bf16.xpose.msra.mxu0 %v18170_v42  ;;  %v10593_v42 = vld [vmem:[%s11277_s30 + $0x50] sm:$0xff]  ;;  %18179 = vst [vmem:[#allocation82_spill] sm:$0xff] %v14652_v46  ;;  %v10367_v13 = vpop.eup %10366  ;;  %18181 = vst [vmem:[#allocation84_spill] sm:$0xff] %v14660_v20  ;;  %v14812_v46 = vld [vmem:[%s13900_s4 + $0x2] ss:$0 sm:$0xff] }
 0x3cb   : > { %6019 = vmatprep.mubr.f32.mxu0 %v14604_v21  ;;  %v14648_v11 = vmul.f32 %v10593_v42, %v10359_v32  ;;  %9893 = vmatprep.subr.bf16.mxu0 %v18174_v6  ;;  %v14656_v21 = vmul.f32 %v10594_v15, %v10363_v63  ;;  %10376 = vrsqrt.f32 %v5604_v1  ;;  %v14664_v6 = vmul.f32 %v10595_v61, %v10361_v2  ;;  %v14669_v15 = vpop.f32.mrb[154].mxu1  ;;  %v10369_v2 = vpop.eup %10368 }
 0x3cc   : > { %6245 = vmatmul.mubr.f32.gmra.mrb[2].mxu1 %v14610_v30  ;;  %6020 = vmatmul.mubr.f32.gmra.mrb[2].mxu0 %v14628_v23  ;;  %v5606_v32 = vadd.f32 1e-16, %v14375_v28  ;;  %18183 = vst [vmem:[#allocation125_spill] sm:$0xff] %v14669_v15  ;;  %10378 = vrsqrt.f32 %v5829_v51  ;;  %v10596_v30 = vld [vmem:[%s11277_s30 + $0x68] sm:$0xff]  ;;  %v5830_v1 = vadd.f32 1e-16, %v14364_v54  ;;  %v14676_v23 = vpop.xlane.xlu1 %5775  ;;  %v14692_v20 = vpop.xlane.xlu0 %5551 }
 0x3cd   : > { %18178 = vst [vmem:[#allocation81_spill] sm:$0xff] %v14648_v11  ;;  %6249 = vmatprep.mubr.f32.mxu1 %v14618_v7  ;;  %18180 = vst [vmem:[#allocation152_spill] sm:$0xff] %v14656_v21  ;;  %6024 = vmatprep.mubr.f32.mxu0 %v14639_v8  ;;  %v14673_v7 = vmul.f32 %v10596_v30, %v10365_v16  ;;  %v14678_v61 = vpop.f32.mrb[155].mxu1  ;;  %10380 = vrsqrt.f32 %v5605_v48  ;;  %v10597_v28 = vld [vmem:[%s11277_s30 + $0x70] sm:$0xff]  ;;  %v5607_v8 = vadd.f32 1e-16, %v14410_v19  ;;  %v10371_v38 = vpop.eup %10370 }
 0x3ce   : > { %18182 = vst [vmem:[#allocation209_spill] sm:$0xff] %v14664_v6  ;;  %18185 = vst [vmem:[#allocation25_spill] sm:$0xff] %v14678_v61  ;;  %v14682_v42 = vmul.f32 %v10597_v28, %v10363_v63  ;;  %v14685_v51 = vpop.f32.mrb[154].mxu0  ;;  %v10598_v30 = vld [vmem:[%s11277_s30 + $0x98] sm:$0xff]  ;;  %v10599_v19 = vld [vmem:[%s11277_s30 + $0x60] sm:$0xff]  ;;  %10382 = vrsqrt.f32 %v5606_v32 }
 0x3cf   : > { %18184 = vst [vmem:[#allocation153_spill] sm:$0xff] %v14673_v7  ;;  %18187 = vst [vmem:[#allocation92_spill] sm:$0xff] %v14685_v51  ;;  %v14689_v54 = vmul.f32 %v10598_v30, %v10367_v13  ;;  %v14696_v63 = vpop.f32.mrb[155].mxu0  ;;  %v14700_v28 = vmul.f32 %v10599_v19, %v10365_v16  ;;  %10384 = vrsqrt.f32 %v5830_v1  ;;  %v10600_v48 = vld [vmem:[%s11277_s30 + $0x88] sm:$0xff]  ;;  %v5831_v16 = vadd.f32 1e-16, %v14398_v43  ;;  %v10373_v19 = vpop.eup %10372 }
 0x3d0   : > { %6250 = vmatmul.mubr.f32.gmra.mrb[4].mxu1 %v14648_v11  ;;  %18186 = vst [vmem:[#allocation26_spill] sm:$0xff] %v14682_v42  ;;  %18190 = vst [vmem:[#allocation154_spill] sm:$0xff] %v14696_v63  ;;  %6025 = vmatmul.mubr.f32.gmra.mrb[4].mxu0 %v14664_v6  ;;  %v14705_v11 = vpop.f32.mrb[156].mxu1  ;;  %v14709_v15 = vmul.f32 %v10600_v48, %v10369_v2  ;;  %v10601_v30 = vld [vmem:[%s11277_s30 + $0x90] sm:$0xff]  ;;  %10386 = vrsqrt.f32 %v5607_v8  ;;  %v14720_v1 = vpop.f32.mrb[156].mxu0 }
 0x3d1   : > { %6254 = vmatprep.mubr.f32.mxu1 %v14656_v21  ;;  %18188 = vst [vmem:[#allocation210_spill] sm:$0xff] %v14689_v54  ;;  %9927 = vmatpush1.bf16.xpose.msra.mxu1 %v18189_v62  ;;  %18191 = vst [vmem:[#allocation118_spill] sm:$0xff] %v14700_v28  ;;  %v18192_v21 = vld [vmem:[#allocation105_spill] sm:$0xff]  ;;  %v14713_v32 = vpop.f32.mrb[157].mxu1  ;;  %v14717_v6 = vmul.f32 %v10601_v30, %v10367_v13  ;;  %v14726_v43 = vpop.xlane.xlu1 %5778  ;;  %v5832_v8 = vadd.f32 1e-16, %v14431_v3  ;;  %10388 = vrsqrt.f32 %v5831_v16 }
 0x3d2   : > { %9929 = vmatprep.subr.bf16.mxu1 %v18192_v21  ;;  %18193 = vst [vmem:[#allocation211_spill] sm:$0xff] %v14705_v11  ;;  %6029 = vmatprep.mubr.f32.mxu0 %v14673_v7  ;;  %18194 = vst [vmem:[#allocation83_spill] sm:$0xff] %v14709_v15  ;;  %v10375_v7 = vpop.eup %10374  ;;  %v14730_v61 = vpop.f32.mrb[157].mxu0  ;;  %v5608_v11 = vadd.f32 1e-16, %v14440_v10  ;;  %v10605_v3 = vld [vmem:[%s11277_s30 + $0xb0] sm:$0xff] }
 0x3d3   : > { %9895 = vmatpush1.bf16.xpose.msra.mxu0 %v18189_v62  ;;  %18195 = vst [vmem:[#allocation129_spill] sm:$0xff] %v14713_v32  ;;  %18196 = vst [vmem:[#allocation130_spill] sm:$0xff] %v14717_v6  ;;  %v10602_v62 = vld [vmem:[%s11277_s30 + $0xb8] sm:$0xff]  ;;  %v14752_v30 = vmul.f32 %v10605_v3, %v10371_v38  ;;  %10390 = vrsqrt.f32 %v5832_v8 }
 0x3d4   : > { %6255 = vmatmul.mubr.f32.gmra.mrb[6].mxu1 %v14682_v42  ;;  %9897 = vmatprep.subr.bf16.mxu0 %v18192_v21  ;;  %18197 = vst [vmem:[#allocation155_spill] sm:$0xff] %v14720_v1  ;;  %v14724_v48 = vmul.f32 %v10602_v62, %v10371_v38  ;;  %18199 = vst [vmem:[#allocation30_spill] sm:$0xff] %v14730_v61  ;;  %v10603_v21 = vld [vmem:[%s11277_s30 + $0x80] sm:$0xff]  ;;  %v14739_v62 = vpop.f32.mrb[158].mxu1  ;;  %v10604_v42 = vld [vmem:[%s11277_s30 + $0xa8] sm:$0xff]  ;;  %v14754_v61 = vpop.f32.mrb[158].mxu0  ;;  %10392 = vrsqrt.f32 %v5608_v11 }
 0x3d5   : > { %6259 = vmatprep.mubr.f32.mxu1 %v14689_v54  ;;  %6030 = vmatmul.mubr.f32.gmra.mrb[6].mxu0 %v14700_v28  ;;  %v14734_v13 = vmul.f32 %v10603_v21, %v10369_v2  ;;  %18201 = vst [vmem:[#allocation89_spill] sm:$0xff] %v14739_v62  ;;  %v14743_v54 = vmul.f32 %v10604_v42, %v10373_v19  ;;  %v14746_v28 = vpop.xlane.xlu0 %5554  ;;  %v10377_v2 = vpop.eup %10376  ;;  %18204 = vst [vmem:[#allocation213_spill] sm:$0xff] %v14752_v30  ;;  %v10606_v42 = vld [vmem:[%s11277_s30 + $0xd8] sm:$0xff]  ;;  %v10607_v38 = vld [vmem:[%s11277_s30 + $0xa0] sm:$0xff] }
 0x3d6   : > { %18198 = vst [vmem:[#allocation27_spill] sm:$0xff] %v14724_v48  ;;  %6034 = vmatprep.mubr.f32.mxu0 %v14709_v15  ;;  %v14748_v21 = vpop.f32.mrb[159].mxu1  ;;  %v10379_v32 = vpop.eup %10378  ;;  %18205 = vst [vmem:[#allocation134_spill] sm:$0xff] %v14754_v61  ;;  %v14758_v16 = vmul.f32 %v10606_v42, %v10375_v7  ;;  %v18207_v10 = vld [vmem:[#allocation223_spill] sm:$0xff]  ;;  %v14767_v3 = vmul.f32 %v10607_v38, %v10373_v19  ;;  %v10609_v42 = vld [vmem:[%s11277_s30 + $0xd0] sm:$0xff] }
 0x3d7   : > { %18200 = vst [vmem:[#allocation212_spill] sm:$0xff] %v14734_v13  ;;  %18202 = vst [vmem:[#allocation156_spill] sm:$0xff] %v14743_v54  ;;  %v10381_v15 = vpop.eup %10380  ;;  %v14763_v63 = vpop.f32.mrb[159].mxu0 }
 0x3d8   : > { %18203 = vst [vmem:[#allocation106_spill] sm:$0xff] %v14748_v21  ;;  %6260 = vmatmul.mubr.f32.gmra.mrb[8].mxu1 %v14717_v6  ;;  %18206 = vst [vmem:[#allocation157_spill] sm:$0xff] %v14758_v16  ;;  %v10608_v6 = vld [vmem:[%s11277_s30 + $0xc8] sm:$0xff]  ;;  %v14778_v19 = vpop.xlane.xlu1 %5781  ;;  %v10383_v8 = vpop.eup %10382  ;;  %v14782_v21 = vmul.f32 %v10609_v42, %v10375_v7 }
 0x3d9   : > { %6264 = vmatprep.mubr.f32.mxu1 %v14724_v48  ;;  %9931 = vmatpush1.bf16.xpose.msra.mxu1 %v18207_v10  ;;  %18208 = vst [vmem:[#allocation31_spill] sm:$0xff] %v14763_v63  ;;  %v8946_v48 = vpop.f32.mrb[160].mxu1  ;;  %v14774_v1 = vmul.f32 %v10608_v6, %v10377_v2  ;;  %v10385_v11 = vpop.eup %10384  ;;  %v10610_v6 = vld [vmem:[%s11277_s30 + $0xc0] sm:$0xff]  ;;  %v10611_v63 = vld [vmem:[%s11277_s30 + $0xe8] sm:$0xff]  ;;  %v14827_v4 = vmul.f32 %v10617_v40, %v10383_v8 }
 0x3da   : > { %6035 = vmatmul.mubr.f32.gmra.mrb[8].mxu0 %v14734_v13  ;;  %9933 = vmatprep.subr.bf16.mxu1 %v13541_v60  ;;  %v5833_v13 = vadd.f32 1e-16, %v14460_v41  ;;  %v4177_v38 = vpop.f32.mrb[161].mxu1  ;;  %v8866_v41 = vpop.f32.mrb[160].mxu0  ;;  %v14791_v62 = vmul.f32 %v10611_v63, %v10381_v15  ;;  %v10614_v63 = vld [vmem:[%s11277_s30 + $0xf0] sm:$0xff] }
 0x3db   : > { %6039 = vmatprep.mubr.f32.mxu0 %v14743_v54  ;;  %18209 = vst [vmem:[#allocation43_spill] sm:$0xff] %v14774_v1  ;;  %9899 = vmatpush1.bf16.xpose.msra.mxu0 %v18207_v10  ;;  %v5609_v54 = vadd.f32 1e-16, %v14475_v0  ;;  %v14788_v10 = vmul.f32 %v10610_v6, %v10377_v2  ;;  %v14796_v0 = vpop.xlane.xlu0 %5557  ;;  %v14798_v42 = vpop.eup %10386  ;;  %v10613_v2 = vld [vmem:[%s11277_s30 + $0xe0] sm:$0xff]  ;;  %v14808_v51 = vmul.f32 %v10614_v63, %v10379_v32 }
 0x3dc   : > { %6265 = vmatmul.mubr.f32.gmra.mrb[10].mxu1 %v14752_v30  ;;  %9901 = vmatprep.subr.bf16.mxu0 %v13541_v60  ;;  %v10612_v30 = vld [vmem:[%s11277_s30 + $0xf8] sm:$0xff]  ;;  %v18210_v60 = vmax.f32 %v14339_v33, %v14329_v9  ;;  %v14805_v6 = vmul.f32 %v10613_v2, %v10381_v15  ;;  %v8949_v33 = vpop.f32.mrb[162].mxu1  ;;  %10394 = vrsqrt.f32 %v5833_v13  ;;  %v10615_v15 = vld [vmem:[%s11277_s30 + $0x108] sm:$0xff] }
 0x3dd   : > { %6269 = vmatprep.mubr.f32.mxu1 %v14758_v16  ;;  %v14794_v7 = vmul.f32 %v10612_v30, %v10379_v32  ;;  %v3920_v16 = vpop.f32.mrb[161].mxu0  ;;  %v5834_v30 = vadd.f32 1e-16, %v14496_v49  ;;  %v5610_v32 = vadd.f32 1e-16, %v14506_v31  ;;  %v4187_v2 = vpop.f32.mrb[163].mxu1  ;;  %10396 = vrsqrt.f32 %v5609_v54 }
 0x3de   : > { %v4080_v61 = vmax.f32 %v18210_v60, %v8866_v41  ;;  %6040 = vmatmul.mubr.f32.gmra.mrb[10].mxu0 %v14767_v3  ;;  %v4079_v9 = vmax.f32 %v18211_v29, %v3920_v16  ;;  %v14819_v41 = vmul.f32 %v10615_v15, %v10383_v8  ;;  %v10616_v49 = vld [vmem:[%s11277_s30 + $0x118] sm:$0xff]  ;;  %v10389_v29 = vpop.eup %10388  ;;  %v8869_v16 = vpop.f32.mrb[162].mxu0  ;;  %v10618_v15 = vld [vmem:[%s11277_s30 + $0x110] sm:$0xff]  ;;  %v10619_v31 = vld [vmem:[%s11277_s30 + $0x128] sm:$0xff]  ;;  %v18213_v8 = vmax.f32 %v14371_v45, %v14362_v35 }
 0x3df   : > { %6044 = vmatprep.mubr.f32.mxu0 %v14774_v1  ;;  %v14824_v63 = vmul.f32 %v10616_v49, %v10385_v11  ;;  %v14831_v1 = vmul.f32 %v10618_v15, %v10385_v11  ;;  %v14838_v54 = vpop.xlane.xlu1 %5784  ;;  %10398 = vrsqrt.f32 %v5834_v30  ;;  %v5835_v11 = vadd.f32 1e-16, %v14529_v57  ;;  %v14854_v45 = vpop.xlane.xlu0 %5560 }
 0x3e0   : > { %v4337_v60 = vmax.f32 %v4080_v61, %v8946_v48  ;;  %6270 = vmatmul.mubr.f32.gmra.mrb[12].mxu1 %v14782_v21  ;;  %v4336_v13 = vmax.f32 %v4079_v9, %v4177_v38  ;;  %v14835_v61 = vmul.f32 %v10619_v31, %v14798_v42  ;;  %v18212_v48 = vld [vmem:[#allocation228_spill] sm:$0xff]  ;;  %v4082_v38 = vmax.f32 %v18213_v8, %v8869_v16  ;;  %v3930_v9 = vpop.f32.mrb[163].mxu0  ;;  %v10391_v57 = vpop.eup %10390 }
 0x3e1   : > { %6274 = vmatprep.mubr.f32.mxu1 %v14794_v7  ;;  %9935 = vmatpush1.bf16.xpose.msra.mxu1 %v18212_v48  ;;  %v18214_v15 = vmax.f32 %v14381_v47, %v14366_v5  ;;  %10400 = vrsqrt.f32 %v5610_v32  ;;  %v5611_v35 = vadd.f32 1e-16, %v14542_v58  ;;  %v10620_v5 = vld [vmem:[%s11277_s30 + $0x138] sm:$0xff]  ;;  %v10393_v58 = vpop.eup %10392  ;;  %v8872_v8 = vpop.f32.mrb[164].mxu0 }
 0x3e2   : > { %v4374_v49 = vmul.f32 %v14812_v46, %v4337_v60  ;;  %6045 = vmatmul.mubr.f32.gmra.mrb[12].mxu0 %v14788_v10  ;;  %9937 = vmatprep.subr.bf16.mxu1 %v13587_v44  ;;  %v4373_v40 = vmul.f32 %v14812_v46, %v4336_v13  ;;  %v8952_v60 = vpop.f32.mrb[164].mxu1  ;;  %v4339_v13 = vmax.f32 %v4082_v38, %v8949_v33  ;;  %v10622_v33 = vld [vmem:[%s11277_s30 + $0x130] sm:$0xff]  ;;  %10402 = vrsqrt.f32 %v5835_v11 }
 0x3e3   : > { %v4081_v31 = vmax.f32 %v18214_v15, %v3930_v9  ;;  %6049 = vmatprep.mubr.f32.mxu0 %v14791_v62  ;;  %9903 = vmatpush1.bf16.xpose.msra.mxu0 %v18212_v48  ;;  %v4197_v16 = vpop.f32.mrb[165].mxu1  ;;  %v14861_v47 = vmul.f32 %v10620_v5, %v10389_v29  ;;  %v10621_v9 = vld [vmem:[%s11277_s30 + $0x120] sm:$0xff]  ;;  %10404 = vrsqrt.f32 %v5611_v35  ;;  %v10623_v5 = vld [vmem:[%s11277_s30 + $0x148] sm:$0xff] }
 0x3e4   : > { %v14857_v30 = vadd.f32 %v4374_v49, %v13937_v36  ;;  %6275 = vmatmul.mubr.f32.gmra.mrb[14].mxu1 %v14808_v51  ;;  %9905 = vmatprep.subr.bf16.mxu0 %v13587_v44  ;;  %v14865_v32 = vadd.f32 %v4373_v40, %v13940_v27  ;;  %v14870_v36 = vmul.f32 %v10621_v9, %v14798_v42  ;;  %v3940_v27 = vpop.f32.mrb[165].mxu0 }
 0x3e5   : > { %v4338_v48 = vmax.f32 %v4081_v31, %v4187_v2  ;;  %6279 = vmatprep.mubr.f32.mxu1 %v14824_v63  ;;  %v14873_v49 = vmul.f32 %v10622_v33, %v10389_v29  ;;  %v4376_v38 = vmul.f32 %v14812_v46, %v4339_v13  ;;  %v18216_v44 = vmax.f32 %v14395_v37, %v14389_v53  ;;  %v8955_v31 = vpop.f32.mrb[166].mxu1  ;;  %v14887_v53 = vpop.xlane.xlu1 %5787 }
 0x3e6   : > { %18215 = vst [vmem:[#allocation32_spill] sm:$0xff] %v14870_v36  ;;  %6050 = vmatmul.mubr.f32.gmra.mrb[14].mxu0 %v14805_v6  ;;  %v5836_v2 = vadd.f32 1e-16, %v14571_v59  ;;  %v18217_v29 = vmax.f32 %v14402_v50, %v14391_v18  ;;  %v5612_v37 = vadd.f32 1e-16, %v14587_v17  ;;  %v4207_v59 = vpop.f32.mrb[167].mxu1 }
 0x3e7   : > { %v4084_v15 = vmax.f32 %v18216_v44, %v8872_v8  ;;  %v4375_v42 = vmul.f32 %v14812_v46, %v4338_v48  ;;  %6054 = vmatprep.mubr.f32.mxu0 %v14819_v41  ;;  %v14890_v13 = vadd.f32 %v4376_v38, %v13961_v25  ;;  %v14894_v48 = vmul.f32 %v10623_v5, %v10393_v58  ;;  %v10624_v18 = vld [vmem:[%s11277_s30 + $0x158] sm:$0xff]  ;;  %v10395_v8 = vpop.eup %10394  ;;  %v8875_v9 = vpop.f32.mrb[166].mxu0  ;;  %v10625_v25 = vld [vmem:[%s11277_s30 + $0x140] sm:$0xff]  ;;  %v18221_v38 = vld [vmem:[#allocation233_spill] sm:$0xff] }
 0x3e8   : > { %v4083_v40 = vmax.f32 %v18217_v29, %v3940_v27  ;;  %6280 = vmatmul.mubr.f32.gmra.mrb[16].mxu1 %v14831_v1  ;;  %v14897_v50 = vmul.f32 %v10624_v18, %v10391_v57  ;;  %v14904_v33 = vmul.f32 %v10625_v25, %v10393_v58  ;;  %v10397_v44 = vpop.eup %10396  ;;  %v18222_v27 = vmax.f32 %v14415_v26, %v14408_v52  ;;  %v10626_v26 = vld [vmem:[%s11277_s30 + $0x150] sm:$0xff] }
 0x3e9   : > { %v4341_v11 = vmax.f32 %v4084_v15, %v8952_v60  ;;  %18218 = vst [vmem:[#allocation216_spill] sm:$0xff] %v14894_v48  ;;  %v14900_v35 = vadd.f32 %v4375_v42, %v13965_v22  ;;  %6284 = vmatprep.mubr.f32.mxu1 %v14861_v47  ;;  %v14906_v60 = vpop.xlane.xlu0 %5563  ;;  %9939 = vmatpush1.bf16.xpose.msra.mxu1 %v18221_v38  ;;  %v3950_v42 = vpop.f32.mrb[167].mxu0  ;;  %10406 = vrsqrt.f32 %v5836_v2 }
 0x3ea   : > { %18219 = vst [vmem:[#allocation214_spill] sm:$0xff] %v14897_v50  ;;  %v4340_v17 = vmax.f32 %v4083_v40, %v4197_v16  ;;  %18220 = vst [vmem:[#allocation159_spill] sm:$0xff] %v14904_v33  ;;  %v4086_v22 = vmax.f32 %v18222_v27, %v8875_v9  ;;  %6055 = vmatmul.mubr.f32.gmra.mrb[16].mxu0 %v14827_v4  ;;  %v5837_v16 = vadd.f32 1e-16, %v14620_v39  ;;  %9941 = vmatprep.subr.bf16.mxu1 %v13629_v14  ;;  %v10399_v2 = vpop.eup %10398 }
 0x3eb   : > { %v4378_v15 = vmul.f32 %v14812_v46, %v4341_v11  ;;  %v18223_v29 = vmax.f32 %v14421_v24, %v14412_v12  ;;  %v8958_v11 = vpop.f32.mrb[168].mxu1  ;;  %6059 = vmatprep.mubr.f32.mxu0 %v14835_v61  ;;  %10408 = vrsqrt.f32 %v5612_v37  ;;  %v14922_v52 = vmul.f32 %v10626_v26, %v10391_v57  ;;  %9907 = vmatpush1.bf16.xpose.msra.mxu0 %v18221_v38  ;;  %v10627_v12 = vld [vmem:[%s11277_s30 + $0x178] sm:$0xff]  ;;  %v10401_v57 = vpop.eup %10400 }
 0x3ec   : > { %v4377_v58 = vmul.f32 %v14812_v46, %v4340_v17  ;;  %v4343_v5 = vmax.f32 %v4086_v22, %v8955_v31  ;;  %v4217_v18 = vpop.f32.mrb[169].mxu1  ;;  %6285 = vmatmul.mubr.f32.gmra.mrb[18].mxu1 %v14873_v49  ;;  %v14930_v24 = vmul.f32 %v10627_v12, %v10395_v8  ;;  %v5613_v37 = vadd.f32 1e-16, %v14642_v34  ;;  %9909 = vmatprep.subr.bf16.mxu0 %v13629_v14  ;;  %v18226_v17 = vld [vmem:[#allocation88_spill] sm:$0xff]  ;;  %v8878_v38 = vpop.f32.mrb[168].mxu0  ;;  %v18229_v34 = vld [vmem:[#allocation241_spill] sm:$0xff] }
 0x3ed   : > { %v4085_v40 = vmax.f32 %v18223_v29, %v3950_v42  ;;  %18224 = vst [vmem:[#allocation158_spill] sm:$0xff] %v14922_v52  ;;  %v14926_v39 = vadd.f32 %v4378_v15, %v13989_v55  ;;  %6289 = vmatprep.mubr.f32.mxu1 %v14897_v50  ;;  %v10628_v55 = vld [vmem:[%s11277_s30 + $0x168] sm:$0xff]  ;;  %v10629_v15 = vld [vmem:[%s11277_s30 + $0x160] sm:$0xff]  ;;  %v14944_v22 = vpop.xlane.xlu1 %5790  ;;  %10410 = vrsqrt.f32 %v5837_v16  ;;  %v14963_v16 = vpop.xlane.xlu0 %5566 }
 0x3ee   : > { %18225 = vst [vmem:[#allocation215_spill] sm:$0xff] %v14930_v24  ;;  %v14935_v9 = vadd.f32 %v4377_v58, %v18226_v17  ;;  %v14939_v31 = vmul.f32 %v10628_v55, %v10397_v44  ;;  %v14942_v27 = vmul.f32 %v10629_v15, %v10397_v44  ;;  %v4380_v14 = vmul.f32 %v14812_v46, %v4343_v5  ;;  %v18230_v42 = vld [vmem:[#allocation240_spill] sm:$0xff]  ;;  %v18233_v44 = vld [vmem:[#allocation197_spill] sm:$0xff]  ;;  %v8961_v15 = vpop.f32.mrb[170].mxu1  ;;  %v10630_v5 = vld [vmem:[%s11277_s30 + $0x170] sm:$0xff] }
 0x3ef   : > { %v4342_v25 = vmax.f32 %v4085_v40, %v4207_v59  ;;  %v18231_v58 = vmax.f32 %v18229_v34, %v18230_v42  ;;  %v3960_v59 = vpop.f32.mrb[169].mxu0  ;;  %6060 = vmatmul.mubr.f32.gmra.mrb[18].mxu0 %v14870_v36  ;;  %v5838_v40 = vadd.f32 1e-16, %v14676_v23  ;;  %v18232_v12 = vld [vmem:[#allocation112_spill] sm:$0xff]  ;;  %v14958_v50 = vmul.f32 %v10630_v5, %v10395_v8  ;;  %v10403_v23 = vpop.eup %10402  ;;  %v18237_v42 = vld [vmem:[#allocation146_spill] sm:$0xff] }
 0x3f0   : > { %18227 = vst [vmem:[#allocation103_spill] sm:$0xff] %v14939_v31  ;;  %18228 = vst [vmem:[#allocation72_spill] sm:$0xff] %v14942_v27  ;;  %v18234_v17 = vmax.f32 %v18232_v12, %v18233_v44  ;;  %6064 = vmatprep.mubr.f32.mxu0 %v14894_v48  ;;  %v4227_v36 = vpop.f32.mrb[171].mxu1  ;;  %6290 = vmatmul.mubr.f32.gmra.mrb[20].mxu1 %v14922_v52  ;;  %10412 = vrsqrt.f32 %v5613_v37  ;;  %v10405_v8 = vpop.eup %10404  ;;  %v18240_v44 = vld [vmem:[#allocation145_spill] sm:$0xff]  ;;  %v18245_v52 = vld [vmem:[#allocation226_spill] sm:$0xff] }
 0x3f1   : > { %v4088_v29 = vmax.f32 %v18231_v58, %v8878_v38  ;;  %v4379_v26 = vmul.f32 %v14812_v46, %v4342_v25  ;;  %18235 = vst [vmem:[#allocation133_spill] sm:$0xff] %v14958_v50  ;;  %v10631_v38 = vld [vmem:[%s11277_s30 + $0x198] sm:$0xff]  ;;  %v14966_v58 = vadd.f32 %v4380_v14, %v18237_v42  ;;  %6294 = vmatprep.mubr.f32.mxu1 %v14930_v24  ;;  %v5614_v14 = vadd.f32 1e-16, %v14692_v20  ;;  %v10633_v42 = vld [vmem:[%s11277_s30 + $0x180] sm:$0xff]  ;;  %v18248_v20 = vld [vmem:[#allocation229_spill] sm:$0xff] }
 0x3f2   : > { %v4087_v55 = vmax.f32 %v18234_v17, %v3960_v59  ;;  %v14961_v34 = vmul.f32 %v10631_v38, %v10399_v2  ;;  %v10632_v59 = vld [vmem:[%s11277_s30 + $0x188] sm:$0xff]  ;;  %v8881_v38 = vpop.f32.mrb[170].mxu0  ;;  %10414 = vrsqrt.f32 %v5838_v40  ;;  %v14999_v40 = vpop.xlane.xlu1 %5793 }
 0x3f3   : > { %18238 = vst [vmem:[#allocation33_spill] sm:$0xff] %v14966_v58  ;;  %v4345_v25 = vmax.f32 %v4088_v29, %v8958_v11  ;;  %v14970_v12 = vmul.f32 %v10632_v59, %v10401_v57  ;;  %v14973_v17 = vadd.f32 %v4379_v26, %v18240_v44  ;;  %v14978_v11 = vmul.f32 %v10633_v42, %v10401_v57  ;;  %v18243_v29 = vld [vmem:[#allocation236_spill] sm:$0xff]  ;;  %v3970_v26 = vpop.f32.mrb[171].mxu0  ;;  %v18249_v44 = vld [vmem:[#allocation242_spill] sm:$0xff] }
 0x3f4   : > { %18236 = vst [vmem:[#allocation160_spill] sm:$0xff] %v14961_v34  ;;  %v4344_v5 = vmax.f32 %v4087_v55, %v4217_v18  ;;  %9943 = vmatpush1.bf16.xpose.msra.mxu1 %v18243_v29  ;;  %v18244_v59 = vld [vmem:[#allocation196_spill] sm:$0xff]  ;;  %6065 = vmatmul.mubr.f32.gmra.mrb[20].mxu0 %v14904_v33  ;;  %v10634_v18 = vld [vmem:[%s11277_s30 + $0x190] sm:$0xff]  ;;  %10416 = vrsqrt.f32 %v5614_v14 }
 0x3f5   : > { %18239 = vst [vmem:[#allocation34_spill] sm:$0xff] %v14970_v12  ;;  %18241 = vst [vmem:[#allocation124_spill] sm:$0xff] %v14973_v17  ;;  %v4382_v37 = vmul.f32 %v14812_v46, %v4345_v25  ;;  %v18246_v58 = vmax.f32 %v18244_v59, %v18245_v52  ;;  %v14987_v55 = vmul.f32 %v10634_v18, %v10399_v2  ;;  %9945 = vmatprep.subr.bf16.mxu1 %v18248_v20  ;;  %v18250_v42 = vld [vmem:[#allocation128_spill] sm:$0xff]  ;;  %v8964_v17 = vpop.f32.mrb[172].mxu1  ;;  %v10407_v2 = vpop.eup %10406 }
 0x3f6   : > { %18242 = vst [vmem:[#allocation123_spill] sm:$0xff] %v14978_v11  ;;  %v4381_v57 = vmul.f32 %v14812_v46, %v4344_v5  ;;  %v18251_v24 = vmax.f32 %v18249_v44, %v18250_v42  ;;  %6069 = vmatprep.mubr.f32.mxu0 %v14939_v31  ;;  %v5839_v52 = vadd.f32 1e-16, %v14726_v43  ;;  %9911 = vmatpush1.bf16.xpose.msra.mxu0 %v18243_v29  ;;  %v18253_v59 = vld [vmem:[#allocation28_spill] sm:$0xff]  ;;  %v4237_v33 = vpop.f32.mrb[173].mxu1  ;;  %v10409_v43 = vpop.eup %10408  ;;  %v18256_v44 = vld [vmem:[#allocation29_spill] sm:$0xff] }
 0x3f7   : > { %v4090_v48 = vmax.f32 %v18246_v58, %v8881_v38  ;;  %18247 = vst [vmem:[#allocation162_spill] sm:$0xff] %v14987_v55  ;;  %v10635_v58 = vld [vmem:[%s11277_s30 + $0x1b8] sm:$0xff]  ;;  %v15003_v18 = vadd.f32 %v4382_v37, %v18253_v59  ;;  %6295 = vmatmul.mubr.f32.gmra.mrb[22].mxu1 %v14958_v50  ;;  %9913 = vmatprep.subr.bf16.mxu0 %v18248_v20  ;;  %v18258_v59 = vld [vmem:[#allocation132_spill] sm:$0xff]  ;;  %v8967_v31 = vpop.f32.mrb[174].mxu1 }
 0x3f8   : > { %v4089_v25 = vmax.f32 %v18251_v24, %v3970_v26  ;;  %v14997_v38 = vmul.f32 %v10635_v58, %v10403_v23  ;;  %v10636_v24 = vld [vmem:[%s11277_s30 + $0x1a8] sm:$0xff]  ;;  %v15011_v42 = vadd.f32 %v4381_v57, %v18256_v44  ;;  %v8884_v58 = vpop.f32.mrb[172].mxu0  ;;  %6299 = vmatprep.mubr.f32.mxu1 %v14961_v34  ;;  %6070 = vmatmul.mubr.f32.gmra.mrb[22].mxu0 %v14942_v27  ;;  %v10637_v57 = vld [vmem:[%s11277_s30 + $0x1a0] sm:$0xff]  ;;  %v18263_v44 = vld [vmem:[#allocation135_spill] sm:$0xff]  ;;  %10418 = vrsqrt.f32 %v5839_v52 }
 0x3f9   : > { %18254 = vst [vmem:[#allocation217_spill] sm:$0xff] %v15003_v18  ;;  %v4347_v5 = vmax.f32 %v4090_v48, %v8961_v15  ;;  %v15007_v26 = vmul.f32 %v10636_v24, %v10405_v8  ;;  %v5615_v48 = vadd.f32 1e-16, %v14746_v28  ;;  %v15015_v15 = vpop.xlane.xlu0 %5569  ;;  %v18259_v24 = vld [vmem:[#allocation230_spill] sm:$0xff]  ;;  %v3980_v18 = vpop.f32.mrb[173].mxu0  ;;  %v18264_v34 = vld [vmem:[#allocation113_spill] sm:$0xff]  ;;  %6074 = vmatprep.mubr.f32.mxu0 %v14970_v12 }
 0x3fa   : > { %18252 = vst [vmem:[#allocation127_spill] sm:$0xff] %v14997_v38  ;;  %18257 = vst [vmem:[#allocation163_spill] sm:$0xff] %v15011_v42  ;;  %v4346_v29 = vmax.f32 %v4089_v25, %v4227_v36  ;;  %v18260_v50 = vmax.f32 %v18258_v59, %v18259_v24  ;;  %v15023_v36 = vmul.f32 %v10637_v57, %v10405_v8  ;;  %v10638_v25 = vld [vmem:[%s11277_s30 + $0x1b0] sm:$0xff]  ;;  %v10411_v8 = vpop.eup %10410  ;;  %v4247_v57 = vpop.f32.mrb[175].mxu1 }
 0x3fb   : > { %18255 = vst [vmem:[#allocation73_spill] sm:$0xff] %v15007_v26  ;;  %v4384_v37 = vmul.f32 %v14812_v46, %v4347_v5  ;;  %v15026_v14 = vmul.f32 %v10638_v25, %v10403_v23  ;;  %v18265_v42 = vmax.f32 %v18263_v44, %v18264_v34  ;;  %v18267_v59 = vld [vmem:[#allocation98_spill] sm:$0xff]  ;;  %6300 = vmatmul.mubr.f32.gmra.mrb[24].mxu1 %v14987_v55  ;;  %v10640_v34 = vld [vmem:[%s11277_s30 + $0x1c8] sm:$0xff]  ;;  %v8887_v44 = vpop.f32.mrb[174].mxu0  ;;  %10420 = vrsqrt.f32 %v5615_v48  ;;  %v18275_v55 = vld [vmem:[#allocation139_spill] sm:$0xff]  ;;  %v8970_v27 = vpop.f32.mrb[176].mxu1 }
 0x3fc   : > { %v4092_v20 = vmax.f32 %v18260_v50, %v8884_v58  ;;  %18261 = vst [vmem:[#allocation35_spill] sm:$0xff] %v15023_v36  ;;  %v4383_v28 = vmul.f32 %v14812_v46, %v4346_v29  ;;  %v10639_v50 = vld [vmem:[%s11277_s30 + $0x1d8] sm:$0xff]  ;;  %v5840_v29 = vadd.f32 1e-16, %v14778_v19  ;;  %6304 = vmatprep.mubr.f32.mxu1 %v14997_v38  ;;  %v10413_v19 = vpop.eup %10412  ;;  %6075 = vmatmul.mubr.f32.gmra.mrb[24].mxu0 %v14978_v11  ;;  %v5616_v48 = vadd.f32 1e-16, %v14796_v0 }
 0x3fd   : > { %18262 = vst [vmem:[#allocation44_spill] sm:$0xff] %v15026_v14  ;;  %v4091_v5 = vmax.f32 %v18265_v42, %v3980_v18  ;;  %v15034_v58 = vmul.f32 %v10639_v50, %v10407_v2  ;;  %v15037_v24 = vadd.f32 %v4384_v37, %v18267_v59  ;;  %v15042_v18 = vmul.f32 %v10640_v34, %v10409_v43  ;;  %v18270_v42 = vld [vmem:[#allocation95_spill] sm:$0xff]  ;;  %v10641_v37 = vld [vmem:[%s11277_s30 + $0x1c0] sm:$0xff]  ;;  %v10415_v0 = vpop.eup %10414 }
 0x3fe   : > { %v4349_v23 = vmax.f32 %v4092_v20, %v8964_v17  ;;  %v15045_v52 = vadd.f32 %v4383_v28, %v18270_v42  ;;  %v15049_v50 = vmul.f32 %v10641_v37, %v10409_v43  ;;  %v15051_v17 = vpop.xlane.xlu1 %5796  ;;  %v18273_v20 = vld [vmem:[#allocation185_spill] sm:$0xff]  ;;  %v18274_v34 = vld [vmem:[#allocation200_spill] sm:$0xff]  ;;  %v18278_v37 = vld [vmem:[#allocation122_spill] sm:$0xff]  ;;  %6079 = vmatprep.mubr.f32.mxu0 %v15007_v26  ;;  %10422 = vrsqrt.f32 %v5840_v29 }
 0x3ff   : > { %18266 = vst [vmem:[#allocation36_spill] sm:$0xff] %v15034_v58  ;;  %18268 = vst [vmem:[#allocation94_spill] sm:$0xff] %v15037_v24  ;;  %v4348_v25 = vmax.f32 %v4091_v5, %v4237_v33  ;;  %9947 = vmatpush1.bf16.xpose.msra.mxu1 %v18273_v20  ;;  %v18276_v28 = vmax.f32 %v18274_v34, %v18275_v55  ;;  %v3990_v33 = vpop.f32.mrb[175].mxu0  ;;  %v10642_v5 = vld [vmem:[%s11277_s30 + $0x1d0] sm:$0xff]  ;;  %v18280_v24 = vld [vmem:[#allocation243_spill] sm:$0xff]  ;;  %v15072_v34 = vpop.xlane.xlu0 %5572  ;;  %9915 = vmatpush1.bf16.xpose.msra.mxu0 %v18273_v20  ;;  %10424 = vrsqrt.f32 %v5616_v48 }
 0x400   : > { %18269 = vst [vmem:[#allocation91_spill] sm:$0xff] %v15042_v18  ;;  %18271 = vst [vmem:[#allocation138_spill] sm:$0xff] %v15045_v52  ;;  %v4386_v59 = vmul.f32 %v14812_v46, %v4349_v23  ;;  %v15061_v43 = vmul.f32 %v10642_v5, %v10407_v2  ;;  %9949 = vmatprep.subr.bf16.mxu1 %v18278_v37  ;;  %v18279_v52 = vld [vmem:[#allocation117_spill] sm:$0xff]  ;;  %v10643_v55 = vld [vmem:[%s11277_s30 + $0x1f8] sm:$0xff]  ;;  %v4257_v5 = vpop.f32.mrb[177].mxu1  ;;  %6305 = vmatmul.mubr.f32.gmra.mrb[26].mxu1 %v15026_v14 }
 0x401   : > { %18272 = vst [vmem:[#allocation165_spill] sm:$0xff] %v15049_v50  ;;  %v4094_v42 = vmax.f32 %v18276_v28, %v8887_v44  ;;  %v4385_v38 = vmul.f32 %v14812_v46, %v4348_v25  ;;  %v18281_v12 = vmax.f32 %v18279_v52, %v18280_v24  ;;  %v15070_v44 = vmul.f32 %v10643_v55, %v10411_v8  ;;  %v18283_v2 = vld [vmem:[#allocation99_spill] sm:$0xff]  ;;  %v18285_v24 = vld [vmem:[#allocation102_spill] sm:$0xff]  ;;  %v8890_v55 = vpop.f32.mrb[176].mxu0  ;;  %v10644_v20 = vld [vmem:[%s11277_s30 + $0x1e8] sm:$0xff] }
 0x402   : > { %18277 = vst [vmem:[#allocation161_spill] sm:$0xff] %v15061_v43  ;;  %v15076_v28 = vadd.f32 %v4386_v59, %v18283_v2  ;;  %9917 = vmatprep.subr.bf16.mxu0 %v18278_v37  ;;  %6309 = vmatprep.mubr.f32.mxu1 %v15034_v58  ;;  %v15086_v59 = vmul.f32 %v10644_v20, %v10413_v19  ;;  %v18290_v2 = vld [vmem:[#allocation232_spill] sm:$0xff]  ;;  %v18292_v20 = vld [vmem:[#allocation198_spill] sm:$0xff]  ;;  %v15108_v48 = vpop.xlane.xlu1 %5799 }
 0x403   : > { %v4093_v23 = vmax.f32 %v18281_v12, %v3990_v33  ;;  %18282 = vst [vmem:[#allocation93_spill] sm:$0xff] %v15070_v44  ;;  %v4351_v25 = vmax.f32 %v4094_v42, %v8967_v31  ;;  %v5841_v12 = vadd.f32 1e-16, %v14838_v54  ;;  %v15082_v52 = vadd.f32 %v4385_v38, %v18285_v24  ;;  %v10645_v31 = vld [vmem:[%s11277_s30 + $0x1e0] sm:$0xff]  ;;  %v4000_v38 = vpop.f32.mrb[177].mxu0  ;;  %6080 = vmatmul.mubr.f32.gmra.mrb[26].mxu0 %v15023_v36 }
 0x404   : > { %18284 = vst [vmem:[#allocation90_spill] sm:$0xff] %v15076_v28  ;;  %18287 = vst [vmem:[#allocation137_spill] sm:$0xff] %v15086_v59  ;;  %v15089_v42 = vmul.f32 %v10645_v31, %v10413_v19  ;;  %v18289_v54 = vld [vmem:[#allocation244_spill] sm:$0xff]  ;;  %v8973_v31 = vpop.f32.mrb[178].mxu1  ;;  %6084 = vmatprep.mubr.f32.mxu0 %v15042_v18  ;;  %6310 = vmatmul.mubr.f32.gmra.mrb[28].mxu1 %v15061_v43 }
 0x405   : > { %18286 = vst [vmem:[#allocation78_spill] sm:$0xff] %v15082_v52  ;;  %v4350_v33 = vmax.f32 %v4093_v23, %v4247_v57  ;;  %v4388_v29 = vmul.f32 %v14812_v46, %v4351_v25  ;;  %v18291_v37 = vmax.f32 %v18289_v54, %v18290_v2  ;;  %v5617_v57 = vadd.f32 1e-16, %v14854_v45  ;;  %v10417_v23 = vpop.eup %10416  ;;  %v18293_v58 = vld [vmem:[#allocation136_spill] sm:$0xff]  ;;  %v10646_v25 = vld [vmem:[%s11277_s30 + $0x1f0] sm:$0xff]  ;;  %v4267_v36 = vpop.f32.mrb[179].mxu1  ;;  %6314 = vmatprep.mubr.f32.mxu1 %v15070_v44 }
 0x406   : > { %18288 = vst [vmem:[#allocation166_spill] sm:$0xff] %v15089_v42  ;;  %v18294_v52 = vmax.f32 %v18292_v20, %v18293_v58  ;;  %v15103_v54 = vmul.f32 %v10646_v25, %v10411_v8  ;;  %v18297_v45 = vld [vmem:[#allocation68_spill] sm:$0xff]  ;;  %10426 = vrsqrt.f32 %v5841_v12  ;;  %v5842_v58 = vadd.f32 1e-16, %v14887_v53  ;;  %v8893_v25 = vpop.f32.mrb[178].mxu0  ;;  %v18304_v53 = vld [vmem:[#allocation115_spill] sm:$0xff] }
 0x407   : > { %v4096_v14 = vmax.f32 %v18291_v37, %v8890_v55  ;;  %v4387_v24 = vmul.f32 %v14812_v46, %v4350_v33  ;;  %v10647_v55 = vld [vmem:[%s11277_s30 + $0x218] sm:$0xff]  ;;  %v15111_v37 = vadd.f32 %v4388_v29, %v18297_v45  ;;  %v15122_v29 = vpop.xlane.xlu0 %5575  ;;  %v18303_v12 = vld [vmem:[#allocation140_spill] sm:$0xff]  ;;  %6085 = vmatmul.mubr.f32.gmra.mrb[28].mxu0 %v15049_v50  ;;  %10428 = vrsqrt.f32 %v5617_v57 }
 0x408   : > { %v4095_v19 = vmax.f32 %v18294_v52, %v4000_v38  ;;  %18295 = vst [vmem:[#allocation37_spill] sm:$0xff] %v15103_v54  ;;  %v15106_v2 = vmul.f32 %v10647_v55, %v10415_v0  ;;  %v10419_v52 = vpop.eup %10418  ;;  %v18299_v38 = vld [vmem:[#allocation234_spill] sm:$0xff]  ;;  %v18305_v45 = vmax.f32 %v18303_v12, %v18304_v53  ;;  %6089 = vmatprep.mubr.f32.mxu0 %v15086_v59  ;;  %v18310_v57 = vld [vmem:[#allocation67_spill] sm:$0xff]  ;;  %10430 = vrsqrt.f32 %v5842_v58 }
 0x409   : > { %18298 = vst [vmem:[#allocation100_spill] sm:$0xff] %v15111_v37  ;;  %v4353_v33 = vmax.f32 %v4096_v14, %v8970_v27  ;;  %v15116_v20 = vadd.f32 %v4387_v24, %v18299_v38  ;;  %v10648_v55 = vld [vmem:[%s11277_s30 + $0x210] sm:$0xff]  ;;  %v18302_v27 = vld [vmem:[#allocation192_spill] sm:$0xff]  ;;  %v4010_v24 = vpop.f32.mrb[179].mxu0  ;;  %v18306_v38 = vld [vmem:[#allocation147_spill] sm:$0xff]  ;;  %v8976_v37 = vpop.f32.mrb[180].mxu1  ;;  %6315 = vmatmul.mubr.f32.gmra.mrb[30].mxu1 %v15103_v54 }
 0x40a   : > { %18296 = vst [vmem:[#allocation38_spill] sm:$0xff] %v15106_v2  ;;  %v4352_v8 = vmax.f32 %v4095_v19, %v4257_v5  ;;  %v15120_v18 = vmul.f32 %v10648_v55, %v10415_v0  ;;  %9951 = vmatpush1.bf16.xpose.msra.mxu1 %v18302_v27  ;;  %v4098_v43 = vmax.f32 %v18305_v45, %v8893_v25  ;;  %v5618_v5 = vadd.f32 1e-16, %v14906_v60  ;;  %v10421_v19 = vpop.eup %10420  ;;  %v18307_v55 = vld [vmem:[#allocation231_spill] sm:$0xff]  ;;  %v4277_v53 = vpop.f32.mrb[181].mxu1 }
 0x40b   : > { %18300 = vst [vmem:[#allocation96_spill] sm:$0xff] %v15116_v20  ;;  %v4390_v14 = vmul.f32 %v14812_v46, %v4353_v33  ;;  %v18308_v44 = vmax.f32 %v18306_v38, %v18307_v55  ;;  %v10649_v33 = vld [vmem:[%s11277_s30 + $0x208] sm:$0xff]  ;;  %9919 = vmatpush1.bf16.xpose.msra.mxu0 %v18302_v27  ;;  %v8896_v38 = vpop.f32.mrb[180].mxu0  ;;  %6319 = vmatprep.mubr.f32.mxu1 %v15106_v2  ;;  %v10650_v55 = vld [vmem:[%s11277_s30 + $0x200] sm:$0xff]  ;;  %v10423_v58 = vpop.eup %10422 }
 0x40c   : > { %18301 = vst [vmem:[#allocation80_spill] sm:$0xff] %v15120_v18  ;;  %v4389_v0 = vmul.f32 %v14812_v46, %v4352_v8  ;;  %v15137_v25 = vmul.f32 %v10649_v33, %v10417_v23  ;;  %v4355_v60 = vmax.f32 %v4098_v43, %v8973_v31  ;;  %v18312_v8 = vld [vmem:[#allocation235_spill] sm:$0xff]  ;;  %v15150_v27 = vmul.f32 %v10650_v55, %v10417_v23  ;;  %v15155_v31 = vpop.xlane.xlu1 %5802  ;;  %v18316_v33 = vld [vmem:[#allocation246_spill] sm:$0xff]  ;;  %v8979_v54 = vpop.f32.mrb[182].mxu1 }
 0x40d   : > { %v4097_v20 = vmax.f32 %v18308_v44, %v4010_v24  ;;  %v15141_v12 = vadd.f32 %v4390_v14, %v18310_v57  ;;  %v5843_v44 = vadd.f32 1e-16, %v14944_v22  ;;  %v10651_v14 = vld [vmem:[%s11277_s30 + $0x238] sm:$0xff]  ;;  %6090 = vmatmul.mubr.f32.gmra.mrb[30].mxu0 %v15089_v42  ;;  %10432 = vrsqrt.f32 %v5618_v5  ;;  %v15174_v5 = vpop.xlane.xlu0 %5578  ;;  %6320 = vmatmul.mubr.f32.gmra.mrb[32].mxu1 %v15120_v18 }
 0x40e   : > { %18309 = vst [vmem:[#allocation77_spill] sm:$0xff] %v15137_v25  ;;  %v15146_v45 = vadd.f32 %v4389_v0, %v18312_v8  ;;  %18314 = vst [vmem:[#allocation101_spill] sm:$0xff] %v15150_v27  ;;  %v15153_v43 = vmul.f32 %v10651_v14, %v10419_v52  ;;  %v4392_v22 = vmul.f32 %v14812_v46, %v4355_v60  ;;  %v18317_v0 = vld [vmem:[#allocation207_spill] sm:$0xff]  ;;  %v5619_v23 = vadd.f32 1e-16, %v14963_v16  ;;  %v18320_v14 = vld [vmem:[#allocation74_spill] sm:$0xff]  ;;  %v10425_v16 = vpop.eup %10424 }
 0x40f   : > { %18311 = vst [vmem:[#allocation168_spill] sm:$0xff] %v15141_v12  ;;  %v4354_v24 = vmax.f32 %v4097_v20, %v4267_v36  ;;  %v18318_v57 = vmax.f32 %v18316_v33, %v18317_v0  ;;  %v4020_v20 = vpop.f32.mrb[181].mxu0  ;;  %v18319_v55 = vld [vmem:[#allocation23_spill] sm:$0xff]  ;;  %6094 = vmatprep.mubr.f32.mxu0 %v15137_v25  ;;  %v10652_v60 = vld [vmem:[%s11277_s30 + $0x228] sm:$0xff]  ;;  %10434 = vrsqrt.f32 %v5843_v44 }
 0x410   : > { %18313 = vst [vmem:[#allocation220_spill] sm:$0xff] %v15146_v45  ;;  %18315 = vst [vmem:[#allocation142_spill] sm:$0xff] %v15153_v43  ;;  %v18321_v2 = vmax.f32 %v18319_v55, %v18320_v14  ;;  %v15169_v12 = vmul.f32 %v10652_v60, %v10421_v19  ;;  %v18324_v0 = vld [vmem:[#allocation107_spill] sm:$0xff]  ;;  %v4287_v55 = vpop.f32.mrb[183].mxu1  ;;  %v8899_v25 = vpop.f32.mrb[182].mxu0  ;;  %6324 = vmatprep.mubr.f32.mxu1 %v15153_v43  ;;  %10436 = vrsqrt.f32 %v5619_v23 }
 0x411   : > { %v4100_v36 = vmax.f32 %v18318_v57, %v8896_v38  ;;  %v4391_v8 = vmul.f32 %v14812_v46, %v4354_v24  ;;  %v10653_v38 = vld [vmem:[%s11277_s30 + $0x230] sm:$0xff]  ;;  %v15177_v24 = vadd.f32 %v4392_v22, %v18324_v0  ;;  %v10655_v22 = vld [vmem:[%s11277_s30 + $0x258] sm:$0xff]  ;;  %6095 = vmatmul.mubr.f32.gmra.mrb[32].mxu0 %v15150_v27  ;;  %v15208_v23 = vpop.xlane.xlu1 %5805 }
 0x412   : > { %v4099_v45 = vmax.f32 %v18321_v2, %v4020_v20  ;;  %18322 = vst [vmem:[#allocation79_spill] sm:$0xff] %v15169_v12  ;;  %v15172_v33 = vmul.f32 %v10653_v38, %v10419_v52  ;;  %v5844_v2 = vadd.f32 1e-16, %v14999_v40  ;;  %v18326_v20 = vld [vmem:[#allocation110_spill] sm:$0xff]  ;;  %v10654_v52 = vld [vmem:[%s11277_s30 + $0x220] sm:$0xff]  ;;  %6099 = vmatprep.mubr.f32.mxu0 %v15169_v12 }
 0x413   : > { %18325 = vst [vmem:[#allocation39_spill] sm:$0xff] %v15177_v24  ;;  %v4357_v57 = vmax.f32 %v4100_v36, %v8976_v37  ;;  %v15182_v14 = vadd.f32 %v4391_v8, %v18326_v20  ;;  %v15186_v38 = vmul.f32 %v10654_v52, %v10421_v19  ;;  %v15189_v37 = vmul.f32 %v10655_v22, %v10423_v58  ;;  %v10427_v36 = vpop.eup %10426  ;;  %v18330_v40 = vld [vmem:[#allocation76_spill] sm:$0xff]  ;;  %v4030_v20 = vpop.f32.mrb[183].mxu0  ;;  %v18333_v52 = vld [vmem:[#allocation150_spill] sm:$0xff] }
 0x414   : > { %18323 = vst [vmem:[#allocation169_spill] sm:$0xff] %v15172_v33  ;;  %v4356_v60 = vmax.f32 %v4099_v45, %v4277_v53  ;;  %v18331_v0 = vmax.f32 %v14613_v56, %v18330_v40  ;;  %v5620_v53 = vadd.f32 1e-16, %v15015_v15  ;;  %v18332_v45 = vld [vmem:[#allocation126_spill] sm:$0xff]  ;;  %v10429_v15 = vpop.eup %10428  ;;  %6325 = vmatmul.mubr.f32.gmra.mrb[34].mxu1 %v15172_v33  ;;  %10438 = vrsqrt.f32 %v5844_v2  ;;  %v8902_v12 = vpop.f32.mrb[184].mxu0 }
 0x415   : > { %18327 = vst [vmem:[#allocation45_spill] sm:$0xff] %v15182_v14  ;;  %18328 = vst [vmem:[#allocation40_spill] sm:$0xff] %v15186_v38  ;;  %v4394_v44 = vmul.f32 %v14812_v46, %v4357_v57  ;;  %v18334_v43 = vmax.f32 %v18332_v45, %v18333_v52  ;;  %v8982_v14 = vpop.f32.mrb[184].mxu1  ;;  %v10656_v57 = vld [vmem:[%s11277_s30 + $0x248] sm:$0xff]  ;;  %v10657_v56 = vld [vmem:[%s11277_s30 + $0x250] sm:$0xff]  ;;  %6329 = vmatprep.mubr.f32.mxu1 %v15189_v37  ;;  %v10431_v2 = vpop.eup %10430  ;;  %6100 = vmatmul.mubr.f32.gmra.mrb[34].mxu0 %v15186_v38 }
 0x416   : > { %18329 = vst [vmem:[#allocation221_spill] sm:$0xff] %v15189_v37  ;;  %v4102_v8 = vmax.f32 %v18331_v0, %v8899_v25  ;;  %v4393_v19 = vmul.f32 %v14812_v46, %v4356_v60  ;;  %v15203_v18 = vmul.f32 %v10656_v57, %v10425_v16  ;;  %v15206_v25 = vmul.f32 %v10657_v56, %v10423_v58  ;;  %v18337_v40 = vld [vmem:[#allocation114_spill] sm:$0xff]  ;;  %v4297_v45 = vpop.f32.mrb[185].mxu1  ;;  %v10658_v58 = vld [vmem:[%s11277_s30 + $0x240] sm:$0xff] }
 0x417   : > { %v4101_v22 = vmax.f32 %v18334_v43, %v4030_v20  ;;  %v15211_v60 = vadd.f32 %v4394_v44, %v18337_v40  ;;  %v5845_v43 = vadd.f32 1e-16, %v15051_v17  ;;  %v18339_v20 = vld [vmem:[#allocation69_spill] sm:$0xff]  ;;  %v15220_v56 = vmul.f32 %v10658_v58, %v10425_v16  ;;  %v10659_v44 = vld [vmem:[%s11277_s30 + $0x278] sm:$0xff]  ;;  %v18343_v40 = vld [vmem:[#allocation82_spill] sm:$0xff] }
 0x418   : > { %18335 = vst [vmem:[#allocation104_spill] sm:$0xff] %v15203_v18  ;;  %18336 = vst [vmem:[#allocation85_spill] sm:$0xff] %v15206_v25  ;;  %v4359_v0 = vmax.f32 %v4102_v8, %v8979_v54  ;;  %v15216_v52 = vadd.f32 %v4393_v19, %v18339_v20  ;;  %v15223_v54 = vmul.f32 %v10659_v44, %v10427_v36  ;;  %v15225_v8 = vpop.xlane.xlu0 %5581  ;;  %v18344_v19 = vld [vmem:[#allocation151_spill] sm:$0xff]  ;;  %10440 = vrsqrt.f32 %v5620_v53  ;;  %v18346_v37 = vld [vmem:[#allocation84_spill] sm:$0xff]  ;;  %v10433_v53 = vpop.eup %10432 }
 0x419   : > { %18338 = vst [vmem:[#allocation141_spill] sm:$0xff] %v15211_v60  ;;  %v4358_v57 = vmax.f32 %v4101_v22, %v4287_v55  ;;  %18341 = vst [vmem:[#allocation164_spill] sm:$0xff] %v15220_v56  ;;  %v18345_v20 = vmax.f32 %v18343_v40, %v18344_v19  ;;  %v4040_v22 = vpop.f32.mrb[185].mxu0  ;;  %v5621_v16 = vadd.f32 1e-16, %v15072_v34  ;;  %v18347_v44 = vld [vmem:[#allocation24_spill] sm:$0xff]  ;;  %6104 = vmatprep.mubr.f32.mxu0 %v15203_v18  ;;  %6330 = vmatmul.mubr.f32.gmra.mrb[36].mxu1 %v15206_v25 }
 0x41a   : > { %18340 = vst [vmem:[#allocation171_spill] sm:$0xff] %v15216_v52  ;;  %18342 = vst [vmem:[#allocation109_spill] sm:$0xff] %v15223_v54  ;;  %v4396_v17 = vmul.f32 %v14812_v46, %v4359_v0  ;;  %v18348_v52 = vmax.f32 %v18346_v37, %v18347_v44  ;;  %v8985_v60 = vpop.f32.mrb[186].mxu1  ;;  %v10660_v0 = vld [vmem:[%s11277_s30 + $0x268] sm:$0xff]  ;;  %10442 = vrsqrt.f32 %v5845_v43  ;;  %v5846_v37 = vadd.f32 1e-16, %v15108_v48  ;;  %6334 = vmatprep.mubr.f32.mxu1 %v15223_v54  ;;  %v10435_v43 = vpop.eup %10434 }
 0x41b   : > { %v4104_v55 = vmax.f32 %v18345_v20, %v8902_v12  ;;  %v4395_v58 = vmul.f32 %v14812_v46, %v4358_v57  ;;  %v15239_v27 = vmul.f32 %v10660_v0, %v10429_v15  ;;  %v10661_v12 = vld [vmem:[%s11277_s30 + $0x270] sm:$0xff]  ;;  %v18351_v19 = vld [vmem:[#allocation237_spill] sm:$0xff]  ;;  %v4307_v20 = vpop.f32.mrb[187].mxu1  ;;  %v8905_v0 = vpop.f32.mrb[186].mxu0  ;;  %6105 = vmatmul.mubr.f32.gmra.mrb[36].mxu0 %v15220_v56  ;;  %10444 = vrsqrt.f32 %v5621_v16 }
 0x41c   : > { %v4103_v33 = vmax.f32 %v18348_v52, %v4040_v22  ;;  %v15242_v40 = vmul.f32 %v10661_v12, %v10427_v36  ;;  %v15245_v34 = vadd.f32 %v4396_v17, %v18351_v19  ;;  %v18353_v52 = vld [vmem:[#allocation111_spill] sm:$0xff]  ;;  %v10662_v36 = vld [vmem:[%s11277_s30 + $0x260] sm:$0xff]  ;;  %v18360_v54 = vld [vmem:[#allocation154_spill] sm:$0xff]  ;;  %v15278_v16 = vpop.xlane.xlu0 %5584  ;;  %10446 = vrsqrt.f32 %v5846_v37 }
 0x41d   : > { %18349 = vst [vmem:[#allocation222_spill] sm:$0xff] %v15239_v27  ;;  %v4361_v57 = vmax.f32 %v4104_v55, %v8982_v14  ;;  %v15250_v22 = vadd.f32 %v4395_v58, %v18353_v52  ;;  %v15254_v12 = vmul.f32 %v10662_v36, %v10429_v15  ;;  %v10663_v17 = vld [vmem:[%s11277_s30 + $0x298] sm:$0xff]  ;;  %v15259_v55 = vpop.xlane.xlu1 %5808  ;;  %v18357_v19 = vld [vmem:[#allocation92_spill] sm:$0xff]  ;;  %v18358_v58 = vld [vmem:[#allocation125_spill] sm:$0xff]  ;;  %v5622_v15 = vadd.f32 1e-16, %v15122_v29  ;;  %6109 = vmatprep.mubr.f32.mxu0 %v15239_v27  ;;  %v10437_v29 = vpop.eup %10436 }
 0x41e   : > { %18350 = vst [vmem:[#allocation87_spill] sm:$0xff] %v15242_v40  ;;  %18352 = vst [vmem:[#allocation86_spill] sm:$0xff] %v15245_v34  ;;  %v4360_v44 = vmax.f32 %v4103_v33, %v4297_v45  ;;  %v15257_v14 = vmul.f32 %v10663_v17, %v10431_v2  ;;  %v18359_v52 = vmax.f32 %v18357_v19, %v18358_v58  ;;  %v4050_v45 = vpop.f32.mrb[187].mxu0  ;;  %v18361_v17 = vld [vmem:[#allocation25_spill] sm:$0xff]  ;;  %v8988_v34 = vpop.f32.mrb[188].mxu1  ;;  %v18365_v58 = vld [vmem:[#allocation184_spill] sm:$0xff]  ;;  %6335 = vmatmul.mubr.f32.gmra.mrb[38].mxu1 %v15242_v40 }
 0x41f   : > { %18354 = vst [vmem:[#allocation172_spill] sm:$0xff] %v15250_v22  ;;  %18355 = vst [vmem:[#allocation173_spill] sm:$0xff] %v15254_v12  ;;  %v4398_v48 = vmul.f32 %v14812_v46, %v4361_v57  ;;  %v18362_v22 = vmax.f32 %v18360_v54, %v18361_v17  ;;  %v10664_v57 = vld [vmem:[%s11277_s30 + $0x288] sm:$0xff]  ;;  %v4317_v54 = vpop.f32.mrb[189].mxu1  ;;  %v8908_v27 = vpop.f32.mrb[188].mxu0  ;;  %6110 = vmatmul.mubr.f32.gmra.mrb[38].mxu0 %v15254_v12  ;;  %10448 = vrsqrt.f32 %v5622_v15 }
 0x420   : > { %18356 = vst [vmem:[#allocation41_spill] sm:$0xff] %v15257_v14  ;;  %v4106_v33 = vmax.f32 %v18359_v52, %v8905_v0  ;;  %v4397_v36 = vmul.f32 %v14812_v46, %v4360_v44  ;;  %v15273_v18 = vmul.f32 %v10664_v57, %v10433_v53  ;;  %v10665_v0 = vld [vmem:[%s11277_s30 + $0x290] sm:$0xff]  ;;  %6339 = vmatprep.mubr.f32.mxu1 %v15257_v14 }
 0x421   : > { %v4105_v25 = vmax.f32 %v18362_v22, %v4050_v45  ;;  %v15276_v19 = vmul.f32 %v10665_v0, %v10431_v2  ;;  %v15281_v44 = vadd.f32 %v4398_v48, %v18365_v58  ;;  %v5847_v22 = vadd.f32 1e-16, %v15155_v31  ;;  %v18367_v45 = vld [vmem:[#allocation238_spill] sm:$0xff]  ;;  %v10666_v2 = vld [vmem:[%s11277_s30 + $0x280] sm:$0xff]  ;;  %v10667_v48 = vld [vmem:[%s11277_s30 + $0x2b8] sm:$0xff]  ;;  %v15312_v15 = vpop.xlane.xlu1 %5811 }
 0x422   : > { %18363 = vst [vmem:[#allocation224_spill] sm:$0xff] %v15273_v18  ;;  %v4363_v52 = vmax.f32 %v4106_v33, %v8985_v60  ;;  %v15286_v17 = vadd.f32 %v4397_v36, %v18367_v45  ;;  %v15290_v0 = vmul.f32 %v10666_v2, %v10433_v53  ;;  %v15293_v60 = vmul.f32 %v10667_v48, %v10435_v43  ;;  %v10439_v33 = vpop.eup %10438  ;;  %v18371_v58 = vld [vmem:[#allocation155_spill] sm:$0xff]  ;;  %v4060_v45 = vpop.f32.mrb[189].mxu0  ;;  %v18375_v2 = vld [vmem:[#allocation129_spill] sm:$0xff] }
 0x423   : > { %18364 = vst [vmem:[#allocation108_spill] sm:$0xff] %v15276_v19  ;;  %18366 = vst [vmem:[#allocation175_spill] sm:$0xff] %v15281_v44  ;;  %v4362_v57 = vmax.f32 %v4105_v25, %v4307_v20  ;;  %v18372_v31 = vld [vmem:[#allocation211_spill] sm:$0xff]  ;;  %v5623_v25 = vadd.f32 1e-16, %v15174_v5  ;;  %v18374_v20 = vld [vmem:[#allocation30_spill] sm:$0xff]  ;;  %6114 = vmatprep.mubr.f32.mxu0 %v15273_v18  ;;  %v10441_v5 = vpop.eup %10440  ;;  %6340 = vmatmul.mubr.f32.gmra.mrb[40].mxu1 %v15276_v19  ;;  %10450 = vrsqrt.f32 %v5847_v22 }
 0x424   : > { %18368 = vst [vmem:[#allocation227_spill] sm:$0xff] %v15286_v17  ;;  %18369 = vst [vmem:[#allocation225_spill] sm:$0xff] %v15290_v0  ;;  %v4400_v37 = vmul.f32 %v14812_v46, %v4363_v52  ;;  %v18373_v40 = vmax.f32 %v18371_v58, %v18372_v31  ;;  %v18376_v14 = vmax.f32 %v18374_v20, %v18375_v2  ;;  %v8991_v17 = vpop.f32.mrb[190].mxu1  ;;  %v10668_v52 = vld [vmem:[%s11277_s30 + $0x2a8] sm:$0xff]  ;;  %v18379_v58 = vld [vmem:[#allocation116_spill] sm:$0xff]  ;;  %v8911_v18 = vpop.f32.mrb[190].mxu0  ;;  %6344 = vmatprep.mubr.f32.mxu1 %v15293_v60 }
 0x425   : > { %18370 = vst [vmem:[#allocation176_spill] sm:$0xff] %v15293_v60  ;;  %v4399_v53 = vmul.f32 %v14812_v46, %v4362_v57  ;;  %v15307_v44 = vmul.f32 %v10668_v52, %v10437_v29  ;;  %v4327_v20 = vpop.f32.mrb[191].mxu1  ;;  %v10443_v22 = vpop.eup %10442  ;;  %6115 = vmatmul.mubr.f32.gmra.mrb[40].mxu0 %v15290_v0  ;;  %10452 = vrsqrt.f32 %v5623_v25  ;;  %v18388_v60 = vld [vmem:[#allocation31_spill] sm:$0xff] }
 0x426   : > { %v4108_v36 = vmax.f32 %v18373_v40, %v8908_v27  ;;  %v4107_v48 = vmax.f32 %v18376_v14, %v4060_v45  ;;  %v10669_v27 = vld [vmem:[%s11277_s30 + $0x2b0] sm:$0xff]  ;;  %v15315_v57 = vadd.f32 %v4400_v37, %v18379_v58  ;;  %v5848_v14 = vadd.f32 1e-16, %v15208_v23  ;;  %v18381_v45 = vld [vmem:[#allocation119_spill] sm:$0xff]  ;;  %v10445_v25 = vpop.eup %10444 }
 0x427   : > { %18377 = vst [vmem:[#allocation177_spill] sm:$0xff] %v15307_v44  ;;  %v15310_v40 = vmul.f32 %v10669_v27, %v10435_v43  ;;  %v15320_v2 = vadd.f32 %v4399_v53, %v18381_v45  ;;  %v10670_v43 = vld [vmem:[%s11277_s30 + $0x2a0] sm:$0xff]  ;;  %v10671_v37 = vld [vmem:[%s11277_s30 + $0x2d8] sm:$0xff]  ;;  %v18385_v58 = vld [vmem:[#allocation134_spill] sm:$0xff]  ;;  %6119 = vmatprep.mubr.f32.mxu0 %v15307_v44 }
 0x428   : > { %18380 = vst [vmem:[#allocation42_spill] sm:$0xff] %v15315_v57  ;;  %v4365_v31 = vmax.f32 %v4108_v36, %v8988_v34  ;;  %v4364_v52 = vmax.f32 %v4107_v48, %v4317_v54  ;;  %v15324_v27 = vmul.f32 %v10670_v43, %v10437_v29  ;;  %v15327_v34 = vmul.f32 %v10671_v37, %v10439_v33  ;;  %v15329_v36 = vpop.xlane.xlu0 %5587  ;;  %v18386_v53 = vld [vmem:[#allocation89_spill] sm:$0xff]  ;;  %v4070_v48 = vpop.f32.mrb[191].mxu0  ;;  %v18389_v37 = vld [vmem:[#allocation106_spill] sm:$0xff] }
 0x429   : > { %18378 = vst [vmem:[#allocation46_spill] sm:$0xff] %v15310_v40  ;;  %18382 = vst [vmem:[#allocation179_spill] sm:$0xff] %v15320_v2  ;;  %v18387_v45 = vmax.f32 %v18385_v58, %v18386_v53  ;;  %v5624_v29 = vadd.f32 1e-16, %v15225_v8  ;;  %v18390_v2 = vmax.f32 %v18388_v60, %v18389_v37  ;;  %v15341_v57 = vpop.f32.mrb[192].mxu1  ;;  %v18393_v8 = vld [vmem:[#allocation191_spill] sm:$0xff]  ;;  %6345 = vmatmul.mubr.f32.gmra.mrb[42].mxu1 %v15310_v40  ;;  %10454 = vrsqrt.f32 %v5848_v14 }
 0x42a   : > { %18383 = vst [vmem:[#allocation167_spill] sm:$0xff] %v15324_v27  ;;  %18384 = vst [vmem:[#allocation180_spill] sm:$0xff] %v15327_v34  ;;  %v4402_v23 = vmul.f32 %v14812_v46, %v4365_v31  ;;  %v4401_v43 = vmul.f32 %v14812_v46, %v4364_v52  ;;  %v10672_v31 = vld [vmem:[%s11277_s30 + $0x2c8] sm:$0xff]  ;;  %v15353_v0 = vpop.f32.mrb[193].mxu1  ;;  %v5849_v60 = vadd.f32 1e-16, %v15259_v55  ;;  %6349 = vmatprep.mubr.f32.mxu1 %v15327_v34  ;;  %6120 = vmatmul.mubr.f32.gmra.mrb[42].mxu0 %v15324_v27 }
 0x42b   : > { %v4110_v54 = vmax.f32 %v18387_v45, %v8911_v18  ;;  %v4109_v19 = vmax.f32 %v18390_v2, %v4070_v48  ;;  %v15345_v58 = vmul.f32 %v10672_v31, %v10441_v5  ;;  %v10673_v18 = vld [vmem:[%s11277_s30 + $0x2d0] sm:$0xff]  ;;  %v18395_v2 = vld [vmem:[#allocation239_spill] sm:$0xff]  ;;  %v15360_v31 = vpop.f32.mrb[192].mxu0  ;;  %10456 = vrsqrt.f32 %v5624_v29  ;;  %v18400_v34 = vld [vmem:[#allocation120_spill] sm:$0xff] }
 0x42c   : > { %v15348_v53 = vmul.f32 %v10673_v18, %v10439_v33  ;;  %v15351_v45 = vadd.f32 %v4402_v23, %v18393_v8  ;;  %v15358_v48 = vadd.f32 %v4401_v43, %v18395_v2  ;;  %v10674_v33 = vld [vmem:[%s11277_s30 + $0x2c0] sm:$0xff]  ;;  %v5815_v18 = vpop.xlane.xlu1 %5814  ;;  %v10447_v8 = vpop.eup %10446  ;;  %10458 = vrsqrt.f32 %v5849_v60 }
 0x42d   : > { %18391 = vst [vmem:[#allocation52_spill] sm:$0xff] %v15345_v58  ;;  %v4367_v52 = vmax.f32 %v4110_v54, %v8991_v17  ;;  %v4366_v37 = vmax.f32 %v4109_v19, %v4327_v20  ;;  %v15364_v23 = vmul.f32 %v10674_v33, %v10441_v5  ;;  %v10675_v17 = vld [vmem:[%s11277_s30 + $0x2f8] sm:$0xff]  ;;  %v15372_v43 = vpop.f32.mrb[193].mxu0  ;;  %v5625_v19 = vadd.f32 1e-16, %v15278_v16  ;;  %v15379_v2 = vpop.f32.mrb[194].mxu1  ;;  %6124 = vmatprep.mubr.f32.mxu0 %v15345_v58 }
 0x42e   : > { %18392 = vst [vmem:[#allocation54_spill] sm:$0xff] %v15348_v53  ;;  %18394 = vst [vmem:[#allocation51_spill] sm:$0xff] %v15351_v45  ;;  %v15367_v54 = vmul.f32 %v10675_v17, %v10443_v22  ;;  %v5591_v17 = vpop.xlane.xlu0 %5590  ;;  %v10449_v55 = vpop.eup %10448  ;;  %6350 = vmatmul.mubr.f32.gmra.mrb[44].mxu1 %v15348_v53  ;;  %v18403_v20 = vld [vmem:[#allocation189_spill] sm:$0xff] }
 0x42f   : > { %18396 = vst [vmem:[#allocation53_spill] sm:$0xff] %v15358_v48  ;;  %18397 = vst [vmem:[#allocation56_spill] sm:$0xff] %v15364_v23  ;;  %v4404_v14 = vmul.f32 %v14812_v46, %v4367_v52  ;;  %v4403_v5 = vmul.f32 %v14812_v46, %v4366_v37  ;;  %v10676_v52 = vld [vmem:[%s11277_s30 + $0x2e8] sm:$0xff]  ;;  %v15388_v29 = vpop.f32.mrb[195].mxu1  ;;  %v10677_v46 = vld [vmem:[%s11277_s30 + $0x2f0] sm:$0xff]  ;;  %6125 = vmatmul.mubr.f32.gmra.mrb[44].mxu0 %v15364_v23  ;;  %10460 = vrsqrt.f32 %v5625_v19 }
 0x430   : > { %18398 = vst [vmem:[#allocation47_spill] sm:$0xff] %v15367_v54  ;;  %v15383_v33 = vmul.f32 %v10676_v52, %v10445_v25  ;;  %v15392_v16 = vmul.f32 %v10677_v46, %v10443_v22  ;;  %v5850_v37 = vadd.f32 1e-16, %v15312_v15  ;;  %v15398_v52 = vpop.f32.mrb[194].mxu0  ;;  %6354 = vmatprep.mubr.f32.mxu1 %v15367_v54  ;;  %v10679_v15 = vld [vmem:[%s11277_s30 + $0x2e0] sm:$0xff]  ;;  %v15415_v46 = vpop.f32.mrb[196].mxu1 }
 0x431   : > { %v15386_v27 = vadd.f32 %v4404_v14, %v18400_v34  ;;  %v15396_v58 = vadd.f32 %v4403_v5, %v18403_v20  ;;  %v10678_v34 = vld [vmem:[%s11277_s30 + $0x318] sm:$0xff]  ;;  %v15406_v53 = vpop.f32.mrb[195].mxu0  ;;  %v15410_v22 = vmul.f32 %v10679_v15, %v10445_v25  ;;  %v5626_v5 = vadd.f32 1e-16, %v15329_v36  ;;  %v5818_v54 = vpop.xlane.xlu1 %5817  ;;  %v10681_v36 = vld [vmem:[%s11277_s30 + $0x310] sm:$0xff] }
 0x432   : > { %18399 = vst [vmem:[#allocation58_spill] sm:$0xff] %v15383_v33  ;;  %18402 = vst [vmem:[#allocation170_spill] sm:$0xff] %v15392_v16  ;;  %v15402_v14 = vmul.f32 %v10678_v34, %v10447_v8  ;;  %6129 = vmatprep.mubr.f32.mxu0 %v15383_v33  ;;  %v10680_v34 = vld [vmem:[%s11277_s30 + $0x308] sm:$0xff]  ;;  %v15421_v23 = vpop.f32.mrb[197].mxu1  ;;  %6355 = vmatmul.mubr.f32.gmra.mrb[46].mxu1 %v15392_v16  ;;  %10462 = vrsqrt.f32 %v5850_v37  ;;  %v15425_v25 = vmul.f32 %v10681_v36, %v10447_v8  ;;  %v15427_v15 = vpop.f32.mrb[196].mxu0  ;;  %v10682_v20 = vld [vmem:[%s11277_s30 + $0x338] sm:$0xff] }
 0x433   : > { %18401 = vst [vmem:[#allocation55_spill] sm:$0xff] %v15386_v27  ;;  %18404 = vst [vmem:[#allocation57_spill] sm:$0xff] %v15396_v58  ;;  %v10451_v27 = vpop.eup %10450  ;;  %v15419_v60 = vmul.f32 %v10680_v34, %v10449_v55  ;;  %v5851_v19 = vadd.f32 1e-16, %v5815_v18  ;;  %v5594_v33 = vpop.xlane.xlu0 %5593  ;;  %6130 = vmatmul.mubr.f32.gmra.mrb[46].mxu0 %v15410_v22  ;;  %10464 = vrsqrt.f32 %v5626_v5  ;;  %v10683_v18 = vld [vmem:[%s11277_s30 + $0x300] sm:$0xff] }
 0x434   : > { %18405 = vst [vmem:[#allocation60_spill] sm:$0xff] %v15402_v14  ;;  %18406 = vst [vmem:[#allocation62_spill] sm:$0xff] %v15410_v22  ;;  %v10453_v58 = vpop.eup %10452  ;;  %6359 = vmatprep.mubr.f32.mxu1 %v15402_v14  ;;  %v15431_v34 = vmul.f32 %v10682_v20, %v10451_v27  ;;  %v15435_v16 = vpop.f32.mrb[197].mxu0  ;;  %v15439_v8 = vmul.f32 %v10683_v18, %v10449_v55  ;;  %v5627_v37 = vadd.f32 1e-16, %v5591_v17  ;;  %v10684_v14 = vld [vmem:[%s11277_s30 + $0x328] sm:$0xff] }
 0x435   : > { %18407 = vst [vmem:[#allocation59_spill] sm:$0xff] %v15419_v60  ;;  %18408 = vst [vmem:[#allocation61_spill] sm:$0xff] %v15425_v25  ;;  %v10455_v48 = vpop.eup %10454  ;;  %v15443_v36 = vpop.f32.mrb[198].mxu1  ;;  %6134 = vmatprep.mubr.f32.mxu0 %v15419_v60  ;;  %v15447_v40 = vmul.f32 %v10684_v14, %v10453_v58  ;;  %10466 = vrsqrt.f32 %v5851_v19  ;;  %v10685_v55 = vld [vmem:[%s11277_s30 + $0x330] sm:$0xff]  ;;  %v5852_v17 = vadd.f32 1e-16, %v5818_v54 }
 0x436   : > { %18409 = vst [vmem:[#allocation64_spill] sm:$0xff] %v15431_v34  ;;  %18410 = vst [vmem:[#allocation48_spill] sm:$0xff] %v15439_v8  ;;  %v10457_v45 = vpop.eup %10456  ;;  %v15449_v44 = vpop.f32.mrb[199].mxu1  ;;  %6360 = vmatmul.mubr.f32.gmra.mrb[48].mxu1 %v15425_v25  ;;  %v15453_v5 = vmul.f32 %v10685_v55, %v10451_v27  ;;  %v10686_v20 = vld [vmem:[%s11277_s30 + $0x358] sm:$0xff]  ;;  %10468 = vrsqrt.f32 %v5627_v37  ;;  %v10687_v27 = vld [vmem:[%s11277_s30 + $0x320] sm:$0xff] }
 0x437   : > { %18411 = vst [vmem:[#allocation66_spill] sm:$0xff] %v15447_v40  ;;  %v15455_v18 = vpop.f32.mrb[198].mxu0  ;;  %6364 = vmatprep.mubr.f32.mxu1 %v15431_v34  ;;  %v15459_v60 = vmul.f32 %v10686_v20, %v10455_v48  ;;  %v5821_v14 = vpop.xlane.xlu1 %5820  ;;  %6135 = vmatmul.mubr.f32.gmra.mrb[48].mxu0 %v15439_v8  ;;  %v15467_v54 = vmul.f32 %v10687_v27, %v10453_v58  ;;  %v5628_v19 = vadd.f32 1e-16, %v5594_v33  ;;  %v10688_v34 = vld [vmem:[%s11277_s30 + $0x348] sm:$0xff]  ;;  %10470 = vrsqrt.f32 %v5852_v17  ;;  %v10689_v58 = vld [vmem:[%s11277_s30 + $0x350] sm:$0xff] }
 0x438   : > { %18412 = vst [vmem:[#allocation63_spill] sm:$0xff] %v15453_v5  ;;  %v10459_v22 = vpop.eup %10458  ;;  %v15463_v56 = vpop.f32.mrb[199].mxu0  ;;  %6139 = vmatprep.mubr.f32.mxu0 %v15447_v40  ;;  %v15475_v12 = vmul.f32 %v10688_v34, %v10457_v45  ;;  %v15481_v33 = vmul.f32 %v10689_v58, %v10455_v48  ;;  %v5853_v37 = vadd.f32 1e-16, %v5821_v14  ;;  %v10690_v20 = vld [vmem:[%s11277_s30 + $0x378] sm:$0xff]  ;;  %v10691_v48 = vld [vmem:[%s11277_s30 + $0x340] sm:$0xff] }
 0x439   : > { %18413 = vst [vmem:[#allocation174_spill] sm:$0xff] %v15459_v60  ;;  %18414 = vst [vmem:[#allocation65_spill] sm:$0xff] %v15467_v54  ;;  %v15471_v55 = vpop.f32.mrb[200].mxu1  ;;  %v5597_v25 = vpop.xlane.xlu0 %5596  ;;  %v15487_v34 = vmul.f32 %v10690_v20, %v10459_v22  ;;  %10472 = vrsqrt.f32 %v5628_v19  ;;  %v15495_v17 = vmul.f32 %v10691_v48, %v10457_v45  ;;  %v10693_v45 = vld [vmem:[%s11277_s30 + $0x370] sm:$0xff]  ;;  %v10694_v48 = vld [vmem:[%s11277_s30 + $0x398] sm:$0xff] }
 0x43a   : > { %18415 = vst [vmem:[#allocation181_spill] sm:$0xff] %v15475_v12  ;;  %v10461_v38 = vpop.eup %10460  ;;  %v15477_v8 = vpop.f32.mrb[201].mxu1  ;;  %6365 = vmatmul.mubr.f32.gmra.mrb[50].mxu1 %v15453_v5  ;;  %18416 = vst [vmem:[#allocation70_spill] sm:$0xff] %v15481_v33  ;;  %v5629_v14 = vadd.f32 1e-16, %v5597_v25  ;;  %10474 = vrsqrt.f32 %v5853_v37  ;;  %v15509_v25 = vmul.f32 %v10693_v45, %v10459_v22  ;;  %v10695_v22 = vld [vmem:[%s11277_s30 + $0x360] sm:$0xff] }
 0x43b   : > { %v15483_v27 = vpop.f32.mrb[200].mxu0  ;;  %6369 = vmatprep.mubr.f32.mxu1 %v15459_v60  ;;  %18417 = vst [vmem:[#allocation182_spill] sm:$0xff] %v15487_v34  ;;  %6140 = vmatmul.mubr.f32.gmra.mrb[50].mxu0 %v15467_v54  ;;  %18418 = vst [vmem:[#allocation183_spill] sm:$0xff] %v15495_v17  ;;  %v15499_v20 = vpop.f32.mrb[202].mxu1  ;;  %v10692_v60 = vld [vmem:[%s11277_s30 + $0x368] sm:$0xff]  ;;  %v15523_v37 = vmul.f32 %v10695_v22, %v10461_v38  ;;  %v10698_v45 = vld [vmem:[%s11277_s30 + $0x3b8] sm:$0xff] }
 0x43c   : > { %v10463_v40 = vpop.eup %10462  ;;  %v15491_v42 = vpop.f32.mrb[201].mxu0  ;;  %6144 = vmatprep.mubr.f32.mxu0 %v15475_v12  ;;  %v15503_v24 = vmul.f32 %v10692_v60, %v10461_v38  ;;  %18420 = vst [vmem:[#allocation49_spill] sm:$0xff] %v15509_v25  ;;  %10476 = vrsqrt.f32 %v5629_v14  ;;  %v10697_v14 = vld [vmem:[%s11277_s30 + $0x390] sm:$0xff] }
 0x43d   : > { %v10465_v5 = vpop.eup %10464  ;;  %v15505_v59 = vpop.f32.mrb[203].mxu1  ;;  %v15515_v58 = vmul.f32 %v10694_v48, %v10463_v40  ;;  %18422 = vst [vmem:[#allocation187_spill] sm:$0xff] %v15523_v37  ;;  %v10696_v48 = vld [vmem:[%s11277_s30 + $0x388] sm:$0xff]  ;;  %v15537_v38 = vmul.f32 %v10697_v14, %v10463_v40  ;;  %v10702_v14 = vld [vmem:[%s11277_s30 + $0x3d8] sm:$0xff] }
 0x43e   : > { %18419 = vst [vmem:[#allocation186_spill] sm:$0xff] %v15503_v24  ;;  %6370 = vmatmul.mubr.f32.gmra.mrb[52].mxu1 %v15481_v33  ;;  %v15511_v19 = vpop.f32.mrb[202].mxu0  ;;  %v15531_v33 = vmul.f32 %v10696_v48, %v10465_v5 }
 0x43f   : > { %6374 = vmatprep.mubr.f32.mxu1 %v15487_v34  ;;  %18421 = vst [vmem:[#allocation188_spill] sm:$0xff] %v15515_v58  ;;  %v10467_v60 = vpop.eup %10466  ;;  %v15519_v54 = vpop.f32.mrb[203].mxu0  ;;  %6145 = vmatmul.mubr.f32.gmra.mrb[52].mxu0 %v15495_v17  ;;  %18426 = vst [vmem:[#allocation195_spill] sm:$0xff] %v15537_v38 }
 0x440   : > { %v15527_v34 = vpop.f32.mrb[204].mxu1  ;;  %6149 = vmatprep.mubr.f32.mxu0 %v15503_v24  ;;  %18424 = vst [vmem:[#allocation190_spill] sm:$0xff] %v15531_v33  ;;  %v10469_v12 = vpop.eup %10468  ;;  %v15543_v24 = vmul.f32 %v10698_v45, %v10467_v60  ;;  %v10700_v45 = vld [vmem:[%s11277_s30 + $0x3a8] sm:$0xff] }
 0x441   : > { %18423 = vst [vmem:[#allocation178_spill] sm:$0xff] %v15527_v34  ;;  %v15533_v50 = vpop.f32.mrb[205].mxu1  ;;  %v15539_v22 = vpop.f32.mrb[204].mxu0  ;;  %v15559_v26 = vmul.f32 %v10700_v45, %v10469_v12 }
 0x442   : > { %18425 = vst [vmem:[#allocation193_spill] sm:$0xff] %v15533_v50  ;;  %6375 = vmatmul.mubr.f32.gmra.mrb[54].mxu1 %v15509_v25  ;;  %18427 = vst [vmem:[#allocation194_spill] sm:$0xff] %v15543_v24  ;;  %v10471_v17 = vpop.eup %10470  ;;  %v15547_v28 = vpop.f32.mrb[205].mxu0  ;;  %v10699_v25 = vld [vmem:[%s11277_s30 + $0x380] sm:$0xff] }
 0x443   : > { %6379 = vmatprep.mubr.f32.mxu1 %v15515_v58  ;;  %18428 = vst [vmem:[#allocation199_spill] sm:$0xff] %v15547_v28  ;;  %6150 = vmatmul.mubr.f32.gmra.mrb[54].mxu0 %v15523_v37  ;;  %v15551_v40 = vmul.f32 %v10699_v25, %v10465_v5  ;;  %v15555_v58 = vpop.f32.mrb[206].mxu1  ;;  %18431 = vst [vmem:[#allocation203_spill] sm:$0xff] %v15559_v26  ;;  %v10473_v48 = vpop.eup %10472  ;;  %v10701_v37 = vld [vmem:[%s11277_s30 + $0x3b0] sm:$0xff] }
 0x444   : > { %18430 = vst [vmem:[#allocation50_spill] sm:$0xff] %v15555_v58  ;;  %6154 = vmatprep.mubr.f32.mxu0 %v15531_v33  ;;  %v15561_v11 = vpop.f32.mrb[207].mxu1  ;;  %v15565_v5 = vmul.f32 %v10701_v37, %v10467_v60  ;;  %v15567_v25 = vpop.f32.mrb[206].mxu0  ;;  %v15571_v33 = vmul.f32 %v10702_v14, %v10471_v17  ;;  %v10704_v14 = vld [vmem:[%s11277_s30 + $0x3c8] sm:$0xff]  ;;  %v10706_v37 = vld [vmem:[%s11277_s30 + $0x3f8] sm:$0xff] }
 0x445   : > { %18429 = vst [vmem:[#allocation201_spill] sm:$0xff] %v15551_v40  ;;  %18432 = vst [vmem:[#allocation202_spill] sm:$0xff] %v15561_v11  ;;  %v10475_v50 = vpop.eup %10474  ;;  %v15575_v28 = vpop.f32.mrb[207].mxu0  ;;  %v15587_v34 = vmul.f32 %v10704_v14, %v10473_v48 }
 0x446   : > { %6380 = vmatmul.mubr.f32.gmra.mrb[56].mxu1 %v15537_v38  ;;  %18433 = vst [vmem:[#allocation131_spill] sm:$0xff] %v15565_v5  ;;  %18434 = vst [vmem:[#allocation204_spill] sm:$0xff] %v15567_v25  ;;  %v10703_v38 = vld [vmem:[%s11277_s30 + $0x3a0] sm:$0xff]  ;;  %v10477_v45 = vpop.eup %10476  ;;  %v15599_v11 = vmul.f32 %v10706_v37, %v10475_v50  ;;  %v10708_v37 = vld [vmem:[%s11277_s30 + $0x3e8] sm:$0xff] }
 0x447   : > { %6384 = vmatprep.mubr.f32.mxu1 %v15543_v24  ;;  %18435 = vst [vmem:[#allocation205_spill] sm:$0xff] %v15571_v33  ;;  %18436 = vst [vmem:[#allocation206_spill] sm:$0xff] %v15575_v28  ;;  %6155 = vmatmul.mubr.f32.gmra.mrb[56].mxu0 %v15551_v40  ;;  %v15579_v60 = vmul.f32 %v10703_v38, %v10469_v12  ;;  %v15583_v24 = vpop.f32.mrb[208].mxu1  ;;  %v10705_v40 = vld [vmem:[%s11277_s30 + $0x3d0] sm:$0xff]  ;;  %v15595_v38 = vpop.f32.mrb[208].mxu0 }
 0x448   : > { %18438 = vst [vmem:[#allocation97_spill] sm:$0xff] %v15583_v24  ;;  %6159 = vmatprep.mubr.f32.mxu0 %v15559_v26  ;;  %18439 = vst [vmem:[#allocation219_spill] sm:$0xff] %v15587_v34  ;;  %v15589_v58 = vpop.f32.mrb[209].mxu1  ;;  %v15593_v12 = vmul.f32 %v10705_v40, %v10471_v17  ;;  %v15603_v26 = vpop.f32.mrb[209].mxu0  ;;  %v10709_v25 = vld [vmem:[%s11277_s30 + $0x3f0] sm:$0xff] }
 0x449   : > { %18437 = vst [vmem:[#allocation218_spill] sm:$0xff] %v15579_v60  ;;  %18441 = vst [vmem:[#allocation223_spill] sm:$0xff] %v15599_v11  ;;  %v15611_v40 = vpop.f32.mrb[210].mxu1  ;;  %v15618_v14 = vmul.f32 %v10709_v25, %v10475_v50  ;;  %v18462_v50 = vld [vmem:[#allocation208_spill] sm:$0xff] }
 0x44a   : > { %6385 = vmatmul.mubr.f32.gmra.mrb[58].mxu1 %v15565_v5  ;;  %18440 = vst [vmem:[#allocation105_spill] sm:$0xff] %v15593_v12  ;;  %v10707_v5 = vld [vmem:[%s11277_s30 + $0x3c0] sm:$0xff]  ;;  %18443 = vst [vmem:[#allocation233_spill] sm:$0xff] %v15611_v40  ;;  %v15620_v24 = vpop.f32.mrb[211].mxu1 }
 0x44b   : > { %6389 = vmatprep.mubr.f32.mxu1 %v15571_v33  ;;  %6160 = vmatmul.mubr.f32.gmra.mrb[58].mxu0 %v15579_v60  ;;  %v15607_v28 = vmul.f32 %v10707_v5, %v10473_v48  ;;  %v15615_v33 = vmul.f32 %v10708_v37, %v10477_v45  ;;  %18445 = vst [vmem:[#allocation241_spill] sm:$0xff] %v15618_v14  ;;  %18446 = vst [vmem:[#allocation240_spill] sm:$0xff] %v15620_v24  ;;  %v15623_v60 = vpop.f32.mrb[210].mxu0  ;;  %v10710_v48 = vld [vmem:[%s11277_s30 + $0x3e0] sm:$0xff]  ;;  %v15636_v25 = vpop.f32.mrb[212].mxu1  ;;  %s18683_s30 = sld [smem:[#allocation248_spill]] }
 0x44c   : > { %6164 = vmatprep.mubr.f32.mxu0 %v15587_v34  ;;  %v15627_v5 = vmul.f32 %v10710_v48, %v10477_v45  ;;  %v15631_v34 = vpop.f32.mrb[211].mxu0  ;;  %18449 = vst [vmem:[#allocation146_spill] sm:$0xff] %v15636_v25  ;;  %v15639_v37 = vpop.f32.mrb[213].mxu1  ;;  %v18452_v48 = vld [vmem:[#allocation143_spill] sm:$0xff] }
 0x44d   : > { %18442 = vst [vmem:[#allocation228_spill] sm:$0xff] %v15607_v28  ;;  %18444 = vst [vmem:[#allocation88_spill] sm:$0xff] %v15615_v33  ;;  %v15642_v45 = vpop.f32.mrb[212].mxu0 }
 0x44e   : > { %6390 = vmatmul.mubr.f32.gmra.mrb[60].mxu1 %v15593_v12  ;;  %18447 = vst [vmem:[#allocation112_spill] sm:$0xff] %v15627_v5  ;;  %18448 = vst [vmem:[#allocation197_spill] sm:$0xff] %v15631_v34  ;;  %v18496_v34 = vld [vmem:[#allocation157_spill] sm:$0xff] }
 0x44f   : > { %6394 = vmatprep.mubr.f32.mxu1 %v15599_v11  ;;  %6165 = vmatmul.mubr.f32.gmra.mrb[60].mxu0 %v15607_v28  ;;  %18450 = vst [vmem:[#allocation145_spill] sm:$0xff] %v15639_v37  ;;  %18451 = vst [vmem:[#allocation236_spill] sm:$0xff] %v15642_v45  ;;  %v15647_v11 = vpop.f32.mrb[213].mxu0  ;;  %v18454_v28 = vld [vmem:[#allocation245_spill] sm:$0xff] }
 0x450   : > { %6169 = vmatprep.mubr.f32.mxu0 %v15615_v33  ;;  %18453 = vst [vmem:[#allocation196_spill] sm:$0xff] %v15647_v11  ;;  %v15653_v33 = vpop.f32.mrb[214].mxu1  ;;  %v15658_v24 = vpop.f32.mrb[214].mxu0 }
 0x451   : > { %18455 = vst [vmem:[#allocation226_spill] sm:$0xff] %v15653_v33  ;;  %v15655_v12 = vpop.f32.mrb[215].mxu1  ;;  %18458 = vst [vmem:[#allocation242_spill] sm:$0xff] %v15658_v24  ;;  %v15663_v25 = vpop.f32.mrb[215].mxu0  ;;  %s16305_s29 = scalar_lea.hbm %s18683_s30, %s7257_s6 }
 0x452   : > { %6395 = vmatmul.mubr.f32.gmra.mrb[62].mxu1 %v15618_v14  ;;  %18456 = vst [vmem:[#allocation229_spill] sm:$0xff] %v15655_v12  ;;  %v18457_v14 = vld [vmem:[#allocation144_spill] sm:$0xff]  ;;  %18460 = vst [vmem:[#allocation128_spill] sm:$0xff] %v15663_v25  ;;  %v15669_v37 = vpop.f32.mrb[216].mxu1  ;;  %v15674_v45 = vpop.f32.mrb[216].mxu0 }
 0x453   : > { %6790 = vmatprep.mubr.f32.mxu1 %v18452_v48  ;;  %6170 = vmatmul.mubr.f32.gmra.mrb[62].mxu0 %v15627_v5  ;;  %v18459_v48 = vld [vmem:[#allocation148_spill] sm:$0xff]  ;;  %v18461_v5 = vld [vmem:[#allocation149_spill] sm:$0xff]  ;;  %18463 = vst [vmem:[#allocation28_spill] sm:$0xff] %v15669_v37  ;;  %v15671_v11 = vpop.f32.mrb[217].mxu1  ;;  %18466 = vst [vmem:[#allocation132_spill] sm:$0xff] %v15674_v45  ;;  %v15679_v33 = vpop.f32.mrb[217].mxu0 }
 0x454   : > { %6565 = vmatprep.mubr.f32.mxu0 %v18454_v28  ;;  %18464 = vst [vmem:[#allocation29_spill] sm:$0xff] %v15671_v11  ;;  %18468 = vst [vmem:[#allocation230_spill] sm:$0xff] %v15679_v33  ;;  %v18470_v28 = vld [vmem:[#allocation22_spill] sm:$0xff]  ;;  %v15685_v12 = vpop.f32.mrb[218].mxu1  ;;  %v15690_v24 = vpop.f32.mrb[218].mxu0 }
 0x455   : > { %18471 = vst [vmem:[#allocation135_spill] sm:$0xff] %v15685_v12  ;;  %v15687_v25 = vpop.f32.mrb[219].mxu1  ;;  %18474 = vst [vmem:[#allocation98_spill] sm:$0xff] %v15690_v24  ;;  %v15695_v37 = vpop.f32.mrb[219].mxu0  ;;  %v18491_v24 = vld [vmem:[#allocation27_spill] sm:$0xff] }
 0x456   : > { %6791 = vmatmul.mubr.f32.vlgmr.msra.gmra.mrb[64].mxu1 %v18457_v14  ;;  %v18465_v14 = vld [vmem:[#allocation75_spill] sm:$0xff]  ;;  %18472 = vst [vmem:[#allocation113_spill] sm:$0xff] %v15687_v25  ;;  %18476 = vst [vmem:[#allocation95_spill] sm:$0xff] %v15695_v37  ;;  %v15701_v11 = vpop.f32.mrb[220].mxu1  ;;  %v15706_v45 = vpop.f32.mrb[220].mxu0 }
 0x457   : > { %6795 = vmatprep.mubr.f32.mxu1 %v18459_v48  ;;  %6566 = vmatmul.mubr.f32.vlgmr.msra.gmra.mrb[64].mxu0 %v18461_v5  ;;  %v18467_v48 = vld [vmem:[#allocation71_spill] sm:$0xff]  ;;  %v18469_v5 = vld [vmem:[#allocation121_spill] sm:$0xff]  ;;  %18479 = vst [vmem:[#allocation185_spill] sm:$0xff] %v15701_v11  ;;  %v15703_v33 = vpop.f32.mrb[221].mxu1  ;;  %18482 = vst [vmem:[#allocation139_spill] sm:$0xff] %v15706_v45  ;;  %v15711_v12 = vpop.f32.mrb[221].mxu0 }
 0x458   : > { %6570 = vmatprep.mubr.f32.mxu0 %v18462_v50  ;;  %v18478_v50 = vld [vmem:[#allocation153_spill] sm:$0xff]  ;;  %18480 = vst [vmem:[#allocation200_spill] sm:$0xff] %v15703_v33  ;;  %18484 = vst [vmem:[#allocation122_spill] sm:$0xff] %v15711_v12  ;;  %v15717_v25 = vpop.f32.mrb[222].mxu1  ;;  %v18493_v11 = vld [vmem:[#allocation212_spill] sm:$0xff] }
 0x459   : > { %18487 = vst [vmem:[#allocation117_spill] sm:$0xff] %v15717_v25  ;;  %v15719_v37 = vpop.f32.mrb[223].mxu1 }
 0x45a   : > { %6796 = vmatmul.mubr.f32.gmra.mrb[66].mxu1 %v18465_v14  ;;  %v18473_v14 = vld [vmem:[#allocation81_spill] sm:$0xff]  ;;  %18488 = vst [vmem:[#allocation243_spill] sm:$0xff] %v15719_v37  ;;  %v9266_v33 = vpop.f32.mrb[224].mxu1  ;;  %v18499_v37 = vld [vmem:[#allocation43_spill] sm:$0xff] }
 0x45b   : > { %6800 = vmatprep.mubr.f32.mxu1 %v18467_v48  ;;  %6571 = vmatmul.mubr.f32.gmra.mrb[66].mxu0 %v18469_v5  ;;  %v18475_v48 = vld [vmem:[#allocation152_spill] sm:$0xff]  ;;  %v18477_v5 = vld [vmem:[#allocation209_spill] sm:$0xff]  ;;  %v5242_v12 = vpop.f32.mrb[225].mxu1 }
 0x45c   : > { %6575 = vmatprep.mubr.f32.mxu0 %v18470_v28  ;;  %v18486_v28 = vld [vmem:[#allocation83_spill] sm:$0xff] }
 0x45e   : > { %6801 = vmatmul.mubr.f32.gmra.mrb[68].mxu1 %v18473_v14  ;;  %v18481_v14 = vld [vmem:[#allocation26_spill] sm:$0xff] }
 0x45f   : > { %6805 = vmatprep.mubr.f32.mxu1 %v18475_v48  ;;  %6576 = vmatmul.mubr.f32.gmra.mrb[68].mxu0 %v18477_v5  ;;  %v18483_v48 = vld [vmem:[#allocation210_spill] sm:$0xff] }
 0x460   : > { %6580 = vmatprep.mubr.f32.mxu0 %v18478_v50  ;;  %v18485_v5 = vld [vmem:[#allocation118_spill] sm:$0xff]  ;;  %v18494_v50 = vld [vmem:[#allocation156_spill] sm:$0xff] }
 0x462   : > { %6806 = vmatmul.mubr.f32.gmra.mrb[70].mxu1 %v18481_v14  ;;  %v18489_v14 = vld [vmem:[#allocation130_spill] sm:$0xff] }
 0x463   : > { %6810 = vmatprep.mubr.f32.mxu1 %v18483_v48  ;;  %6581 = vmatmul.mubr.f32.gmra.mrb[70].mxu0 %v18485_v5  ;;  %v15722_v48 = vpop.f32.mrb[222].mxu0 }
 0x464   : > { %6585 = vmatprep.mubr.f32.mxu0 %v18486_v28  ;;  %18490 = vst [vmem:[#allocation99_spill] sm:$0xff] %v15722_v48  ;;  %v15727_v5 = vpop.f32.mrb[223].mxu0  ;;  %v18498_v28 = vmax.f32 %v15372_v43, %v15353_v0  ;;  %v18501_v43 = vmax.f32 %v15406_v53, %v15388_v29 }
 0x465   : > { %18492 = vst [vmem:[#allocation102_spill] sm:$0xff] %v15727_v5  ;;  %v9186_v45 = vpop.f32.mrb[224].mxu0  ;;  %v9269_v5 = vpop.f32.mrb[226].mxu1 }
 0x466   : > { %6811 = vmatmul.mubr.f32.gmra.mrb[72].mxu1 %v18489_v14  ;;  %v18495_v14 = vld [vmem:[#allocation213_spill] sm:$0xff]  ;;  %v4985_v25 = vpop.f32.mrb[225].mxu0  ;;  %v5252_v48 = vpop.f32.mrb[227].mxu1 }
 0x467   : > { %6815 = vmatprep.mubr.f32.mxu1 %v18491_v24  ;;  %6586 = vmatmul.mubr.f32.gmra.mrb[72].mxu0 %v18493_v11  ;;  %v18497_v24 = vmax.f32 %v15360_v31, %v15341_v57  ;;  %v15740_v11 = vld [vmem:[%s13900_s4 + $0x3] ss:$0 sm:$0xff]  ;;  %v9189_v40 = vpop.f32.mrb[226].mxu0 }
 0x468   : > { %6590 = vmatprep.mubr.f32.mxu0 %v18494_v50  ;;  %v5144_v50 = vmax.f32 %v18498_v28, %v4985_v25 }
 0x469   : > { %v5145_v17 = vmax.f32 %v18497_v24, %v9186_v45  ;;  %v4995_v45 = vpop.f32.mrb[227].mxu0 }
 0x46a   : > { %6816 = vmatmul.mubr.f32.gmra.mrb[74].mxu1 %v18495_v14 }
 0x46b   : > { %6820 = vmatprep.mubr.f32.mxu1 %v18496_v34  ;;  %6591 = vmatmul.mubr.f32.gmra.mrb[74].mxu0 %v14767_v3  ;;  %v5402_v14 = vmax.f32 %v5145_v17, %v9266_v33  ;;  %v5401_v34 = vmax.f32 %v5144_v50, %v5242_v12  ;;  %v18500_v3 = vmax.f32 %v15398_v52, %v15379_v2  ;;  %v9192_v52 = vpop.f32.mrb[228].mxu0 }
 0x46c   : > { %6595 = vmatprep.mubr.f32.mxu0 %v18499_v37  ;;  %v5146_v33 = vmax.f32 %v18501_v43, %v4995_v45  ;;  %v18511_v45 = vld [vmem:[#allocation33_spill] sm:$0xff] }
 0x46d   : > { %v5439_v57 = vmul.f32 %v15740_v11, %v5402_v14  ;;  %v5147_v31 = vmax.f32 %v18500_v3, %v9189_v40  ;;  %v5438_v0 = vmul.f32 %v15740_v11, %v5401_v34  ;;  %v5005_v40 = vpop.f32.mrb[229].mxu0  ;;  %v18506_v14 = vld [vmem:[#allocation214_spill] sm:$0xff]  ;;  %v18510_v3 = vld [vmem:[#allocation216_spill] sm:$0xff] }
 0x46e   : > { %6821 = vmatmul.mubr.f32.gmra.mrb[76].mxu1 %v14782_v21  ;;  %v9272_v21 = vpop.f32.mrb[228].mxu1 }
 0x46f   : > { %6825 = vmatprep.mubr.f32.mxu1 %v14794_v7  ;;  %6596 = vmatmul.mubr.f32.gmra.mrb[76].mxu0 %v14788_v10  ;;  %v15759_v7 = vadd.f32 %v5439_v57, %v14857_v30  ;;  %v5404_v12 = vmax.f32 %v5147_v31, %v9269_v5  ;;  %v5262_v17 = vpop.f32.mrb[229].mxu1  ;;  %v15763_v2 = vadd.f32 %v5438_v0, %v14865_v32 }
 0x470   : > { %6600 = vmatprep.mubr.f32.mxu0 %v14791_v62  ;;  %v5403_v10 = vmax.f32 %v5146_v33, %v5252_v48  ;;  %v18502_v62 = vmax.f32 %v15427_v15, %v15415_v46  ;;  %v9275_v25 = vpop.f32.mrb[230].mxu1  ;;  %v9195_v15 = vpop.f32.mrb[230].mxu0 }
 0x471   : > { %v5441_v53 = vmul.f32 %v15740_v11, %v5404_v12  ;;  %v5272_v48 = vpop.f32.mrb[231].mxu1  ;;  %v5015_v5 = vpop.f32.mrb[231].mxu0 }
 0x472   : > { %6826 = vmatmul.mubr.f32.gmra.mrb[78].mxu1 %v14808_v51  ;;  %v5149_v29 = vmax.f32 %v18502_v62, %v9192_v52  ;;  %v5440_v30 = vmul.f32 %v15740_v11, %v5403_v10  ;;  %v18503_v51 = vmax.f32 %v15435_v16, %v15421_v23  ;;  %v9278_v28 = vpop.f32.mrb[232].mxu1  ;;  %v18514_v10 = vld [vmem:[#allocation215_spill] sm:$0xff] }
 0x473   : > { %6830 = vmatprep.mubr.f32.mxu1 %v14824_v63  ;;  %6601 = vmatmul.mubr.f32.gmra.mrb[78].mxu0 %v14805_v6  ;;  %v15777_v63 = vadd.f32 %v5441_v53, %v14890_v13  ;;  %v5282_v50 = vpop.f32.mrb[233].mxu1  ;;  %v18516_v62 = vld [vmem:[#allocation159_spill] sm:$0xff] }
 0x474   : > { %v5148_v32 = vmax.f32 %v18503_v51, %v5005_v40  ;;  %6605 = vmatprep.mubr.f32.mxu0 %v14819_v41  ;;  %v5406_v37 = vmax.f32 %v5149_v29, %v9272_v21  ;;  %v15781_v46 = vadd.f32 %v5440_v30, %v14900_v35  ;;  %v18504_v41 = vmax.f32 %v15455_v18, %v15443_v36  ;;  %v9198_v18 = vpop.f32.mrb[232].mxu0  ;;  %v9281_v31 = vpop.f32.mrb[234].mxu1  ;;  %v18512_v21 = vld [vmem:[#allocation158_spill] sm:$0xff]  ;;  %v18518_v51 = vld [vmem:[#allocation103_spill] sm:$0xff] }
 0x475   : > { %v5025_v34 = vpop.f32.mrb[233].mxu0  ;;  %v5292_v33 = vpop.f32.mrb[235].mxu1  ;;  %v18517_v40 = vmax.f32 %v15519_v54, %v15505_v59  ;;  %v18523_v54 = vld [vmem:[#allocation178_spill] sm:$0xff] }
 0x476   : > { %6831 = vmatmul.mubr.f32.gmra.mrb[80].mxu1 %v14831_v1  ;;  %v5405_v6 = vmax.f32 %v5148_v32, %v5262_v17  ;;  %v5443_v23 = vmul.f32 %v15740_v11, %v5406_v37  ;;  %v5151_v16 = vmax.f32 %v18504_v41, %v9195_v15  ;;  %v18505_v1 = vmax.f32 %v15463_v56, %v15449_v44  ;;  %v9201_v17 = vpop.f32.mrb[234].mxu0  ;;  %v9284_v32 = vpop.f32.mrb[236].mxu1  ;;  %v18520_v15 = vld [vmem:[#allocation133_spill] sm:$0xff] }
 0x477   : > { %6835 = vmatprep.mubr.f32.mxu1 %v14861_v47  ;;  %6606 = vmatmul.mubr.f32.gmra.mrb[80].mxu0 %v14827_v4  ;;  %v5035_v53 = vpop.f32.mrb[235].mxu0 }
 0x478   : > { %v5442_v13 = vmul.f32 %v15740_v11, %v5405_v6  ;;  %v5150_v35 = vmax.f32 %v18505_v1, %v5015_v5  ;;  %6610 = vmatprep.mubr.f32.mxu0 %v14835_v61  ;;  %v15795_v47 = vadd.f32 %v5443_v23, %v14926_v39  ;;  %v5408_v24 = vmax.f32 %v5151_v16, %v9275_v25  ;;  %v18508_v39 = vld [vmem:[#allocation32_spill] sm:$0xff]  ;;  %v18519_v25 = vld [vmem:[#allocation217_spill] sm:$0xff]  ;;  %v5302_v6 = vpop.f32.mrb[237].mxu1  ;;  %v9204_v41 = vpop.f32.mrb[236].mxu0 }
 0x479   : > { %v18507_v61 = vmax.f32 %v15483_v27, %v15471_v55  ;;  %v18513_v55 = vld [vmem:[#allocation124_spill] sm:$0xff]  ;;  %v5154_v30 = vmax.f32 %v18517_v40, %v5035_v53  ;;  %v18524_v5 = vmax.f32 %v15539_v22, %v18523_v54  ;;  %v5045_v1 = vpop.f32.mrb[237].mxu0  ;;  %v18532_v22 = vld [vmem:[#allocation138_spill] sm:$0xff] }
 0x47a   : > { %6836 = vmatmul.mubr.f32.gmra.mrb[82].mxu1 %v14873_v49  ;;  %v15799_v36 = vadd.f32 %v5442_v13, %v14935_v9  ;;  %v5407_v4 = vmax.f32 %v5150_v35, %v5272_v48  ;;  %v5445_v56 = vmul.f32 %v15740_v11, %v5408_v24  ;;  %v18509_v49 = vmax.f32 %v15491_v42, %v15477_v8  ;;  %v18522_v16 = vld [vmem:[#allocation160_spill] sm:$0xff]  ;;  %v18526_v24 = vld [vmem:[#allocation199_spill] sm:$0xff]  ;;  %v18542_v40 = vld [vmem:[#allocation90_spill] sm:$0xff] }
 0x47b   : > { %6840 = vmatprep.mubr.f32.mxu1 %v18506_v14  ;;  %v5153_v44 = vmax.f32 %v18507_v61, %v9198_v18  ;;  %6611 = vmatmul.mubr.f32.gmra.mrb[82].mxu0 %v18508_v39  ;;  %v18515_v8 = vmax.f32 %v15511_v19, %v15499_v20  ;;  %v18521_v20 = vld [vmem:[#allocation163_spill] sm:$0xff]  ;;  %v5411_v23 = vmax.f32 %v5154_v30, %v5292_v33  ;;  %v18525_v35 = vld [vmem:[#allocation72_spill] sm:$0xff]  ;;  %v18529_v14 = vld [vmem:[#allocation34_spill] sm:$0xff] }
 0x47c   : > { %v5444_v57 = vmul.f32 %v15740_v11, %v5407_v4  ;;  %v5152_v9 = vmax.f32 %v18509_v49, %v5025_v34  ;;  %6615 = vmatprep.mubr.f32.mxu0 %v18510_v3  ;;  %v15813_v0 = vadd.f32 %v5445_v56, %v18511_v45  ;;  %v5157_v13 = vmax.f32 %v18524_v5, %v9204_v41  ;;  %v9287_v56 = vpop.f32.mrb[238].mxu1  ;;  %v18530_v61 = vld [vmem:[#allocation94_spill] sm:$0xff]  ;;  %v9207_v3 = vpop.f32.mrb[238].mxu0 }
 0x47d   : > { %v5410_v43 = vmax.f32 %v5153_v44, %v9278_v28  ;;  %v5155_v52 = vmax.f32 %v18515_v8, %v9201_v17  ;;  %v5448_v28 = vmul.f32 %v15740_v11, %v5411_v23  ;;  %v5312_v39 = vpop.f32.mrb[239].mxu1  ;;  %v18535_v33 = vld [vmem:[#allocation50_spill] sm:$0xff]  ;;  %v18537_v17 = vld [vmem:[#allocation123_spill] sm:$0xff]  ;;  %v18545_v23 = vld [vmem:[#allocation36_spill] sm:$0xff] }
 0x47e   : > { %6841 = vmatmul.mubr.f32.gmra.mrb[84].mxu1 %v18512_v21  ;;  %v15817_v27 = vadd.f32 %v5444_v57, %v18513_v55  ;;  %v5409_v12 = vmax.f32 %v5152_v9, %v5282_v50  ;;  %v18527_v50 = vld [vmem:[#allocation193_spill] sm:$0xff]  ;;  %v5414_v34 = vmax.f32 %v5157_v13, %v9284_v32  ;;  %v18531_v57 = vld [vmem:[#allocation162_spill] sm:$0xff]  ;;  %v18548_v13 = vld [vmem:[#allocation35_spill] sm:$0xff] }
 0x47f   : > { %6845 = vmatprep.mubr.f32.mxu1 %v18514_v10  ;;  %v5447_v42 = vmul.f32 %v15740_v11, %v5410_v43  ;;  %6616 = vmatmul.mubr.f32.gmra.mrb[84].mxu0 %v18516_v62  ;;  %v5412_v48 = vmax.f32 %v5155_v52, %v9281_v31  ;;  %v18528_v4 = vmax.f32 %v18526_v24, %v18527_v50  ;;  %v18533_v31 = vld [vmem:[#allocation127_spill] sm:$0xff]  ;;  %v18534_v43 = vld [vmem:[#allocation204_spill] sm:$0xff]  ;;  %v18539_v8 = vld [vmem:[#allocation202_spill] sm:$0xff] }
 0x480   : > { %v5446_v29 = vmul.f32 %v15740_v11, %v5409_v12  ;;  %6620 = vmatprep.mubr.f32.mxu0 %v18518_v51  ;;  %v15853_v49 = vadd.f32 %v5448_v28, %v18532_v22  ;;  %v5451_v45 = vmul.f32 %v15740_v11, %v5414_v34  ;;  %v18536_v21 = vmax.f32 %v18534_v43, %v18535_v33  ;;  %v5055_v12 = vpop.f32.mrb[239].mxu0  ;;  %v18541_v62 = vld [vmem:[#allocation73_spill] sm:$0xff]  ;;  %v18550_v24 = vld [vmem:[#allocation91_spill] sm:$0xff] }
 0x481   : > { %v15831_v37 = vadd.f32 %v5447_v42, %v18519_v25  ;;  %v5449_v59 = vmul.f32 %v15740_v11, %v5412_v48  ;;  %v5156_v18 = vmax.f32 %v18528_v4, %v5045_v1  ;;  %v18538_v42 = vld [vmem:[#allocation206_spill] sm:$0xff]  ;;  %v18543_v25 = vld [vmem:[#allocation44_spill] sm:$0xff]  ;;  %v18554_v22 = vld [vmem:[#allocation93_spill] sm:$0xff] }
 0x482   : > { %6846 = vmatmul.mubr.f32.gmra.mrb[86].mxu1 %v18520_v15  ;;  %v15835_v19 = vadd.f32 %v5446_v29, %v18521_v20  ;;  %v5159_v55 = vmax.f32 %v18536_v21, %v9207_v3  ;;  %v18540_v52 = vmax.f32 %v18538_v42, %v18539_v8  ;;  %v9290_v29 = vpop.f32.mrb[240].mxu1  ;;  %v15867_v30 = vadd.f32 %v5451_v45, %v18542_v40  ;;  %v18544_v48 = vld [vmem:[#allocation78_spill] sm:$0xff]  ;;  %v9210_v20 = vpop.f32.mrb[240].mxu0  ;;  %v18551_v4 = vld [vmem:[#allocation100_spill] sm:$0xff]  ;;  %v18557_v45 = vld [vmem:[#allocation165_spill] sm:$0xff] }
 0x483   : > { %6850 = vmatprep.mubr.f32.mxu1 %v18522_v16  ;;  %6621 = vmatmul.mubr.f32.gmra.mrb[86].mxu0 %v18525_v35  ;;  %v15849_v44 = vadd.f32 %v5449_v59, %v18530_v61  ;;  %v5413_v9 = vmax.f32 %v5156_v18, %v5302_v6  ;;  %v5322_v32 = vpop.f32.mrb[241].mxu1  ;;  %v18546_v16 = vld [vmem:[#allocation97_spill] sm:$0xff]  ;;  %v5065_v5 = vpop.f32.mrb[241].mxu0  ;;  %v18549_v35 = vmax.f32 %v15603_v26, %v15589_v58  ;;  %v18559_v21 = vld [vmem:[#allocation240_spill] sm:$0xff] }
 0x484   : > { %6625 = vmatprep.mubr.f32.mxu0 %v18529_v14  ;;  %v5158_v53 = vmax.f32 %v18540_v52, %v5055_v12  ;;  %v5416_v51 = vmax.f32 %v5159_v55, %v9287_v56  ;;  %v18547_v59 = vmax.f32 %v15595_v38, %v18546_v16  ;;  %v9293_v50 = vpop.f32.mrb[242].mxu1  ;;  %v18552_v61 = vld [vmem:[#allocation161_spill] sm:$0xff]  ;;  %v18553_v38 = vld [vmem:[#allocation96_spill] sm:$0xff]  ;;  %v18569_v16 = vld [vmem:[#allocation166_spill] sm:$0xff] }
 0x485   : > { %v5450_v10 = vmul.f32 %v15740_v11, %v5413_v9  ;;  %v5160_v28 = vmax.f32 %v18549_v35, %v5065_v5  ;;  %v5332_v56 = vpop.f32.mrb[243].mxu1  ;;  %v18555_v58 = vld [vmem:[#allocation233_spill] sm:$0xff]  ;;  %v18562_v42 = vld [vmem:[#allocation168_spill] sm:$0xff] }
 0x486   : > { %6851 = vmatmul.mubr.f32.gmra.mrb[88].mxu1 %v18531_v57  ;;  %v5415_v15 = vmax.f32 %v5158_v53, %v5312_v39  ;;  %v5453_v41 = vmul.f32 %v15740_v11, %v5416_v51  ;;  %v5161_v54 = vmax.f32 %v18547_v59, %v9210_v20  ;;  %v9213_v57 = vpop.f32.mrb[242].mxu0  ;;  %v18556_v9 = vmax.f32 %v15623_v60, %v18555_v58  ;;  %v18558_v33 = vld [vmem:[#allocation197_spill] sm:$0xff]  ;;  %v18564_v60 = vld [vmem:[#allocation220_spill] sm:$0xff]  ;;  %v18578_v58 = vld [vmem:[#allocation242_spill] sm:$0xff] }
 0x487   : > { %6855 = vmatprep.mubr.f32.mxu1 %v18533_v31  ;;  %6626 = vmatmul.mubr.f32.gmra.mrb[88].mxu0 %v18537_v17  ;;  %v15871_v6 = vadd.f32 %v5450_v10, %v18544_v48  ;;  %v5417_v39 = vmax.f32 %v5160_v28, %v5322_v32  ;;  %v5075_v31 = vpop.f32.mrb[243].mxu0  ;;  %v18560_v55 = vmax.f32 %v18558_v33, %v18559_v21  ;;  %v18561_v17 = vld [vmem:[#allocation137_spill] sm:$0xff]  ;;  %v9296_v10 = vpop.f32.mrb[244].mxu1  ;;  %v18565_v32 = vld [vmem:[#allocation38_spill] sm:$0xff]  ;;  %v18566_v48 = vld [vmem:[#allocation236_spill] sm:$0xff] }
 0x488   : > { %6630 = vmatprep.mubr.f32.mxu0 %v18541_v62  ;;  %v5452_v1 = vmul.f32 %v15740_v11, %v5415_v15  ;;  %v15885_v18 = vadd.f32 %v5453_v41, %v18551_v4  ;;  %v5418_v14 = vmax.f32 %v5161_v54, %v9290_v29  ;;  %v5163_v3 = vmax.f32 %v18556_v9, %v9213_v57  ;;  %v5342_v53 = vpop.f32.mrb[245].mxu1  ;;  %v18563_v62 = vld [vmem:[#allocation37_spill] sm:$0xff]  ;;  %v9216_v51 = vpop.f32.mrb[244].mxu0  ;;  %v18567_v15 = vld [vmem:[#allocation146_spill] sm:$0xff]  ;;  %v18570_v54 = vld [vmem:[#allocation196_spill] sm:$0xff] }
 0x489   : > { %v5454_v43 = vmul.f32 %v15740_v11, %v5417_v39  ;;  %v5162_v12 = vmax.f32 %v18560_v55, %v5075_v31  ;;  %v18568_v20 = vmax.f32 %v18566_v48, %v18567_v15  ;;  %v5085_v41 = vpop.f32.mrb[245].mxu0  ;;  %v18571_v5 = vld [vmem:[#allocation145_spill] sm:$0xff]  ;;  %v9299_v28 = vpop.f32.mrb[246].mxu1  ;;  %v18579_v9 = vld [vmem:[#allocation226_spill] sm:$0xff]  ;;  %v18582_v21 = vld [vmem:[#allocation128_spill] sm:$0xff] }
 0x48a   : > { %6856 = vmatmul.mubr.f32.gmra.mrb[90].mxu1 %v18543_v25  ;;  %v15889_v34 = vadd.f32 %v5452_v1, %v18553_v38  ;;  %v5455_v26 = vmul.f32 %v15740_v11, %v5418_v14  ;;  %v5420_v52 = vmax.f32 %v5163_v3, %v9293_v50  ;;  %v18573_v35 = vld [vmem:[#allocation77_spill] sm:$0xff]  ;;  %v5352_v14 = vpop.f32.mrb[247].mxu1  ;;  %v9219_v57 = vpop.f32.mrb[246].mxu0  ;;  %v18580_v3 = vmax.f32 %v18578_v58, %v18579_v9 }
 0x48b   : > { %6860 = vmatprep.mubr.f32.mxu1 %v18545_v23  ;;  %6631 = vmatmul.mubr.f32.gmra.mrb[90].mxu0 %v18548_v13  ;;  %v15907_v29 = vadd.f32 %v5454_v43, %v18564_v60  ;;  %v5419_v40 = vmax.f32 %v5162_v12, %v5332_v56  ;;  %v5165_v23 = vmax.f32 %v18568_v20, %v9216_v51  ;;  %v18575_v56 = vld [vmem:[#allocation80_spill] sm:$0xff]  ;;  %v18581_v43 = vld [vmem:[#allocation101_spill] sm:$0xff]  ;;  %v18588_v51 = vld [vmem:[#allocation171_spill] sm:$0xff] }
 0x48c   : > { %6635 = vmatprep.mubr.f32.mxu0 %v18550_v24  ;;  %v15903_v8 = vadd.f32 %v5455_v26, %v18562_v42  ;;  %v5457_v25 = vmul.f32 %v15740_v11, %v5420_v52  ;;  %v18572_v13 = vmax.f32 %v18570_v54, %v18571_v5  ;;  %v18574_v24 = vld [vmem:[#allocation39_spill] sm:$0xff]  ;;  %v5167_v31 = vmax.f32 %v18580_v3, %v9219_v57  ;;  %v18583_v55 = vld [vmem:[#allocation229_spill] sm:$0xff]  ;;  %v9302_v42 = vpop.f32.mrb[248].mxu1  ;;  %v18593_v5 = vld [vmem:[#allocation40_spill] sm:$0xff] }
 0x48d   : > { %v5456_v59 = vmul.f32 %v15740_v11, %v5419_v40  ;;  %v5422_v4 = vmax.f32 %v5165_v23, %v9296_v10  ;;  %v18584_v12 = vmax.f32 %v18582_v21, %v18583_v55  ;;  %v18585_v10 = vld [vmem:[#allocation79_spill] sm:$0xff]  ;;  %v18586_v52 = vld [vmem:[#allocation141_spill] sm:$0xff]  ;;  %v5362_v60 = vpop.f32.mrb[249].mxu1  ;;  %v18590_v23 = vld [vmem:[#allocation132_spill] sm:$0xff] }
 0x48e   : > { %6861 = vmatmul.mubr.f32.gmra.mrb[92].mxu1 %v18552_v61  ;;  %v5164_v1 = vmax.f32 %v18572_v13, %v5085_v41  ;;  %v15921_v50 = vadd.f32 %v5457_v25, %v18574_v24  ;;  %v18576_v61 = vld [vmem:[#allocation45_spill] sm:$0xff]  ;;  %v18591_v41 = vld [vmem:[#allocation28_spill] sm:$0xff] }
 0x48f   : > { %6865 = vmatprep.mubr.f32.mxu1 %v18554_v22  ;;  %6636 = vmatmul.mubr.f32.gmra.mrb[92].mxu0 %v18557_v45  ;;  %v15925_v38 = vadd.f32 %v5456_v59, %v18576_v61  ;;  %v18577_v22 = vld [vmem:[#allocation142_spill] sm:$0xff]  ;;  %v5459_v26 = vmul.f32 %v15740_v11, %v5422_v4  ;;  %v5095_v45 = vpop.f32.mrb[247].mxu0  ;;  %v18587_v40 = vld [vmem:[#allocation169_spill] sm:$0xff]  ;;  %v18597_v4 = vld [vmem:[#allocation104_spill] sm:$0xff] }
 0x490   : > { %6640 = vmatprep.mubr.f32.mxu0 %v18561_v17  ;;  %v5421_v39 = vmax.f32 %v5164_v1, %v5342_v53  ;;  %v5166_v17 = vmax.f32 %v18584_v12, %v5095_v45  ;;  %v9222_v48 = vpop.f32.mrb[248].mxu0  ;;  %v18589_v15 = vld [vmem:[#allocation221_spill] sm:$0xff]  ;;  %v18594_v1 = vld [vmem:[#allocation230_spill] sm:$0xff] }
 0x491   : > { %v15939_v53 = vadd.f32 %v5459_v26, %v18586_v52  ;;  %v5105_v54 = vpop.f32.mrb[249].mxu0  ;;  %v18600_v26 = vld [vmem:[#allocation172_spill] sm:$0xff]  ;;  %v18607_v52 = vld [vmem:[#allocation113_spill] sm:$0xff] }
 0x492   : > { %6866 = vmatmul.mubr.f32.gmra.mrb[94].mxu1 %v18563_v62  ;;  %v5458_v33 = vmul.f32 %v15740_v11, %v5421_v39  ;;  %v5424_v62 = vmax.f32 %v5167_v31, %v9299_v28  ;;  %v5423_v25 = vmax.f32 %v5166_v17, %v5352_v14  ;;  %v9305_v14 = vpop.f32.mrb[250].mxu1  ;;  %v9225_v3 = vpop.f32.mrb[250].mxu0  ;;  %v18601_v31 = vld [vmem:[#allocation109_spill] sm:$0xff]  ;;  %v18605_v17 = vld [vmem:[#allocation164_spill] sm:$0xff] }
 0x493   : > { %6870 = vmatprep.mubr.f32.mxu1 %v18565_v32  ;;  %6641 = vmatmul.mubr.f32.gmra.mrb[94].mxu0 %v18569_v16  ;;  %v18592_v16 = vmax.f32 %v18590_v23, %v18591_v41  ;;  %v5372_v57 = vpop.f32.mrb[251].mxu1  ;;  %v5115_v12 = vpop.f32.mrb[251].mxu0  ;;  %v18611_v23 = vld [vmem:[#allocation87_spill] sm:$0xff] }
 0x494   : > { %6645 = vmatprep.mubr.f32.mxu0 %v18573_v35  ;;  %v15943_v32 = vadd.f32 %v5458_v33, %v18588_v51  ;;  %v5461_v20 = vmul.f32 %v15740_v11, %v5424_v62  ;;  %v5460_v13 = vmul.f32 %v15740_v11, %v5423_v25  ;;  %v18595_v35 = vld [vmem:[#allocation29_spill] sm:$0xff]  ;;  %v18603_v33 = vld [vmem:[#allocation135_spill] sm:$0xff]  ;;  %v18609_v51 = vld [vmem:[#allocation222_spill] sm:$0xff] }
 0x495   : > { %v5169_v59 = vmax.f32 %v18592_v16, %v9222_v48  ;;  %v18596_v28 = vmax.f32 %v18594_v1, %v18595_v35  ;;  %v18610_v25 = vld [vmem:[#allocation175_spill] sm:$0xff]  ;;  %v18615_v35 = vld [vmem:[#allocation185_spill] sm:$0xff] }
 0x496   : > { %6871 = vmatmul.mubr.f32.gmra.mrb[96].mxu1 %v18575_v56  ;;  %v18598_v56 = vld [vmem:[#allocation86_spill] sm:$0xff]  ;;  %v15961_v58 = vadd.f32 %v5460_v13, %v18600_v26  ;;  %v18612_v41 = vld [vmem:[#allocation227_spill] sm:$0xff] }
 0x497   : > { %6875 = vmatprep.mubr.f32.mxu1 %v18577_v22  ;;  %6646 = vmatmul.mubr.f32.gmra.mrb[96].mxu0 %v18581_v43  ;;  %v5168_v24 = vmax.f32 %v18596_v28, %v5105_v54  ;;  %v15957_v61 = vadd.f32 %v5461_v20, %v18598_v56  ;;  %v5426_v39 = vmax.f32 %v5169_v59, %v9302_v42  ;;  %v18599_v22 = vld [vmem:[#allocation85_spill] sm:$0xff]  ;;  %v18602_v43 = vld [vmem:[#allocation98_spill] sm:$0xff]  ;;  %v18606_v42 = vld [vmem:[#allocation95_spill] sm:$0xff]  ;;  %v9228_v54 = vpop.f32.mrb[252].mxu0 }
 0x498   : > { %6650 = vmatprep.mubr.f32.mxu0 %v18585_v10  ;;  %v18604_v21 = vmax.f32 %v18602_v43, %v18603_v33  ;;  %v18608_v62 = vmax.f32 %v18606_v42, %v18607_v52  ;;  %v18614_v1 = vld [vmem:[#allocation139_spill] sm:$0xff]  ;;  %v18617_v56 = vld [vmem:[#allocation173_spill] sm:$0xff]  ;;  %v18625_v42 = vld [vmem:[#allocation176_spill] sm:$0xff] }
 0x499   : > { %v5425_v9 = vmax.f32 %v5168_v24, %v5362_v60  ;;  %v5463_v45 = vmul.f32 %v15740_v11, %v5426_v39  ;;  %v9308_v60 = vpop.f32.mrb[252].mxu1  ;;  %v18616_v28 = vmax.f32 %v18614_v1, %v18615_v35  ;;  %v18618_v39 = vld [vmem:[#allocation122_spill] sm:$0xff]  ;;  %v18634_v1 = vld [vmem:[#allocation51_spill] sm:$0xff] }
 0x49a   : > { %6876 = vmatmul.mubr.f32.gmra.mrb[98].mxu1 %v18587_v40  ;;  %v5171_v55 = vmax.f32 %v18604_v21, %v9225_v3  ;;  %v5170_v40 = vmax.f32 %v18608_v62, %v5115_v12  ;;  %v5382_v20 = vpop.f32.mrb[253].mxu1  ;;  %v18621_v3 = vld [vmem:[#allocation224_spill] sm:$0xff]  ;;  %v18626_v62 = vld [vmem:[#allocation99_spill] sm:$0xff] }
 0x49b   : > { %6880 = vmatprep.mubr.f32.mxu1 %v18589_v15  ;;  %6651 = vmatmul.mubr.f32.gmra.mrb[98].mxu0 %v18593_v5  ;;  %v5462_v10 = vmul.f32 %v15740_v11, %v5425_v9  ;;  %v15975_v48 = vadd.f32 %v5463_v45, %v18610_v25  ;;  %v18613_v5 = vld [vmem:[#allocation41_spill] sm:$0xff]  ;;  %v5173_v24 = vmax.f32 %v18616_v28, %v9228_v54  ;;  %v18623_v21 = vld [vmem:[#allocation108_spill] sm:$0xff] }
 0x49c   : > { %6655 = vmatprep.mubr.f32.mxu0 %v18597_v4  ;;  %v5428_v15 = vmax.f32 %v5171_v55, %v9305_v14  ;;  %v5427_v59 = vmax.f32 %v5170_v40, %v5372_v57  ;;  %v5125_v4 = vpop.f32.mrb[253].mxu0  ;;  %v9311_v57 = vpop.f32.mrb[254].mxu1  ;;  %v18624_v55 = vld [vmem:[#allocation179_spill] sm:$0xff]  ;;  %v18627_v40 = vld [vmem:[#allocation117_spill] sm:$0xff] }
 0x49d   : > { %v15979_v16 = vadd.f32 %v5462_v10, %v18612_v41  ;;  %v5430_v43 = vmax.f32 %v5173_v24, %v9308_v60  ;;  %v5392_v33 = vpop.f32.mrb[255].mxu1  ;;  %v9231_v10 = vpop.f32.mrb[254].mxu0  ;;  %v18630_v41 = vld [vmem:[#allocation102_spill] sm:$0xff] }
 0x49e   : > { %6881 = vmatmul.mubr.f32.gmra.mrb[100].mxu1 %v18599_v22  ;;  %v5465_v13 = vmul.f32 %v15740_v11, %v5428_v15  ;;  %v5464_v14 = vmul.f32 %v15740_v11, %v5427_v59  ;;  %v18619_v22 = vld [vmem:[#allocation200_spill] sm:$0xff]  ;;  %v5135_v15 = vpop.f32.mrb[255].mxu0  ;;  %v18631_v59 = vld [vmem:[#allocation243_spill] sm:$0xff] }
 0x49f   : > { %6885 = vmatprep.mubr.f32.mxu1 %v18601_v31  ;;  %6656 = vmatmul.mubr.f32.gmra.mrb[100].mxu0 %v18605_v17  ;;  %v18620_v26 = vmax.f32 %v18618_v39, %v18619_v22  ;;  %v18622_v31 = vld [vmem:[#allocation42_spill] sm:$0xff]  ;;  %v5467_v52 = vmul.f32 %v15740_v11, %v5430_v43  ;;  %v18632_v54 = vmax.f32 %v18630_v41, %v18631_v59  ;;  %v6016_v22 = vpop.f32.mrb[0].mxu0  ;;  %v18644_v41 = vld [vmem:[#allocation56_spill] sm:$0xff] }
 0x4a0   : > { %6660 = vmatprep.mubr.f32.mxu0 %v18609_v51  ;;  %v15993_v45 = vadd.f32 %v5465_v13, %v18622_v31  ;;  %v15997_v12 = vadd.f32 %v5464_v14, %v18624_v55  ;;  %v18628_v51 = vmax.f32 %v18626_v62, %v18627_v40  ;;  %v6241_v13 = vpop.f32.mrb[0].mxu1  ;;  %v6018_v43 = vpop.f32.mrb[1].mxu0  ;;  %v18639_v55 = vld [vmem:[#allocation52_spill] sm:$0xff]  ;;  %v18641_v62 = vld [vmem:[#allocation54_spill] sm:$0xff]  ;;  %v18642_v40 = vld [vmem:[#allocation57_spill] sm:$0xff] }
 0x4a1   : > { %v5172_v9 = vmax.f32 %v18620_v26, %v5125_v4  ;;  %v16011_v35 = vadd.f32 %v5467_v52, %v18634_v1  ;;  %v6243_v24 = vpop.f32.mrb[1].mxu1  ;;  %v18635_v4 = vld [vmem:[#allocation46_spill] sm:$0xff]  ;;  %v16018_v26 = vld [vmem:[%s13900_s4 + $0x4] ss:$0 sm:$0xff]  ;;  %v6400_v31 = vmax.f32 %v6016_v22, %v6241_v13 }
 0x4a2   : > { %6886 = vmatmul.mubr.f32.gmra.mrb[102].mxu1 %v18611_v23  ;;  %v5175_v25 = vmax.f32 %v18628_v51, %v9231_v10  ;;  %v18629_v23 = vld [vmem:[#allocation225_spill] sm:$0xff]  ;;  %v18640_v10 = vld [vmem:[#allocation55_spill] sm:$0xff]  ;;  %v18645_v59 = vld [vmem:[#allocation58_spill] sm:$0xff] }
 0x4a3   : > { %6890 = vmatprep.mubr.f32.mxu1 %v18613_v5  ;;  %6661 = vmatmul.mubr.f32.gmra.mrb[102].mxu0 %v18617_v56  ;;  %v5429_v17 = vmax.f32 %v5172_v9, %v5382_v20  ;;  %v5174_v5 = vmax.f32 %v18632_v54, %v5135_v15  ;;  %v18633_v20 = vld [vmem:[#allocation177_spill] sm:$0xff]  ;;  %v18637_v9 = vld [vmem:[#allocation180_spill] sm:$0xff]  ;;  %v18643_v15 = vld [vmem:[#allocation47_spill] sm:$0xff] }
 0x4a4   : > { %6665 = vmatprep.mubr.f32.mxu0 %v18621_v3  ;;  %v5432_v28 = vmax.f32 %v5175_v25, %v9311_v57  ;;  %v18636_v56 = vld [vmem:[#allocation53_spill] sm:$0xff]  ;;  %v6021_v25 = vpop.f32.mrb[2].mxu0  ;;  %v18646_v13 = vld [vmem:[#allocation170_spill] sm:$0xff] }
 0x4a5   : > { %v5466_v60 = vmul.f32 %v15740_v11, %v5429_v17  ;;  %v5431_v39 = vmax.f32 %v5174_v5, %v5392_v33  ;;  %v6246_v17 = vpop.f32.mrb[2].mxu1  ;;  %v6437_v33 = vmul.f32 %v16018_v26, %v6400_v31  ;;  %v18650_v31 = vld [vmem:[#allocation61_spill] sm:$0xff] }
 0x4a6   : > { %6891 = vmatmul.mubr.f32.gmra.mrb[104].mxu1 %v18623_v21  ;;  %v5469_v3 = vmul.f32 %v15740_v11, %v5432_v28  ;;  %v18638_v21 = vld [vmem:[#allocation167_spill] sm:$0xff]  ;;  %v6248_v52 = vpop.f32.mrb[3].mxu1  ;;  %v18647_v28 = vld [vmem:[#allocation60_spill] sm:$0xff] }
 0x4a7   : > { %6895 = vmatprep.mubr.f32.mxu1 %v18625_v42  ;;  %6666 = vmatmul.mubr.f32.gmra.mrb[104].mxu0 %v18629_v23  ;;  %v16015_v14 = vadd.f32 %v5466_v60, %v18636_v56  ;;  %v5468_v57 = vmul.f32 %v15740_v11, %v5431_v39  ;;  %v16035_v23 = vadd.f32 %v6437_v33, %v15763_v2  ;;  %v6023_v60 = vpop.f32.mrb[3].mxu0  ;;  %v6251_v54 = vpop.f32.mrb[4].mxu1  ;;  %v18648_v56 = vld [vmem:[#allocation62_spill] sm:$0xff]  ;;  %v18649_v39 = vld [vmem:[#allocation59_spill] sm:$0xff] }
 0x4a8   : > { %6670 = vmatprep.mubr.f32.mxu0 %v18633_v20  ;;  %v16026_v42 = vadd.f32 %v5469_v3, %v18640_v10  ;;  %v6401_v11 = vmax.f32 %v6021_v25, %v6246_v17  ;;  %v6253_v20 = vpop.f32.mrb[5].mxu1  ;;  %v6026_v1 = vpop.f32.mrb[4].mxu0  ;;  %v18652_v17 = vld [vmem:[#allocation48_spill] sm:$0xff]  ;;  %v18653_v10 = vld [vmem:[#allocation66_spill] sm:$0xff] }
 0x4a9   : > { %v16031_v51 = vadd.f32 %v5468_v57, %v18642_v40  ;;  %v6402_v2 = vmax.f32 %v6026_v1, %v6251_v54  ;;  %v6256_v22 = vpop.f32.mrb[6].mxu1  ;;  %v18654_v40 = vld [vmem:[#allocation63_spill] sm:$0xff] }
 0x4aa   : > { %6896 = vmatmul.mubr.f32.gmra.mrb[106].mxu1 %v18635_v4  ;;  %v6438_v5 = vmul.f32 %v16018_v26, %v6401_v11  ;;  %v6028_v4 = vpop.f32.mrb[5].mxu0  ;;  %v6258_v3 = vpop.f32.mrb[7].mxu1 }
 0x4ab   : > { %6900 = vmatprep.mubr.f32.mxu1 %v18637_v9  ;;  %6671 = vmatmul.mubr.f32.gmra.mrb[106].mxu0 %v18638_v21  ;;  %v6439_v9 = vmul.f32 %v16018_v26, %v6402_v2  ;;  %v6031_v43 = vpop.f32.mrb[6].mxu0  ;;  %v18651_v21 = vld [vmem:[#allocation64_spill] sm:$0xff]  ;;  %v6261_v33 = vpop.f32.mrb[8].mxu1 }
 0x4ac   : > { %6675 = vmatprep.mubr.f32.mxu0 %v18639_v55  ;;  %v16043_v24 = vadd.f32 %v6438_v5, %v15759_v7  ;;  %v6403_v7 = vmax.f32 %v6031_v43, %v6256_v22  ;;  %v6033_v55 = vpop.f32.mrb[7].mxu0 }
 0x4ad   : > { %v16051_v57 = vadd.f32 %v6439_v9, %v15781_v46  ;;  %v6036_v25 = vpop.f32.mrb[8].mxu0 }
 0x4ae   : > { %6901 = vmatmul.mubr.f32.gmra.mrb[108].mxu1 %v18641_v62  ;;  %v6440_v52 = vmul.f32 %v16018_v26, %v6403_v7  ;;  %v6263_v62 = vpop.f32.mrb[9].mxu1  ;;  %v6404_v46 = vmax.f32 %v6036_v25, %v6261_v33  ;;  %v6038_v60 = vpop.f32.mrb[9].mxu0 }
 0x4af   : > { %6905 = vmatprep.mubr.f32.mxu1 %v18643_v15  ;;  %6676 = vmatmul.mubr.f32.gmra.mrb[108].mxu0 %v18644_v41  ;;  %v18655_v15 = vld [vmem:[#allocation174_spill] sm:$0xff]  ;;  %v18656_v41 = vld [vmem:[#allocation65_spill] sm:$0xff]  ;;  %v6266_v54 = vpop.f32.mrb[10].mxu1 }
 0x4b0   : > { %6680 = vmatprep.mubr.f32.mxu0 %v18645_v59  ;;  %v16059_v11 = vadd.f32 %v6440_v52, %v15777_v63  ;;  %v18657_v59 = vld [vmem:[#allocation181_spill] sm:$0xff]  ;;  %v6441_v5 = vmul.f32 %v16018_v26, %v6404_v46  ;;  %v6268_v20 = vpop.f32.mrb[11].mxu1 }
 0x4b1   : > { %v6041_v1 = vpop.f32.mrb[10].mxu0 }
 0x4b2   : > { %6906 = vmatmul.mubr.f32.gmra.mrb[110].mxu1 %v18646_v13  ;;  %v18658_v13 = vld [vmem:[#allocation70_spill] sm:$0xff]  ;;  %v16067_v2 = vadd.f32 %v6441_v5, %v15799_v36  ;;  %v6405_v63 = vmax.f32 %v6041_v1, %v6266_v54  ;;  %v6043_v4 = vpop.f32.mrb[11].mxu0 }
 0x4b3   : > { %6910 = vmatprep.mubr.f32.mxu1 %v18647_v28  ;;  %6681 = vmatmul.mubr.f32.gmra.mrb[110].mxu0 %v18648_v56  ;;  %v18659_v28 = vld [vmem:[#allocation182_spill] sm:$0xff]  ;;  %v18660_v56 = vld [vmem:[#allocation183_spill] sm:$0xff]  ;;  %v6271_v22 = vpop.f32.mrb[12].mxu1 }
 0x4b4   : > { %6685 = vmatprep.mubr.f32.mxu0 %v18649_v39  ;;  %v18661_v39 = vld [vmem:[#allocation186_spill] sm:$0xff]  ;;  %v6442_v9 = vmul.f32 %v16018_v26, %v6405_v63  ;;  %v6273_v3 = vpop.f32.mrb[13].mxu1 }
 0x4b5   : > { %v6046_v43 = vpop.f32.mrb[12].mxu0 }
 0x4b6   : > { %6911 = vmatmul.mubr.f32.gmra.mrb[112].mxu1 %v18650_v31  ;;  %v18662_v31 = vld [vmem:[#allocation49_spill] sm:$0xff]  ;;  %v16075_v7 = vadd.f32 %v6442_v9, %v15795_v47  ;;  %v6406_v36 = vmax.f32 %v6046_v43, %v6271_v22  ;;  %v6048_v55 = vpop.f32.mrb[13].mxu0 }
 0x4b7   : > { %6915 = vmatprep.mubr.f32.mxu1 %v18651_v21  ;;  %6686 = vmatmul.mubr.f32.gmra.mrb[112].mxu0 %v18652_v17  ;;  %v18663_v21 = vld [vmem:[#allocation188_spill] sm:$0xff]  ;;  %v18664_v17 = vld [vmem:[#allocation187_spill] sm:$0xff]  ;;  %v6276_v33 = vpop.f32.mrb[14].mxu1 }
 0x4b8   : > { %6690 = vmatprep.mubr.f32.mxu0 %v18653_v10  ;;  %v18665_v10 = vld [vmem:[#allocation190_spill] sm:$0xff]  ;;  %v6443_v52 = vmul.f32 %v16018_v26, %v6406_v36  ;;  %v6278_v62 = vpop.f32.mrb[15].mxu1 }
 0x4b9   : > { %v6051_v25 = vpop.f32.mrb[14].mxu0 }
 0x4ba   : > { %6916 = vmatmul.mubr.f32.gmra.mrb[114].mxu1 %v18654_v40  ;;  %v18666_v40 = vld [vmem:[#allocation195_spill] sm:$0xff]  ;;  %v16083_v46 = vadd.f32 %v6443_v52, %v15817_v27  ;;  %v6407_v47 = vmax.f32 %v6051_v25, %v6276_v33  ;;  %v6053_v60 = vpop.f32.mrb[15].mxu0 }
 0x4bb   : > { %6920 = vmatprep.mubr.f32.mxu1 %v18655_v15  ;;  %6691 = vmatmul.mubr.f32.gmra.mrb[114].mxu0 %v18656_v41  ;;  %v18667_v15 = vld [vmem:[#allocation194_spill] sm:$0xff]  ;;  %v18668_v41 = vld [vmem:[#allocation201_spill] sm:$0xff]  ;;  %v6281_v54 = vpop.f32.mrb[16].mxu1 }
 0x4bc   : > { %6695 = vmatprep.mubr.f32.mxu0 %v18657_v59  ;;  %v18669_v59 = vld [vmem:[#allocation203_spill] sm:$0xff]  ;;  %v6444_v5 = vmul.f32 %v16018_v26, %v6407_v47  ;;  %v6283_v20 = vpop.f32.mrb[17].mxu1 }
 0x4bd   : > { %v6056_v1 = vpop.f32.mrb[16].mxu0 }
 0x4be   : > { %6921 = vmatmul.mubr.f32.gmra.mrb[116].mxu1 %v18658_v13  ;;  %v18670_v13 = vld [vmem:[#allocation131_spill] sm:$0xff]  ;;  %v16091_v63 = vadd.f32 %v6444_v5, %v15813_v0  ;;  %v6408_v27 = vmax.f32 %v6056_v1, %v6281_v54  ;;  %v6058_v4 = vpop.f32.mrb[17].mxu0 }
 0x4bf   : > { %6925 = vmatprep.mubr.f32.mxu1 %v18659_v28  ;;  %6696 = vmatmul.mubr.f32.gmra.mrb[116].mxu0 %v18660_v56  ;;  %v18671_v28 = vld [vmem:[#allocation205_spill] sm:$0xff]  ;;  %v18672_v56 = vld [vmem:[#allocation218_spill] sm:$0xff]  ;;  %v6286_v22 = vpop.f32.mrb[18].mxu1 }
 0x4c0   : > { %6700 = vmatprep.mubr.f32.mxu0 %v18661_v39  ;;  %v18673_v39 = vld [vmem:[#allocation219_spill] sm:$0xff]  ;;  %v6445_v9 = vmul.f32 %v16018_v26, %v6408_v27  ;;  %v6288_v3 = vpop.f32.mrb[19].mxu1 }
 0x4c2   : > { %6926 = vmatmul.mubr.f32.gmra.mrb[118].mxu1 %v18662_v31  ;;  %v18674_v31 = vld [vmem:[#allocation105_spill] sm:$0xff]  ;;  %v6061_v43 = vpop.f32.mrb[18].mxu0  ;;  %v16099_v36 = vadd.f32 %v6445_v9, %v15835_v19  ;;  %v18679_v19 = vld [vmem:[#allocation112_spill] sm:$0xff] }
 0x4c3   : > { %6930 = vmatprep.mubr.f32.mxu1 %v18663_v21  ;;  %6701 = vmatmul.mubr.f32.gmra.mrb[118].mxu0 %v18664_v17  ;;  %v18675_v21 = vld [vmem:[#allocation223_spill] sm:$0xff]  ;;  %v6409_v0 = vmax.f32 %v6061_v43, %v6286_v22  ;;  %v6063_v55 = vpop.f32.mrb[19].mxu0  ;;  %v18676_v17 = vld [vmem:[#allocation228_spill] sm:$0xff]  ;;  %v6291_v33 = vpop.f32.mrb[20].mxu1 }
 0x4c4   : > { %6705 = vmatprep.mubr.f32.mxu0 %v18665_v10  ;;  %v18677_v10 = vld [vmem:[#allocation88_spill] sm:$0xff]  ;;  %v6293_v62 = vpop.f32.mrb[21].mxu1 }
 0x4c5   : > { %v6446_v52 = vmul.f32 %v16018_v26, %v6409_v0 }
 0x4c6   : > { %6931 = vmatmul.mubr.f32.gmra.mrb[120].mxu1 %v18666_v40  ;;  %v18678_v40 = vld [vmem:[#allocation241_spill] sm:$0xff] }
 0x4c7   : > { %6935 = vmatprep.mubr.f32.mxu1 %v18667_v15  ;;  %6706 = vmatmul.mubr.f32.gmra.mrb[120].mxu0 %v18668_v41  ;;  %v6066_v25 = vpop.f32.mrb[20].mxu0  ;;  %v16106_v15 = vadd.f32 %v6446_v52, %v15831_v37 }
 0x4c8   : > { %6710 = vmatprep.mubr.f32.mxu0 %v18669_v59  ;;  %v6410_v47 = vmax.f32 %v6066_v25, %v6291_v33  ;;  %v6068_v60 = vpop.f32.mrb[21].mxu0 }
 0x4ca   : > { %6936 = vmatmul.mubr.f32.gmra.mrb[122].mxu1 %v18670_v13  ;;  %v6296_v41 = vpop.f32.mrb[22].mxu1  ;;  %v6447_v59 = vmul.f32 %v16018_v26, %v6410_v47 }
 0x4cb   : > { %6940 = vmatprep.mubr.f32.mxu1 %v18671_v28  ;;  %6711 = vmatmul.mubr.f32.gmra.mrb[122].mxu0 %v18672_v56  ;;  %v6298_v54 = vpop.f32.mrb[23].mxu1  ;;  %v6071_v5 = vpop.f32.mrb[22].mxu0 }
 0x4cc   : > { %6715 = vmatprep.mubr.f32.mxu0 %v18673_v39  ;;  %v16111_v20 = vadd.f32 %v6447_v59, %v15853_v49  ;;  %v6411_v13 = vmax.f32 %v6071_v5, %v6296_v41  ;;  %v6073_v1 = vpop.f32.mrb[23].mxu0 }
 0x4ce   : > { %6941 = vmatmul.mubr.f32.gmra.mrb[124].mxu1 %v18674_v31  ;;  %v6301_v28 = vpop.f32.mrb[24].mxu1  ;;  %v6448_v27 = vmul.f32 %v16018_v26, %v6411_v13 }
 0x4cf   : > { %6945 = vmatprep.mubr.f32.mxu1 %v18675_v21  ;;  %6716 = vmatmul.mubr.f32.gmra.mrb[124].mxu0 %v18676_v17  ;;  %v6303_v4 = vpop.f32.mrb[25].mxu1  ;;  %v6076_v37 = vpop.f32.mrb[24].mxu0 }
 0x4d0   : > { %6720 = vmatprep.mubr.f32.mxu0 %v18677_v10  ;;  %v16115_v56 = vadd.f32 %v6448_v27, %v15849_v44  ;;  %v6412_v39 = vmax.f32 %v6076_v37, %v6301_v28  ;;  %v6078_v22 = vpop.f32.mrb[25].mxu0 }
 0x4d2   : > { %6946 = vmatmul.mubr.f32.gmra.mrb[126].mxu1 %v18678_v40  ;;  %v6449_v3 = vmul.f32 %v16018_v26, %v6412_v39 }
 0x4d3   : > { %6721 = vmatmul.mubr.f32.gmra.mrb[126].mxu0 %v18679_v19  ;;  %v6306_v9 = vpop.f32.mrb[26].mxu1 }
 0x4d4   : > { %v6308_v31 = vpop.f32.mrb[27].mxu1  ;;  %v16119_v49 = vadd.f32 %v6449_v3, %v15871_v6 }
 0x4d6   : > { %v6081_v43 = vpop.f32.mrb[26].mxu0 }
 0x4d7   : > { %v6413_v21 = vmax.f32 %v6081_v43, %v6306_v9  ;;  %v6083_v0 = vpop.f32.mrb[27].mxu0  ;;  %v6311_v55 = vpop.f32.mrb[28].mxu1 }
 0x4d8   : > { %v6313_v10 = vpop.f32.mrb[29].mxu1 }
 0x4d9   : > { %v6450_v17 = vmul.f32 %v16018_v26, %v6413_v21 }
 0x4da   : > { %v6086_v33 = vpop.f32.mrb[28].mxu0 }
 0x4db   : > { %v16123_v44 = vadd.f32 %v6450_v17, %v15867_v30  ;;  %v6414_v52 = vmax.f32 %v6086_v33, %v6311_v55  ;;  %v6088_v62 = vpop.f32.mrb[29].mxu0 }
 0x4dc   : > { %v6316_v40 = vpop.f32.mrb[30].mxu1 }
 0x4dd   : > { %v6451_v25 = vmul.f32 %v16018_v26, %v6414_v52  ;;  %v6318_v47 = vpop.f32.mrb[31].mxu1 }
 0x4df   : > { %v16127_v6 = vadd.f32 %v6451_v25, %v15889_v34 }
 0x4e0   : > { %v6091_v60 = vpop.f32.mrb[30].mxu0  ;;  %v6321_v59 = vpop.f32.mrb[32].mxu1 }
 0x4e1   : > { %v6415_v19 = vmax.f32 %v6091_v60, %v6316_v40  ;;  %v6093_v41 = vpop.f32.mrb[31].mxu0  ;;  %v6323_v5 = vpop.f32.mrb[33].mxu1 }
 0x4e3   : > { %v6452_v54 = vmul.f32 %v16018_v26, %v6415_v19 }
 0x4e4   : > { %v6096_v13 = vpop.f32.mrb[32].mxu0 }
 0x4e5   : > { %v16131_v30 = vadd.f32 %v6452_v54, %v15885_v18  ;;  %v6416_v1 = vmax.f32 %v6096_v13, %v6321_v59  ;;  %v6098_v28 = vpop.f32.mrb[33].mxu0 }
 0x4e7   : > { %v6326_v27 = vpop.f32.mrb[34].mxu1  ;;  %v6453_v4 = vmul.f32 %v16018_v26, %v6416_v1 }
 0x4e8   : > { %v6328_v37 = vpop.f32.mrb[35].mxu1  ;;  %v6101_v39 = vpop.f32.mrb[34].mxu0 }
 0x4e9   : > { %v16135_v34 = vadd.f32 %v6453_v4, %v15907_v29  ;;  %v6417_v22 = vmax.f32 %v6101_v39, %v6326_v27  ;;  %v6103_v9 = vpop.f32.mrb[35].mxu0 }
 0x4eb   : > { %v6454_v31 = vmul.f32 %v16018_v26, %v6417_v22 }
 0x4ec   : > { %v6331_v3 = vpop.f32.mrb[36].mxu1 }
 0x4ed   : > { %v6333_v43 = vpop.f32.mrb[37].mxu1  ;;  %v16139_v18 = vadd.f32 %v6454_v31, %v15903_v8 }
 0x4ee   : > { %v6106_v21 = vpop.f32.mrb[36].mxu0 }
 0x4ef   : > { %v6418_v0 = vmax.f32 %v6106_v21, %v6331_v3  ;;  %v6108_v55 = vpop.f32.mrb[37].mxu0 }
 0x4f1   : > { %v6336_v17 = vpop.f32.mrb[38].mxu1  ;;  %v6455_v10 = vmul.f32 %v16018_v26, %v6418_v0 }
 0x4f2   : > { %v6338_v33 = vpop.f32.mrb[39].mxu1  ;;  %v6111_v52 = vpop.f32.mrb[38].mxu0 }
 0x4f3   : > { %v16143_v29 = vadd.f32 %v6455_v10, %v15925_v38  ;;  %v6419_v62 = vmax.f32 %v6111_v52, %v6336_v17  ;;  %v6113_v40 = vpop.f32.mrb[39].mxu0 }
 0x4f5   : > { %v6456_v47 = vmul.f32 %v16018_v26, %v6419_v62 }
 0x4f6   : > { %v6341_v25 = vpop.f32.mrb[40].mxu1 }
 0x4f7   : > { %v6343_v60 = vpop.f32.mrb[41].mxu1  ;;  %v16147_v8 = vadd.f32 %v6456_v47, %v15921_v50 }
 0x4f8   : > { %v6116_v19 = vpop.f32.mrb[40].mxu0 }
 0x4f9   : > { %v6420_v41 = vmax.f32 %v6116_v19, %v6341_v25  ;;  %v6118_v59 = vpop.f32.mrb[41].mxu0 }
 0x4fb   : > { %v6457_v5 = vmul.f32 %v16018_v26, %v6420_v41 }
 0x4fc   : > { %v6346_v54 = vpop.f32.mrb[42].mxu1 }
 0x4fd   : > { %v6348_v13 = vpop.f32.mrb[43].mxu1  ;;  %v6121_v1 = vpop.f32.mrb[42].mxu0  ;;  %v16151_v38 = vadd.f32 %v6457_v5, %v15943_v32 }
 0x4fe   : > { %v6421_v28 = vmax.f32 %v6121_v1, %v6346_v54  ;;  %v6123_v27 = vpop.f32.mrb[43].mxu0 }
 0x500   : > { %v6458_v37 = vmul.f32 %v16018_v26, %v6421_v28 }
 0x501   : > { %v6351_v4 = vpop.f32.mrb[44].mxu1 }
 0x502   : > { %v6353_v39 = vpop.f32.mrb[45].mxu1  ;;  %v6126_v22 = vpop.f32.mrb[44].mxu0  ;;  %v16155_v50 = vadd.f32 %v6458_v37, %v15939_v53 }
 0x503   : > { %v6422_v9 = vmax.f32 %v6126_v22, %v6351_v4  ;;  %v6128_v3 = vpop.f32.mrb[45].mxu0 }
 0x505   : > { %v6356_v31 = vpop.f32.mrb[46].mxu1  ;;  %v6459_v43 = vmul.f32 %v16018_v26, %v6422_v9 }
 0x506   : > { %v6358_v21 = vpop.f32.mrb[47].mxu1  ;;  %v6131_v0 = vpop.f32.mrb[46].mxu0 }
 0x507   : > { %v16159_v32 = vadd.f32 %v6459_v43, %v15961_v58  ;;  %v6423_v55 = vmax.f32 %v6131_v0, %v6356_v31  ;;  %v6133_v17 = vpop.f32.mrb[47].mxu0 }
 0x509   : > { %v6361_v10 = vpop.f32.mrb[48].mxu1  ;;  %v6460_v33 = vmul.f32 %v16018_v26, %v6423_v55 }
 0x50a   : > { %v6363_v52 = vpop.f32.mrb[49].mxu1  ;;  %v6136_v62 = vpop.f32.mrb[48].mxu0 }
 0x50b   : > { %v16163_v53 = vadd.f32 %v6460_v33, %v15957_v61  ;;  %v6424_v40 = vmax.f32 %v6136_v62, %v6361_v10  ;;  %v6138_v25 = vpop.f32.mrb[49].mxu0 }
 0x50d   : > { %v6366_v47 = vpop.f32.mrb[50].mxu1  ;;  %v6461_v60 = vmul.f32 %v16018_v26, %v6424_v40 }
 0x50e   : > { %v6368_v19 = vpop.f32.mrb[51].mxu1  ;;  %v6141_v41 = vpop.f32.mrb[50].mxu0 }
 0x50f   : > { %v16167_v58 = vadd.f32 %v6461_v60, %v15979_v16  ;;  %v6425_v59 = vmax.f32 %v6141_v41, %v6366_v47  ;;  %v6143_v54 = vpop.f32.mrb[51].mxu0 }
 0x511   : > { %v6371_v5 = vpop.f32.mrb[52].mxu1  ;;  %v6462_v13 = vmul.f32 %v16018_v26, %v6425_v59 }
 0x512   : > { %v6373_v1 = vpop.f32.mrb[53].mxu1  ;;  %v6146_v28 = vpop.f32.mrb[52].mxu0 }
 0x513   : > { %v16171_v61 = vadd.f32 %v6462_v13, %v15975_v48  ;;  %v6426_v27 = vmax.f32 %v6146_v28, %v6371_v5  ;;  %v6148_v4 = vpop.f32.mrb[53].mxu0 }
 0x515   : > { %v6376_v37 = vpop.f32.mrb[54].mxu1  ;;  %v6463_v39 = vmul.f32 %v16018_v26, %v6426_v27 }
 0x516   : > { %v6378_v22 = vpop.f32.mrb[55].mxu1  ;;  %v6151_v9 = vpop.f32.mrb[54].mxu0 }
 0x517   : > { %v16175_v16 = vadd.f32 %v6463_v39, %v15997_v12  ;;  %v6427_v3 = vmax.f32 %v6151_v9, %v6376_v37  ;;  %v6153_v31 = vpop.f32.mrb[55].mxu0 }
 0x519   : > { %v6381_v43 = vpop.f32.mrb[56].mxu1  ;;  %v6464_v21 = vmul.f32 %v16018_v26, %v6427_v3  ;;  %v16196_v3 = vld [vmem:[%s13900_s4 + $0x5] ss:$0 sm:$0xff] }
 0x51a   : > { %v6383_v0 = vpop.f32.mrb[57].mxu1  ;;  %v6156_v55 = vpop.f32.mrb[56].mxu0 }
 0x51b   : > { %v16179_v48 = vadd.f32 %v6464_v21, %v15993_v45  ;;  %v6428_v17 = vmax.f32 %v6156_v55, %v6381_v43  ;;  %v6158_v10 = vpop.f32.mrb[57].mxu0 }
 0x51d   : > { %v6386_v33 = vpop.f32.mrb[58].mxu1  ;;  %v6465_v52 = vmul.f32 %v16018_v26, %v6428_v17 }
 0x51e   : > { %v6388_v62 = vpop.f32.mrb[59].mxu1  ;;  %v6161_v40 = vpop.f32.mrb[58].mxu0 }
 0x51f   : > { %v16183_v12 = vadd.f32 %v6465_v52, %v16015_v14  ;;  %v6429_v25 = vmax.f32 %v6161_v40, %v6386_v33  ;;  %v6163_v47 = vpop.f32.mrb[59].mxu0 }
 0x521   : > { %v6391_v60 = vpop.f32.mrb[60].mxu1  ;;  %v6466_v19 = vmul.f32 %v16018_v26, %v6429_v25 }
 0x522   : > { %v6393_v41 = vpop.f32.mrb[61].mxu1  ;;  %v6166_v59 = vpop.f32.mrb[60].mxu0 }
 0x523   : > { %v16187_v45 = vadd.f32 %v6466_v19, %v16011_v35  ;;  %v6430_v54 = vmax.f32 %v6166_v59, %v6391_v60  ;;  %v6168_v5 = vpop.f32.mrb[61].mxu0 }
 0x525   : > { %v6396_v13 = vpop.f32.mrb[62].mxu1  ;;  %v6467_v1 = vmul.f32 %v16018_v26, %v6430_v54 }
 0x526   : > { %v6398_v14 = vpop.f32.mrb[63].mxu1  ;;  %v6171_v28 = vpop.f32.mrb[62].mxu0 }
 0x527   : > { %v16191_v27 = vadd.f32 %v6467_v1, %v16031_v51  ;;  %v6431_v4 = vmax.f32 %v6171_v28, %v6396_v13  ;;  %v6173_v37 = vpop.f32.mrb[63].mxu0 }
 0x529   : > { %v6792_v39 = vpop.f32.mrb[64].mxu1  ;;  %v6468_v22 = vmul.f32 %v16018_v26, %v6431_v4 }
 0x52a   : > { %v6794_v9 = vpop.f32.mrb[65].mxu1  ;;  %v6567_v35 = vpop.f32.mrb[64].mxu0 }
 0x52b   : > { %v16199_v31 = vadd.f32 %v6468_v22, %v16026_v42  ;;  %v6951_v43 = vmax.f32 %v6567_v35, %v6792_v39  ;;  %v6569_v21 = vpop.f32.mrb[65].mxu0 }
 0x52d   : > { %v6797_v0 = vpop.f32.mrb[66].mxu1  ;;  %v6988_v51 = vmul.f32 %v16196_v3, %v6951_v43 }
 0x52e   : > { %v6799_v55 = vpop.f32.mrb[67].mxu1  ;;  %v6572_v17 = vpop.f32.mrb[66].mxu0 }
 0x52f   : > { %v7020_v10 = vadd.f32 %v6988_v51, %v16035_v23  ;;  %v6952_v33 = vmax.f32 %v6572_v17, %v6797_v0  ;;  %v6574_v26 = vpop.f32.mrb[67].mxu0 }
 0x531   : > { %v6802_v52 = vpop.f32.mrb[68].mxu1  ;;  %7052 = vst [vmem:[%s16205_s20] sm:$0xff] %v7020_v10  ;;  %v6989_v42 = vmul.f32 %v16196_v3, %v6952_v33 }
 0x532   : > { %v6804_v62 = vpop.f32.mrb[69].mxu1  ;;  %v6577_v40 = vpop.f32.mrb[68].mxu0 }
 0x533   : > { %v7021_v25 = vadd.f32 %v6989_v42, %v16043_v24  ;;  %v6953_v47 = vmax.f32 %v6577_v40, %v6802_v52  ;;  %v6579_v60 = vpop.f32.mrb[69].mxu0 }
 0x535   : > { %v6807_v19 = vpop.f32.mrb[70].mxu1  ;;  %7053 = vst [vmem:[%s16205_s20 + $0x8] sm:$0xff] %v7021_v25  ;;  %v6990_v23 = vmul.f32 %v16196_v3, %v6953_v47 }
 0x536   : > { %v6809_v41 = vpop.f32.mrb[71].mxu1  ;;  %v6582_v59 = vpop.f32.mrb[70].mxu0 }
 0x537   : > { %v7022_v54 = vadd.f32 %v6990_v23, %v16051_v57  ;;  %v6954_v5 = vmax.f32 %v6582_v59, %v6807_v19  ;;  %v6584_v13 = vpop.f32.mrb[71].mxu0 }
 0x539   : > { %v6812_v1 = vpop.f32.mrb[72].mxu1  ;;  %7054 = vst [vmem:[%s16205_s20 + $0x10] sm:$0xff] %v7022_v54  ;;  %v6991_v14 = vmul.f32 %v16196_v3, %v6954_v5 }
 0x53a   : > { %v6814_v28 = vpop.f32.mrb[73].mxu1  ;;  %v6587_v24 = vpop.f32.mrb[72].mxu0 }
 0x53b   : > { %v7023_v4 = vadd.f32 %v6991_v14, %v16059_v11  ;;  %v6955_v37 = vmax.f32 %v6587_v24, %v6812_v1  ;;  %v6589_v39 = vpop.f32.mrb[73].mxu0 }
 0x53d   : > { %v6817_v22 = vpop.f32.mrb[74].mxu1  ;;  %7055 = vst [vmem:[%s16205_s20 + $0x18] sm:$0xff] %v7023_v4  ;;  %v6992_v9 = vmul.f32 %v16196_v3, %v6955_v37 }
 0x53e   : > { %v6819_v35 = vpop.f32.mrb[75].mxu1  ;;  %v6592_v57 = vpop.f32.mrb[74].mxu0 }
 0x53f   : > { %v7024_v43 = vadd.f32 %v6992_v9, %v16067_v2  ;;  %v6956_v21 = vmax.f32 %v6592_v57, %v6817_v22  ;;  %v6594_v0 = vpop.f32.mrb[75].mxu0 }
 0x541   : > { %v6822_v51 = vpop.f32.mrb[76].mxu1  ;;  %7056 = vst [vmem:[%s16205_s20 + $0x20] sm:$0xff] %v7024_v43  ;;  %v6993_v55 = vmul.f32 %v16196_v3, %v6956_v21 }
 0x542   : > { %v6824_v17 = vpop.f32.mrb[77].mxu1  ;;  %v6597_v11 = vpop.f32.mrb[76].mxu0 }
 0x543   : > { %v7025_v10 = vadd.f32 %v6993_v55, %v16075_v7  ;;  %v6957_v33 = vmax.f32 %v6597_v11, %v6822_v51  ;;  %v6599_v26 = vpop.f32.mrb[77].mxu0 }
 0x545   : > { %v6827_v52 = vpop.f32.mrb[78].mxu1  ;;  %7057 = vst [vmem:[%s16205_s20 + $0x28] sm:$0xff] %v7025_v10  ;;  %v6994_v42 = vmul.f32 %v16196_v3, %v6957_v33 }
 0x546   : > { %v6829_v62 = vpop.f32.mrb[79].mxu1  ;;  %v6602_v2 = vpop.f32.mrb[78].mxu0 }
 0x547   : > { %v7026_v40 = vadd.f32 %v6994_v42, %v16083_v46  ;;  %v6958_v25 = vmax.f32 %v6602_v2, %v6827_v52  ;;  %v6604_v47 = vpop.f32.mrb[79].mxu0 }
 0x549   : > { %v6832_v60 = vpop.f32.mrb[80].mxu1  ;;  %7058 = vst [vmem:[%s16205_s20 + $0x30] sm:$0xff] %v7026_v40  ;;  %v6995_v19 = vmul.f32 %v16196_v3, %v6958_v25 }
 0x54a   : > { %v6834_v23 = vpop.f32.mrb[81].mxu1  ;;  %v6607_v7 = vpop.f32.mrb[80].mxu0 }
 0x54b   : > { %v7027_v41 = vadd.f32 %v6995_v19, %v16091_v63  ;;  %v6959_v59 = vmax.f32 %v6607_v7, %v6832_v60  ;;  %v6609_v54 = vpop.f32.mrb[81].mxu0 }
 0x54d   : > { %v6837_v5 = vpop.f32.mrb[82].mxu1  ;;  %7059 = vst [vmem:[%s16205_s20 + $0x38] sm:$0xff] %v7027_v41  ;;  %v6996_v13 = vmul.f32 %v16196_v3, %v6959_v59 }
 0x54e   : > { %v6839_v1 = vpop.f32.mrb[83].mxu1  ;;  %v6612_v46 = vpop.f32.mrb[82].mxu0 }
 0x54f   : > { %v7028_v14 = vadd.f32 %v6996_v13, %v16099_v36  ;;  %v6960_v28 = vmax.f32 %v6612_v46, %v6837_v5  ;;  %v6614_v24 = vpop.f32.mrb[83].mxu0 }
 0x551   : > { %v6842_v4 = vpop.f32.mrb[84].mxu1  ;;  %7060 = vst [vmem:[%s16205_s20 + $0x40] sm:$0xff] %v7028_v14  ;;  %v6997_v37 = vmul.f32 %v16196_v3, %v6960_v28 }
 0x552   : > { %v6844_v39 = vpop.f32.mrb[85].mxu1  ;;  %v6617_v63 = vpop.f32.mrb[84].mxu0 }
 0x553   : > { %v7029_v22 = vadd.f32 %v6997_v37, %v16106_v15  ;;  %v6961_v9 = vmax.f32 %v6617_v63, %v6842_v4  ;;  %v6619_v35 = vpop.f32.mrb[85].mxu0 }
 0x555   : > { %v6847_v57 = vpop.f32.mrb[86].mxu1  ;;  %7061 = vst [vmem:[%s16205_s20 + $0x48] sm:$0xff] %v7029_v22  ;;  %v6998_v43 = vmul.f32 %v16196_v3, %v6961_v9 }
 0x556   : > { %v6849_v21 = vpop.f32.mrb[87].mxu1  ;;  %v6622_v36 = vpop.f32.mrb[86].mxu0 }
 0x557   : > { %v7030_v0 = vadd.f32 %v6998_v43, %v16111_v20  ;;  %v6962_v51 = vmax.f32 %v6622_v36, %v6847_v57  ;;  %v6624_v55 = vpop.f32.mrb[87].mxu0 }
 0x559   : > { %v6852_v17 = vpop.f32.mrb[88].mxu1  ;;  %7062 = vst [vmem:[%s16205_s20 + $0x50] sm:$0xff] %v7030_v0  ;;  %v6999_v11 = vmul.f32 %v16196_v3, %v6962_v51 }
 0x55a   : > { %v6854_v10 = vpop.f32.mrb[89].mxu1  ;;  %v6627_v15 = vpop.f32.mrb[88].mxu0 }
 0x55b   : > { %v7031_v33 = vadd.f32 %v6999_v11, %v16115_v56  ;;  %v6963_v26 = vmax.f32 %v6627_v15, %v6852_v17  ;;  %v6629_v52 = vpop.f32.mrb[89].mxu0 }
 0x55d   : > { %v6857_v42 = vpop.f32.mrb[90].mxu1  ;;  %7063 = vst [vmem:[%s16205_s20 + $0x58] sm:$0xff] %v7031_v33  ;;  %v7000_v62 = vmul.f32 %v16196_v3, %v6963_v26 }
 0x55e   : > { %v6859_v2 = vpop.f32.mrb[91].mxu1  ;;  %v6632_v20 = vpop.f32.mrb[90].mxu0 }
 0x55f   : > { %v7032_v40 = vadd.f32 %v7000_v62, %v16119_v49  ;;  %v6964_v25 = vmax.f32 %v6632_v20, %v6857_v42  ;;  %v6634_v47 = vpop.f32.mrb[91].mxu0 }
 0x561   : > { %v6862_v60 = vpop.f32.mrb[92].mxu1  ;;  %7064 = vst [vmem:[%s16205_s20 + $0x60] sm:$0xff] %v7032_v40  ;;  %v7001_v19 = vmul.f32 %v16196_v3, %v6964_v25 }
 0x562   : > { %v6864_v23 = vpop.f32.mrb[93].mxu1  ;;  %v6637_v56 = vpop.f32.mrb[92].mxu0 }
 0x563   : > { %v7033_v7 = vadd.f32 %v7001_v19, %v16123_v44  ;;  %v6965_v41 = vmax.f32 %v6637_v56, %v6862_v60  ;;  %v6639_v59 = vpop.f32.mrb[93].mxu0 }
 0x565   : > { %v6867_v54 = vpop.f32.mrb[94].mxu1  ;;  %7065 = vst [vmem:[%s16205_s20 + $0x68] sm:$0xff] %v7033_v7  ;;  %v7002_v5 = vmul.f32 %v16196_v3, %v6965_v41 }
 0x566   : > { %v6869_v13 = vpop.f32.mrb[95].mxu1  ;;  %v6642_v49 = vpop.f32.mrb[94].mxu0 }
 0x567   : > { %v7034_v1 = vadd.f32 %v7002_v5, %v16127_v6  ;;  %v6966_v46 = vmax.f32 %v6642_v49, %v6867_v54  ;;  %v6644_v14 = vpop.f32.mrb[95].mxu0 }
 0x569   : > { %v6872_v28 = vpop.f32.mrb[96].mxu1  ;;  %7066 = vst [vmem:[%s16205_s20 + $0x70] sm:$0xff] %v7034_v1  ;;  %v7003_v24 = vmul.f32 %v16196_v3, %v6966_v46 }
 0x56a   : > { %v6874_v4 = vpop.f32.mrb[97].mxu1  ;;  %v6647_v44 = vpop.f32.mrb[96].mxu0 }
 0x56b   : > { %v7035_v37 = vadd.f32 %v7003_v24, %v16131_v30  ;;  %v6967_v39 = vmax.f32 %v6647_v44, %v6872_v28  ;;  %v6649_v63 = vpop.f32.mrb[97].mxu0 }
 0x56d   : > { %v6877_v22 = vpop.f32.mrb[98].mxu1  ;;  %7067 = vst [vmem:[%s16205_s20 + $0x78] sm:$0xff] %v7035_v37  ;;  %v7004_v9 = vmul.f32 %v16196_v3, %v6967_v39 }
 0x56e   : > { %v6879_v35 = vpop.f32.mrb[99].mxu1  ;;  %v6652_v6 = vpop.f32.mrb[98].mxu0 }
 0x56f   : > { %v7036_v57 = vadd.f32 %v7004_v9, %v16135_v34  ;;  %v6968_v43 = vmax.f32 %v6652_v6, %v6877_v22  ;;  %v6654_v21 = vpop.f32.mrb[99].mxu0 }
 0x571   : > { %v6882_v36 = vpop.f32.mrb[100].mxu1  ;;  %7068 = vst [vmem:[%s16205_s20 + $0x80] sm:$0xff] %v7036_v57  ;;  %v7005_v0 = vmul.f32 %v16196_v3, %v6968_v43 }
 0x572   : > { %v6884_v51 = vpop.f32.mrb[101].mxu1  ;;  %v6657_v30 = vpop.f32.mrb[100].mxu0 }
 0x573   : > { %v7037_v55 = vadd.f32 %v7005_v0, %v16139_v18  ;;  %v6969_v17 = vmax.f32 %v6657_v30, %v6882_v36  ;;  %v6659_v11 = vpop.f32.mrb[101].mxu0 }
 0x575   : > { %v6887_v10 = vpop.f32.mrb[102].mxu1  ;;  %7069 = vst [vmem:[%s16205_s20 + $0x88] sm:$0xff] %v7037_v55  ;;  %v7006_v15 = vmul.f32 %v16196_v3, %v6969_v17 }
 0x576   : > { %v6889_v33 = vpop.f32.mrb[103].mxu1  ;;  %v6662_v34 = vpop.f32.mrb[102].mxu0 }
 0x577   : > { %v7038_v26 = vadd.f32 %v7006_v15, %v16143_v29  ;;  %v6970_v52 = vmax.f32 %v6662_v34, %v6887_v10  ;;  %v6664_v42 = vpop.f32.mrb[103].mxu0 }
 0x579   : > { %v6892_v62 = vpop.f32.mrb[104].mxu1  ;;  %7070 = vst [vmem:[%s16205_s20 + $0x90] sm:$0xff] %v7038_v26  ;;  %v7007_v2 = vmul.f32 %v16196_v3, %v6970_v52 }
 0x57a   : > { %v6894_v20 = vpop.f32.mrb[105].mxu1  ;;  %v6667_v18 = vpop.f32.mrb[104].mxu0 }
 0x57b   : > { %v7039_v40 = vadd.f32 %v7007_v2, %v16147_v8  ;;  %v6971_v25 = vmax.f32 %v6667_v18, %v6892_v62  ;;  %v6669_v47 = vpop.f32.mrb[105].mxu0 }
 0x57d   : > { %v6897_v60 = vpop.f32.mrb[106].mxu1  ;;  %7071 = vst [vmem:[%s16205_s20 + $0x98] sm:$0xff] %v7039_v40  ;;  %v7008_v19 = vmul.f32 %v16196_v3, %v6971_v25 }
 0x57e   : > { %v6899_v23 = vpop.f32.mrb[107].mxu1  ;;  %v6672_v29 = vpop.f32.mrb[106].mxu0 }
 0x57f   : > { %v7040_v56 = vadd.f32 %v7008_v19, %v16151_v38  ;;  %v6972_v7 = vmax.f32 %v6672_v29, %v6897_v60  ;;  %v6674_v41 = vpop.f32.mrb[107].mxu0 }
 0x581   : > { %v6902_v59 = vpop.f32.mrb[108].mxu1  ;;  %7072 = vst [vmem:[%s16205_s20 + $0xa0] sm:$0xff] %v7040_v56  ;;  %v7009_v54 = vmul.f32 %v16196_v3, %v6972_v7 }
 0x582   : > { %v6904_v5 = vpop.f32.mrb[109].mxu1  ;;  %v6677_v8 = vpop.f32.mrb[108].mxu0 }
 0x583   : > { %v7041_v13 = vadd.f32 %v7009_v54, %v16155_v50  ;;  %v6973_v49 = vmax.f32 %v6677_v8, %v6902_v59  ;;  %v6679_v1 = vpop.f32.mrb[109].mxu0 }
 0x585   : > { %v6907_v46 = vpop.f32.mrb[110].mxu1  ;;  %7073 = vst [vmem:[%s16205_s20 + $0xa8] sm:$0xff] %v7041_v13  ;;  %v7010_v14 = vmul.f32 %v16196_v3, %v6973_v49 }
 0x586   : > { %v6909_v28 = vpop.f32.mrb[111].mxu1  ;;  %v6682_v38 = vpop.f32.mrb[110].mxu0 }
 0x587   : > { %v7042_v24 = vadd.f32 %v7010_v14, %v16159_v32  ;;  %v6974_v4 = vmax.f32 %v6682_v38, %v6907_v46  ;;  %v6684_v44 = vpop.f32.mrb[111].mxu0 }
 0x589   : > { %v6912_v37 = vpop.f32.mrb[112].mxu1  ;;  %7074 = vst [vmem:[%s16205_s20 + $0xb0] sm:$0xff] %v7042_v24  ;;  %v7011_v39 = vmul.f32 %v16196_v3, %v6974_v4 }
 0x58a   : > { %v6914_v63 = vpop.f32.mrb[113].mxu1  ;;  %v6687_v50 = vpop.f32.mrb[112].mxu0 }
 0x58b   : > { %v7043_v22 = vadd.f32 %v7011_v39, %v16163_v53  ;;  %v6975_v9 = vmax.f32 %v6687_v50, %v6912_v37  ;;  %v6689_v35 = vpop.f32.mrb[113].mxu0 }
 0x58d   : > { %v6917_v6 = vpop.f32.mrb[114].mxu1  ;;  %7075 = vst [vmem:[%s16205_s20 + $0xb8] sm:$0xff] %v7043_v22  ;;  %v7012_v57 = vmul.f32 %v16196_v3, %v6975_v9 }
 0x58e   : > { %v6919_v43 = vpop.f32.mrb[115].mxu1  ;;  %v6692_v32 = vpop.f32.mrb[114].mxu0 }
 0x58f   : > { %v7044_v21 = vadd.f32 %v7012_v57, %v16167_v58  ;;  %v6976_v36 = vmax.f32 %v6692_v32, %v6917_v6  ;;  %v6694_v0 = vpop.f32.mrb[115].mxu0 }
 0x591   : > { %v6922_v51 = vpop.f32.mrb[116].mxu1  ;;  %7076 = vst [vmem:[%s16205_s20 + $0xc0] sm:$0xff] %v7044_v21  ;;  %v7013_v30 = vmul.f32 %v16196_v3, %v6976_v36 }
 0x592   : > { %v6924_v55 = vpop.f32.mrb[117].mxu1  ;;  %v6697_v53 = vpop.f32.mrb[116].mxu0 }
 0x593   : > { %v7045_v17 = vadd.f32 %v7013_v30, %v16171_v61  ;;  %v6977_v11 = vmax.f32 %v6697_v53, %v6922_v51  ;;  %v6699_v10 = vpop.f32.mrb[117].mxu0 }
 0x595   : > { %v6927_v15 = vpop.f32.mrb[118].mxu1  ;;  %7077 = vst [vmem:[%s16205_s20 + $0xc8] sm:$0xff] %v7045_v17  ;;  %v7014_v33 = vmul.f32 %v16196_v3, %v6977_v11 }
 0x596   : > { %v6929_v34 = vpop.f32.mrb[119].mxu1  ;;  %v6702_v58 = vpop.f32.mrb[118].mxu0 }
 0x597   : > { %v7046_v26 = vadd.f32 %v7014_v33, %v16175_v16  ;;  %v6978_v52 = vmax.f32 %v6702_v58, %v6927_v15  ;;  %v6704_v42 = vpop.f32.mrb[119].mxu0 }
 0x599   : > { %v6932_v62 = vpop.f32.mrb[120].mxu1  ;;  %7078 = vst [vmem:[%s16205_s20 + $0xd0] sm:$0xff] %v7046_v26  ;;  %v7015_v2 = vmul.f32 %v16196_v3, %v6978_v52 }
 0x59a   : > { %v6934_v61 = vpop.f32.mrb[121].mxu1  ;;  %v6707_v20 = vpop.f32.mrb[120].mxu0 }
 0x59b   : > { %v7047_v18 = vadd.f32 %v7015_v2, %v16179_v48  ;;  %v6979_v40 = vmax.f32 %v6707_v20, %v6932_v62  ;;  %v6709_v25 = vpop.f32.mrb[121].mxu0 }
 0x59d   : > { %v6937_v47 = vpop.f32.mrb[122].mxu1  ;;  %7079 = vst [vmem:[%s16205_s20 + $0xd8] sm:$0xff] %v7047_v18  ;;  %v7016_v60 = vmul.f32 %v16196_v3, %v6979_v40 }
 0x59e   : > { %v6939_v16 = vpop.f32.mrb[123].mxu1  ;;  %v6712_v19 = vpop.f32.mrb[122].mxu0 }
 0x59f   : > { %v7048_v23 = vadd.f32 %v7016_v60, %v16183_v12  ;;  %v6980_v29 = vmax.f32 %v6712_v19, %v6937_v47  ;;  %v6714_v56 = vpop.f32.mrb[123].mxu0 }
 0x5a1   : > { %v6942_v7 = vpop.f32.mrb[124].mxu1  ;;  %7080 = vst [vmem:[%s16205_s20 + $0xe0] sm:$0xff] %v7048_v23  ;;  %v7017_v41 = vmul.f32 %v16196_v3, %v6980_v29 }
 0x5a2   : > { %v6944_v48 = vpop.f32.mrb[125].mxu1  ;;  %v6717_v59 = vpop.f32.mrb[124].mxu0 }
 0x5a3   : > { %v7049_v54 = vadd.f32 %v7017_v41, %v16187_v45  ;;  %v6981_v5 = vmax.f32 %v6717_v59, %v6942_v7  ;;  %v6719_v8 = vpop.f32.mrb[125].mxu0 }
 0x5a5   : > { %v6947_v13 = vpop.f32.mrb[126].mxu1  ;;  %7081 = vst [vmem:[%s16205_s20 + $0xe8] sm:$0xff] %v7049_v54  ;;  %v7018_v12 = vmul.f32 %v16196_v3, %v6981_v5 }
 0x5a6   : > { %v6949_v49 = vpop.f32.mrb[127].mxu1  ;;  %v6722_v1 = vpop.f32.mrb[126].mxu0 }
 0x5a7   : > { %v7050_v46 = vadd.f32 %v7018_v12, %v16191_v27  ;;  %v6982_v14 = vmax.f32 %v6722_v1, %v6947_v13  ;;  %v6724_v28 = vpop.f32.mrb[127].mxu0 }
 0x5a9   : > { %7082 = vst [vmem:[%s16205_s20 + $0xf0] sm:$0xff] %v7050_v46  ;;  %v7019_v45 = vmul.f32 %v16196_v3, %v6982_v14 }
 0x5ab   : > { %v7051_v38 = vadd.f32 %v7019_v45, %v16199_v31 }
 0x5ad   : > { %7083 = vst [vmem:[%s16205_s20 + $0xf8] sm:$0xff] %v7051_v38 }
 0x5ae   : > { %10814 = shalt.err (!%p10811_p8)
}
 0x5af   : > { %s10815_s4 = scalar_lea.hbm %s16305_s29, 4096  ;;  %s10819_s22 = scalar_lea.hbm %s18683_s30, 24576 }
 0x5b0   : > { %p10816_p7 = scmp.ne.s32.totalorder %s16305_s29, %s10815_s4  ;;  %p10820_p12 = scmp.lt.u32.totalorder %s16305_s29, %s18683_s30 }
 0x5b1   : > { %p10821_p5 = scmp.lt.u32.totalorder %s10819_s22, %s10815_s4  ;;  %p10823_p6 = scmp.lt.u32.totalorder %s10815_s4, %s16305_s29 }
 0x5b2   : > { %p10817_p2 = pnand %p10816_p7, %p18684_p0 }
 0x5b3   : > { %p10822_p10 = por %p10821_p5, %p10820_p12 }
 0x5b4   : > { %p10818_p9 = pneg %p10817_p2 }
 0x5b5   : > { %p10824_p1 = por %p10823_p6, %p10822_p10 }
 0x5b7   : > { %p10825_p4 = pnand %p10824_p1, %p10818_p9 }
 0x5b9   : > { %10828 = shalt.err (!%p10825_p4)
}
 0x5ba   : > { %s10959_s13 = smov 128   ;;  %s10960_s24 = smov 384  }
 0x5bb   : > { %s10961_s9 = smov 8  }
 0x5bc   : > { %9959 = dma.vmem_to_hbm [thread:$0]  (%p18684_p0), %s16307_s18, 4096, %s16305_s29, %s16313_s10, %s10959_s13, %s10960_s24, %s10961_s9  }
 0x5bd PF: > { %s18685_s6 = sld [smem:[#allocation12_spill]]  ;;  %p9976_p11 = scmp.ge.s32.totalorder %s10951_s25, 2 }
 0x5be   : > { %p18686_p13 = scmp.ne.s32.totalorder %s17124_s12, 0 }
 0x5c0   : > { %p9972_p3 = pnand %p9976_p11, %p18686_p13 }
 0x5c3   : > { %s7115_s3 = sand.u32 1, %s18685_s6  }
 0x5c4   : > { %s7116_s15 = scalar_lea.sflag [#allocation4], %s7115_s3 }
 0x5c5   : > { %10894 = dma.done.wait (!%p9972_p3), %s7116_s15, 4096  }
 0x5c6   : > { %10896 = vsyncadd (!%p9972_p3), %s7116_s15, 4294963200  ;;  %s22_s25 = sadd.s32 1, %s10951_s25   ;;  %s18688_s12 = sld [smem:[#allocation13_spill]] }
 0x5c7   : > { %p16342_p8 = scmp.ge.s32.totalorder %s22_s25, 8   ;;  %s18689_s7 = sld [smem:[#allocation19_spill]] }
 0x5c8   : > { %s18690_s29 = sld [smem:[#allocation14_spill]]  ;;  %s18691_s20 = sld [smem:[#allocation21_spill]] }
 0x5c9   : > { %s18692_s22 = sld [smem:[#allocation17_spill]]  ;;  %s18693_s10 = sld [smem:[#allocation18_spill]] }
 0x5ca   : > { %s18694_s24 = sld [smem:[#allocation20_spill]]  ;;  %s18695_s13 = smov %s10907_s14 }
 0x5cb   : > { %s18696_s14 = smov %s11187_s1  ;;  %s18697_s15 = smov %s10915_s16 }
 0x5cc   : > { %s18698_s16 = smov %s10919_s17  ;;  %s18700_s18 = smov %s10927_s19 }
 0x5cd   : > { %s18699_s17 = smov %s18689_s7  ;;  %s18702_s21 = smov %s10943_s23 }
 0x5ce   : > { %s18701_s19 = smov %s18690_s29  ;;  %21 = sbr.rel (!%p16342_p8) target bundleno = 15 (0xf), region = 101 }
 0x5cf   : > { %s18703_s23 = smov %s18693_s10 }
 0x5d5   :  { %7121 = vsyncpa [#allocation3], 1 }
 0x5d6   :  { %7123 = vsyncpa [#allocation3 + $0x1], 1 }
 0x5d7   :  { %7124 = vsyncpa [#allocation6], 1 }
 0x5d8   :  { %7126 = vsyncpa [#allocation6 + $0x1], 1 }
 0x5d9   :  { %7127 = vsyncpa [#allocation4], 1 }
 0x5da   :  { %7129 = vsyncpa [#allocation4 + $0x1], 1 }

</bundles_post_ra>
